<compile_context>
chip_gen: v6e
topology: v6e:2x2x1
jax: 0.10.0
libtpu: 0.0.40
codegen_flags: <defaults>
</compile_context>

<pallas_src>
import jax
import jax.numpy as jnp
import numpy as np
from jax.experimental import pallas as pl
from jax.experimental.pallas import tpu as pltpu

EPS = 1e-5


# ---------------- Pallas kernel ----------------

def resnet_block_kernel(xpad_ref, w1_ref, w2_ref, o_ref, xpad_bf_ref, y1pad_ref):
    """Fused ResnetBlock forward for one batch element (NHWC layout).

    xpad_ref   : (H+2, W+2, C) f32   reflection-padded input
    w1_ref     : (9, C, C)     bf16  conv1 weights, tap-major (k = di*3+dj), [in_c, out_c]
    w2_ref     : (9, C, C)     bf16  conv2 weights
    o_ref      : (H, W, C)     f32   output
    xpad_bf_ref: (H+2, W+2, C) bf16  VMEM scratch: padded input cast once to bf16
    y1pad_ref  : (H+2, W+2, C) bf16  VMEM scratch: padded post-ReLU intermediate
    """
    hp, wp, c = xpad_ref.shape
    h, w = hp - 2, wp - 2
    hw = h * w
    inv_hw = 1.0 / float(hw)

    # Cast the padded input to bf16 exactly once (hoisted out of the tap loop).
    xpad_bf_ref[...] = xpad_ref[...].astype(jnp.bfloat16)

    def conv3x3(pad_ref, w_ref_):
        # 3x3 conv as 9 shifted (HW, C) @ (C, C) MXU matmuls; bf16 operands,
        # f32 accumulation. First tap initializes the accumulator (no zero-fill).
        acc = None
        for di in range(3):
            for dj in range(3):
                slab = pad_ref[di:di + h, dj:dj + w, :].reshape(hw, c)
                part = jnp.dot(slab, w_ref_[di * 3 + dj],
                               preferred_element_type=jnp.float32)
                acc = part if acc is None else acc + part
        return acc                                        # (HW, C) f32

    def instance_norm(acc):
        # Two-pass stats (mean, then variance of the centered values); matches
        # InstanceNorm2d (biased var, affine=False) and avoids E[y^2]-mean^2
        # cancellation.
        mean = jnp.sum(acc, axis=0, keepdims=True) * inv_hw
        centered = acc - mean
        var = jnp.sum(centered * centered, axis=0, keepdims=True) * inv_hw
        return centered * jax.lax.rsqrt(var + EPS)

    # -------- stage 1: conv -> InstanceNorm -> ReLU --------
    y1 = jnp.maximum(instance_norm(conv3x3(xpad_bf_ref, w1_ref)), 0.0)  # (HW, C) f32
    # TODO(synk): training-mode Dropout(0.5) (pltpu.prng_*) not implemented; identity at inference.

    # -------- rebuild reflection padding of y1 inside the bf16 VMEM scratch --------
    y1_3d = y1.astype(jnp.bfloat16).reshape(h, w, c)
    y1pad_ref[1:h + 1, 1:w + 1, :] = y1_3d                          # interior
    y1pad_ref[0:1, 1:w + 1, :] = y1_3d[1:2, :, :]                   # top    = row 1
    y1pad_ref[h + 1:h + 2, 1:w + 1, :] = y1_3d[h - 2:h - 1, :, :]   # bottom = row H-2
    y1pad_ref[:, 0:1, :] = y1pad_ref[:, 2:3, :]                     # left  col (incl. corners)
    y1pad_ref[:, w + 1:w + 2, :] = y1pad_ref[:, w - 1:w, :]         # right col (incl. corners)

    # -------- stage 2: conv -> InstanceNorm, then residual add --------
    y2 = instance_norm(conv3x3(y1pad_ref, w2_ref))                  # (HW, C) f32
    res = xpad_ref[1:h + 1, 1:w + 1, :].reshape(hw, c)              # f32 residual from the ref
    o_ref[...] = (y2 + res).reshape(h, w, c)


# ---------------- JAX glue ----------------

def _torch_weight_to_taps(w_oihw):
    """(out_c, in_c, 3, 3) -> (9, in_c, out_c), tap index k = di*3 + dj."""
    out_c, in_c, kh, kw = w_oihw.shape
    return jnp.transpose(w_oihw, (2, 3, 1, 0)).reshape(kh * kw, in_c, out_c)


def resnet_block_forward(x_nchw, params, use_dropout=False):
    """ResnetBlock forward. x_nchw: (N, C, H, W) f32 -> (N, C, H, W) f32."""
    del use_dropout   # Dropout(0.5) is identity at inference time.
    n, c, h, w = x_nchw.shape

    x_nhwc = jnp.transpose(x_nchw, (0, 2, 3, 1))
    xpad = jnp.pad(x_nhwc, ((0, 0), (1, 1), (1, 1), (0, 0)), mode="reflect")

    # Conv bias omitted: with affine=False InstanceNorm a per-channel bias is
    # exactly cancelled by the mean subtraction (variance unchanged).
    w1 = _torch_weight_to_taps(params["w1"]).astype(jnp.bfloat16)
    w2 = _torch_weight_to_taps(params["w2"]).astype(jnp.bfloat16)

    out_nhwc = pl.pallas_call(
        resnet_block_kernel,
        out_shape=jax.ShapeDtypeStruct((n, h, w, c), jnp.float32),
        grid=(n,),
        in_specs=[
            pl.BlockSpec((None, h + 2, w + 2, c), lambda i: (i, 0, 0, 0)),
            pl.BlockSpec((9, c, c), lambda i: (0, 0, 0)),
            pl.BlockSpec((9, c, c), lambda i: (0, 0, 0)),
        ],
        out_specs=pl.BlockSpec((None, h, w, c), lambda i: (i, 0, 0, 0)),
        scratch_shapes=[
            pltpu.VMEM((h + 2, w + 2, c), jnp.bfloat16),   # bf16 padded input
            pltpu.VMEM((h + 2, w + 2, c), jnp.bfloat16),   # bf16 padded intermediate
        ],
        compiler_params=pltpu.CompilerParams(
            dimension_semantics=("parallel",),
            vmem_limit_bytes=64 * 1024 * 1024,
        ),
    )(xpad, w1, w2)

    return jnp.transpose(out_nhwc, (0, 3, 1, 2))


def init_params(key, dim):
    k1, k2, k3, k4 = jax.random.split(key, 4)
    fan_in = dim * 3 * 3
    scale = 1.0 / jnp.sqrt(fan_in)
    return {
        "w1": jax.random.uniform(k1, (dim, dim, 3, 3), jnp.float32, -scale, scale),
        "b1": jax.random.uniform(k2, (dim,), jnp.float32, -scale, scale),
        "w2": jax.random.uniform(k3, (dim, dim, 3, 3), jnp.float32, -scale, scale),
        "b2": jax.random.uniform(k4, (dim,), jnp.float32, -scale, scale),
    }


def _reference_forward(x_nchw, params):
    """Pure-JAX reference mirroring the PyTorch module (bias included, bf16 matmul operands)."""
    n, c, h, w = x_nchw.shape
    x = jnp.transpose(x_nchw, (0, 2, 3, 1))
    w1 = _torch_weight_to_taps(params["w1"]).astype(jnp.bfloat16)
    w2 = _torch_weight_to_taps(params["w2"]).astype(jnp.bfloat16)

    def conv_in(act, w_taps, b, relu):
        xp = jnp.pad(act, ((0, 0), (1, 1), (1, 1), (0, 0)), mode="reflect")
        acc = jnp.zeros((n, h, w, c), jnp.float32)
        for di in range(3):
            for dj in range(3):
                slab = xp[:, di:di + h, dj:dj + w, :].astype(jnp.bfloat16)
                y = jnp.dot(slab.reshape(n * h * w, c), w_taps[di * 3 + dj],
                            preferred_element_type=jnp.float32)
                acc = acc + y.reshape(n, h, w, c)
        acc = acc + b.reshape(1, 1, 1, c)
        mean = jnp.mean(acc, axis=(1, 2), keepdims=True)
        var = jnp.mean(jnp.square(acc - mean), axis=(1, 2), keepdims=True)
        yn = (acc - mean) * jax.lax.rsqrt(var + EPS)
        return jnp.maximum(yn, 0.0) if relu else yn

    y1 = conv_in(x, w1, params["b1"], relu=True)
    y2 = conv_in(y1, w2, params["b2"], relu=False)
    return jnp.transpose(y2 + x, (0, 3, 1, 2))


if __name__ == "__main__":
    key = jax.random.PRNGKey(0)
    k_x, k_p = jax.random.split(key)

    # Small correctness config (NOT a perf config: MXU/lane utilization needs C >= 128).
    N, C, H, W = 2, 4, 16, 16
    x = jax.random.normal(k_x, (N, C, H, W), jnp.float32)
    params = init_params(k_p, C)

    out = jax.block_until_ready(resnet_block_forward(x, params, use_dropout=False))
    assert out.shape == (N, C, H, W), out.shape

    ref = jax.block_until_ready(_reference_forward(x, params))
    np.testing.assert_allclose(np.asarray(out), np.asarray(ref), atol=1e-2, rtol=1e-2)

    print("KERNEL_OK")
</pallas_src>

<mosaic_0001>
module attributes {stable_mosaic.version = 11 : i64} {
  func.func @resnet_block_kernel(%arg0: i32, %arg1: memref<1x18x18x4xf32, #tpu.memory_space<vmem>>, %arg2: memref<9x4x4xbf16, #tpu.memory_space<vmem>>, %arg3: memref<9x4x4xbf16, #tpu.memory_space<vmem>>, %arg4: memref<1x16x16x4xf32, #tpu.memory_space<vmem>>, %arg5: memref<18x18x4xbf16, #tpu.memory_space<vmem>>, %arg6: memref<18x18x4xbf16, #tpu.memory_space<vmem>>) attributes {dimension_semantics = [#tpu.dimension_semantics<parallel>], iteration_bounds = array<i64: 2>, scalar_prefetch = 0 : i64, scratch_operands = 2 : i64, tpu.core_type = #tpu.core_type<tc>, window_params = [{transform_indices = @transform_0, window_bounds = array<i64: 1, 18, 18, 4>}, {pipeline_mode = #tpu.pipeline_mode<synchronous>, transform_indices = @transform_1, window_bounds = array<i64: 9, 4, 4>}, {pipeline_mode = #tpu.pipeline_mode<synchronous>, transform_indices = @transform_2, window_bounds = array<i64: 9, 4, 4>}, {transform_indices = @transform_3, window_bounds = array<i64: 1, 16, 16, 4>}]} {
    %c0 = arith.constant 0 : index
    %c0_0 = arith.constant 0 : index
    %c0_1 = arith.constant 0 : index
    %c0_2 = arith.constant 0 : index
    %0 = vector.load %arg1[%c0, %c0_0, %c0_1, %c0_2] : memref<1x18x18x4xf32, #tpu.memory_space<vmem>>, vector<1x18x18x4xf32>
    %1 = vector.shape_cast %0 : vector<1x18x18x4xf32> to vector<18x18x4xf32>
    %2 = arith.truncf %1 : vector<18x18x4xf32> to vector<18x18x4xbf16>
    %c0_3 = arith.constant 0 : index
    %c0_4 = arith.constant 0 : index
    %c0_5 = arith.constant 0 : index
    %3 = vector.load %arg5[%c0_3, %c0_4, %c0_5] : memref<18x18x4xbf16, #tpu.memory_space<vmem>>, vector<18x18x4xbf16>
    tpu.vector_store %arg5[%c0_3, %c0_4, %c0_5], %2 {strides = array<i32>} : memref<18x18x4xbf16, #tpu.memory_space<vmem>>, vector<18x18x4xbf16>,
    %c0_6 = arith.constant 0 : index
    %c0_7 = arith.constant 0 : index
    %c0_8 = arith.constant 0 : index
    %4 = vector.load %arg5[%c0_6, %c0_7, %c0_8] : memref<18x18x4xbf16, #tpu.memory_space<vmem>>, vector<16x16x4xbf16>
    %5 = vector.shape_cast %4 : vector<16x16x4xbf16> to vector<256x4xbf16>
    %c0_9 = arith.constant 0 : index
    %c0_10 = arith.constant 0 : index
    %c0_11 = arith.constant 0 : index
    %6 = vector.load %arg2[%c0_9, %c0_10, %c0_11] : memref<9x4x4xbf16, #tpu.memory_space<vmem>>, vector<1x4x4xbf16>
    %7 = vector.shape_cast %6 : vector<1x4x4xbf16> to vector<4x4xbf16>
    %cst = arith.constant dense<0.000000e+00> : vector<256x4xf32>
    %8 = tpu.matmul %5, %7, %cst {dimension_numbers = #tpu.dot_dimension_numbers<[1], [0], [0], [1], [0, 0, 1, 1], [], []>} : vector<256x4xbf16>, vector<4x4xbf16>, vector<256x4xf32> -> vector<256x4xf32>
    %c0_12 = arith.constant 0 : index
    %c1 = arith.constant 1 : index
    %c0_13 = arith.constant 0 : index
    %9 = vector.load %arg5[%c0_12, %c1, %c0_13] : memref<18x18x4xbf16, #tpu.memory_space<vmem>>, vector<16x16x4xbf16>
    %10 = vector.shape_cast %9 : vector<16x16x4xbf16> to vector<256x4xbf16>
    %c1_14 = arith.constant 1 : index
    %c0_15 = arith.constant 0 : index
    %c0_16 = arith.constant 0 : index
    %11 = vector.load %arg2[%c1_14, %c0_15, %c0_16] : memref<9x4x4xbf16, #tpu.memory_space<vmem>>, vector<1x4x4xbf16>
    %12 = vector.shape_cast %11 : vector<1x4x4xbf16> to vector<4x4xbf16>
    %cst_17 = arith.constant dense<0.000000e+00> : vector<256x4xf32>
    %13 = tpu.matmul %10, %12, %cst_17 {dimension_numbers = #tpu.dot_dimension_numbers<[1], [0], [0], [1], [0, 0, 1, 1], [], []>} : vector<256x4xbf16>, vector<4x4xbf16>, vector<256x4xf32> -> vector<256x4xf32>
    %14 = arith.addf %8, %13 : vector<256x4xf32>
    %c0_18 = arith.constant 0 : index
    %c2 = arith.constant 2 : index
    %c0_19 = arith.constant 0 : index
    %15 = vector.load %arg5[%c0_18, %c2, %c0_19] : memref<18x18x4xbf16, #tpu.memory_space<vmem>>, vector<16x16x4xbf16>
    %16 = vector.shape_cast %15 : vector<16x16x4xbf16> to vector<256x4xbf16>
    %c2_20 = arith.constant 2 : index
    %c0_21 = arith.constant 0 : index
    %c0_22 = arith.constant 0 : index
    %17 = vector.load %arg2[%c2_20, %c0_21, %c0_22] : memref<9x4x4xbf16, #tpu.memory_space<vmem>>, vector<1x4x4xbf16>
    %18 = vector.shape_cast %17 : vector<1x4x4xbf16> to vector<4x4xbf16>
    %cst_23 = arith.constant dense<0.000000e+00> : vector<256x4xf32>
    %19 = tpu.matmul %16, %18, %cst_23 {dimension_numbers = #tpu.dot_dimension_numbers<[1], [0], [0], [1], [0, 0, 1, 1], [], []>} : vector<256x4xbf16>, vector<4x4xbf16>, vector<256x4xf32> -> vector<256x4xf32>
    %20 = arith.addf %14, %19 : vector<256x4xf32>
    %c1_24 = arith.constant 1 : index
    %c0_25 = arith.constant 0 : index
    %c0_26 = arith.constant 0 : index
    %21 = vector.load %arg5[%c1_24, %c0_25, %c0_26] : memref<18x18x4xbf16, #tpu.memory_space<vmem>>, vector<16x16x4xbf16>
    %22 = vector.shape_cast %21 : vector<16x16x4xbf16> to vector<256x4xbf16>
    %c3 = arith.constant 3 : index
    %c0_27 = arith.constant 0 : index
    %c0_28 = arith.constant 0 : index
    %23 = vector.load %arg2[%c3, %c0_27, %c0_28] : memref<9x4x4xbf16, #tpu.memory_space<vmem>>, vector<1x4x4xbf16>
    %24 = vector.shape_cast %23 : vector<1x4x4xbf16> to vector<4x4xbf16>
    %cst_29 = arith.constant dense<0.000000e+00> : vector<256x4xf32>
    %25 = tpu.matmul %22, %24, %cst_29 {dimension_numbers = #tpu.dot_dimension_numbers<[1], [0], [0], [1], [0, 0, 1, 1], [], []>} : vector<256x4xbf16>, vector<4x4xbf16>, vector<256x4xf32> -> vector<256x4xf32>
    %26 = arith.addf %20, %25 : vector<256x4xf32>
    %c1_30 = arith.constant 1 : index
    %c1_31 = arith.constant 1 : index
    %c0_32 = arith.constant 0 : index
    %27 = vector.load %arg5[%c1_30, %c1_31, %c0_32] : memref<18x18x4xbf16, #tpu.memory_space<vmem>>, vector<16x16x4xbf16>
    %28 = vector.shape_cast %27 : vector<16x16x4xbf16> to vector<256x4xbf16>
    %c4 = arith.constant 4 : index
    %c0_33 = arith.constant 0 : index
    %c0_34 = arith.constant 0 : index
    %29 = vector.load %arg2[%c4, %c0_33, %c0_34] : memref<9x4x4xbf16, #tpu.memory_space<vmem>>, vector<1x4x4xbf16>
    %30 = vector.shape_cast %29 : vector<1x4x4xbf16> to vector<4x4xbf16>
    %cst_35 = arith.constant dense<0.000000e+00> : vector<256x4xf32>
    %31 = tpu.matmul %28, %30, %cst_35 {dimension_numbers = #tpu.dot_dimension_numbers<[1], [0], [0], [1], [0, 0, 1, 1], [], []>} : vector<256x4xbf16>, vector<4x4xbf16>, vector<256x4xf32> -> vector<256x4xf32>
    %32 = arith.addf %26, %31 : vector<256x4xf32>
    %c1_36 = arith.constant 1 : index
    %c2_37 = arith.constant 2 : index
    %c0_38 = arith.constant 0 : index
    %33 = vector.load %arg5[%c1_36, %c2_37, %c0_38] : memref<18x18x4xbf16, #tpu.memory_space<vmem>>, vector<16x16x4xbf16>
    %34 = vector.shape_cast %33 : vector<16x16x4xbf16> to vector<256x4xbf16>
    %c5 = arith.constant 5 : index
    %c0_39 = arith.constant 0 : index
    %c0_40 = arith.constant 0 : index
    %35 = vector.load %arg2[%c5, %c0_39, %c0_40] : memref<9x4x4xbf16, #tpu.memory_space<vmem>>, vector<1x4x4xbf16>
    %36 = vector.shape_cast %35 : vector<1x4x4xbf16> to vector<4x4xbf16>
    %cst_41 = arith.constant dense<0.000000e+00> : vector<256x4xf32>
    %37 = tpu.matmul %34, %36, %cst_41 {dimension_numbers = #tpu.dot_dimension_numbers<[1], [0], [0], [1], [0, 0, 1, 1], [], []>} : vector<256x4xbf16>, vector<4x4xbf16>, vector<256x4xf32> -> vector<256x4xf32>
    %38 = arith.addf %32, %37 : vector<256x4xf32>
    %c2_42 = arith.constant 2 : index
    %c0_43 = arith.constant 0 : index
    %c0_44 = arith.constant 0 : index
    %39 = vector.load %arg5[%c2_42, %c0_43, %c0_44] : memref<18x18x4xbf16, #tpu.memory_space<vmem>>, vector<16x16x4xbf16>
    %40 = vector.shape_cast %39 : vector<16x16x4xbf16> to vector<256x4xbf16>
    %c6 = arith.constant 6 : index
    %c0_45 = arith.constant 0 : index
    %c0_46 = arith.constant 0 : index
    %41 = vector.load %arg2[%c6, %c0_45, %c0_46] : memref<9x4x4xbf16, #tpu.memory_space<vmem>>, vector<1x4x4xbf16>
    %42 = vector.shape_cast %41 : vector<1x4x4xbf16> to vector<4x4xbf16>
    %cst_47 = arith.constant dense<0.000000e+00> : vector<256x4xf32>
    %43 = tpu.matmul %40, %42, %cst_47 {dimension_numbers = #tpu.dot_dimension_numbers<[1], [0], [0], [1], [0, 0, 1, 1], [], []>} : vector<256x4xbf16>, vector<4x4xbf16>, vector<256x4xf32> -> vector<256x4xf32>
    %44 = arith.addf %38, %43 : vector<256x4xf32>
    %c2_48 = arith.constant 2 : index
    %c1_49 = arith.constant 1 : index
    %c0_50 = arith.constant 0 : index
    %45 = vector.load %arg5[%c2_48, %c1_49, %c0_50] : memref<18x18x4xbf16, #tpu.memory_space<vmem>>, vector<16x16x4xbf16>
    %46 = vector.shape_cast %45 : vector<16x16x4xbf16> to vector<256x4xbf16>
    %c7 = arith.constant 7 : index
    %c0_51 = arith.constant 0 : index
    %c0_52 = arith.constant 0 : index
    %47 = vector.load %arg2[%c7, %c0_51, %c0_52] : memref<9x4x4xbf16, #tpu.memory_space<vmem>>, vector<1x4x4xbf16>
    %48 = vector.shape_cast %47 : vector<1x4x4xbf16> to vector<4x4xbf16>
    %cst_53 = arith.constant dense<0.000000e+00> : vector<256x4xf32>
    %49 = tpu.matmul %46, %48, %cst_53 {dimension_numbers = #tpu.dot_dimension_numbers<[1], [0], [0], [1], [0, 0, 1, 1], [], []>} : vector<256x4xbf16>, vector<4x4xbf16>, vector<256x4xf32> -> vector<256x4xf32>
    %50 = arith.addf %44, %49 : vector<256x4xf32>
    %c2_54 = arith.constant 2 : index
    %c2_55 = arith.constant 2 : index
    %c0_56 = arith.constant 0 : index
    %51 = vector.load %arg5[%c2_54, %c2_55, %c0_56] : memref<18x18x4xbf16, #tpu.memory_space<vmem>>, vector<16x16x4xbf16>
    %52 = vector.shape_cast %51 : vector<16x16x4xbf16> to vector<256x4xbf16>
    %c8 = arith.constant 8 : index
    %c0_57 = arith.constant 0 : index
    %c0_58 = arith.constant 0 : index
    %53 = vector.load %arg2[%c8, %c0_57, %c0_58] : memref<9x4x4xbf16, #tpu.memory_space<vmem>>, vector<1x4x4xbf16>
    %54 = vector.shape_cast %53 : vector<1x4x4xbf16> to vector<4x4xbf16>
    %cst_59 = arith.constant dense<0.000000e+00> : vector<256x4xf32>
    %55 = tpu.matmul %52, %54, %cst_59 {dimension_numbers = #tpu.dot_dimension_numbers<[1], [0], [0], [1], [0, 0, 1, 1], [], []>} : vector<256x4xbf16>, vector<4x4xbf16>, vector<256x4xf32> -> vector<256x4xf32>
    %56 = arith.addf %50, %55 : vector<256x4xf32>
    %cst_60 = arith.constant dense<0.000000e+00> : vector<4xf32>
    %57 = vector.multi_reduction <add>, %56, %cst_60 [0] : vector<256x4xf32> to vector<4xf32>
    %58 = vector.shape_cast %57 : vector<4xf32> to vector<1x4xf32>
    %cst_61 = arith.constant 3.906250e-03 : f32
    %59 = vector.broadcast %cst_61 : f32 to vector<1x4xf32>
    %60 = arith.mulf %58, %59 : vector<1x4xf32>
    %61 = vector.broadcast %60 : vector<1x4xf32> to vector<256x4xf32>
    %62 = arith.subf %56, %61 : vector<256x4xf32>
    %63 = arith.mulf %62, %62 : vector<256x4xf32>
    %cst_62 = arith.constant dense<0.000000e+00> : vector<4xf32>
    %64 = vector.multi_reduction <add>, %63, %cst_62 [0] : vector<256x4xf32> to vector<4xf32>
    %65 = vector.shape_cast %64 : vector<4xf32> to vector<1x4xf32>
    %cst_63 = arith.constant 3.906250e-03 : f32
    %66 = vector.broadcast %cst_63 : f32 to vector<1x4xf32>
    %67 = arith.mulf %65, %66 : vector<1x4xf32>
    %cst_64 = arith.constant 9.99999974E-6 : f32
    %68 = vector.broadcast %cst_64 : f32 to vector<1x4xf32>
    %69 = arith.addf %67, %68 : vector<1x4xf32>
    %70 = math.rsqrt %69 : vector<1x4xf32>
    %71 = vector.broadcast %70 : vector<1x4xf32> to vector<256x4xf32>
    %72 = arith.mulf %62, %71 : vector<256x4xf32>
    %cst_65 = arith.constant 0.000000e+00 : f32
    %73 = vector.broadcast %cst_65 : f32 to vector<256x4xf32>
    %74 = arith.maximumf %72, %73 : vector<256x4xf32>
    %75 = arith.truncf %74 : vector<256x4xf32> to vector<256x4xbf16>
    %76 = vector.shape_cast %75 : vector<256x4xbf16> to vector<16x16x4xbf16>
    %c1_66 = arith.constant 1 : index
    %c1_67 = arith.constant 1 : index
    %c0_68 = arith.constant 0 : index
    %77 = vector.load %arg6[%c1_66, %c1_67, %c0_68] : memref<18x18x4xbf16, #tpu.memory_space<vmem>>, vector<16x16x4xbf16>
    tpu.vector_store %arg6[%c1_66, %c1_67, %c0_68], %76 {strides = array<i32>} : memref<18x18x4xbf16, #tpu.memory_space<vmem>>, vector<16x16x4xbf16>,
    %78 = vector.extract_strided_slice %76 {offsets = [1, 0, 0], sizes = [1, 16, 4], strides = [1, 1, 1]} : vector<16x16x4xbf16> to vector<1x16x4xbf16>
    %c0_69 = arith.constant 0 : index
    %c1_70 = arith.constant 1 : index
    %c0_71 = arith.constant 0 : index
    %79 = vector.load %arg6[%c0_69, %c1_70, %c0_71] : memref<18x18x4xbf16, #tpu.memory_space<vmem>>, vector<1x16x4xbf16>
    tpu.vector_store %arg6[%c0_69, %c1_70, %c0_71], %78 {strides = array<i32>} : memref<18x18x4xbf16, #tpu.memory_space<vmem>>, vector<1x16x4xbf16>,
    %80 = vector.extract_strided_slice %76 {offsets = [14, 0, 0], sizes = [1, 16, 4], strides = [1, 1, 1]} : vector<16x16x4xbf16> to vector<1x16x4xbf16>
    %c17 = arith.constant 17 : index
    %c1_72 = arith.constant 1 : index
    %c0_73 = arith.constant 0 : index
    %81 = vector.load %arg6[%c17, %c1_72, %c0_73] : memref<18x18x4xbf16, #tpu.memory_space<vmem>>, vector<1x16x4xbf16>
    tpu.vector_store %arg6[%c17, %c1_72, %c0_73], %80 {strides = array<i32>} : memref<18x18x4xbf16, #tpu.memory_space<vmem>>, vector<1x16x4xbf16>,
    %c0_74 = arith.constant 0 : index
    %c2_75 = arith.constant 2 : index
    %c0_76 = arith.constant 0 : index
    %82 = vector.load %arg6[%c0_74, %c2_75, %c0_76] : memref<18x18x4xbf16, #tpu.memory_space<vmem>>, vector<18x1x4xbf16>
    %c0_77 = arith.constant 0 : index
    %c0_78 = arith.constant 0 : index
    %c0_79 = arith.constant 0 : index
    %83 = vector.load %arg6[%c0_77, %c0_78, %c0_79] : memref<18x18x4xbf16, #tpu.memory_space<vmem>>, vector<18x1x4xbf16>
    tpu.vector_store %arg6[%c0_77, %c0_78, %c0_79], %82 {strides = array<i32>} : memref<18x18x4xbf16, #tpu.memory_space<vmem>>, vector<18x1x4xbf16>,
    %c0_80 = arith.constant 0 : index
    %c15 = arith.constant 15 : index
    %c0_81 = arith.constant 0 : index
    %84 = vector.load %arg6[%c0_80, %c15, %c0_81] : memref<18x18x4xbf16, #tpu.memory_space<vmem>>, vector<18x1x4xbf16>
    %c0_82 = arith.constant 0 : index
    %c17_83 = arith.constant 17 : index
    %c0_84 = arith.constant 0 : index
    %85 = vector.load %arg6[%c0_82, %c17_83, %c0_84] : memref<18x18x4xbf16, #tpu.memory_space<vmem>>, vector<18x1x4xbf16>
    tpu.vector_store %arg6[%c0_82, %c17_83, %c0_84], %84 {strides = array<i32>} : memref<18x18x4xbf16, #tpu.memory_space<vmem>>, vector<18x1x4xbf16>,
    %c0_85 = arith.constant 0 : index
    %c0_86 = arith.constant 0 : index
    %c0_87 = arith.constant 0 : index
    %86 = vector.load %arg6[%c0_85, %c0_86, %c0_87] : memref<18x18x4xbf16, #tpu.memory_space<vmem>>, vector<16x16x4xbf16>
    %87 = vector.shape_cast %86 : vector<16x16x4xbf16> to vector<256x4xbf16>
    %c0_88 = arith.constant 0 : index
    %c0_89 = arith.constant 0 : index
    %c0_90 = arith.constant 0 : index
    %88 = vector.load %arg3[%c0_88, %c0_89, %c0_90] : memref<9x4x4xbf16, #tpu.memory_space<vmem>>, vector<1x4x4xbf16>
    %89 = vector.shape_cast %88 : vector<1x4x4xbf16> to vector<4x4xbf16>
    %cst_91 = arith.constant dense<0.000000e+00> : vector<256x4xf32>
    %90 = tpu.matmul %87, %89, %cst_91 {dimension_numbers = #tpu.dot_dimension_numbers<[1], [0], [0], [1], [0, 0, 1, 1], [], []>} : vector<256x4xbf16>, vector<4x4xbf16>, vector<256x4xf32> -> vector<256x4xf32>
    %c0_92 = arith.constant 0 : index
    %c1_93 = arith.constant 1 : index
    %c0_94 = arith.constant 0 : index
    %91 = vector.load %arg6[%c0_92, %c1_93, %c0_94] : memref<18x18x4xbf16, #tpu.memory_space<vmem>>, vector<16x16x4xbf16>
    %92 = vector.shape_cast %91 : vector<16x16x4xbf16> to vector<256x4xbf16>
    %c1_95 = arith.constant 1 : index
    %c0_96 = arith.constant 0 : index
    %c0_97 = arith.constant 0 : index
    %93 = vector.load %arg3[%c1_95, %c0_96, %c0_97] : memref<9x4x4xbf16, #tpu.memory_space<vmem>>, vector<1x4x4xbf16>
    %94 = vector.shape_cast %93 : vector<1x4x4xbf16> to vector<4x4xbf16>
    %cst_98 = arith.constant dense<0.000000e+00> : vector<256x4xf32>
    %95 = tpu.matmul %92, %94, %cst_98 {dimension_numbers = #tpu.dot_dimension_numbers<[1], [0], [0], [1], [0, 0, 1, 1], [], []>} : vector<256x4xbf16>, vector<4x4xbf16>, vector<256x4xf32> -> vector<256x4xf32>
    %96 = arith.addf %90, %95 : vector<256x4xf32>
    %c0_99 = arith.constant 0 : index
    %c2_100 = arith.constant 2 : index
    %c0_101 = arith.constant 0 : index
    %97 = vector.load %arg6[%c0_99, %c2_100, %c0_101] : memref<18x18x4xbf16, #tpu.memory_space<vmem>>, vector<16x16x4xbf16>
    %98 = vector.shape_cast %97 : vector<16x16x4xbf16> to vector<256x4xbf16>
    %c2_102 = arith.constant 2 : index
    %c0_103 = arith.constant 0 : index
    %c0_104 = arith.constant 0 : index
    %99 = vector.load %arg3[%c2_102, %c0_103, %c0_104] : memref<9x4x4xbf16, #tpu.memory_space<vmem>>, vector<1x4x4xbf16>
    %100 = vector.shape_cast %99 : vector<1x4x4xbf16> to vector<4x4xbf16>
    %cst_105 = arith.constant dense<0.000000e+00> : vector<256x4xf32>
    %101 = tpu.matmul %98, %100, %cst_105 {dimension_numbers = #tpu.dot_dimension_numbers<[1], [0], [0], [1], [0, 0, 1, 1], [], []>} : vector<256x4xbf16>, vector<4x4xbf16>, vector<256x4xf32> -> vector<256x4xf32>
    %102 = arith.addf %96, %101 : vector<256x4xf32>
    %c1_106 = arith.constant 1 : index
    %c0_107 = arith.constant 0 : index
    %c0_108 = arith.constant 0 : index
    %103 = vector.load %arg6[%c1_106, %c0_107, %c0_108] : memref<18x18x4xbf16, #tpu.memory_space<vmem>>, vector<16x16x4xbf16>
    %104 = vector.shape_cast %103 : vector<16x16x4xbf16> to vector<256x4xbf16>
    %c3_109 = arith.constant 3 : index
    %c0_110 = arith.constant 0 : index
    %c0_111 = arith.constant 0 : index
    %105 = vector.load %arg3[%c3_109, %c0_110, %c0_111] : memref<9x4x4xbf16, #tpu.memory_space<vmem>>, vector<1x4x4xbf16>
    %106 = vector.shape_cast %105 : vector<1x4x4xbf16> to vector<4x4xbf16>
    %cst_112 = arith.constant dense<0.000000e+00> : vector<256x4xf32>
    %107 = tpu.matmul %104, %106, %cst_112 {dimension_numbers = #tpu.dot_dimension_numbers<[1], [0], [0], [1], [0, 0, 1, 1], [], []>} : vector<256x4xbf16>, vector<4x4xbf16>, vector<256x4xf32> -> vector<256x4xf32>
    %108 = arith.addf %102, %107 : vector<256x4xf32>
    %c1_113 = arith.constant 1 : index
    %c1_114 = arith.constant 1 : index
    %c0_115 = arith.constant 0 : index
    %109 = vector.load %arg6[%c1_113, %c1_114, %c0_115] : memref<18x18x4xbf16, #tpu.memory_space<vmem>>, vector<16x16x4xbf16>
    %110 = vector.shape_cast %109 : vector<16x16x4xbf16> to vector<256x4xbf16>
    %c4_116 = arith.constant 4 : index
    %c0_117 = arith.constant 0 : index
    %c0_118 = arith.constant 0 : index
    %111 = vector.load %arg3[%c4_116, %c0_117, %c0_118] : memref<9x4x4xbf16, #tpu.memory_space<vmem>>, vector<1x4x4xbf16>
    %112 = vector.shape_cast %111 : vector<1x4x4xbf16> to vector<4x4xbf16>
    %cst_119 = arith.constant dense<0.000000e+00> : vector<256x4xf32>
    %113 = tpu.matmul %110, %112, %cst_119 {dimension_numbers = #tpu.dot_dimension_numbers<[1], [0], [0], [1], [0, 0, 1, 1], [], []>} : vector<256x4xbf16>, vector<4x4xbf16>, vector<256x4xf32> -> vector<256x4xf32>
    %114 = arith.addf %108, %113 : vector<256x4xf32>
    %c1_120 = arith.constant 1 : index
    %c2_121 = arith.constant 2 : index
    %c0_122 = arith.constant 0 : index
    %115 = vector.load %arg6[%c1_120, %c2_121, %c0_122] : memref<18x18x4xbf16, #tpu.memory_space<vmem>>, vector<16x16x4xbf16>
    %116 = vector.shape_cast %115 : vector<16x16x4xbf16> to vector<256x4xbf16>
    %c5_123 = arith.constant 5 : index
    %c0_124 = arith.constant 0 : index
    %c0_125 = arith.constant 0 : index
    %117 = vector.load %arg3[%c5_123, %c0_124, %c0_125] : memref<9x4x4xbf16, #tpu.memory_space<vmem>>, vector<1x4x4xbf16>
    %118 = vector.shape_cast %117 : vector<1x4x4xbf16> to vector<4x4xbf16>
    %cst_126 = arith.constant dense<0.000000e+00> : vector<256x4xf32>
    %119 = tpu.matmul %116, %118, %cst_126 {dimension_numbers = #tpu.dot_dimension_numbers<[1], [0], [0], [1], [0, 0, 1, 1], [], []>} : vector<256x4xbf16>, vector<4x4xbf16>, vector<256x4xf32> -> vector<256x4xf32>
    %120 = arith.addf %114, %119 : vector<256x4xf32>
    %c2_127 = arith.constant 2 : index
    %c0_128 = arith.constant 0 : index
    %c0_129 = arith.constant 0 : index
    %121 = vector.load %arg6[%c2_127, %c0_128, %c0_129] : memref<18x18x4xbf16, #tpu.memory_space<vmem>>, vector<16x16x4xbf16>
    %122 = vector.shape_cast %121 : vector<16x16x4xbf16> to vector<256x4xbf16>
    %c6_130 = arith.constant 6 : index
    %c0_131 = arith.constant 0 : index
    %c0_132 = arith.constant 0 : index
    %123 = vector.load %arg3[%c6_130, %c0_131, %c0_132] : memref<9x4x4xbf16, #tpu.memory_space<vmem>>, vector<1x4x4xbf16>
    %124 = vector.shape_cast %123 : vector<1x4x4xbf16> to vector<4x4xbf16>
    %cst_133 = arith.constant dense<0.000000e+00> : vector<256x4xf32>
    %125 = tpu.matmul %122, %124, %cst_133 {dimension_numbers = #tpu.dot_dimension_numbers<[1], [0], [0], [1], [0, 0, 1, 1], [], []>} : vector<256x4xbf16>, vector<4x4xbf16>, vector<256x4xf32> -> vector<256x4xf32>
    %126 = arith.addf %120, %125 : vector<256x4xf32>
    %c2_134 = arith.constant 2 : index
    %c1_135 = arith.constant 1 : index
    %c0_136 = arith.constant 0 : index
    %127 = vector.load %arg6[%c2_134, %c1_135, %c0_136] : memref<18x18x4xbf16, #tpu.memory_space<vmem>>, vector<16x16x4xbf16>
    %128 = vector.shape_cast %127 : vector<16x16x4xbf16> to vector<256x4xbf16>
    %c7_137 = arith.constant 7 : index
    %c0_138 = arith.constant 0 : index
    %c0_139 = arith.constant 0 : index
    %129 = vector.load %arg3[%c7_137, %c0_138, %c0_139] : memref<9x4x4xbf16, #tpu.memory_space<vmem>>, vector<1x4x4xbf16>
    %130 = vector.shape_cast %129 : vector<1x4x4xbf16> to vector<4x4xbf16>
    %cst_140 = arith.constant dense<0.000000e+00> : vector<256x4xf32>
    %131 = tpu.matmul %128, %130, %cst_140 {dimension_numbers = #tpu.dot_dimension_numbers<[1], [0], [0], [1], [0, 0, 1, 1], [], []>} : vector<256x4xbf16>, vector<4x4xbf16>, vector<256x4xf32> -> vector<256x4xf32>
    %132 = arith.addf %126, %131 : vector<256x4xf32>
    %c2_141 = arith.constant 2 : index
    %c2_142 = arith.constant 2 : index
    %c0_143 = arith.constant 0 : index
    %133 = vector.load %arg6[%c2_141, %c2_142, %c0_143] : memref<18x18x4xbf16, #tpu.memory_space<vmem>>, vector<16x16x4xbf16>
    %134 = vector.shape_cast %133 : vector<16x16x4xbf16> to vector<256x4xbf16>
    %c8_144 = arith.constant 8 : index
    %c0_145 = arith.constant 0 : index
    %c0_146 = arith.constant 0 : index
    %135 = vector.load %arg3[%c8_144, %c0_145, %c0_146] : memref<9x4x4xbf16, #tpu.memory_space<vmem>>, vector<1x4x4xbf16>
    %136 = vector.shape_cast %135 : vector<1x4x4xbf16> to vector<4x4xbf16>
    %cst_147 = arith.constant dense<0.000000e+00> : vector<256x4xf32>
    %137 = tpu.matmul %134, %136, %cst_147 {dimension_numbers = #tpu.dot_dimension_numbers<[1], [0], [0], [1], [0, 0, 1, 1], [], []>} : vector<256x4xbf16>, vector<4x4xbf16>, vector<256x4xf32> -> vector<256x4xf32>
    %138 = arith.addf %132, %137 : vector<256x4xf32>
    %cst_148 = arith.constant dense<0.000000e+00> : vector<4xf32>
    %139 = vector.multi_reduction <add>, %138, %cst_148 [0] : vector<256x4xf32> to vector<4xf32>
    %140 = vector.shape_cast %139 : vector<4xf32> to vector<1x4xf32>
    %cst_149 = arith.constant 3.906250e-03 : f32
    %141 = vector.broadcast %cst_149 : f32 to vector<1x4xf32>
    %142 = arith.mulf %140, %141 : vector<1x4xf32>
    %143 = vector.broadcast %142 : vector<1x4xf32> to vector<256x4xf32>
    %144 = arith.subf %138, %143 : vector<256x4xf32>
    %145 = arith.mulf %144, %144 : vector<256x4xf32>
    %cst_150 = arith.constant dense<0.000000e+00> : vector<4xf32>
    %146 = vector.multi_reduction <add>, %145, %cst_150 [0] : vector<256x4xf32> to vector<4xf32>
    %147 = vector.shape_cast %146 : vector<4xf32> to vector<1x4xf32>
    %cst_151 = arith.constant 3.906250e-03 : f32
    %148 = vector.broadcast %cst_151 : f32 to vector<1x4xf32>
    %149 = arith.mulf %147, %148 : vector<1x4xf32>
    %cst_152 = arith.constant 9.99999974E-6 : f32
    %150 = vector.broadcast %cst_152 : f32 to vector<1x4xf32>
    %151 = arith.addf %149, %150 : vector<1x4xf32>
    %152 = math.rsqrt %151 : vector<1x4xf32>
    %153 = vector.broadcast %152 : vector<1x4xf32> to vector<256x4xf32>
    %154 = arith.mulf %144, %153 : vector<256x4xf32>
    %c0_153 = arith.constant 0 : index
    %c1_154 = arith.constant 1 : index
    %c1_155 = arith.constant 1 : index
    %c0_156 = arith.constant 0 : index
    %155 = vector.load %arg1[%c0_153, %c1_154, %c1_155, %c0_156] : memref<1x18x18x4xf32, #tpu.memory_space<vmem>>, vector<1x16x16x4xf32>
    %156 = vector.shape_cast %155 : vector<1x16x16x4xf32> to vector<16x16x4xf32>
    %157 = vector.shape_cast %156 : vector<16x16x4xf32> to vector<256x4xf32>
    %158 = arith.addf %154, %157 : vector<256x4xf32>
    %159 = vector.shape_cast %158 : vector<256x4xf32> to vector<16x16x4xf32>
    %c0_157 = arith.constant 0 : index
    %c0_158 = arith.constant 0 : index
    %c0_159 = arith.constant 0 : index
    %c0_160 = arith.constant 0 : index
    %160 = vector.load %arg4[%c0_157, %c0_158, %c0_159, %c0_160] : memref<1x16x16x4xf32, #tpu.memory_space<vmem>>, vector<1x16x16x4xf32>
    %161 = vector.shape_cast %160 : vector<1x16x16x4xf32> to vector<16x16x4xf32>
    %162 = vector.shape_cast %159 : vector<16x16x4xf32> to vector<1x16x16x4xf32>
    tpu.vector_store %arg4[%c0_157, %c0_158, %c0_159, %c0_160], %162 {strides = array<i32>} : memref<1x16x16x4xf32, #tpu.memory_space<vmem>>, vector<1x16x16x4xf32>,
    return
  }
  func.func @transform_0(%arg0: i32) -> (i32, i32, i32, i32) {
    %c0_i32 = arith.constant 0 : i32
    %c0_i32_0 = arith.constant 0 : i32
    %c0_i32_1 = arith.constant 0 : i32
    %c0_i32_2 = arith.constant 0 : i32
    return %arg0, %c0_i32, %c0_i32_0, %c0_i32_1 : i32, i32, i32, i32
  }
  func.func @transform_1(%arg0: i32) -> (i32, i32, i32) {
    %c0_i32 = arith.constant 0 : i32
    %c0_i32_0 = arith.constant 0 : i32
    %c0_i32_1 = arith.constant 0 : i32
    %c0_i32_2 = arith.constant 0 : i32
    return %c0_i32, %c0_i32_0, %c0_i32_1 : i32, i32, i32
  }
  func.func @transform_2(%arg0: i32) -> (i32, i32, i32) {
    %c0_i32 = arith.constant 0 : i32
    %c0_i32_0 = arith.constant 0 : i32
    %c0_i32_1 = arith.constant 0 : i32
    %c0_i32_2 = arith.constant 0 : i32
    return %c0_i32, %c0_i32_0, %c0_i32_1 : i32, i32, i32
  }
  func.func @transform_3(%arg0: i32) -> (i32, i32, i32, i32) {
    %c0_i32 = arith.constant 0 : i32
    %c0_i32_0 = arith.constant 0 : i32
    %c0_i32_1 = arith.constant 0 : i32
    %c0_i32_2 = arith.constant 0 : i32
    return %arg0, %c0_i32, %c0_i32_0, %c0_i32_1 : i32, i32, i32, i32
  }
}

</mosaic_0001>

<bundles_post_ra>
// kernel: tpu_custom_call.1
= control target key start
LH: loop header
LB: loop body
LE: loop exit
PB: predicated region body
PF: predicated region fallthrough
CT: control target
= control target key end

     0   :  { %s13142_s12 = smov 0   ;;  %s18680_s0 = inlined_call_operand.vmem [shape: f32[2,18,18,4], index: 0, kind: input, shape index: {}]   ;;  %s18681_s1 = inlined_call_operand.vmem [shape: bf16[9,4,4], index: 1, kind: input, shape index: {}]   ;;  %s18682_s2 = inlined_call_operand.vmem [shape: bf16[9,4,4], index: 2, kind: input, shape index: {}]   ;;  %s18683_s3 = inlined_call_operand.vmem [shape: f32[2,16,16,4], index: 3, kind: output, shape index: {}]  }
   0x1 LB: > { %s11126_s13 = sadd.s32 4294967295, %s13120_s12   ;;  %p11130_p0 = scmp.ge.s32.totalorder %s13120_s12, 1  ;;  %s13120_s12 = sphi %s13142_s12, %s13_s12  }
   0x2   : > { %p137_p1 = scmp.lt.s32.totalorder %s13120_s12, 3 }
   0x4   : > { %p138_p2 = pnand %p11130_p0, %p137_p1 }
   0x6   : > { %141 = sbr.rel (%p138_p2) target bundleno = 1523 (0x5f3), region = 32 }
   0xb   : > { %v11188_v0 = vld [vmem:[%s18681_s1 + $0x2] sm:$0x3]  ;;  %vm1051_vm0 = vcmask 1041408   ;;  %v548_v1 = vld [vmem:[%s18681_s1] sm:$0x3]  ;;  %p161_p3 = scmp.lt.s32.totalorder %s11126_s13, 1 }
   0xc   : > { %12983 = vmatprep.subr.msk.bf16.mxu0 %vm1051_vm0, %v11188_v0  ;;  %v1053_v2 = vsel %vm1051_vm0, %v11188_v0, 0  ;;  %12984 = vmatprep.subr.msk.bf16.mxu1 %vm1051_vm0, %v548_v1  ;;  %v1345_v3 = vsel %vm1051_vm0, %v548_v1, 0  ;;  %v13163_v4 = vld [vmem:[%s18681_s1 + $0x4] sm:$0x3]  ;;  %v13172_v5 = vld [vmem:[%s18681_s1 + $0x6] sm:$0x3] }
   0xd   : > { %12372 = vmatpush3.bf16.msra.mxu0 %v1053_v2  ;;  %12406 = vmatpush3.bf16.msra.mxu1 %v1345_v3  ;;  %s19019_s13 = smov (!%p161_p3, %s11126_s13), 1  ;;  %vm460_vm1 = vcmask 27648   ;;  %vm463_vm2 = vcmask 24576   ;;  %v13206_v33 = vld [vmem:[%s18681_s1 + $0x8] sm:$0x3]  ;;  %vm1002_vm5 = vcmask 31744  }
   0xe   : > { %12985 = vmatprep.subr.msk.bf16.mxu0 %vm1051_vm0, %v13163_v4  ;;  %s13001_s22 = smul.u32 432, %s19019_s13  ;;  %12986 = vmatprep.subr.msk.bf16.mxu1 %vm1051_vm0, %v13172_v5  ;;  %vm565_vm3 = vsmask.f32 3328  ;;  %vm566_vm4 = vsmask.f32 7440  ;;  %v13222_v46 = vsel %vm1051_vm0, %v13163_v4, 0 }
   0xf   : > { %v13238_v59 = vsel %vm1051_vm0, %v13172_v5, 0  ;;  %v13248_v2 = vsel %vm1051_vm0, %v13206_v33, 0  ;;  %vm13278_vm6 = vmor %vm565_vm3, %vm566_vm4  ;;  %vm1556_vm7 = vcmask 1042432   ;;  %vm1557_vm8 = vcmask 1046532   ;;  %s11978_s9 = sshll.u32 %s19019_s13, 8 }
  0x10   : > { %s13180_s25 = scalar_lea.vmem %s18680_s0, %s13001_s22  ;;  %vm13455_vm9 = vmor %vm1556_vm7, %vm1557_vm8  ;;  %vm5441_vm10 = vsmask.f32 256  ;;  %vm5442_vm11 = vsmask.f32 4368  ;;  %vm5766_vm14 = vsmask.f32 7938  ;;  %s18561_s11 = scalar_lea.vmem %s18683_s3, %s11978_s9 }
  0x11   : > { %v172_v6 = vld [vmem:[%s13180_s25] sm:$0xff]  ;;  %v173_v7 = vld [vmem:[%s13180_s25 + $0x8] sm:$0xff]  ;;  %v174_v8 = vld [vmem:[%s13180_s25 + $0x10] sm:$0x3] }
  0x12   : > { %v11979_v9 = vpack.c.bf16 %v172_v6, %v172_v6  ;;  %v11980_v10 = vpack.c.bf16 %v173_v7, %v173_v7  ;;  %v11981_v11 = vpack.c.bf16 %v174_v8, %v174_v8  ;;  %v175_v12 = vld [vmem:[%s13180_s25 + $0x18] sm:$0xff]  ;;  %v176_v13 = vld [vmem:[%s13180_s25 + $0x20] sm:$0xff]  ;;  %v177_v14 = vld [vmem:[%s13180_s25 + $0x28] sm:$0x3] }
  0x13   : > { %v11982_v15 = vpack.c.bf16 %v175_v12, %v175_v12  ;;  %v11983_v16 = vpack.c.bf16 %v176_v13, %v176_v13  ;;  %v11984_v17 = vpack.c.bf16 %v177_v14, %v177_v14  ;;  %v178_v18 = vld [vmem:[%s13180_s25 + $0x30] sm:$0xff]  ;;  %v179_v19 = vld [vmem:[%s13180_s25 + $0x38] sm:$0xff]  ;;  %v180_v20 = vld [vmem:[%s13180_s25 + $0x40] sm:$0x3] }
  0x14   : > { %461 = vst.msk [vmem:[#allocation2] sm:$0xf] %vm460_vm1, %v11979_v9  ;;  %462 = vst.msk [vmem:[#allocation2 + $0x4] sm:$0xf] %vm460_vm1, %v11980_v10  ;;  %v11985_v21 = vpack.c.bf16 %v178_v18, %v178_v18  ;;  %v11986_v22 = vpack.c.bf16 %v179_v19, %v179_v19  ;;  %v11987_v23 = vpack.c.bf16 %v180_v20, %v180_v20  ;;  %v181_v24 = vld [vmem:[%s13180_s25 + $0x48] sm:$0xff]  ;;  %v182_v25 = vld [vmem:[%s13180_s25 + $0x50] sm:$0xff] }
  0x15   : > { %464 = vst.msk [vmem:[#allocation2 + $0x8] sm:$0x1] %vm463_vm2, %v11981_v11  ;;  %v183_v26 = vld [vmem:[%s13180_s25 + $0x58] sm:$0x3]  ;;  %467 = vst.msk [vmem:[#allocation2 + $0x14] sm:$0x1] %vm463_vm2, %v11984_v17  ;;  %v11988_v27 = vpack.c.bf16 %v181_v24, %v181_v24  ;;  %v11989_v28 = vpack.c.bf16 %v182_v25, %v182_v25 }
  0x16   : > { %465 = vst.msk [vmem:[#allocation2 + $0xc] sm:$0xf] %vm460_vm1, %v11982_v15  ;;  %466 = vst.msk [vmem:[#allocation2 + $0x10] sm:$0xf] %vm460_vm1, %v11983_v16  ;;  %v11990_v29 = vpack.c.bf16 %v183_v26, %v183_v26  ;;  %v184_v30 = vld [vmem:[%s13180_s25 + $0x60] sm:$0xff]  ;;  %v185_v31 = vld [vmem:[%s13180_s25 + $0x68] sm:$0xff] }
  0x17   : > { %v186_v32 = vld [vmem:[%s13180_s25 + $0x70] sm:$0x3]  ;;  %468 = vst.msk [vmem:[#allocation2 + $0x18] sm:$0xf] %vm460_vm1, %v11985_v21  ;;  %469 = vst.msk [vmem:[#allocation2 + $0x1c] sm:$0xf] %vm460_vm1, %v11986_v22  ;;  %v11991_v34 = vpack.c.bf16 %v184_v30, %v184_v30  ;;  %v11992_v35 = vpack.c.bf16 %v185_v31, %v185_v31 }
  0x18   : > { %470 = vst.msk [vmem:[#allocation2 + $0x20] sm:$0x1] %vm463_vm2, %v11987_v23  ;;  %v11993_v36 = vpack.c.bf16 %v186_v32, %v186_v32  ;;  %v187_v37 = vld [vmem:[%s13180_s25 + $0x78] sm:$0xff]  ;;  %v188_v38 = vld [vmem:[%s13180_s25 + $0x80] sm:$0xff]  ;;  %v189_v39 = vld [vmem:[%s13180_s25 + $0x88] sm:$0x3] }
  0x19   : > { %471 = vst.msk [vmem:[#allocation2 + $0x24] sm:$0xf] %vm460_vm1, %v11988_v27  ;;  %472 = vst.msk [vmem:[#allocation2 + $0x28] sm:$0xf] %vm460_vm1, %v11989_v28  ;;  %v11994_v40 = vpack.c.bf16 %v187_v37, %v187_v37  ;;  %v11995_v41 = vpack.c.bf16 %v188_v38, %v188_v38  ;;  %v11996_v42 = vpack.c.bf16 %v189_v39, %v189_v39  ;;  %v190_v43 = vld [vmem:[%s13180_s25 + $0x90] sm:$0xff]  ;;  %v191_v44 = vld [vmem:[%s13180_s25 + $0x98] sm:$0xff] }
  0x1a   : > { %473 = vst.msk [vmem:[#allocation2 + $0x2c] sm:$0x1] %vm463_vm2, %v11990_v29  ;;  %v192_v45 = vld [vmem:[%s13180_s25 + $0xa0] sm:$0x3]  ;;  %476 = vst.msk [vmem:[#allocation2 + $0x38] sm:$0x1] %vm463_vm2, %v11993_v36  ;;  %v11997_v47 = vpack.c.bf16 %v190_v43, %v190_v43  ;;  %v11998_v48 = vpack.c.bf16 %v191_v44, %v191_v44 }
  0x1b   : > { %474 = vst.msk [vmem:[#allocation2 + $0x30] sm:$0xf] %vm460_vm1, %v11991_v34  ;;  %475 = vst.msk [vmem:[#allocation2 + $0x34] sm:$0xf] %vm460_vm1, %v11992_v35  ;;  %v11999_v49 = vpack.c.bf16 %v192_v45, %v192_v45  ;;  %v193_v50 = vld [vmem:[%s13180_s25 + $0xa8] sm:$0xff]  ;;  %v194_v51 = vld [vmem:[%s13180_s25 + $0xb0] sm:$0xff] }
  0x1c   : > { %v195_v52 = vld [vmem:[%s13180_s25 + $0xb8] sm:$0x3]  ;;  %477 = vst.msk [vmem:[#allocation2 + $0x3c] sm:$0xf] %vm460_vm1, %v11994_v40  ;;  %478 = vst.msk [vmem:[#allocation2 + $0x40] sm:$0xf] %vm460_vm1, %v11995_v41  ;;  %v12000_v53 = vpack.c.bf16 %v193_v50, %v193_v50  ;;  %v12001_v54 = vpack.c.bf16 %v194_v51, %v194_v51 }
  0x1d   : > { %479 = vst.msk [vmem:[#allocation2 + $0x44] sm:$0x1] %vm463_vm2, %v11996_v42  ;;  %v12002_v55 = vpack.c.bf16 %v195_v52, %v195_v52  ;;  %v196_v56 = vld [vmem:[%s13180_s25 + $0xc0] sm:$0xff]  ;;  %v197_v57 = vld [vmem:[%s13180_s25 + $0xc8] sm:$0xff]  ;;  %v198_v58 = vld [vmem:[%s13180_s25 + $0xd0] sm:$0x3] }
  0x1e   : > { %480 = vst.msk [vmem:[#allocation2 + $0x48] sm:$0xf] %vm460_vm1, %v11997_v47  ;;  %481 = vst.msk [vmem:[#allocation2 + $0x4c] sm:$0xf] %vm460_vm1, %v11998_v48  ;;  %v12003_v60 = vpack.c.bf16 %v196_v56, %v196_v56  ;;  %v12004_v61 = vpack.c.bf16 %v197_v57, %v197_v57  ;;  %v12005_v62 = vpack.c.bf16 %v198_v58, %v198_v58  ;;  %v199_v63 = vld [vmem:[%s13180_s25 + $0xd8] sm:$0xff]  ;;  %v200_v0 = vld [vmem:[%s13180_s25 + $0xe0] sm:$0xff] }
  0x1f   : > { %482 = vst.msk [vmem:[#allocation2 + $0x50] sm:$0x1] %vm463_vm2, %v11999_v49  ;;  %v201_v1 = vld [vmem:[%s13180_s25 + $0xe8] sm:$0x3]  ;;  %v516_v3 = vld [vmem:[#allocation2] sm:$0xf]  ;;  %v12006_v6 = vpack.c.bf16 %v199_v63, %v199_v63  ;;  %v12007_v7 = vpack.c.bf16 %v200_v0, %v200_v0  ;;  %vm15549_vm12 = vmor %vm5441_vm10, %vm5442_vm11 }
  0x20   : > { %v13250_v4 = vld [vmem:[#allocation2 + $0x4] sm:$0xf]  ;;  %v13252_v5 = vld [vmem:[#allocation2 + $0x8] sm:$0x1]  ;;  %483 = vst.msk [vmem:[#allocation2 + $0x54] sm:$0xf] %vm460_vm1, %v12000_v53  ;;  %v12008_v8 = vpack.c.bf16 %v201_v1, %v201_v1  ;;  %vm15563_vm13 = vmand %vm463_vm2, %vm5441_vm10 }
  0x21   : > { %484 = vst.msk [vmem:[#allocation2 + $0x58] sm:$0xf] %vm460_vm1, %v12001_v54  ;;  %v569_v9 = vshrl.u32 %v516_v3, 16  ;;  %v572_v10 = vshll.u32 %v516_v3, 16  ;;  %v578_v11 = vshll.u32 %v13250_v4, 16  ;;  %v582_v12 = vshrl.u32 %v13250_v4, 16  ;;  %vm15624_vm15 = vmand %vm463_vm2, %vm5766_vm14 }
  0x22   : > { %485 = vst.msk [vmem:[#allocation2 + $0x5c] sm:$0x1] %vm463_vm2, %v12002_v55  ;;  %v518_v13 = vld [vmem:[#allocation2 + $0xc] sm:$0xf]  ;;  %488 = vst.msk [vmem:[#allocation2 + $0x68] sm:$0x1] %vm463_vm2, %v12005_v62  ;;  %v11221_v16 = vcombine.low %v516_v3, %v13250_v4 }
  0x23   : > { %486 = vst.msk [vmem:[#allocation2 + $0x60] sm:$0xf] %vm460_vm1, %v12003_v60  ;;  %487 = vst.msk [vmem:[#allocation2 + $0x64] sm:$0xf] %vm460_vm1, %v12004_v61  ;;  %v588_v14 = vshll.u32 %v13252_v5, 16  ;;  %v1564_v15 = vrot.slane %v13252_v5, 5 }
  0x24   : > { %v13265_v17 = vld [vmem:[#allocation2 + $0x10] sm:$0xf]  ;;  %v13267_v18 = vld [vmem:[#allocation2 + $0x14] sm:$0x1]  ;;  %489 = vst.msk [vmem:[#allocation2 + $0x6c] sm:$0xf] %vm460_vm1, %v12006_v6  ;;  %12407 = vmatprep.mubr.msk.bf16.mxu1 %vm1002_vm5, %v11221_v16 }
  0x25   : > { %490 = vst.msk [vmem:[#allocation2 + $0x70] sm:$0xf] %vm460_vm1, %v12007_v7  ;;  %v571_v19 = vrot.slane %v569_v9, 4  ;;  %v574_v20 = vrot.slane %v572_v10, 5  ;;  %v580_v21 = vrot.slane %v578_v11, 5  ;;  %v584_v22 = vrot.slane %v582_v12, 4 }
  0x26   : > { %491 = vst.msk [vmem:[#allocation2 + $0x74] sm:$0x1] %vm463_vm2, %v12008_v8  ;;  %v590_v23 = vrot.slane %v588_v14, 5  ;;  %v593_v24 = vshrl.u32 %v518_v13, 16  ;;  %v596_v25 = vshll.u32 %v518_v13, 16  ;;  %v602_v26 = vshll.u32 %v13265_v17, 16 }
  0x27   : > { %v575_v27 = vor.u32 %v574_v20, %v571_v19  ;;  %v585_v28 = vor.u32 %v584_v22, %v580_v21  ;;  %v606_v29 = vshrl.u32 %v13265_v17, 16  ;;  %v612_v30 = vshll.u32 %v13267_v18, 16  ;;  %v520_v31 = vld [vmem:[#allocation2 + $0x18] sm:$0xf]  ;;  %v13283_v42 = vld [vmem:[#allocation2 + $0x1c] sm:$0xf] }
  0x28   : > { %v18709_v32 = vmov 0  ;;  %v595_v34 = vrot.slane %v593_v24, 4  ;;  %v598_v35 = vrot.slane %v596_v25, 5  ;;  %v604_v36 = vrot.slane %v602_v26, 5  ;;  %v13287_v47 = vld [vmem:[#allocation2 + $0x20] sm:$0x1] }
  0x29   : > { %v18710_v32 = vsel %vm13278_vm6, 4294967295, %v18709_v32  ;;  %v1568_v37 = vrot.slane %v13265_v17, 5  ;;  %v576_v38 = vrot.slane %v575_v27, 4  ;;  %v586_v39 = vrot.slane %v585_v28, 4  ;;  %v522_v53 = vld [vmem:[#allocation2 + $0x24] sm:$0xf] }
  0x2a   : > { %18711 = vst [vmem:[#allocation4_spill] sm:$0xff] %v18710_v32  ;;  %v608_v40 = vrot.slane %v606_v29, 4  ;;  %v614_v41 = vrot.slane %v612_v30, 5  ;;  %v599_v43 = vor.u32 %v598_v35, %v595_v34  ;;  %v1571_v44 = vrot.slane %v13267_v18, 5  ;;  %v13297_v63 = vld [vmem:[#allocation2 + $0x28] sm:$0xf] }
  0x2b   : > { %v11222_v45 = vcombine.low %v518_v13, %v13265_v17  ;;  %v617_v48 = vshrl.u32 %v520_v31, 16  ;;  %v581_v49 = vsel %vm13278_vm6, %v576_v38, %v580_v21  ;;  %v591_v50 = vsel %vm13278_vm6, %v586_v39, %v590_v23  ;;  %v13304_v6 = vld [vmem:[#allocation2 + $0x2c] sm:$0x1]  ;;  %v524_v12 = vld [vmem:[#allocation2 + $0x30] sm:$0xf] }
  0x2c   : > { %v609_v51 = vor.u32 %v608_v40, %v604_v36  ;;  %v620_v52 = vshll.u32 %v520_v31, 16  ;;  %v11189_v54 = vcombine.low %v581_v49, %v591_v50  ;;  %v600_v55 = vrot.slane %v599_v43, 4  ;;  %v13312_v23 = vld [vmem:[#allocation2 + $0x34] sm:$0xf]  ;;  %v13316_v27 = vld [vmem:[#allocation2 + $0x38] sm:$0x1] }
  0x2d   : > { %12408 = vmatmul.mubr.msk.bf16.vlgmr.msra.gmra.mxu1 %vm1002_vm5, %v11222_v45  ;;  %v619_v56 = vrot.slane %v617_v48, 4  ;;  %v626_v57 = vshll.u32 %v13283_v42, 16  ;;  %v630_v61 = vshrl.u32 %v13283_v42, 16  ;;  %v636_v62 = vshll.u32 %v13287_v47, 16  ;;  %v526_v45 = vld [vmem:[#allocation2 + $0x3c] sm:$0xf] }
  0x2e   : > { %v610_v58 = vrot.slane %v609_v51, 4  ;;  %v622_v60 = vrot.slane %v620_v52, 5  ;;  %12474 = vmatpush3.bf16.msra.mxu1 %v13238_v59  ;;  %12373 = vmatprep.mubr.msk.bf16.mxu0 %vm1002_vm5, %v11189_v54  ;;  %v605_v0 = vsel %vm13278_vm6, %v600_v55, %v604_v36  ;;  %v11223_v3 = vcombine.low %v520_v31, %v13283_v42  ;;  %v13329_v52 = vld [vmem:[#allocation2 + $0x40] sm:$0xf] }
  0x2f   : > { %v628_v1 = vrot.slane %v626_v57, 5  ;;  %v641_v7 = vshrl.u32 %v522_v53, 16  ;;  %v632_v10 = vrot.slane %v630_v61, 4  ;;  %v638_v11 = vrot.slane %v636_v62, 5 }
  0x30   : > { %v615_v8 = vsel %vm13278_vm6, %v610_v58, %v614_v41  ;;  %v623_v9 = vor.u32 %v622_v60, %v619_v56  ;;  %12411 = vmatprep.mubr.msk.bf16.mxu1 %vm1002_vm5, %v11223_v3  ;;  %v644_v14 = vshll.u32 %v522_v53, 16  ;;  %v650_v16 = vshll.u32 %v13297_v63, 16  ;;  %v13335_v58 = vld [vmem:[#allocation2 + $0x44] sm:$0x1] }
  0x31   : > { %v11190_v13 = vcombine.low %v605_v0, %v615_v8  ;;  %v643_v59 = vrot.slane %v641_v7, 4  ;;  %v633_v20 = vor.u32 %v632_v10, %v628_v1  ;;  %v654_v21 = vshrl.u32 %v13297_v63, 16  ;;  %v528_v7 = vld [vmem:[#allocation2 + $0x48] sm:$0xf] }
  0x32   : > { %v624_v19 = vrot.slane %v623_v9, 4  ;;  %v660_v22 = vshll.u32 %v13304_v6, 16  ;;  %v646_v24 = vrot.slane %v644_v14, 5  ;;  %v652_v25 = vrot.slane %v650_v16, 5  ;;  %v13343_v16 = vld [vmem:[#allocation2 + $0x4c] sm:$0xf] }
  0x33   : > { %12374 = vmatmul.mubr.msk.bf16.vlgmr.msra.gmra.mxu0 %vm1002_vm5, %v11190_v13  ;;  %v11224_v26 = vcombine.low %v522_v53, %v13297_v63  ;;  %v665_v28 = vshrl.u32 %v524_v12, 16  ;;  %v634_v30 = vrot.slane %v633_v20, 4  ;;  %v656_v31 = vrot.slane %v654_v21, 4 }
  0x34   : > { %12440 = vmatpush3.bf16.msra.mxu0 %v13222_v46  ;;  %v629_v29 = vsel %vm13278_vm6, %v624_v19, %v628_v1  ;;  %v662_v34 = vrot.slane %v660_v22, 5  ;;  %v647_v35 = vor.u32 %v646_v24, %v643_v59  ;;  %v668_v38 = vshll.u32 %v524_v12, 16  ;;  %v13349_v22 = vld [vmem:[#allocation2 + $0x50] sm:$0x1] }
  0x35   : > { %12412 = vmatmul.mubr.msk.bf16.gmra.mxu1 %vm1002_vm5, %v11224_v26  ;;  %v667_v36 = vrot.slane %v665_v28, 4  ;;  %v674_v39 = vshll.u32 %v13312_v23, 16  ;;  %12987 = vmatprep.subr.msk.bf16.mxu0 %vm1051_vm0, %v13206_v33  ;;  %v639_v40 = vsel %vm13278_vm6, %v634_v30, %v638_v11  ;;  %v657_v46 = vor.u32 %v656_v31, %v652_v25  ;;  %v13353_v31 = vld [vmem:[#allocation2 + $0x58] sm:$0xf] }
  0x36   : > { %v678_v41 = vshrl.u32 %v13312_v23, 16  ;;  %v684_v43 = vshll.u32 %v13316_v27, 16  ;;  %v11191_v48 = vcombine.low %v629_v29, %v639_v40  ;;  %v648_v49 = vrot.slane %v647_v35, 4 }
  0x37   : > { %v670_v50 = vrot.slane %v668_v38, 5  ;;  %v676_v51 = vrot.slane %v674_v39, 5  ;;  %v658_v53 = vrot.slane %v657_v46, 4  ;;  %v11225_v33 = vcombine.low %v524_v12, %v13312_v23 }
  0x38   : > { %v680_v54 = vrot.slane %v678_v41, 4  ;;  %v686_v55 = vrot.slane %v684_v43, 5  ;;  %12377 = vmatprep.mubr.msk.bf16.mxu0 %vm1002_vm5, %v11191_v48  ;;  %v653_v56 = vsel %vm13278_vm6, %v648_v49, %v652_v25  ;;  %v689_v60 = vshrl.u32 %v526_v45, 16  ;;  %v530_v25 = vld [vmem:[#allocation2 + $0x54] sm:$0xf] }
  0x39   : > { %v671_v57 = vor.u32 %v670_v50, %v667_v36  ;;  %v692_v61 = vshll.u32 %v526_v45, 16  ;;  %v663_v62 = vsel %vm13278_vm6, %v658_v53, %v662_v34  ;;  %12415 = vmatprep.mubr.msk.bf16.mxu1 %vm1002_vm5, %v11225_v33  ;;  %v698_v1 = vshll.u32 %v13329_v52, 16  ;;  %v13363_v49 = vld [vmem:[#allocation2 + $0x5c] sm:$0x1] }
  0x3a   : > { %v681_v0 = vor.u32 %v680_v54, %v676_v51  ;;  %v702_v3 = vshrl.u32 %v13329_v52, 16  ;;  %v11192_v8 = vcombine.low %v653_v56, %v663_v62  ;;  %v691_v10 = vrot.slane %v689_v60, 4  ;;  %v13367_v56 = vld [vmem:[#allocation2 + $0x64] sm:$0xf] }
  0x3b   : > { %v672_v9 = vrot.slane %v671_v57, 4  ;;  %v694_v11 = vrot.slane %v692_v61, 5  ;;  %v700_v13 = vrot.slane %v698_v1, 5  ;;  %v708_v14 = vshll.u32 %v13335_v58, 16 }
  0x3c   : > { %v682_v12 = vrot.slane %v681_v0, 4  ;;  %v704_v59 = vrot.slane %v702_v3, 4  ;;  %12378 = vmatmul.mubr.msk.bf16.gmra.mxu0 %vm1002_vm5, %v11192_v8  ;;  %v11226_v21 = vcombine.low %v526_v45, %v13329_v52  ;;  %v713_v24 = vshrl.u32 %v528_v7, 16 }
  0x3d   : > { %v677_v19 = vsel %vm13278_vm6, %v672_v9, %v676_v51  ;;  %v695_v20 = vor.u32 %v694_v11, %v691_v10  ;;  %v710_v29 = vrot.slane %v708_v14, 5  ;;  %v716_v30 = vshll.u32 %v528_v7, 16  ;;  %v532_v51 = vld [vmem:[#allocation2 + $0x60] sm:$0xf]  ;;  %v13375_v11 = vld [vmem:[#allocation2 + $0x68] sm:$0x1] }
  0x3e   : > { %v687_v26 = vsel %vm13278_vm6, %v682_v12, %v686_v55  ;;  %v705_v28 = vor.u32 %v704_v59, %v700_v13  ;;  %12416 = vmatmul.mubr.msk.bf16.gmra.mxu1 %vm1002_vm5, %v11226_v21  ;;  %v715_v36 = vrot.slane %v713_v24, 4  ;;  %v722_v38 = vshll.u32 %v13343_v16, 16 }
  0x3f   : > { %v11193_v34 = vcombine.low %v677_v19, %v687_v26  ;;  %v696_v35 = vrot.slane %v695_v20, 4  ;;  %v718_v40 = vrot.slane %v716_v30, 5  ;;  %v726_v46 = vshrl.u32 %v13343_v16, 16  ;;  %v13379_v20 = vld [vmem:[#allocation2 + $0x6c] sm:$0xf] }
  0x40   : > { %v706_v39 = vrot.slane %v705_v28, 4  ;;  %v732_v41 = vshll.u32 %v13349_v22, 16  ;;  %v724_v45 = vrot.slane %v722_v38, 5  ;;  %v11227_v48 = vcombine.low %v528_v7, %v13343_v16 }
  0x41   : > { %12381 = vmatprep.mubr.msk.bf16.mxu0 %vm1002_vm5, %v11193_v34  ;;  %v701_v43 = vsel %vm13278_vm6, %v696_v35, %v700_v13  ;;  %v737_v50 = vshrl.u32 %v530_v25, 16  ;;  %v719_v54 = vor.u32 %v718_v40, %v715_v36  ;;  %v728_v55 = vrot.slane %v726_v46, 4 }
  0x42   : > { %v711_v53 = vsel %vm13278_vm6, %v706_v39, %v710_v29  ;;  %v734_v33 = vrot.slane %v732_v41, 5  ;;  %12419 = vmatprep.mubr.msk.bf16.mxu1 %vm1002_vm5, %v11227_v48  ;;  %v740_v61 = vshll.u32 %v530_v25, 16  ;;  %v746_v62 = vshll.u32 %v13353_v31, 16  ;;  %v202_v48 = vld [vmem:[%s13180_s25 + $0xf0] sm:$0xff] }
  0x43   : > { %v11194_v57 = vcombine.low %v701_v43, %v711_v53  ;;  %v739_v60 = vrot.slane %v737_v50, 4  ;;  %v720_v0 = vrot.slane %v719_v54, 4  ;;  %v729_v1 = vor.u32 %v728_v55, %v724_v45  ;;  %v13394_v54 = vld [vmem:[#allocation2 + $0x74] sm:$0x1] }
  0x44   : > { %v750_v3 = vshrl.u32 %v13353_v31, 16  ;;  %v756_v7 = vshll.u32 %v13363_v49, 16  ;;  %v742_v8 = vrot.slane %v740_v61, 5  ;;  %v748_v9 = vrot.slane %v746_v62, 5 }
  0x45   : > { %12382 = vmatmul.mubr.msk.bf16.gmra.mxu0 %vm1002_vm5, %v11194_v57  ;;  %v11228_v10 = vcombine.low %v530_v25, %v13353_v31  ;;  %v761_v12 = vshrl.u32 %v532_v51, 16  ;;  %v725_v13 = vsel %vm13278_vm6, %v720_v0, %v724_v45  ;;  %v730_v59 = vrot.slane %v729_v1, 4  ;;  %v13383_v25 = vld [vmem:[#allocation2 + $0x70] sm:$0xf]  ;;  %v203_v57 = vld [vmem:[%s13180_s25 + $0xf8] sm:$0xff]  ;;  %v205_v0 = vld [vmem:[%s13180_s25 + $0x108] sm:$0xff] }
  0x46   : > { %v752_v14 = vrot.slane %v750_v3, 4  ;;  %v758_v19 = vrot.slane %v756_v7, 5  ;;  %v743_v21 = vor.u32 %v742_v8, %v739_v60  ;;  %v764_v26 = vshll.u32 %v532_v51, 16 }
  0x47   : > { %12420 = vmatmul.mubr.msk.bf16.gmra.mxu1 %vm1002_vm5, %v11228_v10  ;;  %v763_v24 = vrot.slane %v761_v12, 4  ;;  %v770_v28 = vshll.u32 %v13367_v56, 16  ;;  %v735_v29 = vsel %vm13278_vm6, %v730_v59, %v734_v33  ;;  %v774_v34 = vshrl.u32 %v13367_v56, 16  ;;  %v208_v10 = vld [vmem:[%s13180_s25 + $0x120] sm:$0xff] }
  0x48   : > { %v753_v30 = vor.u32 %v752_v14, %v748_v9  ;;  %v780_v35 = vshll.u32 %v13375_v11, 16  ;;  %v11195_v36 = vcombine.low %v725_v13, %v735_v29  ;;  %v744_v38 = vrot.slane %v743_v21, 4  ;;  %v209_v21 = vld [vmem:[%s13180_s25 + $0x128] sm:$0xff] }
  0x49   : > { %v766_v39 = vrot.slane %v764_v26, 5  ;;  %v772_v40 = vrot.slane %v770_v28, 5  ;;  %v776_v41 = vrot.slane %v774_v34, 4  ;;  %v11229_v45 = vcombine.low %v532_v51, %v13367_v56 }
  0x4a   : > { %v754_v46 = vrot.slane %v753_v30, 4  ;;  %v782_v43 = vrot.slane %v780_v35, 5  ;;  %12385 = vmatprep.mubr.msk.bf16.mxu0 %vm1002_vm5, %v11195_v36  ;;  %v749_v50 = vsel %vm13278_vm6, %v744_v38, %v748_v9  ;;  %v785_v55 = vshrl.u32 %v13379_v20, 16  ;;  %v206_v9 = vld [vmem:[%s13180_s25 + $0x110] sm:$0xff]  ;;  %v207_v30 = vld [vmem:[%s13180_s25 + $0x118] sm:$0x3] }
  0x4b   : > { %v767_v53 = vor.u32 %v766_v39, %v763_v24  ;;  %v788_v33 = vshll.u32 %v13379_v20, 16  ;;  %v777_v60 = vor.u32 %v776_v41, %v772_v40  ;;  %12423 = vmatprep.mubr.msk.bf16.mxu1 %vm1002_vm5, %v11229_v45  ;;  %v794_v61 = vshll.u32 %v13383_v25, 16  ;;  %v210_v39 = vld [vmem:[%s13180_s25 + $0x130] sm:$0x3] }
  0x4c   : > { %v759_v51 = vsel %vm13278_vm6, %v754_v46, %v758_v19  ;;  %v798_v62 = vshrl.u32 %v13383_v25, 16  ;;  %v787_v7 = vrot.slane %v785_v55, 4  ;;  %v804_v14 = vshll.u32 %v13394_v54, 16  ;;  %v204_v19 = vld [vmem:[%s13180_s25 + $0x100] sm:$0x3]  ;;  %v211_v46 = vld [vmem:[%s13180_s25 + $0x138] sm:$0xff] }
  0x4d   : > { %v11196_v1 = vcombine.low %v749_v50, %v759_v51  ;;  %v768_v3 = vrot.slane %v767_v53, 4  ;;  %v790_v8 = vrot.slane %v788_v33, 5  ;;  %v778_v12 = vrot.slane %v777_v60, 4  ;;  %v213_v50 = vld [vmem:[%s13180_s25 + $0x148] sm:$0x3]  ;;  %v214_v53 = vld [vmem:[%s13180_s25 + $0x150] sm:$0xff] }
  0x4e   : > { %v796_v13 = vrot.slane %v794_v61, 5  ;;  %v800_v59 = vrot.slane %v798_v62, 4  ;;  %v11230_v28 = vcombine.low %v13379_v20, %v13383_v25  ;;  %v12009_v29 = vpack.c.bf16 %v202_v48, %v202_v48  ;;  %v212_v48 = vld [vmem:[%s13180_s25 + $0x140] sm:$0xff]  ;;  %v215_v60 = vld [vmem:[%s13180_s25 + $0x158] sm:$0xff]  ;;  %v217_v62 = vld [vmem:[%s13180_s25 + $0x168] sm:$0xff] }
  0x4f   : > { %12386 = vmatmul.mubr.msk.bf16.gmra.mxu0 %vm1002_vm5, %v11196_v1  ;;  %v773_v24 = vsel %vm13278_vm6, %v768_v3, %v772_v40  ;;  %v791_v26 = vor.u32 %v790_v8, %v787_v7  ;;  %v783_v34 = vsel %vm13278_vm6, %v778_v12, %v782_v43  ;;  %v806_v36 = vrot.slane %v804_v14, 5  ;;  %v13423_v40 = vld [vmem:[%s18681_s1 + $0xa] sm:$0x3]  ;;  %v216_v61 = vld [vmem:[%s13180_s25 + $0x160] sm:$0x3]  ;;  %v218_v8 = vld [vmem:[%s13180_s25 + $0x170] sm:$0xff] }
  0x50   : > { %v801_v35 = vor.u32 %v800_v59, %v796_v13  ;;  %v12010_v38 = vpack.c.bf16 %v203_v57, %v203_v57  ;;  %v11197_v20 = vcombine.low %v773_v24, %v783_v34  ;;  %12424 = vmatmul.mubr.msk.bf16.gmra.mxu1 %vm1002_vm5, %v11230_v28  ;;  %v12011_v45 = vpack.c.bf16 %v204_v19, %v204_v19  ;;  %v219_v12 = vld [vmem:[%s13180_s25 + $0x178] sm:$0x3]  ;;  %v1509_v19 = vld [vmem:[#allocation2 + $0xc] sm:$0xe]  ;;  %v13459_v34 = vld [vmem:[#allocation2 + $0x24] sm:$0xe] }
  0x51   : > { %v792_v41 = vrot.slane %v791_v26, 4  ;;  %492 = vst.msk [vmem:[#allocation2 + $0x78] sm:$0xf] %vm460_vm1, %v12009_v29  ;;  %v12012_v43 = vpack.c.bf16 %v205_v0, %v205_v0  ;;  %12988 = vmatprep.subr.msk.bf16.mxu1 %vm1051_vm0, %v13423_v40  ;;  %v12013_v33 = vpack.c.bf16 %v206_v9, %v206_v9  ;;  %v12014_v57 = vpack.c.bf16 %v207_v30, %v207_v30  ;;  %v1508_v9 = vld [vmem:[#allocation2] sm:$0xe] }
  0x52   : > { %v802_v55 = vrot.slane %v801_v35, 4  ;;  %493 = vst.msk [vmem:[#allocation2 + $0x7c] sm:$0xf] %vm460_vm1, %v12010_v38  ;;  %v12015_v51 = vpack.c.bf16 %v208_v10, %v208_v10  ;;  %12389 = vmatprep.mubr.msk.bf16.mxu0 %vm1002_vm5, %v11197_v20  ;;  %v12016_v1 = vpack.c.bf16 %v209_v21, %v209_v21  ;;  %v12017_v3 = vpack.c.bf16 %v210_v39, %v210_v39  ;;  %v13448_v24 = vld [vmem:[#allocation2 + $0x18] sm:$0xe] }
  0x53   : > { %v797_v0 = vsel %vm13278_vm6, %v792_v41, %v796_v13  ;;  %494 = vst.msk [vmem:[#allocation2 + $0x80] sm:$0x1] %vm463_vm2, %v12011_v45  ;;  %v12018_v7 = vpack.c.bf16 %v211_v46, %v211_v46  ;;  %497 = vst.msk [vmem:[#allocation2 + $0x8c] sm:$0x1] %vm463_vm2, %v12014_v57  ;;  %v12019_v13 = vpack.c.bf16 %v212_v48, %v212_v48  ;;  %v18712_v30 = vmov 0 }
  0x54   : > { %495 = vst.msk [vmem:[#allocation2 + $0x84] sm:$0xf] %vm460_vm1, %v12012_v43  ;;  %v807_v10 = vsel %vm13278_vm6, %v802_v55, %v806_v36  ;;  %496 = vst.msk [vmem:[#allocation2 + $0x88] sm:$0xf] %vm460_vm1, %v12013_v33  ;;  %v12020_v59 = vpack.c.bf16 %v213_v50, %v213_v50  ;;  %v12021_v14 = vpack.c.bf16 %v214_v53, %v214_v53  ;;  %v18713_v30 = vsel %vm13455_vm9, 4294967295, %v18712_v30 }
  0x55   : > { %498 = vst.msk [vmem:[#allocation2 + $0x90] sm:$0xf] %vm460_vm1, %v12015_v51  ;;  %v11198_v21 = vcombine.low %v797_v0, %v807_v10  ;;  %499 = vst.msk [vmem:[#allocation2 + $0x94] sm:$0xf] %vm460_vm1, %v12016_v1  ;;  %v12022_v26 = vpack.c.bf16 %v215_v60, %v215_v60  ;;  %v12023_v28 = vpack.c.bf16 %v216_v61, %v216_v61  ;;  %v11253_v38 = vrot.slane %v1508_v9, 9 }
  0x56   : > { %500 = vst.msk [vmem:[#allocation2 + $0x98] sm:$0x1] %vm463_vm2, %v12017_v3  ;;  %v12024_v29 = vpack.c.bf16 %v217_v62, %v217_v62  ;;  %18714 = vst [vmem:[#allocation5_spill] sm:$0xff] %v18713_v30  ;;  %v12025_v35 = vpack.c.bf16 %v218_v8, %v218_v8  ;;  %v12026_v36 = vpack.c.bf16 %v219_v12, %v219_v12  ;;  %v1561_v39 = vrot.slane %v13250_v4, 5 }
  0x57   : > { %501 = vst.msk [vmem:[#allocation2 + $0x9c] sm:$0xf] %vm460_vm1, %v12018_v7  ;;  %502 = vst.msk [vmem:[#allocation2 + $0xa0] sm:$0xf] %vm460_vm1, %v12019_v13  ;;  %12390 = vmatmul.mubr.msk.bf16.gmra.mxu0 %vm1002_vm5, %v11198_v21  ;;  %v11254_v46 = vrot.slane %v1509_v19, 9  ;;  %v1570_v20 = vrot.slane %v1568_v37, 4 }
  0x58   : > { %503 = vst.msk [vmem:[#allocation2 + $0xa4] sm:$0x1] %vm463_vm2, %v12020_v59  ;;  %506 = vst.msk [vmem:[#allocation2 + $0xb0] sm:$0x1] %vm463_vm2, %v12023_v28  ;;  %v1575_v45 = vrot.slane %v13283_v42, 5  ;;  %v13477_v4 = vsel %vm13455_vm9, %v11253_v38, %v1561_v39  ;;  %v1563_v48 = vrot.slane %v1561_v39, 4 }
  0x59   : > { %504 = vst.msk [vmem:[#allocation2 + $0xa8] sm:$0xf] %vm460_vm1, %v12021_v14  ;;  %505 = vst.msk [vmem:[#allocation2 + $0xac] sm:$0xf] %vm460_vm1, %v12022_v26  ;;  %v536_v43 = vld [vmem:[#allocation2 + $0x78] sm:$0xf]  ;;  %v13487_v51 = vsel %vm13455_vm9, %v11254_v46, %v1568_v37  ;;  %v13493_v60 = vsel %vm13455_vm9, %v1570_v20, %v1571_v44 }
  0x5a   : > { %507 = vst.msk [vmem:[#allocation2 + $0xb4] sm:$0xf] %vm460_vm1, %v12024_v29  ;;  %508 = vst.msk [vmem:[#allocation2 + $0xb8] sm:$0xf] %vm460_vm1, %v12025_v35  ;;  %v13481_v55 = vld [vmem:[#allocation2 + $0x7c] sm:$0xf]  ;;  %v13504_v17 = vsel %vm13455_vm9, %v1563_v48, %v1564_v15 }
  0x5b   : > { %509 = vst.msk [vmem:[#allocation2 + $0xbc] sm:$0x1] %vm463_vm2, %v12026_v36  ;;  %v809_v33 = vshrl.u32 %v536_v43, 16  ;;  %v812_v57 = vshll.u32 %v536_v43, 16  ;;  %v13495_v61 = vld [vmem:[#allocation2 + $0x80] sm:$0x1]  ;;  %v11231_v1 = vcombine.low %v536_v43, %v13481_v55 }
  0x5c   : > { %v818_v62 = vshll.u32 %v13481_v55, 16  ;;  %v822_v0 = vshrl.u32 %v13481_v55, 16  ;;  %v538_v3 = vld [vmem:[#allocation2 + $0x84] sm:$0xf]  ;;  %v828_v44 = vshll.u32 %v13495_v61, 16 }
  0x5d   : > { %v811_v18 = vrot.slane %v809_v33, 4  ;;  %v814_v37 = vrot.slane %v812_v57, 5  ;;  %v13507_v7 = vld [vmem:[#allocation2 + $0x88] sm:$0xf]  ;;  %v833_v8 = vshrl.u32 %v538_v3, 16  ;;  %12427 = vmatprep.mubr.msk.bf16.mxu1 %vm1002_vm5, %v11231_v1  ;;  %v836_v13 = vshll.u32 %v538_v3, 16 }
  0x5e   : > { %v820_v12 = vrot.slane %v818_v62, 5  ;;  %v824_v9 = vrot.slane %v822_v0, 4  ;;  %v13510_v10 = vld [vmem:[#allocation2 + $0x8c] sm:$0x1]  ;;  %v842_v5 = vshll.u32 %v13507_v7, 16  ;;  %v830_v14 = vrot.slane %v828_v44, 5 }
  0x5f   : > { %v815_v59 = vor.u32 %v814_v37, %v811_v18  ;;  %v835_v15 = vrot.slane %v833_v8, 4  ;;  %v846_v19 = vshrl.u32 %v13507_v7, 16  ;;  %v540_v21 = vld [vmem:[#allocation2 + $0x90] sm:$0xf]  ;;  %v838_v28 = vrot.slane %v836_v13, 5 }
  0x60   : > { %v825_v26 = vor.u32 %v824_v9, %v820_v12  ;;  %v844_v29 = vrot.slane %v842_v5, 5  ;;  %v852_v35 = vshll.u32 %v13510_v10, 16  ;;  %v13515_v36 = vld [vmem:[#allocation2 + $0x94] sm:$0xf]  ;;  %v11232_v46 = vcombine.low %v538_v3, %v13507_v7  ;;  %v13518_v57 = vld [vmem:[#allocation2 + $0x98] sm:$0x1] }
  0x61   : > { %v816_v38 = vrot.slane %v815_v59, 4  ;;  %v848_v39 = vrot.slane %v846_v19, 4  ;;  %v857_v20 = vshrl.u32 %v540_v21, 16  ;;  %v839_v48 = vor.u32 %v838_v28, %v835_v15  ;;  %v542_v13 = vld [vmem:[#allocation2 + $0x9c] sm:$0xf] }
  0x62   : > { %v826_v43 = vrot.slane %v825_v26, 4  ;;  %v854_v33 = vrot.slane %v852_v35, 5  ;;  %v860_v62 = vshll.u32 %v540_v21, 16  ;;  %12428 = vmatmul.mubr.msk.bf16.gmra.mxu1 %vm1002_vm5, %v11232_v46  ;;  %v866_v37 = vshll.u32 %v13515_v36, 16  ;;  %v13558_v53 = vld [vmem:[#allocation2 + $0xbc] sm:$0x1] }
  0x63   : > { %v821_v0 = vsel %vm13278_vm6, %v816_v38, %v820_v12  ;;  %v849_v1 = vor.u32 %v848_v39, %v844_v29  ;;  %v859_v18 = vrot.slane %v857_v20, 4  ;;  %v840_v3 = vrot.slane %v839_v48, 4  ;;  %v13528_v12 = vld [vmem:[#allocation2 + $0xa0] sm:$0xf]  ;;  %v544_v48 = vld [vmem:[#allocation2 + $0xa8] sm:$0xf] }
  0x64   : > { %v831_v44 = vsel %vm13278_vm6, %v826_v43, %v830_v14  ;;  %v862_v8 = vrot.slane %v860_v62, 5  ;;  %v870_v9 = vshrl.u32 %v13515_v36, 16  ;;  %v868_v15 = vrot.slane %v866_v37, 5  ;;  %v13533_v14 = vld [vmem:[#allocation2 + $0xa4] sm:$0x1] }
  0x65   : > { %v11199_v5 = vcombine.low %v821_v0, %v831_v44  ;;  %v850_v59 = vrot.slane %v849_v1, 4  ;;  %v876_v19 = vshll.u32 %v13518_v57, 16  ;;  %v845_v26 = vsel %vm13278_vm6, %v840_v3, %v844_v29 }
  0x66   : > { %v863_v28 = vor.u32 %v862_v8, %v859_v18  ;;  %v872_v35 = vrot.slane %v870_v9, 4  ;;  %v11233_v38 = vcombine.low %v540_v21, %v13515_v36  ;;  %v881_v20 = vshrl.u32 %v542_v13, 16  ;;  %v13540_v18 = vld [vmem:[#allocation2 + $0xac] sm:$0xf] }
  0x67   : > { %12393 = vmatprep.mubr.msk.bf16.mxu0 %vm1002_vm5, %v11199_v5  ;;  %v855_v39 = vsel %vm13278_vm6, %v850_v59, %v854_v33  ;;  %v878_v46 = vrot.slane %v876_v19, 5  ;;  %v884_v43 = vshll.u32 %v542_v13, 16  ;;  %v890_v29 = vshll.u32 %v13528_v12, 16  ;;  %v13544_v33 = vld [vmem:[#allocation2 + $0xb0] sm:$0x1] }
  0x68   : > { %v11200_v62 = vcombine.low %v845_v26, %v855_v39  ;;  %v864_v0 = vrot.slane %v863_v28, 4  ;;  %v873_v1 = vor.u32 %v872_v35, %v868_v15  ;;  %12431 = vmatprep.mubr.msk.bf16.mxu1 %vm1002_vm5, %v11233_v38  ;;  %v883_v21 = vrot.slane %v881_v20, 4  ;;  %v546_v19 = vld [vmem:[#allocation2 + $0xb4] sm:$0xf] }
  0x69   : > { %v886_v37 = vrot.slane %v884_v43, 5  ;;  %v894_v44 = vshrl.u32 %v13528_v12, 16  ;;  %v900_v3 = vshll.u32 %v13533_v14, 16  ;;  %v892_v5 = vrot.slane %v890_v29, 5 }
  0x6a   : > { %12394 = vmatmul.mubr.msk.bf16.gmra.mxu0 %vm1002_vm5, %v11200_v62  ;;  %v869_v8 = vsel %vm13278_vm6, %v864_v0, %v868_v15  ;;  %v874_v9 = vrot.slane %v873_v1, 4  ;;  %v11234_v59 = vcombine.low %v542_v13, %v13528_v12  ;;  %v905_v38 = vshrl.u32 %v544_v48, 16  ;;  %v13555_v13 = vld [vmem:[#allocation2 + $0xb8] sm:$0xf] }
  0x6b   : > { %v887_v26 = vor.u32 %v886_v37, %v883_v21  ;;  %v896_v28 = vrot.slane %v894_v44, 4  ;;  %v902_v35 = vrot.slane %v900_v3, 5  ;;  %v908_v20 = vshll.u32 %v544_v48, 16 }
  0x6c   : > { %v879_v39 = vsel %vm13278_vm6, %v874_v9, %v878_v46  ;;  %12432 = vmatmul.mubr.msk.bf16.gmra.mxu1 %vm1002_vm5, %v11234_v59  ;;  %v914_v43 = vshll.u32 %v13540_v18, 16  ;;  %v918_v62 = vshrl.u32 %v13540_v18, 16  ;;  %v907_v29 = vrot.slane %v905_v38, 4 }
  0x6d   : > { %v11201_v15 = vcombine.low %v869_v8, %v879_v39  ;;  %v888_v0 = vrot.slane %v887_v26, 4  ;;  %v897_v1 = vor.u32 %v896_v28, %v892_v5  ;;  %v910_v21 = vrot.slane %v908_v20, 5 }
  0x6e   : > { %v916_v37 = vrot.slane %v914_v43, 5  ;;  %v920_v44 = vrot.slane %v918_v62, 4  ;;  %v924_v3 = vshll.u32 %v13544_v33, 16  ;;  %v11235_v8 = vcombine.low %v544_v48, %v13540_v18  ;;  %v13026_v48 = vld [vmem:[#allocation2 + $0xc] sm:$0xff]  }
  0x6f   : > { %12397 = vmatprep.mubr.msk.bf16.mxu0 %vm1002_vm5, %v11201_v15  ;;  %v893_v46 = vsel %vm13278_vm6, %v888_v0, %v892_v5  ;;  %v898_v9 = vrot.slane %v897_v1, 4  ;;  %v929_v59 = vshrl.u32 %v546_v19, 16  ;;  %v911_v26 = vor.u32 %v910_v21, %v907_v29 }
  0x70   : > { %v921_v28 = vor.u32 %v920_v44, %v916_v37  ;;  %v926_v38 = vrot.slane %v924_v3, 5  ;;  %v932_v39 = vshll.u32 %v546_v19, 16  ;;  %12435 = vmatprep.mubr.msk.bf16.mxu1 %vm1002_vm5, %v11235_v8  ;;  %v938_v62 = vshll.u32 %v13555_v13, 16  ;;  %v1512_v8 = vld [vmem:[#allocation2 + $0x30] sm:$0xe] }
  0x71   : > { %v903_v20 = vsel %vm13278_vm6, %v898_v9, %v902_v35  ;;  %v931_v43 = vrot.slane %v929_v59, 4  ;;  %v942_v15 = vshrl.u32 %v13555_v13, 16  ;;  %v912_v5 = vrot.slane %v911_v26, 4 }
  0x72   : > { %v11202_v50 = vcombine.low %v893_v46, %v903_v20  ;;  %v922_v0 = vrot.slane %v921_v28, 4  ;;  %v934_v1 = vrot.slane %v932_v39, 5  ;;  %v940_v41 = vrot.slane %v938_v62, 5 }
  0x73   : > { %v944_v29 = vrot.slane %v942_v15, 4  ;;  %v948_v21 = vshll.u32 %v13558_v53, 16  ;;  %v11236_v44 = vcombine.low %v546_v19, %v13555_v13  ;;  %v917_v35 = vsel %vm13278_vm6, %v912_v5, %v916_v37  ;;  %v1513_v15 = vld [vmem:[#allocation2 + $0x3c] sm:$0xe] }
  0x74   : > { %12398 = vmatmul.mubr.msk.bf16.gmra.mxu0 %vm1002_vm5, %v11202_v50  ;;  %v927_v3 = vsel %vm13278_vm6, %v922_v0, %v926_v38  ;;  %v935_v9 = vor.u32 %v934_v1, %v931_v43  ;;  %v11270_v46 = vcombine.low %v13477_v4, %v13504_v17  ;;  %v11271_v19 = vcombine.low %v13487_v51, %v13493_v60  ;;  %v1514_v0 = vld [vmem:[#allocation2 + $0x48] sm:$0xe]  ;;  %v13027_v1 = vld [vmem:[#allocation2 + $0x18] sm:$0xff]  }
  0x75   : > { %v11203_v59 = vcombine.low %v917_v35, %v927_v3  ;;  %v945_v26 = vor.u32 %v944_v29, %v940_v41  ;;  %v950_v28 = vrot.slane %v948_v21, 5  ;;  %12436 = vmatmul.mubr.msk.bf16.gmra.mxu1 %vm1002_vm5, %v11236_v44  ;;  %v18715_v37 = vrot.slane %v13448_v24, 9  ;;  %v1515_v29 = vld [vmem:[#allocation2 + $0x54] sm:$0xe]  ;;  %v13028_v44 = vld [vmem:[#allocation2 + $0x24] sm:$0xff]  }
  0x76   : > { %v936_v50 = vrot.slane %v935_v9, 4  ;;  %12475 = vmatprep.mubr.msk.bf16.mxu1 %vm1002_vm5, %v13026_v48  ;;  %v1577_v4 = vrot.slane %v1575_v45, 4  ;;  %v1582_v17 = vrot.slane %v13297_v63, 5  ;;  %v1585_v20 = vrot.slane %v13304_v6, 5 }
  0x77   : > { %v13588_v38 = vsel %vm13455_vm9, %v18715_v37, %v1575_v45  ;;  %12401 = vmatprep.mubr.msk.bf16.mxu0 %vm1002_vm5, %v11203_v59  ;;  %v946_v39 = vrot.slane %v945_v26, 4  ;;  %v11257_v43 = vrot.slane %v1512_v8, 9  ;;  %v1589_v62 = vrot.slane %v13312_v23, 5 }
  0x78   : > { %v941_v24 = vsel %vm13278_vm6, %v936_v50, %v940_v41  ;;  %v18716_v5 = vrot.slane %v13287_v47, 5  ;;  %v18717_v63 = vrot.slane %v13459_v34, 9  ;;  %v1584_v6 = vrot.slane %v1582_v17, 4 }
  0x79   : > { %v951_v23 = vsel %vm13278_vm6, %v946_v39, %v950_v28  ;;  %v13616_v47 = vsel %vm13455_vm9, %v11257_v43, %v1589_v62  ;;  %v1591_v48 = vrot.slane %v1589_v62, 4  ;;  %v1592_v35 = vrot.slane %v13316_v27, 5  ;;  %v1516_v28 = vld [vmem:[#allocation2 + $0x60] sm:$0xe] }
  0x7a   : > { %v13602_v42 = vsel %vm13455_vm9, %v1577_v4, %v18716_v5  ;;  %v13608_v45 = vsel %vm13455_vm9, %v18717_v63, %v1582_v17  ;;  %v11204_v34 = vcombine.low %v941_v24, %v951_v23  ;;  %v13620_v21 = vsel %vm13455_vm9, %v1584_v6, %v1585_v20  ;;  %v1517_v20 = vld [vmem:[#allocation2 + $0x6c] sm:$0xe]  ;;  %v1518_v5 = vld [vmem:[#allocation2 + $0x78] sm:$0xe]  ;;  %v1519_v23 = vld [vmem:[#allocation2 + $0x84] sm:$0xe] }
  0x7b   : > { %v11272_v41 = vcombine.low %v13588_v38, %v13602_v42  ;;  %v11258_v3 = vrot.slane %v1513_v15, 9  ;;  %v11273_v9 = vcombine.low %v13608_v45, %v13620_v21  ;;  %v1596_v8 = vrot.slane %v13329_v52, 5 }
  0x7c   : > { %v1599_v59 = vrot.slane %v13335_v58, 5  ;;  %v11259_v26 = vrot.slane %v1514_v0, 9  ;;  %12402 = vmatmul.mubr.msk.bf16.gmra.mxu0 %vm1002_vm5, %v11204_v34  ;;  %v13630_v50 = vsel %vm13455_vm9, %v1591_v48, %v1592_v35  ;;  %v1603_v37 = vrot.slane %v13343_v16, 5  ;;  %v13029_v34 = vld [vmem:[#allocation2 + $0x30] sm:$0xff]  }
  0x7d   : > { %v1606_v27 = vrot.slane %v13349_v22, 5  ;;  %v11260_v4 = vrot.slane %v1515_v29, 9  ;;  %12441 = vmatprep.mubr.msk.bf16.mxu0 %vm1002_vm5, %v11270_v46  ;;  %12476 = vmatmul.mubr.msk.bf16.vlgmr.msra.gmra.mxu1 %vm1002_vm5, %v13027_v1  ;;  %v11274_v52 = vcombine.low %v13616_v47, %v13630_v50  ;;  %v13640_v58 = vsel %vm13455_vm9, %v11258_v3, %v1596_v8 }
  0x7e   : > { %v1598_v17 = vrot.slane %v1596_v8, 4  ;;  %v1610_v39 = vrot.slane %v13353_v31, 5  ;;  %12479 = vmatprep.mubr.msk.bf16.mxu1 %vm1002_vm5, %v13028_v44  ;;  %v13646_v16 = vsel %vm13455_vm9, %v11259_v26, %v1603_v37  ;;  %v1605_v22 = vrot.slane %v1603_v37, 4  ;;  %v1520_v8 = vld [vmem:[#allocation2 + $0x90] sm:$0xe] }
  0x7f   : > { %v1613_v46 = vrot.slane %v13363_v49, 5  ;;  %v11261_v43 = vrot.slane %v1516_v28, 9  ;;  %v1617_v24 = vrot.slane %v13367_v56, 5  ;;  %v1620_v49 = vrot.slane %v13375_v11, 5 }
  0x80   : > { %v13651_v62 = vsel %vm13455_vm9, %v1598_v17, %v1599_v59  ;;  %v13655_v15 = vsel %vm13455_vm9, %v11260_v4, %v1610_v39  ;;  %v1612_v31 = vrot.slane %v1610_v39, 4  ;;  %v13662_v6 = vsel %vm13455_vm9, %v1605_v22, %v1606_v27  ;;  %v13030_v59 = vld [vmem:[#allocation2 + $0x3c] sm:$0xff]   ;;  %v13688_v4 = vld [vmem:[%s18681_s1 + $0xc] sm:$0x3] }
  0x81   : > { %v11275_v63 = vcombine.low %v13640_v58, %v13651_v62  ;;  %v11262_v0 = vrot.slane %v1517_v20, 9  ;;  %v11276_v1 = vcombine.low %v13646_v16, %v13662_v6  ;;  %v13673_v56 = vsel %vm13455_vm9, %v11261_v43, %v1617_v24  ;;  %v1521_v17 = vld [vmem:[#allocation2 + $0x9c] sm:$0xe]  ;;  %v1523_v43 = vld [vmem:[#allocation2 + $0xb4] sm:$0xe] }
  0x82   : > { %v13669_v48 = vsel %vm13455_vm9, %v1612_v31, %v1613_v46  ;;  %v1619_v29 = vrot.slane %v1617_v24, 4  ;;  %v1624_v11 = vrot.slane %v13383_v25, 5  ;;  %v1627_v35 = vrot.slane %v13394_v54, 5 }
  0x83   : > { %v11277_v44 = vcombine.low %v13655_v15, %v13669_v48  ;;  %v11263_v3 = vrot.slane %v1518_v5, 9  ;;  %v1631_v28 = vrot.slane %v13481_v55, 5  ;;  %v1634_v37 = vrot.slane %v13495_v61, 5 }
  0x84   : > { %v13681_v26 = vsel %vm13455_vm9, %v1619_v29, %v1620_v49  ;;  %v11264_v27 = vrot.slane %v1519_v23, 9  ;;  %12442 = vmatmul.mubr.msk.bf16.vlgmr.msra.gmra.mxu0 %vm1002_vm5, %v11271_v19  ;;  %v13698_v54 = vsel %vm13455_vm9, %v11262_v0, %v1624_v11  ;;  %v1626_v55 = vrot.slane %v1624_v11, 4  ;;  %v220_v29 = vld [vmem:[%s13180_s25 + $0x180] sm:$0xff] }
  0x85   : > { %v11278_v25 = vcombine.low %v13673_v56, %v13681_v26  ;;  %v1638_v61 = vrot.slane %v13507_v7, 5  ;;  %12508 = vmatpush3.bf16.msra.mxu0 %v13248_v2  ;;  %12445 = vmatprep.mubr.msk.bf16.mxu0 %vm1002_vm5, %v11272_v41  ;;  %v13708_v51 = vsel %vm13455_vm9, %v11263_v3, %v1631_v28  ;;  %v1633_v60 = vrot.slane %v1631_v28, 4  ;;  %v1522_v41 = vld [vmem:[#allocation2 + $0xa8] sm:$0xe]  ;;  %v13032_v28 = vld [vmem:[#allocation2 + $0x54] sm:$0xff]  }
  0x86   : > { %v1641_v19 = vrot.slane %v13510_v10, 5  ;;  %v11265_v39 = vrot.slane %v1520_v8, 9  ;;  %12480 = vmatmul.mubr.msk.bf16.gmra.mxu1 %vm1002_vm5, %v13029_v34  ;;  %v13714_v7 = vsel %vm13455_vm9, %v1626_v55, %v1627_v35  ;;  %v1645_v42 = vrot.slane %v13515_v36, 5  ;;  %12989 = vmatprep.subr.msk.bf16.mxu0 %vm1051_vm0, %v13688_v4  ;;  %v13031_v34 = vld [vmem:[#allocation2 + $0x48] sm:$0xff]  }
  0x87   : > { %v13718_v2 = vsel %vm13455_vm9, %v11264_v27, %v1638_v61  ;;  %v1640_v38 = vrot.slane %v1638_v61, 4  ;;  %12483 = vmatprep.mubr.msk.bf16.mxu1 %vm1002_vm5, %v13030_v59  ;;  %v11279_v10 = vcombine.low %v13698_v54, %v13714_v7  ;;  %v13728_v20 = vsel %vm13455_vm9, %v1633_v60, %v1634_v37  ;;  %v221_v59 = vld [vmem:[%s13180_s25 + $0x188] sm:$0xff]  ;;  %v13769_v60 = vld [vmem:[#allocation2 + $0x10] sm:$0xf] }
  0x88   : > { %v1648_v22 = vrot.slane %v13518_v57, 5  ;;  %v11266_v46 = vrot.slane %v1521_v17, 9  ;;  %v11280_v36 = vcombine.low %v13708_v51, %v13728_v20  ;;  %v13739_v24 = vsel %vm13455_vm9, %v11265_v39, %v1645_v42  ;;  %v2324_v55 = vld [vmem:[#allocation2 + $0xc] sm:$0xf]  ;;  %v2327_v39 = vld [vmem:[#allocation2 + $0x18] sm:$0xf] }
  0x89   : > { %v13735_v31 = vsel %vm13455_vm9, %v1640_v38, %v1641_v19  ;;  %v1647_v5 = vrot.slane %v1645_v42, 4  ;;  %v1652_v57 = vrot.slane %v13528_v12, 5  ;;  %v1655_v0 = vrot.slane %v13533_v14, 5  ;;  %v13783_v19 = vld [vmem:[#allocation2 + $0x14] sm:$0x1] }
  0x8a   : > { %v11281_v49 = vcombine.low %v13718_v2, %v13735_v31  ;;  %v11267_v23 = vrot.slane %v1522_v41, 9  ;;  %v1659_v35 = vrot.slane %v13540_v18, 5  ;;  %v1662_v3 = vrot.slane %v13544_v33, 5  ;;  %v13795_v38 = vld [vmem:[#allocation2 + $0x1c] sm:$0xf] }
  0x8b   : > { %v13748_v11 = vsel %vm13455_vm9, %v1647_v5, %v1648_v22  ;;  %v11268_v8 = vrot.slane %v1523_v43, 9  ;;  %v13757_v12 = vsel %vm13455_vm9, %v11266_v46, %v1652_v57  ;;  %v1654_v14 = vrot.slane %v1652_v57, 4  ;;  %v11450_v43 = vld [vmem:[%s18681_s1 + $0xe] sm:$0x3] }
  0x8c   : > { %v11282_v37 = vcombine.low %v13739_v24, %v13748_v11  ;;  %v1666_v27 = vrot.slane %v13555_v13, 5  ;;  %12446 = vmatmul.mubr.msk.bf16.gmra.mxu0 %vm1002_vm5, %v11273_v9  ;;  %v13766_v18 = vsel %vm13455_vm9, %v11267_v23, %v1659_v35  ;;  %v1661_v33 = vrot.slane %v1659_v35, 4 }
  0x8d   : > { %v1669_v61 = vrot.slane %v13558_v53, 5  ;;  %v12027_v17 = vpack.c.bf16 %v220_v29, %v220_v29  ;;  %12449 = vmatprep.mubr.msk.bf16.mxu0 %vm1002_vm5, %v11274_v52  ;;  %v13777_v13 = vsel %vm13455_vm9, %v1654_v14, %v1655_v0  ;;  %v12028_v9 = vpack.c.bf16 %v221_v59, %v221_v59  ;;  %v3050_v29 = vld [vmem:[#allocation2 + $0xc] sm:$0xe]  ;;  %v13033_v59 = vld [vmem:[#allocation2 + $0x60] sm:$0xff]  }
  0x8e   : > { %v13781_v45 = vsel %vm13455_vm9, %v11268_v8, %v1666_v27  ;;  %v1668_v21 = vrot.slane %v1666_v27, 4  ;;  %12484 = vmatmul.mubr.msk.bf16.gmra.mxu1 %vm1002_vm5, %v13031_v34  ;;  %v11283_v53 = vcombine.low %v13757_v12, %v13777_v13  ;;  %v13790_v47 = vsel %vm13455_vm9, %v1661_v33, %v1662_v3  ;;  %v13034_v33 = vld [vmem:[#allocation2 + $0x6c] sm:$0xff]  }
  0x8f   : > { %510 = vst.msk [vmem:[#allocation2 + $0xc0] sm:$0xf] %vm460_vm1, %v12027_v17  ;;  %v3325_v50 = vsel %vm1051_vm0, %v13423_v40, 0  ;;  %v2373_v52 = vshrl.u32 %v2324_v55, 16  ;;  %12487 = vmatprep.mubr.msk.bf16.mxu1 %vm1002_vm5, %v13032_v28  ;;  %v11284_v42 = vcombine.low %v13766_v18, %v13790_v47  ;;  %511 = vst.msk [vmem:[#allocation2 + $0xc4] sm:$0xf] %vm460_vm1, %v12028_v9 }
  0x90   : > { %v13802_v41 = vsel %vm13455_vm9, %v1668_v21, %v1669_v61  ;;  %12542 = vmatpush3.bf16.msra.mxu1 %v3325_v50  ;;  %v2376_v22 = vshll.u32 %v2324_v55, 16  ;;  %v2382_v46 = vshll.u32 %v13769_v60, 16  ;;  %v13806_v40 = vld [vmem:[#allocation2 + $0x20] sm:$0x1]  ;;  %v2386_v0 = vshrl.u32 %v13769_v60, 16 }
  0x91   : > { %v11285_v5 = vcombine.low %v13781_v45, %v13802_v41  ;;  %v2375_v57 = vrot.slane %v2373_v52, 4  ;;  %v2392_v23 = vshll.u32 %v13783_v19, 16  ;;  %12990 = vmatprep.subr.msk.bf16.mxu1 %vm1051_vm0, %v11450_v43  ;;  %v2397_v3 = vshrl.u32 %v2327_v39, 16  ;;  %v3051_v55 = vld [vmem:[#allocation2 + $0x18] sm:$0xe] }
  0x92   : > { %v2378_v34 = vrot.slane %v2376_v22, 5  ;;  %v2384_v35 = vrot.slane %v2382_v46, 5  ;;  %v2400_v8 = vshll.u32 %v2327_v39, 16  ;;  %v2388_v28 = vrot.slane %v2386_v0, 4 }
  0x93   : > { %v2406_v14 = vshll.u32 %v13795_v38, 16  ;;  %v2410_v27 = vshrl.u32 %v13795_v38, 16  ;;  %v2399_v17 = vrot.slane %v2397_v3, 4  ;;  %v2416_v9 = vshll.u32 %v13806_v40, 16 }
  0x94   : > { %v2379_v61 = vor.u32 %v2378_v34, %v2375_v57  ;;  %v2402_v21 = vrot.slane %v2400_v8, 5  ;;  %12450 = vmatmul.mubr.msk.bf16.gmra.mxu0 %vm1002_vm5, %v11275_v63  ;;  %v2389_v50 = vor.u32 %v2388_v28, %v2384_v35  ;;  %v2394_v52 = vrot.slane %v2392_v23, 5  ;;  %v2330_v34 = vld [vmem:[#allocation2 + $0x24] sm:$0xf]  ;;  %v13834_v8 = vld [vmem:[#allocation2 + $0x28] sm:$0xf] }
  0x95   : > { %v2408_v39 = vrot.slane %v2406_v14, 5  ;;  %v2412_v22 = vrot.slane %v2410_v27, 4  ;;  %12453 = vmatprep.mubr.msk.bf16.mxu0 %vm1002_vm5, %v11276_v1  ;;  %v2418_v57 = vrot.slane %v2416_v9, 5  ;;  %v11368_v0 = vrot.slane %v3050_v29, 9  ;;  %v13842_v28 = vld [vmem:[#allocation2 + $0x2c] sm:$0x1] }
  0x96   : > { %v2380_v46 = vrot.slane %v2379_v61, 4  ;;  %v2403_v43 = vor.u32 %v2402_v21, %v2399_v17  ;;  %12488 = vmatmul.mubr.msk.bf16.gmra.mxu1 %vm1002_vm5, %v13033_v59  ;;  %v2390_v3 = vrot.slane %v2389_v50, 4  ;;  %v3116_v62 = vrot.slane %v13769_v60, 5  ;;  %v13035_v61 = vld [vmem:[#allocation2 + $0x78] sm:$0xff]  }
  0x97   : > { %v2413_v58 = vor.u32 %v2412_v22, %v2408_v39  ;;  %v3119_v63 = vrot.slane %v13783_v19, 5  ;;  %12491 = vmatprep.mubr.msk.bf16.mxu1 %vm1002_vm5, %v13034_v33  ;;  %v11369_v1 = vrot.slane %v3051_v55, 9  ;;  %v3123_v23 = vrot.slane %v13795_v38, 5  ;;  %v2333_v55 = vld [vmem:[#allocation2 + $0x30] sm:$0xf] }
  0x98   : > { %v2385_v16 = vsel %vm13278_vm6, %v2380_v46, %v2384_v35  ;;  %v2404_v6 = vrot.slane %v2403_v43, 4  ;;  %v2395_v29 = vsel %vm13278_vm6, %v2390_v3, %v2394_v52  ;;  %v13840_v60 = vsel %vm1051_vm0, %v13688_v4, 0  ;;  %v13852_v33 = vld [vmem:[#allocation2 + $0x34] sm:$0xf]  ;;  %v13861_v50 = vld [vmem:[#allocation2 + $0x38] sm:$0x1] }
  0x99   : > { %v2414_v59 = vrot.slane %v2413_v58, 4  ;;  %v3118_v19 = vrot.slane %v3116_v62, 4  ;;  %v13844_v14 = vcombine.low %v2385_v16, %v2395_v29  ;;  %v13850_v38 = vsel %vm13455_vm9, %v11368_v0, %v3116_v62  ;;  %v13036_v52 = vld [vmem:[#allocation2 + $0x84] sm:$0xff]   ;;  %v3053_v62 = vld [vmem:[#allocation2 + $0x30] sm:$0xe] }
  0x9a   : > { %v2409_v35 = vsel %vm13278_vm6, %v2404_v6, %v2408_v39  ;;  %v3125_v27 = vrot.slane %v3123_v23, 4  ;;  %v3126_v21 = vrot.slane %v13806_v40, 5  ;;  %v2421_v9 = vshrl.u32 %v2330_v34, 16 }
  0x9b   : > { %v2419_v4 = vsel %vm13278_vm6, %v2414_v59, %v2418_v57  ;;  %v13858_v17 = vsel %vm13455_vm9, %v3118_v19, %v3119_v63  ;;  %v13867_v22 = vsel %vm13455_vm9, %v11369_v1, %v3123_v23  ;;  %v2424_v46 = vshll.u32 %v2330_v34, 16  ;;  %v3052_v57 = vld [vmem:[#allocation2 + $0x24] sm:$0xe] }
  0x9c   : > { %v13863_v39 = vcombine.low %v2409_v35, %v2419_v4  ;;  %v2430_v43 = vshll.u32 %v13834_v8, 16  ;;  %12454 = vmatmul.mubr.msk.bf16.gmra.mxu0 %vm1002_vm5, %v11277_v44  ;;  %v11385_v40 = vcombine.low %v13850_v38, %v13858_v17  ;;  %v2423_v0 = vrot.slane %v2421_v9, 4 }
  0x9d   : > { %v2434_v3 = vshrl.u32 %v13834_v8, 16  ;;  %v2440_v58 = vshll.u32 %v13842_v28, 16  ;;  %12457 = vmatprep.mubr.msk.bf16.mxu0 %vm1002_vm5, %v11278_v25  ;;  %v13884_v34 = vsel %vm13455_vm9, %v3125_v27, %v3126_v21  ;;  %v2426_v15 = vrot.slane %v2424_v46, 5 }
  0x9e   : > { %v2432_v48 = vrot.slane %v2430_v43, 5  ;;  %v2445_v44 = vshrl.u32 %v2333_v55, 16  ;;  %12492 = vmatmul.mubr.msk.bf16.gmra.mxu1 %vm1002_vm5, %v13035_v61  ;;  %v2448_v6 = vshll.u32 %v2333_v55, 16  ;;  %v2454_v1 = vshll.u32 %v13852_v33, 16  ;;  %v13037_v55 = vld [vmem:[#allocation2 + $0x90] sm:$0xff]  }
  0x9f   : > { %v2436_v63 = vrot.slane %v2434_v3, 4  ;;  %v2442_v16 = vrot.slane %v2440_v58, 5  ;;  %12495 = vmatprep.mubr.msk.bf16.mxu1 %vm1002_vm5, %v13036_v52  ;;  %v2427_v56 = vor.u32 %v2426_v15, %v2423_v0  ;;  %v2458_v25 = vshrl.u32 %v13852_v33, 16  ;;  %v2336_v0 = vld [vmem:[#allocation2 + $0x3c] sm:$0xf] }
  0xa0   : > { %v2447_v26 = vrot.slane %v2445_v44, 4  ;;  %v2464_v23 = vshll.u32 %v13861_v50, 16  ;;  %v2450_v59 = vrot.slane %v2448_v6, 5  ;;  %v2456_v19 = vrot.slane %v2454_v1, 5  ;;  %v13038_v3 = vld [vmem:[#allocation2 + $0x9c] sm:$0xff]  }
  0xa1   : > { %v2437_v29 = vor.u32 %v2436_v63, %v2432_v48  ;;  %v11370_v35 = vrot.slane %v3052_v57, 9  ;;  %v2428_v27 = vrot.slane %v2427_v56, 4  ;;  %v2460_v4 = vrot.slane %v2458_v25, 4  ;;  %v13899_v63 = vld [vmem:[#allocation2 + $0x40] sm:$0xf] }
  0xa2   : > { %v2466_v61 = vrot.slane %v2464_v23, 5  ;;  %v3130_v21 = vrot.slane %v13834_v8, 5  ;;  %v2451_v46 = vor.u32 %v2450_v59, %v2447_v26  ;;  %v3133_v52 = vrot.slane %v13842_v28, 5  ;;  %v13901_v8 = vld [vmem:[#allocation2 + $0x44] sm:$0x1] }
  0xa3   : > { %v2438_v9 = vrot.slane %v2437_v29, 4  ;;  %v11371_v43 = vrot.slane %v3053_v62, 9  ;;  %v2433_v58 = vsel %vm13278_vm6, %v2428_v27, %v2432_v48  ;;  %v2461_v15 = vor.u32 %v2460_v4, %v2456_v19  ;;  %v2339_v1 = vld [vmem:[#allocation2 + $0x48] sm:$0xf]  ;;  %v13932_v23 = vld [vmem:[#allocation2 + $0x4c] sm:$0xf] }
  0xa4   : > { %v13897_v57 = vsel %vm13455_vm9, %v11370_v35, %v3130_v21  ;;  %v3132_v44 = vrot.slane %v3130_v21, 4  ;;  %12458 = vmatmul.mubr.msk.bf16.gmra.mxu0 %vm1002_vm5, %v11279_v10  ;;  %v2452_v62 = vrot.slane %v2451_v46, 4  ;;  %v3137_v48 = vrot.slane %v13852_v33, 5  ;;  %v13942_v27 = vld [vmem:[#allocation2 + $0x50] sm:$0x1]  ;;  %v13039_v46 = vld [vmem:[#allocation2 + $0xa8] sm:$0xff]  }
  0xa5   : > { %v2443_v28 = vsel %vm13278_vm6, %v2438_v9, %v2442_v16  ;;  %v3140_v6 = vrot.slane %v13861_v50, 5  ;;  %12461 = vmatprep.mubr.msk.bf16.mxu0 %vm1002_vm5, %v11280_v36  ;;  %v11386_v56 = vcombine.low %v13867_v22, %v13884_v34  ;;  %v2462_v54 = vrot.slane %v2461_v15, 4  ;;  %v3054_v9 = vld [vmem:[#allocation2 + $0x3c] sm:$0xe] }
  0xa6   : > { %v13919_v7 = vsel %vm13455_vm9, %v3132_v44, %v3133_v52  ;;  %v2469_v10 = vshrl.u32 %v2336_v0, 16  ;;  %12496 = vmatmul.mubr.msk.bf16.gmra.mxu1 %vm1002_vm5, %v13037_v55  ;;  %v13922_v33 = vcombine.low %v2433_v58, %v2443_v28  ;;  %v2457_v50 = vsel %vm13278_vm6, %v2452_v62, %v2456_v19  ;;  %v13040_v58 = vld [vmem:[#allocation2 + $0xb4] sm:$0xff]  }
  0xa7   : > { %v11387_v51 = vcombine.low %v13897_v57, %v13919_v7  ;;  %v3139_v20 = vrot.slane %v3137_v48, 4  ;;  %12499 = vmatprep.mubr.msk.bf16.mxu1 %vm1002_vm5, %v13038_v3  ;;  %v2467_v36 = vsel %vm13278_vm6, %v2462_v54, %v2466_v61  ;;  %v2472_v26 = vshll.u32 %v2336_v0, 16  ;;  %v14074_v7 = vld [vmem:[#allocation2 + $0x80] sm:$0x1] }
  0xa8   : > { %v2471_v16 = vrot.slane %v2469_v10, 4  ;;  %v2478_v25 = vshll.u32 %v13899_v63, 16  ;;  %v13934_v29 = vcombine.low %v2457_v50, %v2467_v36  ;;  %v13938_v59 = vsel %vm13455_vm9, %v11371_v43, %v3137_v48  ;;  %v3055_v48 = vld [vmem:[#allocation2 + $0x48] sm:$0xe] }
  0xa9   : > { %v2482_v19 = vshrl.u32 %v13899_v63, 16  ;;  %v2488_v35 = vshll.u32 %v13901_v8, 16  ;;  %v13946_v4 = vsel %vm13455_vm9, %v3139_v20, %v3140_v6  ;;  %v2474_v61 = vrot.slane %v2472_v26, 5 }
  0xaa   : > { %v2480_v21 = vrot.slane %v2478_v25, 5  ;;  %v2493_v55 = vshrl.u32 %v2339_v1, 16  ;;  %v2496_v3 = vshll.u32 %v2339_v1, 16  ;;  %v2502_v43 = vshll.u32 %v13932_v23, 16  ;;  %v2342_v1 = vld [vmem:[#allocation2 + $0x54] sm:$0xf] }
  0xab   : > { %v2484_v52 = vrot.slane %v2482_v19, 4  ;;  %v2490_v0 = vrot.slane %v2488_v35, 5  ;;  %v2475_v15 = vor.u32 %v2474_v61, %v2471_v16  ;;  %v2506_v28 = vshrl.u32 %v13932_v23, 16  ;;  %v2343_v35 = vld [vmem:[#allocation2 + $0x58] sm:$0xf] }
  0xac   : > { %v2495_v44 = vrot.slane %v2493_v55, 4  ;;  %v2512_v62 = vshll.u32 %v13942_v27, 16  ;;  %12462 = vmatmul.mubr.msk.bf16.gmra.mxu0 %vm1002_vm5, %v11281_v49  ;;  %v2498_v54 = vrot.slane %v2496_v3, 5  ;;  %v2504_v10 = vrot.slane %v2502_v43, 5  ;;  %v2345_v43 = vld [vmem:[#allocation2 + $0x60] sm:$0xf] }
  0xad   : > { %v2485_v6 = vor.u32 %v2484_v52, %v2480_v21  ;;  %v11372_v50 = vrot.slane %v3054_v9, 9  ;;  %12465 = vmatprep.mubr.msk.bf16.mxu0 %vm1002_vm5, %v11282_v37  ;;  %v11388_v20 = vcombine.low %v13938_v59, %v13946_v4  ;;  %v2476_v36 = vrot.slane %v2475_v15, 4 }
  0xae   : > { %v2508_v16 = vrot.slane %v2506_v28, 4  ;;  %v3144_v26 = vrot.slane %v13899_v63, 5  ;;  %12500 = vmatmul.mubr.msk.bf16.gmra.mxu1 %vm1002_vm5, %v13039_v46  ;;  %v2499_v31 = vor.u32 %v2498_v54, %v2495_v44  ;;  %v2514_v49 = vrot.slane %v2512_v62, 5  ;;  %v13987_v28 = vld [vmem:[#allocation2 + $0x64] sm:$0xf] }
  0xaf   : > { %v2486_v2 = vrot.slane %v2485_v6, 4  ;;  %v3147_v25 = vrot.slane %v13901_v8, 5  ;;  %12503 = vmatprep.mubr.msk.bf16.mxu1 %vm1002_vm5, %v13040_v58  ;;  %v2481_v24 = vsel %vm13278_vm6, %v2476_v36, %v2480_v21  ;;  %v11373_v55 = vrot.slane %v3055_v48, 9  ;;  %v13974_v8 = vld [vmem:[#allocation2 + $0x5c] sm:$0x1]  ;;  %v13041_v58 = vld [vmem:[#allocation2 + $0xc0] sm:$0xff]  }
  0xb0   : > { %v2509_v11 = vor.u32 %v2508_v16, %v2504_v10  ;;  %v13969_v37 = vsel %vm13455_vm9, %v11372_v50, %v3144_v26  ;;  %v3146_v19 = vrot.slane %v3144_v26, 4  ;;  %v2500_v61 = vrot.slane %v2499_v31, 4  ;;  %v13989_v62 = vld [vmem:[#allocation2 + $0x68] sm:$0x1]  ;;  %v3056_v50 = vld [vmem:[#allocation2 + $0x54] sm:$0xe] }
  0xb1   : > { %v2491_v63 = vsel %vm13278_vm6, %v2486_v2, %v2490_v0  ;;  %v3151_v9 = vrot.slane %v13932_v23, 5  ;;  %v3154_v52 = vrot.slane %v13942_v27, 5  ;;  %v2517_v3 = vshrl.u32 %v2342_v1, 16 }
  0xb2   : > { %v2510_v46 = vrot.slane %v2509_v11, 4  ;;  %v13978_v21 = vsel %vm13455_vm9, %v3146_v19, %v3147_v25  ;;  %v13981_v15 = vcombine.low %v2481_v24, %v2491_v63  ;;  %v2505_v0 = vsel %vm13278_vm6, %v2500_v61, %v2504_v10  ;;  %v3057_v11 = vld [vmem:[#allocation2 + $0x60] sm:$0xe] }
  0xb3   : > { %v11389_v23 = vcombine.low %v13969_v37, %v13978_v21  ;;  %v3153_v44 = vrot.slane %v3151_v9, 4  ;;  %v2519_v27 = vrot.slane %v2517_v3, 4  ;;  %v2520_v6 = vshll.u32 %v2342_v1, 16  ;;  %v14116_v37 = vld [vmem:[#allocation2 + $0x8c] sm:$0x1] }
  0xb4   : > { %v2515_v48 = vsel %vm13278_vm6, %v2510_v46, %v2514_v49  ;;  %v2526_v54 = vshll.u32 %v2343_v35, 16  ;;  %12466 = vmatmul.mubr.msk.bf16.gmra.mxu0 %vm1002_vm5, %v11283_v53  ;;  %v14001_v36 = vsel %vm13455_vm9, %v11373_v55, %v3151_v9  ;;  %v2530_v16 = vshrl.u32 %v2343_v35, 16 }
  0xb5   : > { %v13997_v10 = vcombine.low %v2505_v0, %v2515_v48  ;;  %v2536_v26 = vshll.u32 %v13974_v8, 16  ;;  %12469 = vmatprep.mubr.msk.bf16.mxu0 %vm1002_vm5, %v11284_v42  ;;  %v14010_v1 = vsel %vm13455_vm9, %v3153_v44, %v3154_v52  ;;  %v2522_v12 = vrot.slane %v2520_v6, 5  ;;  %v14021_v0 = vld [vmem:[#allocation2 + $0x70] sm:$0xf] }
  0xb6   : > { %v2528_v13 = vrot.slane %v2526_v54, 5  ;;  %v2541_v53 = vshrl.u32 %v2345_v43, 16  ;;  %12504 = vmatmul.mubr.msk.bf16.gmra.mxu1 %vm1002_vm5, %v13041_v58  ;;  %v2532_v2 = vrot.slane %v2530_v16, 4  ;;  %v2544_v49 = vshll.u32 %v2345_v43, 16  ;;  %v2348_v43 = vld [vmem:[#allocation2 + $0x6c] sm:$0xf] }
  0xb7   : > { %v2538_v31 = vrot.slane %v2536_v26, 5  ;;  %v2550_v25 = vshll.u32 %v13987_v28, 16  ;;  %12543 = vmatprep.mubr.msk.bf16.mxu1 %vm1002_vm5, %v11385_v40  ;;  %v2523_v18 = vor.u32 %v2522_v12, %v2519_v27  ;;  %v2554_v42 = vshrl.u32 %v13987_v28, 16  ;;  %v14029_v54 = vld [vmem:[#allocation2 + $0x74] sm:$0x1] }
  0xb8   : > { %v2543_v47 = vrot.slane %v2541_v53, 4  ;;  %v2560_v24 = vshll.u32 %v13989_v62, 16  ;;  %v2533_v19 = vor.u32 %v2532_v2, %v2528_v13  ;;  %v2546_v63 = vrot.slane %v2544_v49, 5  ;;  %v14064_v2 = vld [vmem:[#allocation2 + $0x7c] sm:$0xf] }
  0xb9   : > { %v2552_v61 = vrot.slane %v2550_v25, 5  ;;  %v11374_v55 = vrot.slane %v3056_v50, 9  ;;  %v2524_v9 = vrot.slane %v2523_v18, 4  ;;  %v2556_v46 = vrot.slane %v2554_v42, 4 }
  0xba   : > { %v2562_v52 = vrot.slane %v2560_v24, 5  ;;  %v3158_v3 = vrot.slane %v2343_v35, 5  ;;  %v2534_v58 = vrot.slane %v2533_v19, 4  ;;  %v2547_v38 = vor.u32 %v2546_v63, %v2543_v47 }
  0xbb   : > { %v3161_v17 = vrot.slane %v13974_v8, 5  ;;  %v11375_v40 = vrot.slane %v3057_v11, 9  ;;  %v2529_v44 = vsel %vm13278_vm6, %v2524_v9, %v2528_v13  ;;  %v2557_v48 = vor.u32 %v2556_v46, %v2552_v61  ;;  %v2351_v13 = vld [vmem:[#allocation2 + $0x78] sm:$0xf]  ;;  %v14083_v11 = vld [vmem:[%s18681_s1 + $0x10] sm:$0x3] }
  0xbc   : > { %v14027_v27 = vsel %vm13455_vm9, %v11374_v55, %v3158_v3  ;;  %v3160_v6 = vrot.slane %v3158_v3, 4  ;;  %12470 = vmatmul.mubr.msk.bf16.gmra.mxu0 %vm1002_vm5, %v11285_v5  ;;  %v2539_v35 = vsel %vm13278_vm6, %v2534_v58, %v2538_v31  ;;  %v2548_v8 = vrot.slane %v2547_v38, 4 }
  0xbd   : > { %v3165_v50 = vrot.slane %v13987_v28, 5  ;;  %v3168_v16 = vrot.slane %v13989_v62, 5  ;;  %12509 = vmatprep.mubr.msk.bf16.mxu0 %vm1002_vm5, %v13844_v14  ;;  %v11390_v26 = vcombine.low %v14001_v36, %v14010_v1  ;;  %v2558_v12 = vrot.slane %v2557_v48, 4 }
  0xbe   : > { %v14045_v45 = vsel %vm13455_vm9, %v3160_v6, %v3161_v17  ;;  %v2565_v41 = vshrl.u32 %v2348_v43, 16  ;;  %12544 = vmatmul.mubr.msk.bf16.vlgmr.msra.gmra.mxu1 %vm1002_vm5, %v11386_v56  ;;  %v14051_v5 = vcombine.low %v2529_v44, %v2539_v35  ;;  %v2553_v28 = vsel %vm13278_vm6, %v2548_v8, %v2552_v61 }
  0xbf   : > { %v11391_v14 = vcombine.low %v14027_v27, %v14045_v45  ;;  %v3167_v62 = vrot.slane %v3165_v50, 4  ;;  %12547 = vmatprep.mubr.msk.bf16.mxu1 %vm1002_vm5, %v11387_v51  ;;  %v2563_v22 = vsel %vm13278_vm6, %v2558_v12, %v2562_v52  ;;  %v2568_v56 = vshll.u32 %v2348_v43, 16  ;;  %v3058_v51 = vld [vmem:[#allocation2 + $0x6c] sm:$0xe]  ;;  %v3059_v43 = vld [vmem:[#allocation2 + $0x78] sm:$0xe] }
  0xc0   : > { %v2567_v34 = vrot.slane %v2565_v41, 4  ;;  %v2574_v53 = vshll.u32 %v14021_v0, 16  ;;  %v14066_v31 = vcombine.low %v2553_v28, %v2563_v22  ;;  %v14070_v49 = vsel %vm13455_vm9, %v11375_v40, %v3165_v50  ;;  %v2357_v22 = vld [vmem:[#allocation2 + $0x90] sm:$0xf] }
  0xc1   : > { %v2578_v25 = vshrl.u32 %v14021_v0, 16  ;;  %v2584_v57 = vshll.u32 %v14029_v54, 16  ;;  %v14078_v18 = vsel %vm13455_vm9, %v3167_v62, %v3168_v16  ;;  %v2570_v47 = vrot.slane %v2568_v56, 5  ;;  %v2354_v16 = vld [vmem:[#allocation2 + $0x84] sm:$0xf] }
  0xc2   : > { %v2576_v42 = vrot.slane %v2574_v53, 5  ;;  %v2589_v24 = vshrl.u32 %v2351_v13, 16  ;;  %v2592_v61 = vshll.u32 %v2351_v13, 16  ;;  %v2598_v55 = vshll.u32 %v14064_v2, 16 }
  0xc3   : > { %v2580_v19 = vrot.slane %v2578_v25, 4  ;;  %v2586_v63 = vrot.slane %v2584_v57, 5  ;;  %v2571_v9 = vor.u32 %v2570_v47, %v2567_v34  ;;  %v2602_v52 = vshrl.u32 %v14064_v2, 16 }
  0xc4   : > { %v2591_v46 = vrot.slane %v2589_v24, 4  ;;  %v2608_v3 = vshll.u32 %v14074_v7, 16  ;;  %12510 = vmatmul.mubr.msk.bf16.vlgmr.msra.gmra.mxu0 %vm1002_vm5, %v13863_v39  ;;  %v2594_v38 = vrot.slane %v2592_v61, 5  ;;  %v2600_v17 = vrot.slane %v2598_v55, 5  ;;  %v14142_v61 = vld [vmem:[#allocation2 + $0x98] sm:$0x1] }
  0xc5   : > { %v2581_v58 = vor.u32 %v2580_v19, %v2576_v42  ;;  %v11376_v40 = vrot.slane %v3058_v51, 9  ;;  %12576 = vmatpush3.bf16.msra.mxu0 %v13840_v60  ;;  %12513 = vmatprep.mubr.msk.bf16.mxu0 %vm1002_vm5, %v13922_v33  ;;  %v11392_v44 = vcombine.low %v14070_v49, %v14078_v18  ;;  %v2572_v48 = vrot.slane %v2571_v9, 4 }
  0xc6   : > { %v2604_v6 = vrot.slane %v2602_v52, 4  ;;  %v3172_v35 = vrot.slane %v14021_v0, 5  ;;  %12548 = vmatmul.mubr.msk.bf16.gmra.mxu1 %vm1002_vm5, %v11388_v20  ;;  %v2595_v8 = vor.u32 %v2594_v38, %v2591_v46  ;;  %v2610_v50 = vrot.slane %v2608_v3, 5  ;;  %12991 = vmatprep.subr.msk.bf16.mxu0 %vm1051_vm0, %v14083_v11  ;;  %v2355_v0 = vld [vmem:[#allocation2 + $0x88] sm:$0xf] }
  0xc7   : > { %v2582_v39 = vrot.slane %v2581_v58, 4  ;;  %v3175_v60 = vrot.slane %v14029_v54, 5  ;;  %12551 = vmatprep.mubr.msk.bf16.mxu1 %vm1002_vm5, %v11389_v23  ;;  %v2577_v33 = vsel %vm13278_vm6, %v2572_v48, %v2576_v42  ;;  %v11377_v41 = vrot.slane %v3059_v43, 9  ;;  %v14131_v42 = vld [vmem:[#allocation2 + $0x94] sm:$0xf] }
  0xc8   : > { %v2605_v59 = vor.u32 %v2604_v6, %v2600_v17  ;;  %v14111_v4 = vsel %vm13455_vm9, %v11376_v40, %v3172_v35  ;;  %v3174_v20 = vrot.slane %v3172_v35, 4  ;;  %v2596_v12 = vrot.slane %v2595_v8, 4  ;;  %v3060_v52 = vld [vmem:[#allocation2 + $0x84] sm:$0xe] }
  0xc9   : > { %v2587_v54 = vsel %vm13278_vm6, %v2582_v39, %v2586_v63  ;;  %v3179_v28 = vrot.slane %v14064_v2, 5  ;;  %v3182_v62 = vrot.slane %v14074_v7, 5  ;;  %v2613_v13 = vshrl.u32 %v2354_v16, 16 }
  0xca   : > { %v2606_v21 = vrot.slane %v2605_v59, 4  ;;  %v14120_v23 = vsel %vm13455_vm9, %v3174_v20, %v3175_v60  ;;  %v14123_v34 = vcombine.low %v2577_v33, %v2587_v54  ;;  %v2601_v56 = vsel %vm13278_vm6, %v2596_v12, %v2600_v17  ;;  %v3061_v60 = vld [vmem:[#allocation2 + $0x90] sm:$0xe]  ;;  %v2360_v33 = vld [vmem:[#allocation2 + $0x9c] sm:$0xf] }
  0xcb   : > { %v11393_v53 = vcombine.low %v14111_v4, %v14120_v23  ;;  %v3181_v2 = vrot.slane %v3179_v28, 4  ;;  %v2615_v57 = vrot.slane %v2613_v13, 4  ;;  %v2616_v51 = vshll.u32 %v2354_v16, 16 }
  0xcc   : > { %v2611_v25 = vsel %vm13278_vm6, %v2606_v21, %v2610_v50  ;;  %v2622_v47 = vshll.u32 %v2355_v0, 16  ;;  %12514 = vmatmul.mubr.msk.bf16.gmra.mxu0 %vm1002_vm5, %v13934_v29  ;;  %v14139_v24 = vsel %vm13455_vm9, %v11377_v41, %v3179_v28  ;;  %v2626_v19 = vshrl.u32 %v2355_v0, 16 }
  0xcd   : > { %v14135_v7 = vcombine.low %v2601_v56, %v2611_v25  ;;  %v2632_v63 = vshll.u32 %v14116_v37, 16  ;;  %12517 = vmatprep.mubr.msk.bf16.mxu0 %vm1002_vm5, %v13981_v15  ;;  %v14148_v55 = vsel %vm13455_vm9, %v3181_v2, %v3182_v62  ;;  %v2618_v9 = vrot.slane %v2616_v51, 5  ;;  %v14178_v56 = vld [vmem:[#allocation2 + $0xa4] sm:$0x1]  ;;  %v2363_v51 = vld [vmem:[#allocation2 + $0xa8] sm:$0xf] }
  0xce   : > { %v2624_v29 = vrot.slane %v2622_v47, 5  ;;  %v2637_v46 = vshrl.u32 %v2357_v22, 16  ;;  %12552 = vmatmul.mubr.msk.bf16.gmra.mxu1 %vm1002_vm5, %v11390_v26  ;;  %v2628_v3 = vrot.slane %v2626_v19, 4  ;;  %v2640_v58 = vshll.u32 %v2357_v22, 16 }
  0xcf   : > { %v2634_v43 = vrot.slane %v2632_v63, 5  ;;  %v2646_v38 = vshll.u32 %v14131_v42, 16  ;;  %12555 = vmatprep.mubr.msk.bf16.mxu1 %vm1002_vm5, %v11391_v14  ;;  %v2619_v15 = vor.u32 %v2618_v9, %v2615_v57  ;;  %v2650_v40 = vshrl.u32 %v14131_v42, 16 }
  0xd0   : > { %v2639_v17 = vrot.slane %v2637_v46, 4  ;;  %v2656_v48 = vshll.u32 %v14142_v61, 16  ;;  %v2629_v6 = vor.u32 %v2628_v3, %v2624_v29  ;;  %v2642_v36 = vrot.slane %v2640_v58, 5 }
  0xd1   : > { %v2648_v1 = vrot.slane %v2646_v38, 5  ;;  %v11378_v26 = vrot.slane %v3060_v52, 9  ;;  %v11394_v35 = vcombine.low %v14139_v24, %v14148_v55  ;;  %v2620_v39 = vrot.slane %v2619_v15, 4  ;;  %v3062_v52 = vld [vmem:[#allocation2 + $0x9c] sm:$0xe] }
  0xd2   : > { %v2652_v8 = vrot.slane %v2650_v40, 4  ;;  %v3186_v50 = vrot.slane %v2355_v0, 5  ;;  %v2630_v27 = vrot.slane %v2629_v6, 4  ;;  %v2643_v45 = vor.u32 %v2642_v36, %v2639_v17  ;;  %v3063_v6 = vld [vmem:[#allocation2 + $0xa8] sm:$0xe] }
  0xd3   : > { %v2658_v14 = vrot.slane %v2656_v48, 5  ;;  %v3189_v16 = vrot.slane %v14116_v37, 5  ;;  %v2625_v59 = vsel %vm13278_vm6, %v2620_v39, %v2624_v29  ;;  %v11379_v28 = vrot.slane %v3061_v60, 9  ;;  %v2361_v37 = vld [vmem:[#allocation2 + $0xa0] sm:$0xf] }
  0xd4   : > { %v2653_v20 = vor.u32 %v2652_v8, %v2648_v1  ;;  %v3187_v54 = vsel %vm13455_vm9, %v11378_v26, %v3186_v50  ;;  %v3188_v12 = vrot.slane %v3186_v50, 4  ;;  %12518 = vmatmul.mubr.msk.bf16.gmra.mxu0 %vm1002_vm5, %v13997_v10  ;;  %v2635_v0 = vsel %vm13278_vm6, %v2630_v27, %v2634_v43  ;;  %v2365_v29 = vld [vmem:[#allocation2 + $0xb0] sm:$0x1] }
  0xd5   : > { %v2644_v41 = vrot.slane %v2643_v45, 4  ;;  %v3193_v21 = vrot.slane %v14131_v42, 5  ;;  %12521 = vmatprep.mubr.msk.bf16.mxu0 %vm1002_vm5, %v14051_v5  ;;  %v3196_v22 = vrot.slane %v14142_v61, 5  ;;  %v2661_v10 = vshrl.u32 %v2360_v33, 16 }
  0xd6   : > { %v2654_v62 = vrot.slane %v2653_v20, 4  ;;  %v3190_v13 = vsel %vm13455_vm9, %v3188_v12, %v3189_v16  ;;  %12556 = vmatmul.mubr.msk.bf16.gmra.mxu1 %vm1002_vm5, %v11392_v44  ;;  %v14184_v2 = vcombine.low %v2625_v59, %v2635_v0  ;;  %v2664_v49 = vshll.u32 %v2360_v33, 16  ;;  %v2364_v44 = vld [vmem:[#allocation2 + $0xac] sm:$0xf]  ;;  %v2366_v33 = vld [vmem:[#allocation2 + $0xb4] sm:$0xf] }
  0xd7   : > { %v2649_v25 = vsel %vm13278_vm6, %v2644_v41, %v2648_v1  ;;  %v11395_v5 = vcombine.low %v3187_v54, %v3190_v13  ;;  %v3195_v57 = vrot.slane %v3193_v21, 4  ;;  %12559 = vmatprep.mubr.msk.bf16.mxu1 %vm1002_vm5, %v11393_v53  ;;  %v2663_v42 = vrot.slane %v2661_v10, 4  ;;  %v2367_v0 = vld [vmem:[#allocation2 + $0xb8] sm:$0xf] }
  0xd8   : > { %v2659_v47 = vsel %vm13278_vm6, %v2654_v62, %v2658_v14  ;;  %v2670_v18 = vshll.u32 %v2361_v37, 16  ;;  %v14198_v63 = vsel %vm13455_vm9, %v11379_v28, %v3193_v21  ;;  %v2674_v61 = vshrl.u32 %v2361_v37, 16 }
  0xd9   : > { %v14194_v19 = vcombine.low %v2649_v25, %v2659_v47  ;;  %v2680_v9 = vshll.u32 %v14178_v56, 16  ;;  %v14203_v4 = vsel %vm13455_vm9, %v3195_v57, %v3196_v22  ;;  %v2666_v23 = vrot.slane %v2664_v49, 5  ;;  %v222_v25 = vld [vmem:[%s13180_s25 + $0x190] sm:$0x3] }
  0xda   : > { %v2672_v53 = vrot.slane %v2670_v18, 5  ;;  %v2685_v46 = vshrl.u32 %v2363_v51, 16  ;;  %v2676_v3 = vrot.slane %v2674_v61, 4  ;;  %v2688_v58 = vshll.u32 %v2363_v51, 16  ;;  %v2370_v61 = vld [vmem:[#allocation2 + $0xc4] sm:$0xf] }
  0xdb   : > { %v2682_v43 = vrot.slane %v2680_v9, 5  ;;  %v2694_v38 = vshll.u32 %v2364_v44, 16  ;;  %v2667_v15 = vor.u32 %v2666_v23, %v2663_v42  ;;  %v2698_v40 = vshrl.u32 %v2364_v44, 16  ;;  %v2369_v42 = vld [vmem:[#allocation2 + $0xc0] sm:$0xf] }
  0xdc   : > { %v2687_v17 = vrot.slane %v2685_v46, 4  ;;  %v2704_v48 = vshll.u32 %v2365_v29, 16  ;;  %12522 = vmatmul.mubr.msk.bf16.gmra.mxu0 %vm1002_vm5, %v14066_v31  ;;  %v2677_v36 = vor.u32 %v2676_v3, %v2672_v53  ;;  %v2690_v1 = vrot.slane %v2688_v58, 5  ;;  %v3064_v9 = vld [vmem:[#allocation2 + $0xb4] sm:$0xe] }
  0xdd   : > { %v14207_v26 = vrot.slane %v2694_v38, 5  ;;  %v11380_v39 = vrot.slane %v3062_v52, 9  ;;  %12525 = vmatprep.mubr.msk.bf16.mxu0 %vm1002_vm5, %v14123_v34  ;;  %v2668_v8 = vrot.slane %v2667_v15, 4  ;;  %v2700_v50 = vrot.slane %v2698_v40, 4 }
  0xde   : > { %v14211_v60 = vrot.slane %v2704_v48, 5  ;;  %v3200_v27 = vrot.slane %v2361_v37, 5  ;;  %12560 = vmatmul.mubr.msk.bf16.gmra.mxu1 %vm1002_vm5, %v11394_v35  ;;  %v2678_v45 = vrot.slane %v2677_v36, 4  ;;  %v2691_v31 = vor.u32 %v2690_v1, %v2687_v17  ;;  %v2368_v37 = vld [vmem:[#allocation2 + $0xbc] sm:$0x1] }
  0xdf   : > { %v3203_v14 = vrot.slane %v14178_v56, 5  ;;  %v11381_v16 = vrot.slane %v3063_v6, 9  ;;  %12563 = vmatprep.mubr.msk.bf16.mxu1 %vm1002_vm5, %v11395_v5  ;;  %v2673_v34 = vsel %vm13278_vm6, %v2668_v8, %v2672_v53  ;;  %v2701_v59 = vor.u32 %v2700_v50, %v14207_v26  ;;  %v3065_v6 = vld [vmem:[#allocation2 + $0xc0] sm:$0xe] }
  0xe0   : > { %v3201_v20 = vsel %vm13455_vm9, %v11380_v39, %v3200_v27  ;;  %v3202_v24 = vrot.slane %v3200_v27, 4  ;;  %v2683_v55 = vsel %vm13278_vm6, %v2678_v45, %v2682_v43  ;;  %v14226_v35 = vrot.slane %v2691_v31, 4 }
  0xe1   : > { %v3207_v54 = vrot.slane %v2364_v44, 5  ;;  %v3210_v12 = vrot.slane %v2365_v29, 5  ;;  %v11396_v41 = vcombine.low %v14198_v63, %v14203_v4  ;;  %v14230_v28 = vrot.slane %v2701_v59, 4 }
  0xe2   : > { %v3204_v21 = vsel %vm13455_vm9, %v3202_v24, %v3203_v14  ;;  %v2709_v62 = vshrl.u32 %v2366_v33, 16  ;;  %v11348_v13 = vcombine.low %v2673_v34, %v2683_v55  ;;  %v2697_v22 = vsel %vm13278_vm6, %v14226_v35, %v14207_v26  ;;  %v14274_v55 = vld [vmem:[#allocation2 + $0x1c] sm:$0xf] }
  0xe3   : > { %v14240_v56 = vsel %vm13455_vm9, %v11381_v16, %v3207_v54  ;;  %v3209_v10 = vrot.slane %v3207_v54, 4  ;;  %v11397_v5 = vcombine.low %v3201_v20, %v3204_v21  ;;  %v2712_v51 = vshll.u32 %v2366_v33, 16  ;;  %v3879_v33 = vld [vmem:[#allocation2 + $0x18] sm:$0xf]  ;;  %v13110_v20 = vld [vmem:[%s18681_s1 + $0xe] sm:$0x3] }
  0xe4   : > { %v2711_v57 = vrot.slane %v2709_v62, 4  ;;  %v2718_v47 = vshll.u32 %v2367_v0, 16  ;;  %12526 = vmatmul.mubr.msk.bf16.gmra.mxu0 %vm1002_vm5, %v14135_v7  ;;  %v2707_v49 = vsel %vm13278_vm6, %v14230_v28, %v14211_v60  ;;  %v2722_v44 = vshrl.u32 %v2367_v0, 16 }
  0xe5   : > { %v3211_v18 = vsel %vm13455_vm9, %v3209_v10, %v3210_v12  ;;  %v2728_v63 = vshll.u32 %v2368_v37, 16  ;;  %12529 = vmatprep.mubr.msk.bf16.mxu0 %vm1002_vm5, %v14184_v2  ;;  %v2714_v4 = vrot.slane %v2712_v51, 5  ;;  %v12029_v7 = vpack.c.bf16 %v222_v25, %v222_v25 }
  0xe6   : > { %v11398_v29 = vcombine.low %v14240_v56, %v3211_v18  ;;  %v2720_v23 = vrot.slane %v2718_v47, 5  ;;  %12564 = vmatmul.mubr.msk.bf16.gmra.mxu1 %vm1002_vm5, %v11396_v41  ;;  %v2724_v53 = vrot.slane %v2722_v44, 4  ;;  %v2733_v52 = vshrl.u32 %v2369_v42, 16  ;;  %v3882_v41 = vld [vmem:[#allocation2 + $0x24] sm:$0xf] }
  0xe7   : > { %v2730_v46 = vrot.slane %v2728_v63, 5  ;;  %v2736_v3 = vshll.u32 %v2369_v42, 16  ;;  %12567 = vmatprep.mubr.msk.bf16.mxu1 %vm1002_vm5, %v11397_v5  ;;  %v2715_v43 = vor.u32 %v2714_v4, %v2711_v57  ;;  %512 = vst.msk [vmem:[#allocation2 + $0xc8] sm:$0x1] %vm463_vm2, %v12029_v7  ;;  %v2742_v58 = vshll.u32 %v2370_v61, 16 }
  0xe8   : > { %v2746_v38 = vshrl.u32 %v2370_v61, 16  ;;  %v11382_v15 = vrot.slane %v3064_v9, 9  ;;  %v2725_v2 = vor.u32 %v2724_v53, %v2720_v23  ;;  %v2735_v17 = vrot.slane %v2733_v52, 4  ;;  %v14286_v42 = vld [vmem:[#allocation2 + $0x28] sm:$0xf] }
  0xe9   : > { %v2738_v40 = vrot.slane %v2736_v3, 5  ;;  %v3214_v48 = vrot.slane %v2367_v0, 5  ;;  %v2716_v36 = vrot.slane %v2715_v43, 4  ;;  %v14257_v1 = vrot.slane %v2742_v58, 5  ;;  %v14277_v0 = vld [vmem:[#allocation2 + $0x20] sm:$0x1] }
  0xea   : > { %v2748_v26 = vrot.slane %v2746_v38, 4  ;;  %v3217_v39 = vrot.slane %v2368_v37, 5  ;;  %v2726_v8 = vrot.slane %v2725_v2, 4  ;;  %v11383_v14 = vrot.slane %v3065_v6, 9 }
  0xeb   : > { %v2739_v50 = vor.u32 %v2738_v40, %v2735_v17  ;;  %v3215_v60 = vsel %vm13455_vm9, %v11382_v15, %v3214_v48  ;;  %v3216_v27 = vrot.slane %v3214_v48, 4  ;;  %v2721_v45 = vsel %vm13278_vm6, %v2716_v36, %v2720_v23  ;;  %v3885_v40 = vld [vmem:[#allocation2 + $0x30] sm:$0xf] }
  0xec   : > { %v2749_v31 = vor.u32 %v2748_v26, %v14257_v1  ;;  %v3221_v16 = vrot.slane %v2370_v61, 5  ;;  %12530 = vmatmul.mubr.msk.bf16.gmra.mxu0 %vm1002_vm5, %v14194_v19  ;;  %v2731_v34 = vsel %vm13278_vm6, %v2726_v8, %v2730_v46  ;;  %v4410_v24 = vsel %vm1051_vm0, %v13110_v20, 0 }
  0xed   : > { %v3218_v59 = vsel %vm13455_vm9, %v3216_v27, %v3217_v39  ;;  %12533 = vmatprep.mubr.msk.bf16.mxu0 %vm1002_vm5, %v11348_v13  ;;  %v11349_v35 = vcombine.low %v2697_v22, %v2707_v49  ;;  %v11350_v54 = vcombine.low %v2721_v45, %v2731_v34  ;;  %v2740_v12 = vrot.slane %v2739_v50, 4  ;;  %12610 = vmatpush3.bf16.msra.mxu1 %v4410_v24  ;;  %v12409_v22 = vpop.f32.mrf.mxu1  ;;  %v14305_v27 = vld [vmem:[#allocation2 + $0x34] sm:$0xf] }
  0xee   : > { %v11399_v19 = vcombine.low %v3215_v60, %v3218_v59  ;;  %12568 = vmatmul.mubr.msk.bf16.gmra.mxu1 %vm1002_vm5, %v11398_v29  ;;  %v2371_v28 = vld [vmem:[#allocation2 + $0xc8] sm:$0x1]  ;;  %v2750_v21 = vrot.slane %v2749_v31, 4  ;;  %v3222_v37 = vsel %vm13455_vm9, %v11383_v14, %v3221_v16  ;;  %v3223_v62 = vrot.slane %v3221_v16, 4  ;;  %v14290_v29 = vld [vmem:[#allocation2 + $0x2c] sm:$0x1] }
  0xef   : > { %v3928_v56 = vshrl.u32 %v3879_v33, 16  ;;  %v2752_v10 = vshll.u32 %v2371_v28, 16  ;;  %v3224_v13 = vrot.slane %v2371_v28, 5  ;;  %v3931_v25 = vshll.u32 %v3879_v33, 16  ;;  %v1381_v9 = vpop.f32.mrf.mxu1 }
  0xf0   : > { %12571 = vmatprep.mubr.msk.bf16.mxu1 %vm1002_vm5, %v11399_v19  ;;  %v3937_v5 = vshll.u32 %v14274_v55, 16  ;;  %v3941_v51 = vshrl.u32 %v14274_v55, 16  ;;  %v3947_v47 = vshll.u32 %v14277_v0, 16  ;;  %v3952_v49 = vshrl.u32 %v3882_v41, 16  ;;  %v13042_v19 = vld [vmem:[#allocation2 + $0x18] sm:$0xff]  }
  0xf1   : > { %v3930_v57 = vrot.slane %v3928_v56, 4  ;;  %v2754_v18 = vrot.slane %v2752_v10, 5  ;;  %v3225_v44 = vsel %vm13455_vm9, %v3223_v62, %v3224_v13  ;;  %v3933_v63 = vrot.slane %v3931_v25, 5  ;;  %v12410_v58 = vpop.f32.mrf.mxu1 }
  0xf2   : > { %v3939_v61 = vrot.slane %v3937_v5, 5  ;;  %v2745_v4 = vsel %vm13278_vm6, %v2740_v12, %v14257_v1  ;;  %v11400_v23 = vcombine.low %v3222_v37, %v3225_v44  ;;  %v3943_v7 = vrot.slane %v3941_v51, 4  ;;  %v3888_v12 = vld [vmem:[#allocation2 + $0x3c] sm:$0xf] }
  0xf3   : > { %v3954_v53 = vrot.slane %v3952_v49, 4  ;;  %v2755_v46 = vsel %vm13278_vm6, %v2750_v21, %v2754_v18  ;;  %v3934_v52 = vor.u32 %v3933_v63, %v3930_v57  ;;  %v3955_v3 = vshll.u32 %v3882_v41, 16  ;;  %v12375_v48 = vpop.f32.mrf.mxu0  ;;  %v1384_v26 = vpop.f32.mrf.mxu1  ;;  %v14323_v49 = vld [vmem:[#allocation2 + $0x40] sm:$0xf] }
  0xf4   : > { %v3961_v43 = vshll.u32 %v14286_v42, 16  ;;  %12534 = vmatmul.mubr.msk.bf16.gmra.mxu0 %vm1002_vm5, %v11349_v35  ;;  %v3944_v38 = vor.u32 %v3943_v7, %v3939_v61  ;;  %v3949_v15 = vrot.slane %v3947_v47, 5  ;;  %v3965_v2 = vshrl.u32 %v14286_v42, 16  ;;  %v14313_v35 = vld [vmem:[#allocation2 + $0x38] sm:$0x1] }
  0xf5   : > { %v3971_v17 = vshll.u32 %v14290_v29, 16  ;;  %12537 = vmatprep.mubr.msk.bf16.mxu0 %vm1002_vm5, %v11350_v54  ;;  %v3935_v6 = vrot.slane %v3934_v52, 4  ;;  %v3957_v36 = vrot.slane %v3955_v3, 5  ;;  %v11351_v39 = vcombine.low %v2745_v4, %v2755_v46  ;;  %v1089_v31 = vpop.f32.mrf.mxu0  ;;  %v12413_v33 = vpop.f32.mrf.mxu1  ;;  %v3891_v7 = vld [vmem:[#allocation2 + $0x48] sm:$0xf] }
  0xf6   : > { %v3963_v1 = vrot.slane %v3961_v43, 5  ;;  %12572 = vmatmul.mubr.msk.bf16.gmra.mxu1 %vm1002_vm5, %v11400_v23  ;;  %v14303_v8 = vadd.f32 %v12409_v22, %v12375_v48  ;;  %v3945_v50 = vrot.slane %v3944_v38, 4  ;;  %v3967_v60 = vrot.slane %v3965_v2, 4  ;;  %v14330_v23 = vld [vmem:[#allocation2 + $0x44] sm:$0x1] }
  0xf7   : > { %v3940_v45 = vsel %vm13278_vm6, %v3935_v6, %v3939_v61  ;;  %v3958_v14 = vor.u32 %v3957_v36, %v3954_v53  ;;  %v3973_v16 = vrot.slane %v3971_v17, 5  ;;  %v3976_v34 = vshrl.u32 %v3885_v40, 16  ;;  %v12376_v21 = vpop.f32.mrf.mxu0  ;;  %v1397_v56 = vpop.f32.mrf.mxu1  ;;  %v14339_v36 = vld [vmem:[#allocation2 + $0x4c] sm:$0xf] }
  0xf8   : > { %v3950_v59 = vsel %vm13278_vm6, %v3945_v50, %v3949_v15  ;;  %v14311_v20 = vadd.f32 %v1381_v9, %v1089_v31  ;;  %v3968_v24 = vor.u32 %v3967_v60, %v3963_v1  ;;  %v3979_v54 = vshll.u32 %v3885_v40, 16  ;;  %v13044_v31 = vld [vmem:[#allocation2 + $0x30] sm:$0xff]  }
  0xf9   : > { %v11451_v41 = vcombine.low %v3940_v45, %v3950_v59  ;;  %v3959_v28 = vrot.slane %v3958_v14, 4  ;;  %v3978_v37 = vrot.slane %v3976_v34, 4  ;;  %v3985_v62 = vshll.u32 %v14305_v27, 16  ;;  %v1092_v57 = vpop.f32.mrf.mxu0  ;;  %v12414_v44 = vpop.f32.mrf.mxu1 }
  0xfa   : > { %v3969_v10 = vrot.slane %v3968_v24, 4  ;;  %v14316_v13 = vadd.f32 %v12410_v58, %v12376_v21  ;;  %v3981_v22 = vrot.slane %v3979_v54, 5  ;;  %v3989_v25 = vshrl.u32 %v14305_v27, 16  ;;  %v14345_v24 = vld [vmem:[#allocation2 + $0x50] sm:$0x1] }
  0xfb   : > { %12611 = vmatprep.mubr.msk.bf16.mxu1 %vm1002_vm5, %v11451_v41  ;;  %v3964_v5 = vsel %vm13278_vm6, %v3959_v28, %v3963_v1  ;;  %v3987_v51 = vrot.slane %v3985_v62, 5  ;;  %v3995_v47 = vshll.u32 %v14313_v35, 16  ;;  %v4000_v18 = vshrl.u32 %v3888_v12, 16  ;;  %v1400_v43 = vpop.f32.mrf.mxu1  ;;  %v3894_v28 = vld [vmem:[#allocation2 + $0x54] sm:$0xf] }
  0xfc   : > { %12538 = vmatmul.mubr.msk.bf16.gmra.mxu0 %vm1002_vm5, %v11351_v39  ;;  %v3974_v63 = vsel %vm13278_vm6, %v3969_v10, %v3973_v16  ;;  %v14328_v61 = vadd.f32 %v1384_v26, %v1092_v57  ;;  %v3982_v9 = vor.u32 %v3981_v22, %v3978_v37  ;;  %v3991_v4 = vrot.slane %v3989_v25, 4  ;;  %v12379_v40 = vpop.f32.mrf.mxu0  ;;  %v13043_v26 = vld [vmem:[#allocation2 + $0x24] sm:$0xff]  }
  0xfd   : > { %12577 = vmatprep.mubr.msk.bf16.mxu0 %vm1002_vm5, %v13042_v19  ;;  %v11452_v53 = vcombine.low %v3964_v5, %v3974_v63  ;;  %v3997_v46 = vrot.slane %v3995_v47, 5  ;;  %v4002_v52 = vrot.slane %v4000_v18, 4  ;;  %v4003_v3 = vshll.u32 %v3888_v12, 16  ;;  %v14357_v47 = vld [vmem:[#allocation2 + $0x58] sm:$0xf] }
  0xfe   : > { %v3983_v58 = vrot.slane %v3982_v9, 4  ;;  %v3992_v38 = vor.u32 %v3991_v4, %v3987_v51  ;;  %v4009_v15 = vshll.u32 %v14323_v49, 16  ;;  %v4013_v2 = vshrl.u32 %v14323_v49, 16  ;;  %v1105_v14 = vpop.f32.mrf.mxu0  ;;  %v12417_v59 = vpop.f32.mrf.mxu1 }
  0xff   : > { %v4880_v17 = vsel %vm1051_vm0, %v14083_v11, 0  ;;  %12612 = vmatmul.mubr.msk.bf16.vlgmr.msra.gmra.mxu1 %vm1002_vm5, %v11452_v53  ;;  %v4005_v48 = vrot.slane %v4003_v3, 5  ;;  %v4019_v6 = vshll.u32 %v14330_v23, 16  ;;  %v4024_v1 = vshrl.u32 %v3891_v7, 16  ;;  %v14365_v3 = vld [vmem:[#allocation2 + $0x5c] sm:$0x1] }
 0x100   : > { %v14341_v39 = vadd.f32 %v12413_v33, %v12379_v40  ;;  %v3988_v50 = vsel %vm13278_vm6, %v3983_v58, %v3987_v51  ;;  %v3993_v60 = vrot.slane %v3992_v38, 4  ;;  %v4011_v45 = vrot.slane %v4009_v15, 5  ;;  %v12380_v10 = vpop.f32.mrf.mxu0  ;;  %v1413_v25 = vpop.f32.mrf.mxu1 }
 0x101   : > { %v4006_v11 = vor.u32 %v4005_v48, %v4002_v52  ;;  %v4015_v16 = vrot.slane %v4013_v2, 4  ;;  %v4021_v34 = vrot.slane %v4019_v6, 5  ;;  %v4026_v54 = vrot.slane %v4024_v1, 4  ;;  %v13045_v6 = vld [vmem:[#allocation2 + $0x3c] sm:$0xff]  }
 0x102   : > { %v3998_v12 = vsel %vm13278_vm6, %v3993_v60, %v3997_v46  ;;  %v14349_v19 = vadd.f32 %v1397_v56, %v1105_v14  ;;  %v4027_v33 = vshll.u32 %v3891_v7, 16  ;;  %v4033_v41 = vshll.u32 %v14339_v36, 16  ;;  %v1108_v9 = vpop.f32.mrf.mxu0  ;;  %v12418_v53 = vpop.f32.mrf.mxu1  ;;  %v3897_v60 = vld [vmem:[#allocation2 + $0x60] sm:$0xf] }
 0x103   : > { %v11453_v21 = vcombine.low %v3988_v50, %v3998_v12  ;;  %v4007_v37 = vrot.slane %v4006_v11, 4  ;;  %v4016_v62 = vor.u32 %v4015_v16, %v4011_v45  ;;  %v4037_v22 = vshrl.u32 %v14339_v36, 16 }
 0x104   : > { %12578 = vmatmul.mubr.msk.bf16.vlgmr.msra.gmra.mxu0 %vm1002_vm5, %v13043_v26  ;;  %v14354_v5 = vadd.f32 %v12414_v44, %v12380_v10  ;;  %v4029_v57 = vrot.slane %v4027_v33, 5  ;;  %v4035_v51 = vrot.slane %v4033_v41, 5  ;;  %v4043_v56 = vshll.u32 %v14345_v24, 16  ;;  %v1416_v48 = vpop.f32.mrf.mxu1  ;;  %v14379_v41 = vld [vmem:[#allocation2 + $0x64] sm:$0xf] }
 0x105   : > { %12644 = vmatpush3.bf16.msra.mxu0 %v4880_v17  ;;  %12581 = vmatprep.mubr.msk.bf16.mxu0 %vm1002_vm5, %v13044_v31  ;;  %v4012_v18 = vsel %vm13278_vm6, %v4007_v37, %v4011_v45  ;;  %v4017_v63 = vrot.slane %v4016_v62, 4  ;;  %v4039_v4 = vrot.slane %v4037_v22, 4  ;;  %v4048_v7 = vshrl.u32 %v3894_v28, 16  ;;  %v12383_v15 = vpop.f32.mrf.mxu0  ;;  %v13046_v45 = vld [vmem:[#allocation2 + $0x48] sm:$0xff]  }
 0x106   : > { %12615 = vmatprep.mubr.msk.bf16.mxu1 %vm1002_vm5, %v11453_v21  ;;  %v14363_v44 = vadd.f32 %v1400_v43, %v1108_v9  ;;  %v4030_v46 = vor.u32 %v4029_v57, %v4026_v54  ;;  %v4045_v52 = vrot.slane %v4043_v56, 5  ;;  %v4051_v58 = vshll.u32 %v3894_v28, 16  ;;  %v14383_v10 = vld [vmem:[#allocation2 + $0x68] sm:$0x1] }
 0x107   : > { %v4022_v38 = vsel %vm13278_vm6, %v4017_v63, %v4021_v34  ;;  %v4040_v2 = vor.u32 %v4039_v4, %v4035_v51  ;;  %v4050_v17 = vrot.slane %v4048_v7, 4  ;;  %v4057_v40 = vshll.u32 %v14357_v47, 16  ;;  %v1121_v14 = vpop.f32.mrf.mxu0  ;;  %v12421_v54 = vpop.f32.mrf.mxu1  ;;  %v3900_v63 = vld [vmem:[#allocation2 + $0x6c] sm:$0xf] }
 0x108   : > { %v11454_v1 = vcombine.low %v4012_v18, %v4022_v38  ;;  %v14370_v26 = vadd.f32 %v12417_v59, %v12383_v15  ;;  %v4031_v43 = vrot.slane %v4030_v46, 4  ;;  %v4053_v50 = vrot.slane %v4051_v58, 5  ;;  %v14391_v58 = vld [vmem:[#allocation2 + $0x70] sm:$0xf] }
 0x109   : > { %v4041_v31 = vrot.slane %v4040_v2, 4  ;;  %v4059_v11 = vrot.slane %v4057_v40, 5  ;;  %v4061_v16 = vshrl.u32 %v14357_v47, 16  ;;  %v4067_v34 = vshll.u32 %v14365_v3, 16  ;;  %v12384_v62 = vpop.f32.mrf.mxu0  ;;  %v1429_v57 = vpop.f32.mrf.mxu1 }
 0x10a   : > { %12616 = vmatmul.mubr.msk.bf16.gmra.mxu1 %vm1002_vm5, %v11454_v1  ;;  %v4036_v12 = vsel %vm13278_vm6, %v4031_v43, %v4035_v51  ;;  %v14377_v33 = vadd.f32 %v1413_v25, %v1121_v14  ;;  %v4054_v59 = vor.u32 %v4053_v50, %v4050_v17  ;;  %v4072_v22 = vshrl.u32 %v3897_v60, 16  ;;  %v14399_v14 = vld [vmem:[#allocation2 + $0x74] sm:$0x1] }
 0x10b   : > { %v4046_v28 = vsel %vm13278_vm6, %v4041_v31, %v4045_v52  ;;  %v4063_v21 = vrot.slane %v4061_v16, 4  ;;  %v4069_v37 = vrot.slane %v4067_v34, 5  ;;  %v14386_v51 = vadd.f32 %v12418_v53, %v12384_v62  ;;  %v1124_v4 = vpop.f32.mrf.mxu0  ;;  %v12422_v38 = vpop.f32.mrf.mxu1 }
 0x10c   : > { %12582 = vmatmul.mubr.msk.bf16.gmra.mxu0 %vm1002_vm5, %v13045_v6  ;;  %v11455_v56 = vcombine.low %v4036_v12, %v4046_v28  ;;  %v4055_v18 = vrot.slane %v4054_v59, 4  ;;  %v4075_v25 = vshll.u32 %v3897_v60, 16  ;;  %v4074_v7 = vrot.slane %v4072_v22, 4  ;;  %v13047_v60 = vld [vmem:[#allocation2 + $0x54] sm:$0xff]  }
 0x10d   : > { %12585 = vmatprep.mubr.msk.bf16.mxu0 %vm1002_vm5, %v13046_v45  ;;  %v4064_v9 = vor.u32 %v4063_v21, %v4059_v11  ;;  %v4081_v46 = vshll.u32 %v14379_v41, 16  ;;  %v4085_v52 = vshrl.u32 %v14379_v41, 16  ;;  %v14396_v15 = vadd.f32 %v1416_v48, %v1124_v4  ;;  %v1432_v50 = vpop.f32.mrf.mxu1 }
 0x10e   : > { %12619 = vmatprep.mubr.msk.bf16.mxu1 %vm1002_vm5, %v11455_v56  ;;  %v4060_v53 = vsel %vm13278_vm6, %v4055_v18, %v4059_v11  ;;  %v4077_v2 = vrot.slane %v4075_v25, 5  ;;  %v4091_v17 = vshll.u32 %v14383_v10, 16  ;;  %v4096_v43 = vshrl.u32 %v3900_v63, 16  ;;  %v13048_v11 = vld [vmem:[#allocation2 + $0x60] sm:$0xff]   ;;  %v3903_v25 = vld [vmem:[#allocation2 + $0x78] sm:$0xf] }
 0x10f   : > { %18718 = vst [vmem:[#allocation6_spill] sm:$0xff] %v14396_v15  ;;  %v4065_v40 = vrot.slane %v4064_v9, 4  ;;  %v4083_v6 = vrot.slane %v4081_v46, 5  ;;  %v4087_v1 = vrot.slane %v4085_v52, 4  ;;  %v4099_v16 = vshll.u32 %v3900_v63, 16  ;;  %v12387_v12 = vpop.f32.mrf.mxu0 }
 0x110   : > { %v4078_v45 = vor.u32 %v4077_v2, %v4074_v7  ;;  %v4093_v31 = vrot.slane %v4091_v17, 5  ;;  %v4105_v34 = vshll.u32 %v14391_v58, 16  ;;  %v4098_v28 = vrot.slane %v4096_v43, 4  ;;  %v12425_v52 = vpop.f32.mrf.mxu1  ;;  %v14414_v2 = vld [vmem:[#allocation2 + $0x7c] sm:$0xf] }
 0x111   : > { %v4070_v48 = vsel %vm13278_vm6, %v4065_v40, %v4069_v37  ;;  %v4088_v59 = vor.u32 %v4087_v1, %v4083_v6  ;;  %v4109_v21 = vshrl.u32 %v14391_v58, 16  ;;  %v14405_v22 = vadd.f32 %v12421_v54, %v12387_v12  ;;  %v1137_v4 = vpop.f32.mrf.mxu0 }
 0x112   : > { %v11456_v62 = vcombine.low %v4060_v53, %v4070_v48  ;;  %v4079_v56 = vrot.slane %v4078_v45, 4  ;;  %v4101_v18 = vrot.slane %v4099_v16, 5  ;;  %v4107_v63 = vrot.slane %v4105_v34, 5  ;;  %v14419_v45 = vld [vmem:[#allocation2 + $0x80] sm:$0x1] }
 0x113   : > { %18719 = vst [vmem:[#allocation7_spill] sm:$0xff] %v14405_v22  ;;  %v4089_v9 = vrot.slane %v4088_v59, 4  ;;  %v4111_v7 = vrot.slane %v4109_v21, 4  ;;  %v4115_v46 = vshll.u32 %v14399_v14, 16  ;;  %v14412_v53 = vadd.f32 %v1429_v57, %v1137_v4  ;;  %v12388_v43 = vpop.f32.mrf.mxu0 }
 0x114   : > { %12586 = vmatmul.mubr.msk.bf16.gmra.mxu0 %vm1002_vm5, %v13047_v60  ;;  %12620 = vmatmul.mubr.msk.bf16.gmra.mxu1 %vm1002_vm5, %v11456_v62  ;;  %v4084_v37 = vsel %vm13278_vm6, %v4079_v56, %v4083_v6  ;;  %v4102_v54 = vor.u32 %v4101_v18, %v4098_v28  ;;  %v4120_v60 = vshrl.u32 %v3903_v25, 16  ;;  %v14421_v48 = vadd.f32 %v12422_v38, %v12388_v43  ;;  %v3906_v6 = vld [vmem:[#allocation2 + $0x84] sm:$0xf]  ;;  %v13049_v62 = vld [vmem:[#allocation2 + $0x6c] sm:$0xff]  }
 0x115   : > { %18720 = vst [vmem:[#allocation8_spill] sm:$0xff] %v14412_v53  ;;  %12589 = vmatprep.mubr.msk.bf16.mxu0 %vm1002_vm5, %v13048_v11  ;;  %v4094_v17 = vsel %vm13278_vm6, %v4089_v9, %v4093_v31  ;;  %v4112_v40 = vor.u32 %v4111_v7, %v4107_v63  ;;  %v4117_v1 = vrot.slane %v4115_v46, 5  ;;  %v4123_v57 = vshll.u32 %v3903_v25, 16  ;;  %v1140_v59 = vpop.f32.mrf.mxu0  ;;  %v1445_v31 = vpop.f32.mrf.mxu1  ;;  %v14431_v9 = vld [vmem:[#allocation2 + $0x88] sm:$0xf]  ;;  %v13050_v7 = vld [vmem:[#allocation2 + $0x78] sm:$0xff]  }
 0x116   : > { %v11457_v16 = vcombine.low %v4084_v37, %v4094_v17  ;;  %v4103_v34 = vrot.slane %v4102_v54, 4  ;;  %18721 = vst [vmem:[#allocation9_spill] sm:$0xff] %v14421_v48  ;;  %v4122_v28 = vrot.slane %v4120_v60, 4  ;;  %v4129_v11 = vshll.u32 %v14414_v2, 16  ;;  %v14435_v17 = vld [vmem:[#allocation2 + $0x8c] sm:$0x1] }
 0x117   : > { %v4113_v12 = vrot.slane %v4112_v40, 4  ;;  %v4133_v21 = vshrl.u32 %v14414_v2, 16  ;;  %v14428_v18 = vadd.f32 %v1432_v50, %v1140_v59  ;;  %v4125_v38 = vrot.slane %v4123_v57, 5  ;;  %v12391_v46 = vpop.f32.mrf.mxu0  ;;  %v13052_v53 = vld [vmem:[#allocation2 + $0x90] sm:$0xff]  }
 0x118   : > { %12623 = vmatprep.mubr.msk.bf16.mxu1 %vm1002_vm5, %v11457_v16  ;;  %v4108_v56 = vsel %vm13278_vm6, %v4103_v34, %v4107_v63  ;;  %v4139_v25 = vshll.u32 %v14419_v45, 16  ;;  %v4131_v37 = vrot.slane %v4129_v11, 5  ;;  %v4144_v40 = vshrl.u32 %v3906_v6, 16  ;;  %v3909_v16 = vld [vmem:[#allocation2 + $0x90] sm:$0xf] }
 0x119   : > { %18722 = vst [vmem:[#allocation10_spill] sm:$0xff] %v14428_v18  ;;  %v4118_v4 = vsel %vm13278_vm6, %v4113_v12, %v4117_v1  ;;  %v4135_v54 = vrot.slane %v4133_v21, 4  ;;  %v14437_v60 = vadd.f32 %v12425_v52, %v12391_v46  ;;  %v4126_v50 = vor.u32 %v4125_v38, %v4122_v28  ;;  %v1153_v57 = vpop.f32.mrf.mxu0  ;;  %v12426_v1 = vpop.f32.mrf.mxu1 }
 0x11a   : > { %v11458_v43 = vcombine.low %v4108_v56, %v4118_v4  ;;  %v4141_v63 = vrot.slane %v4139_v25, 5  ;;  %v4146_v59 = vrot.slane %v4144_v40, 4  ;;  %v4147_v18 = vshll.u32 %v3906_v6, 16  ;;  %v14447_v25 = vld [vmem:[#allocation2 + $0x94] sm:$0xf] }
 0x11b   : > { %18723 = vst [vmem:[#allocation11_spill] sm:$0xff] %v14437_v60  ;;  %v4136_v34 = vor.u32 %v4135_v54, %v4131_v37  ;;  %v4153_v48 = vshll.u32 %v14431_v9, 16  ;;  %v4127_v12 = vrot.slane %v4126_v50, 4  ;;  %v14442_v11 = vadd.f32 %v1445_v31, %v1153_v57  ;;  %v12392_v6 = vpop.f32.mrf.mxu0  ;;  %v14453_v31 = vld [vmem:[#allocation2 + $0x98] sm:$0x1] }
 0x11c   : > { %12590 = vmatmul.mubr.msk.bf16.gmra.mxu0 %vm1002_vm5, %v13049_v62  ;;  %12624 = vmatmul.mubr.msk.bf16.gmra.mxu1 %vm1002_vm5, %v11458_v43  ;;  %v4157_v52 = vshrl.u32 %v14431_v9, 16  ;;  %v4163_v28 = vshll.u32 %v14435_v17, 16  ;;  %v4149_v56 = vrot.slane %v4147_v18, 5  ;;  %v4168_v4 = vshrl.u32 %v3909_v16, 16  ;;  %18726 = vst [vmem:[#allocation14_spill] sm:$0xff] %v14453_v31 }
 0x11d   : > { %18724 = vst [vmem:[#allocation12_spill] sm:$0xff] %v14442_v11  ;;  %12593 = vmatprep.mubr.msk.bf16.mxu0 %vm1002_vm5, %v13050_v7  ;;  %v4137_v21 = vrot.slane %v4136_v34, 4  ;;  %v4155_v38 = vrot.slane %v4153_v48, 5  ;;  %v4132_v62 = vsel %vm13278_vm6, %v4127_v12, %v4131_v37  ;;  %v14451_v54 = vadd.f32 %v12426_v1, %v12392_v6  ;;  %v14457_v7 = vpop.f32.mrf.mxu1  ;;  %v3912_v50 = vld [vmem:[#allocation2 + $0x9c] sm:$0xf]  ;;  %v13051_v34 = vld [vmem:[#allocation2 + $0x84] sm:$0xff]  }
 0x11e   : > { %v4159_v46 = vrot.slane %v4157_v52, 4  ;;  %v4150_v43 = vor.u32 %v4149_v56, %v4146_v59  ;;  %18727 = vst [vmem:[#allocation15_spill] sm:$0xff] %v14457_v7  ;;  %v4170_v18 = vrot.slane %v4168_v4, 4  ;;  %v4171_v48 = vshll.u32 %v3909_v16, 16 }
 0x11f   : > { %18725 = vst [vmem:[#allocation13_spill] sm:$0xff] %v14451_v54  ;;  %v4142_v40 = vsel %vm13278_vm6, %v4137_v21, %v4141_v63  ;;  %v4165_v60 = vrot.slane %v4163_v28, 5  ;;  %v4177_v37 = vshll.u32 %v14447_v25, 16  ;;  %v4181_v52 = vshrl.u32 %v14447_v25, 16  ;;  %v14462_v63 = vld [vmem:[#allocation2 + $0xa0] sm:$0xf] }
 0x120   : > { %v11459_v57 = vcombine.low %v4132_v62, %v4142_v40  ;;  %v4160_v11 = vor.u32 %v4159_v46, %v4155_v38  ;;  %v4151_v1 = vrot.slane %v4150_v43, 4  ;;  %v4173_v12 = vrot.slane %v4171_v48, 5  ;;  %18728 = vst [vmem:[#allocation16_spill] sm:$0xff] %v14462_v63  ;;  %v14467_v43 = vld [vmem:[#allocation2 + $0xa4] sm:$0x1] }
 0x121   : > { %v4187_v6 = vshll.u32 %v14453_v31, 16  ;;  %v4179_v16 = vrot.slane %v4177_v37, 5  ;;  %v4192_v21 = vshrl.u32 %v3912_v50, 16  ;;  %v4195_v56 = vshll.u32 %v3912_v50, 16  ;;  %18729 = vst [vmem:[#allocation17_spill] sm:$0xff] %v14467_v43 }
 0x122   : > { %12627 = vmatprep.mubr.msk.bf16.mxu1 %vm1002_vm5, %v11459_v57  ;;  %v4161_v59 = vrot.slane %v4160_v11, 4  ;;  %v4156_v28 = vsel %vm13278_vm6, %v4151_v1, %v4155_v38  ;;  %v12429_v4 = vpop.f32.mrf.mxu1  ;;  %v4174_v62 = vor.u32 %v4173_v12, %v4170_v18  ;;  %v4183_v46 = vrot.slane %v4181_v52, 4  ;;  %v3915_v48 = vld [vmem:[#allocation2 + $0xa8] sm:$0xf]  ;;  %v14475_v52 = vld [vmem:[#allocation2 + $0xac] sm:$0xf] }
 0x123   : > { %v4189_v40 = vrot.slane %v4187_v6, 5  ;;  %v4194_v57 = vrot.slane %v4192_v21, 4  ;;  %v4197_v11 = vrot.slane %v4195_v56, 5  ;;  %v4201_v37 = vshll.u32 %v14462_v63, 16  ;;  %18730 = vst [vmem:[#allocation18_spill] sm:$0xff] %v14475_v52  ;;  %v14477_v6 = vpop.f32.mrf.mxu0 }
 0x124   : > { %12594 = vmatmul.mubr.msk.bf16.gmra.mxu0 %vm1002_vm5, %v13051_v34  ;;  %v4166_v7 = vsel %vm13278_vm6, %v4161_v59, %v4165_v60  ;;  %v4175_v38 = vrot.slane %v4174_v62, 4  ;;  %v4184_v1 = vor.u32 %v4183_v46, %v4179_v16  ;;  %v1461_v18 = vpop.f32.mrf.mxu1  ;;  %v4205_v12 = vshrl.u32 %v14462_v63, 16  ;;  %18731 = vst [vmem:[#allocation19_spill] sm:$0xff] %v14477_v6  ;;  %v13053_v46 = vld [vmem:[#allocation2 + $0x9c] sm:$0xff]   ;;  %v13054_v6 = vld [vmem:[#allocation2 + $0xa8] sm:$0xff]  }
 0x125   : > { %v11460_v50 = vcombine.low %v4156_v28, %v4166_v7  ;;  %12597 = vmatprep.mubr.msk.bf16.mxu0 %vm1002_vm5, %v13052_v53  ;;  %v4198_v34 = vor.u32 %v4197_v11, %v4194_v57  ;;  %v4203_v54 = vrot.slane %v4201_v37, 5  ;;  %v4211_v60 = vshll.u32 %v14467_v43, 16  ;;  %v14483_v28 = vld [vmem:[#allocation2 + $0xb0] sm:$0x1] }
 0x126   : > { %v4216_v59 = vshrl.u32 %v3915_v48, 16  ;;  %v4180_v7 = vsel %vm13278_vm6, %v4175_v38, %v4179_v16  ;;  %v4185_v53 = vrot.slane %v4184_v1, 4  ;;  %v4207_v21 = vrot.slane %v4205_v12, 4  ;;  %v12430_v56 = vpop.f32.mrf.mxu1  ;;  %v3918_v1 = vld [vmem:[#allocation2 + $0xb4] sm:$0xf] }
 0x127   : > { %12628 = vmatmul.mubr.msk.bf16.gmra.mxu1 %vm1002_vm5, %v11460_v50  ;;  %v4219_v62 = vshll.u32 %v3915_v48, 16  ;;  %v4199_v63 = vrot.slane %v4198_v34, 4  ;;  %v4213_v22 = vrot.slane %v4211_v60, 5  ;;  %v4225_v11 = vshll.u32 %v14475_v52, 16  ;;  %v14491_v12 = vld [vmem:[#allocation2 + $0xb8] sm:$0xf] }
 0x128   : > { %v4218_v57 = vrot.slane %v4216_v59, 4  ;;  %v4190_v37 = vsel %vm13278_vm6, %v4185_v53, %v4189_v40  ;;  %v4208_v50 = vor.u32 %v4207_v21, %v4203_v54  ;;  %v14488_v43 = vpop.f32.mrf.mxu1  ;;  %v4229_v38 = vshrl.u32 %v14475_v52, 16  ;;  %18733 = vst [vmem:[#allocation21_spill] sm:$0xff] %v14491_v12 }
 0x129   : > { %18732 = vst [vmem:[#allocation20_spill] sm:$0xff] %v14488_v43  ;;  %v4221_v16 = vrot.slane %v4219_v62, 5  ;;  %v11461_v15 = vcombine.low %v4180_v7, %v4190_v37  ;;  %v4204_v34 = vsel %vm13278_vm6, %v4199_v63, %v4203_v54  ;;  %v4227_v60 = vrot.slane %v4225_v11, 5 }
 0x12a   : > { %v12395_v48 = vpop.f32.mrf.mxu0  ;;  %v4235_v59 = vshll.u32 %v14483_v28, 16  ;;  %v4209_v40 = vrot.slane %v4208_v50, 4  ;;  %v4231_v21 = vrot.slane %v4229_v38, 4  ;;  %v4240_v37 = vshrl.u32 %v3918_v1, 16  ;;  %v14506_v50 = vld [vmem:[#allocation2 + $0xbc] sm:$0x1] }
 0x12b   : > { %v14496_v31 = vadd.f32 %v12429_v4, %v12395_v48  ;;  %v4222_v53 = vor.u32 %v4221_v16, %v4218_v57  ;;  %12631 = vmatprep.mubr.msk.bf16.mxu1 %vm1002_vm5, %v11461_v15  ;;  %v4243_v52 = vshll.u32 %v3918_v1, 16  ;;  %v4249_v54 = vshll.u32 %v14491_v12, 16  ;;  %18736 = vst [vmem:[#allocation24_spill] sm:$0xff] %v14506_v50  ;;  %v224_v15 = vld [vmem:[%s13180_s25 + $0x1a0] sm:$0xff] }
 0x12c   : > { %12598 = vmatmul.mubr.msk.bf16.gmra.mxu0 %vm1002_vm5, %v13053_v46  ;;  %v1169_v62 = vpop.f32.mrf.mxu0  ;;  %v12433_v43 = vpop.f32.mrf.mxu1  ;;  %v4237_v7 = vrot.slane %v4235_v59, 5  ;;  %v4214_v4 = vsel %vm13278_vm6, %v4209_v40, %v4213_v22  ;;  %v4232_v11 = vor.u32 %v4231_v21, %v4227_v60  ;;  %v223_v46 = vld [vmem:[%s13180_s25 + $0x198] sm:$0xff]  ;;  %v4242_v59 = vrot.slane %v4240_v37, 4 }
 0x12d   : > { %18734 = vst [vmem:[#allocation22_spill] sm:$0xff] %v14496_v31  ;;  %v14501_v63 = vadd.f32 %v1461_v18, %v1169_v62  ;;  %12601 = vmatprep.mubr.msk.bf16.mxu0 %vm1002_vm5, %v13054_v6  ;;  %v4223_v57 = vrot.slane %v4222_v53, 4  ;;  %v11462_v16 = vcombine.low %v4204_v34, %v4214_v4  ;;  %v4245_v1 = vrot.slane %v4243_v52, 5  ;;  %v3921_v18 = vld [vmem:[#allocation2 + $0xc0] sm:$0xf]  ;;  %v13055_v34 = vld [vmem:[#allocation2 + $0xb4] sm:$0xff]  }
 0x12e   : > { %v12396_v38 = vpop.f32.mrf.mxu0  ;;  %v1477_v48 = vpop.f32.mrf.mxu1  ;;  %v4251_v31 = vrot.slane %v4249_v54, 5  ;;  %v4233_v6 = vrot.slane %v4232_v11, 4  ;;  %v4253_v40 = vshrl.u32 %v14491_v12, 16  ;;  %v4259_v37 = vshll.u32 %v14506_v50, 16  ;;  %v13056_v11 = vld [vmem:[#allocation2 + $0xc0] sm:$0xff]  }
 0x12f   : > { %18735 = vst [vmem:[#allocation23_spill] sm:$0xff] %v14501_v63  ;;  %v14510_v62 = vadd.f32 %v12430_v56, %v12396_v38  ;;  %v4228_v22 = vsel %vm13278_vm6, %v4223_v57, %v4227_v60  ;;  %12632 = vmatmul.mubr.msk.bf16.gmra.mxu1 %vm1002_vm5, %v11462_v16  ;;  %v4246_v21 = vor.u32 %v4245_v1, %v4242_v59  ;;  %v14519_v63 = vld [vmem:[#allocation2 + $0xc4] sm:$0xf]  ;;  %v225_v56 = vld [vmem:[%s13180_s25 + $0x1a8] sm:$0x3] }
 0x130   : > { %v14516_v53 = vpop.f32.mrf.mxu0  ;;  %v12434_v52 = vpop.f32.mrf.mxu1  ;;  %v12030_v4 = vpack.c.bf16 %v223_v46, %v223_v46  ;;  %v12031_v54 = vpack.c.bf16 %v224_v15, %v224_v15  ;;  %18739 = vst [vmem:[#allocation27_spill] sm:$0xff] %v14519_v63  ;;  %v4238_v60 = vsel %vm13278_vm6, %v4233_v6, %v4237_v7  ;;  %v4255_v57 = vrot.slane %v4253_v40, 4  ;;  %v14525_v16 = vld [vmem:[#allocation2 + $0xc8] sm:$0x1]  ;;  %v4605_v6 = vld [vmem:[#allocation2 + $0x18] sm:$0xe] }
 0x131   : > { %18737 = vst [vmem:[#allocation25_spill] sm:$0xff] %v14510_v62  ;;  %18738 = vst [vmem:[#allocation26_spill] sm:$0xff] %v14516_v53  ;;  %v4264_v53 = vshrl.u32 %v3921_v18, 16  ;;  %v11463_v62 = vcombine.low %v4228_v22, %v4238_v60  ;;  %v4247_v59 = vrot.slane %v4246_v21, 4  ;;  %v4261_v1 = vrot.slane %v4259_v37, 5 }
 0x132   : > { %v14527_v50 = vpop.f32.mrf.mxu1  ;;  %513 = vst.msk [vmem:[#allocation2 + $0xcc] sm:$0xf] %vm460_vm1, %v12030_v4  ;;  %514 = vst.msk [vmem:[#allocation2 + $0xd0] sm:$0xf] %vm460_vm1, %v12031_v54  ;;  %v4267_v46 = vshll.u32 %v3921_v18, 16  ;;  %v4256_v15 = vor.u32 %v4255_v57, %v4251_v31  ;;  %v4273_v12 = vshll.u32 %v14519_v63, 16  ;;  %v12032_v4 = vpack.c.bf16 %v225_v56, %v225_v56 }
 0x133   : > { %18740 = vst [vmem:[#allocation28_spill] sm:$0xff] %v14527_v50  ;;  %v4266_v38 = vrot.slane %v4264_v53, 4  ;;  %v4277_v7 = vshrl.u32 %v14519_v63, 16  ;;  %12635 = vmatprep.mubr.msk.bf16.mxu1 %vm1002_vm5, %v11463_v62  ;;  %v4252_v22 = vsel %vm13278_vm6, %v4247_v59, %v4251_v31  ;;  %v4283_v37 = vshll.u32 %v14525_v16, 16 }
 0x134   : > { %v12399_v40 = vpop.f32.mrf.mxu0  ;;  %12602 = vmatmul.mubr.msk.bf16.gmra.mxu0 %vm1002_vm5, %v13055_v34  ;;  %v4269_v21 = vrot.slane %v4267_v46, 5  ;;  %v4257_v53 = vrot.slane %v4256_v15, 4  ;;  %v4275_v60 = vrot.slane %v4273_v12, 5  ;;  %515 = vst.msk [vmem:[#allocation2 + $0xd4] sm:$0x1] %vm463_vm2, %v12032_v4  ;;  %v11483_v62 = vrot.slane %v4605_v6, 9  ;;  %vm15855_vm2 = vmand %vm460_vm1, %vm5766_vm14 }
 0x135   : > { %v14538_v18 = vadd.f32 %v12433_v43, %v12399_v40  ;;  %12605 = vmatprep.mubr.msk.bf16.mxu0 %vm1002_vm5, %v13056_v11  ;;  %v12437_v54 = vpop.f32.mrf.mxu1  ;;  %v4279_v57 = vrot.slane %v4277_v7, 4  ;;  %v4285_v34 = vrot.slane %v4283_v37, 5  ;;  %v4671_v31 = vrot.slane %v14274_v55, 5  ;;  %v4606_v15 = vld [vmem:[#allocation2 + $0x24] sm:$0xe] }
 0x136   : > { %v1185_v50 = vpop.f32.mrf.mxu0  ;;  %v4270_v63 = vor.u32 %v4269_v21, %v4266_v38  ;;  %v4262_v43 = vsel %vm13278_vm6, %v4257_v53, %v4261_v1  ;;  %v4674_v11 = vrot.slane %v14277_v0, 5  ;;  %v4681_v12 = vrot.slane %v14290_v29, 5 }
 0x137   : > { %v14543_v59 = vadd.f32 %v1477_v48, %v1185_v50  ;;  %v4280_v56 = vor.u32 %v4279_v57, %v4275_v60  ;;  %v1493_v46 = vpop.f32.mrf.mxu1  ;;  %v11464_v7 = vcombine.low %v4252_v22, %v4262_v43  ;;  %v4673_v21 = vrot.slane %v4671_v31, 4 }
 0x138   : > { %v12400_v38 = vpop.f32.mrf.mxu0  ;;  %v4271_v40 = vrot.slane %v4270_v63, 4  ;;  %v4672_v48 = vsel %vm13455_vm9, %v11483_v62, %v4671_v31  ;;  %v18744_v4 = vrot.slane %v14286_v42, 5 }
 0x139   : > { %18741 = vst [vmem:[#allocation29_spill] sm:$0xff] %v14543_v59  ;;  %v14549_v37 = vadd.f32 %v12434_v52, %v12400_v38  ;;  %v13057_v6 = vld [vmem:[#allocation2 + $0xcc] sm:$0xff]   ;;  %v4281_v55 = vrot.slane %v4280_v56, 4  ;;  %v12438_v50 = vpop.f32.mrf.mxu1  ;;  %12636 = vmatmul.mubr.msk.bf16.gmra.mxu1 %vm1002_vm5, %v11464_v7  ;;  %v4675_v63 = vsel %vm13455_vm9, %v4673_v21, %v4674_v11  ;;  %v11484_v52 = vrot.slane %v4606_v15, 9 }
 0x13a   : > { %v14554_v1 = vpop.f32.mrf.mxu0  ;;  %v4276_v0 = vsel %vm13278_vm6, %v4271_v40, %v4275_v60  ;;  %v3924_v29 = vld [vmem:[#allocation2 + $0xcc] sm:$0xf]  ;;  %v14558_v22 = vld [vmem:[#allocation2 + $0xd0] sm:$0xf]  ;;  %v4680_v53 = vrot.slane %v18744_v4, 4  ;;  %v11500_v15 = vcombine.low %v4672_v48, %v4675_v63 }
 0x13b   : > { %18742 = vst [vmem:[#allocation30_spill] sm:$0xff] %v14549_v37  ;;  %18743 = vst [vmem:[#allocation31_spill] sm:$0xff] %v14554_v1  ;;  %v4286_v62 = vsel %vm13278_vm6, %v4281_v55, %v4285_v34  ;;  %v4288_v31 = vshrl.u32 %v3924_v29, 16  ;;  %v4291_v43 = vshll.u32 %v3924_v29, 16  ;;  %v14567_v56 = vpop.f32.mrf.mxu1  ;;  %v4297_v38 = vshll.u32 %v14558_v22, 16 }
 0x13c   : > { %18745 = vst [vmem:[#allocation32_spill] sm:$0xff] %v14567_v56  ;;  %v12403_v60 = vpop.f32.mrf.mxu0  ;;  %12606 = vmatmul.mubr.msk.bf16.gmra.mxu0 %vm1002_vm5, %v13057_v6  ;;  %v11465_v7 = vcombine.low %v4276_v0, %v4286_v62  ;;  %v4301_v11 = vshrl.u32 %v14558_v22, 16  ;;  %v4607_v40 = vld [vmem:[#allocation2 + $0x30] sm:$0xe]  ;;  %v14574_v4 = vld [vmem:[#allocation2 + $0xd4] sm:$0x1] }
 0x13d   : > { %v14572_v21 = vadd.f32 %v12437_v54, %v12403_v60  ;;  %v4290_v57 = vrot.slane %v4288_v31, 4  ;;  %v4293_v34 = vrot.slane %v4291_v43, 5  ;;  %v18747_v55 = vrot.slane %v14286_v42, 5  ;;  %v12477_v56 = vpop.f32.mrf.mxu1  ;;  %12645 = vmatprep.mubr.msk.bf16.mxu0 %vm1002_vm5, %v11500_v15  ;;  %v4608_v63 = vld [vmem:[#allocation2 + $0x3c] sm:$0xe] }
 0x13e   : > { %12639 = vmatprep.mubr.msk.bf16.mxu1 %vm1002_vm5, %v11465_v7  ;;  %v1201_v6 = vpop.f32.mrf.mxu0  ;;  %v4299_v0 = vrot.slane %v4297_v38, 5  ;;  %v4303_v62 = vrot.slane %v4301_v11, 4  ;;  %v4307_v48 = vshll.u32 %v14574_v4, 16  ;;  %v4682_v54 = vsel %vm13455_vm9, %v4680_v53, %v4681_v12 }
 0x13f   : > { %18746 = vst [vmem:[#allocation33_spill] sm:$0xff] %v14572_v21  ;;  %v4679_v29 = vsel %vm13455_vm9, %v11484_v52, %v18747_v55  ;;  %v14585_v31 = vadd.f32 %v1493_v46, %v1201_v6  ;;  %v4294_v42 = vor.u32 %v4293_v34, %v4290_v57  ;;  %v2165_v60 = vpop.f32.mrf.mxu1  ;;  %v11485_v52 = vrot.slane %v4607_v40, 9  ;;  %v4609_v55 = vld [vmem:[#allocation2 + $0x48] sm:$0xe] }
 0x140   : > { %v11501_v43 = vcombine.low %v4679_v29, %v4682_v54  ;;  %v4304_v1 = vor.u32 %v4303_v62, %v4299_v0  ;;  %v4309_v7 = vrot.slane %v4307_v48, 5  ;;  %v12404_v21 = vpop.f32.mrf.mxu0  ;;  %v4685_v38 = vrot.slane %v14305_v27, 5 }
 0x141   : > { %v4688_v11 = vrot.slane %v14313_v35, 5  ;;  %v4295_v37 = vrot.slane %v4294_v42, 4  ;;  %v14589_v15 = vadd.f32 %v12438_v50, %v12404_v21  ;;  %v12478_v59 = vpop.f32.mrf.mxu1  ;;  %v11486_v12 = vrot.slane %v4608_v63, 9 }
 0x142   : > { %v4692_v46 = vrot.slane %v14323_v49, 5  ;;  %v4305_v53 = vrot.slane %v4304_v1, 4  ;;  %v14592_v57 = vpop.f32.mrf.mxu0  ;;  %v4686_v40 = vsel %vm13455_vm9, %v11485_v52, %v4685_v38  ;;  %v4687_v34 = vrot.slane %v4685_v38, 4  ;;  %v4610_v49 = vld [vmem:[#allocation2 + $0x54] sm:$0xe] }
 0x143   : > { %18748 = vst [vmem:[#allocation34_spill] sm:$0xff] %v14592_v57  ;;  %v11487_v29 = vrot.slane %v4609_v55, 9  ;;  %v4709_v6 = vrot.slane %v14365_v3, 5  ;;  %v4300_v27 = vsel %vm13278_vm6, %v4295_v37, %v4299_v0  ;;  %v14599_v35 = vpop.f32.mrf.mxu1  ;;  %v4699_v3 = vrot.slane %v14339_v36, 5  ;;  %v4611_v55 = vld [vmem:[#allocation2 + $0x60] sm:$0xe] }
 0x144   : > { %v4693_v50 = vsel %vm13455_vm9, %v11486_v12, %v4692_v46  ;;  %v4694_v21 = vrot.slane %v4692_v46, 4  ;;  %v4310_v1 = vsel %vm13278_vm6, %v4305_v53, %v4309_v7  ;;  %v12443_v62 = vpop.f32.mrf.mxu0  ;;  %12646 = vmatmul.mubr.msk.bf16.vlgmr.msra.gmra.mxu0 %vm1002_vm5, %v11501_v43  ;;  %v4689_v48 = vsel %vm13455_vm9, %v4687_v34, %v4688_v11  ;;  %v4612_v7 = vld [vmem:[#allocation2 + $0x6c] sm:$0xe] }
 0x145   : > { %v4702_v37 = vrot.slane %v14345_v24, 5  ;;  %v11466_v0 = vcombine.low %v4300_v27, %v4310_v1  ;;  %v1935_v54 = vadd.f32 %v12443_v62, %v14303_v8  ;;  %v11502_v63 = vcombine.low %v4686_v40, %v4689_v48 }
 0x146   : > { %v18749_v42 = vrot.slane %v14330_v23, 5  ;;  %v4723_v43 = vrot.slane %v14399_v14, 5  ;;  %v1806_v38 = vpop.f32.mrf.mxu0  ;;  %v12481_v12 = vpop.f32.mrf.mxu1  ;;  %v4700_v36 = vsel %vm13455_vm9, %v11487_v29, %v4699_v3  ;;  %v4701_v11 = vrot.slane %v4699_v3, 4 }
 0x147   : > { %v11488_v24 = vrot.slane %v4610_v49, 9  ;;  %12640 = vmatmul.mubr.msk.bf16.gmra.mxu1 %vm1002_vm5, %v11466_v0  ;;  %v1933_v8 = vadd.f32 %v1806_v38, %v14311_v20  ;;  %v14620_v46 = vadd.f32 %v12477_v56, %v1935_v54  ;;  %12649 = vmatprep.mubr.msk.bf16.mxu0 %vm1002_vm5, %v11502_v63  ;;  %v4706_v53 = vrot.slane %v14357_v47, 5 }
 0x148   : > { %v4696_v52 = vsel %vm13455_vm9, %v4694_v21, %v18749_v42  ;;  %v12444_v40 = vpop.f32.mrf.mxu0  ;;  %v2181_v14 = vpop.f32.mrf.mxu1  ;;  %v4703_v34 = vsel %vm13455_vm9, %v4701_v11, %v4702_v37  ;;  %v11489_v27 = vrot.slane %v4611_v55, 9  ;;  %v4713_v29 = vrot.slane %v14379_v41, 5  ;;  %v4613_v11 = vld [vmem:[#allocation2 + $0x78] sm:$0xe] }
 0x149   : > { %v11503_v23 = vcombine.low %v4693_v50, %v4696_v52  ;;  %v11490_v21 = vrot.slane %v4612_v7, 9  ;;  %v1936_v49 = vadd.f32 %v12444_v40, %v14316_v13  ;;  %v14628_v1 = vadd.f32 %v2165_v60, %v1933_v8 }
 0x14a   : > { %v11504_v20 = vcombine.low %v4700_v36, %v4703_v34  ;;  %v4716_v56 = vrot.slane %v14383_v10, 5  ;;  %v1809_v62 = vpop.f32.mrf.mxu0  ;;  %v12482_v50 = vpop.f32.mrf.mxu1  ;;  %v4707_v47 = vsel %vm13455_vm9, %v11488_v24, %v4706_v53  ;;  %v4708_v48 = vrot.slane %v4706_v53, 4 }
 0x14b   : > { %v4715_v3 = vrot.slane %v4713_v29, 4  ;;  %v4720_v37 = vrot.slane %v14391_v58, 5  ;;  %v14635_v0 = vadd.f32 %v1809_v62, %v14328_v61  ;;  %v14637_v41 = vadd.f32 %v12478_v59, %v1936_v49 }
 0x14c   : > { %v12447_v13 = vpop.f32.mrf.mxu0  ;;  %12650 = vmatmul.mubr.msk.bf16.gmra.mxu0 %vm1002_vm5, %v11503_v23  ;;  %v14640_v60 = vpop.f32.mrf.mxu1  ;;  %v4710_v10 = vsel %vm13455_vm9, %v4708_v48, %v4709_v6  ;;  %v4714_v52 = vsel %vm13455_vm9, %v11489_v27, %v4713_v29  ;;  %v4727_v7 = vrot.slane %v14414_v2, 5  ;;  %v11491_v29 = vrot.slane %v4613_v11, 9 }
 0x14d   : > { %v4721_v54 = vsel %vm13455_vm9, %v11490_v21, %v4720_v37  ;;  %v4722_v63 = vrot.slane %v4720_v37, 4  ;;  %v1939_v42 = vadd.f32 %v12447_v13, %v14341_v39  ;;  %12653 = vmatprep.mubr.msk.bf16.mxu0 %vm1002_vm5, %v11504_v20  ;;  %v11505_v61 = vcombine.low %v4707_v47, %v4710_v10 }
 0x14e   : > { %v1822_v58 = vpop.f32.mrf.mxu0  ;;  %v12485_v59 = vpop.f32.mrf.mxu1  ;;  %v4717_v55 = vsel %vm13455_vm9, %v4715_v3, %v4716_v56  ;;  %v4729_v21 = vrot.slane %v4727_v7, 4  ;;  %v4734_v20 = vrot.slane %v14431_v9, 5  ;;  %v4737_v9 = vrot.slane %v14435_v17, 5 }
 0x14f   : > { %v4724_v6 = vsel %vm13455_vm9, %v4722_v63, %v4723_v43  ;;  %v1937_v38 = vadd.f32 %v1822_v58, %v14349_v19  ;;  %v14656_v36 = vadd.f32 %v12481_v12, %v1939_v42  ;;  %v11506_v40 = vcombine.low %v4714_v52, %v4717_v55  ;;  %v18750_v55 = vld [vmem:[#allocation14_spill] sm:$0xff] }
 0x150   : > { %v11507_v39 = vcombine.low %v4721_v54, %v4724_v6  ;;  %v12448_v24 = vpop.f32.mrf.mxu0  ;;  %v2197_v8 = vpop.f32.mrf.mxu1  ;;  %v4730_v43 = vrot.slane %v14419_v45, 5  ;;  %v4736_v42 = vrot.slane %v4734_v20, 4 }
 0x151   : > { %v1940_v23 = vadd.f32 %v12448_v24, %v14354_v5  ;;  %v14659_v53 = vadd.f32 %v2181_v14, %v1937_v38  ;;  %v4614_v14 = vld [vmem:[#allocation2 + $0x84] sm:$0xe] }
 0x152   : > { %v1825_v34 = vpop.f32.mrf.mxu0  ;;  %v12486_v27 = vpop.f32.mrf.mxu1  ;;  %v4731_v45 = vsel %vm13455_vm9, %v4729_v21, %v4730_v43  ;;  %v11492_v13 = vrot.slane %v4614_v14, 9  ;;  %v18754_v43 = vld [vmem:[#allocation18_spill] sm:$0xff] }
 0x153   : > { %v14663_v2 = vadd.f32 %v1825_v34, %v14363_v44  ;;  %v14665_v19 = vadd.f32 %v12482_v50, %v1940_v23  ;;  %v4728_v44 = vsel %vm13455_vm9, %v11491_v29, %v4727_v7  ;;  %v4741_v50 = vrot.slane %v14447_v25, 5  ;;  %v4616_v23 = vld [vmem:[#allocation2 + $0x9c] sm:$0xe] }
 0x154   : > { %v12451_v12 = vpop.f32.mrf.mxu0  ;;  %12654 = vmatmul.mubr.msk.bf16.gmra.mxu0 %vm1002_vm5, %v11505_v61  ;;  %v14668_v49 = vpop.f32.mrf.mxu1  ;;  %v11508_v63 = vcombine.low %v4728_v44, %v4731_v45  ;;  %v4735_v24 = vsel %vm13455_vm9, %v11492_v13, %v4734_v20  ;;  %v4617_v20 = vld [vmem:[#allocation2 + $0xa8] sm:$0xe] }
 0x155   : > { %v1943_v5 = vadd.f32 %v12451_v12, %v14370_v26  ;;  %12657 = vmatprep.mubr.msk.bf16.mxu0 %vm1002_vm5, %v11506_v40  ;;  %v4615_v26 = vld [vmem:[#allocation2 + $0x90] sm:$0xe]  ;;  %v4743_v25 = vrot.slane %v4741_v50, 4  ;;  %v4755_v12 = vrot.slane %v18754_v43, 5 }
 0x156   : > { %v1838_v56 = vpop.f32.mrf.mxu0  ;;  %v12489_v62 = vpop.f32.mrf.mxu1  ;;  %v11493_v52 = vrot.slane %v4615_v26, 9  ;;  %v18753_v40 = vld [vmem:[#allocation16_spill] sm:$0xff]  ;;  %v11494_v26 = vrot.slane %v4616_v23, 9 }
 0x157   : > { %v1941_v47 = vadd.f32 %v1838_v56, %v14377_v33  ;;  %v14679_v48 = vadd.f32 %v12485_v59, %v1943_v5  ;;  %v4744_v33 = vrot.slane %v18750_v55, 5  ;;  %v18751_v59 = vld [vmem:[#allocation6_spill] sm:$0xff]  ;;  %v4748_v34 = vrot.slane %v18753_v40, 5  ;;  %v18755_v5 = vld [vmem:[#allocation8_spill] sm:$0xff]  ;;  %v18761_v40 = vld [vmem:[#allocation21_spill] sm:$0xff] }
 0x158   : > { %v12452_v3 = vpop.f32.mrf.mxu0  ;;  %v2213_v37 = vpop.f32.mrf.mxu1  ;;  %v4757_v55 = vrot.slane %v4755_v12, 4  ;;  %v4618_v23 = vld [vmem:[#allocation2 + $0xb4] sm:$0xe] }
 0x159   : > { %v1944_v10 = vadd.f32 %v12452_v3, %v14386_v51  ;;  %v14683_v54 = vadd.f32 %v2197_v8, %v1941_v47  ;;  %v18752_v51 = vld [vmem:[#allocation7_spill] sm:$0xff]  ;;  %v4738_v8 = vsel %vm13455_vm9, %v4736_v42, %v4737_v9  ;;  %v4745_v21 = vsel %vm13455_vm9, %v4743_v25, %v4744_v33  ;;  %v18756_v3 = vld [vmem:[#allocation17_spill] sm:$0xff]  ;;  %v18758_v33 = vld [vmem:[#allocation10_spill] sm:$0xff] }
 0x15a   : > { %v1841_v61 = vpop.f32.mrf.mxu0  ;;  %v12490_v58 = vpop.f32.mrf.mxu1  ;;  %v11509_v45 = vcombine.low %v4735_v24, %v4738_v8  ;;  %v4751_v13 = vrot.slane %v18756_v3, 5  ;;  %v18757_v9 = vld [vmem:[#allocation9_spill] sm:$0xff]  ;;  %v4750_v42 = vrot.slane %v4748_v34, 4  ;;  %v11495_v25 = vrot.slane %v4617_v20, 9  ;;  %v18763_v20 = vld [vmem:[#allocation12_spill] sm:$0xff] }
 0x15b   : > { %v14687_v6 = vadd.f32 %v1841_v61, %v18751_v59  ;;  %v14689_v7 = vadd.f32 %v12486_v27, %v1944_v10  ;;  %v4749_v8 = vsel %vm13455_vm9, %v11494_v26, %v4748_v34  ;;  %v4619_v34 = vld [vmem:[#allocation2 + $0xc0] sm:$0xe] }
 0x15c   : > { %v12455_v38 = vpop.f32.mrf.mxu0  ;;  %12658 = vmatmul.mubr.msk.bf16.gmra.mxu0 %vm1002_vm5, %v11507_v39  ;;  %v14692_v17 = vpop.f32.mrf.mxu1  ;;  %v4742_v39 = vsel %vm13455_vm9, %v11493_v52, %v4741_v50 }
 0x15d   : > { %v1947_v11 = vadd.f32 %v12455_v38, %v18752_v51  ;;  %12661 = vmatprep.mubr.msk.bf16.mxu0 %vm1002_vm5, %v11508_v63  ;;  %v11510_v50 = vcombine.low %v4742_v39, %v4745_v21  ;;  %v4756_v21 = vsel %vm13455_vm9, %v11495_v25, %v4755_v12 }
 0x15e   : > { %v1854_v27 = vpop.f32.mrf.mxu0  ;;  %v12493_v29 = vpop.f32.mrf.mxu1 }
 0x15f   : > { %v1945_v14 = vadd.f32 %v1854_v27, %v18755_v5  ;;  %v14707_v56 = vadd.f32 %v12489_v62, %v1947_v11  ;;  %v4758_v62 = vrot.slane %v14483_v28, 5  ;;  %v4752_v28 = vsel %vm13455_vm9, %v4750_v42, %v4751_v13  ;;  %v18762_v5 = vld [vmem:[#allocation27_spill] sm:$0xff]  ;;  %v18765_v42 = vld [vmem:[#allocation13_spill] sm:$0xff] }
 0x160   : > { %v12456_v44 = vpop.f32.mrf.mxu0  ;;  %v2229_v47 = vpop.f32.mrf.mxu1  ;;  %v4762_v27 = vrot.slane %v18761_v40, 5  ;;  %v11511_v3 = vcombine.low %v4749_v8, %v4752_v28 }
 0x161   : > { %v1948_v10 = vadd.f32 %v12456_v44, %v18757_v9  ;;  %v14711_v63 = vadd.f32 %v2213_v37, %v1945_v14  ;;  %v18760_v37 = vld [vmem:[#allocation11_spill] sm:$0xff]  ;;  %v4759_v43 = vsel %vm13455_vm9, %v4757_v55, %v4758_v62  ;;  %v4769_v14 = vrot.slane %v18762_v5, 5 }
 0x162   : > { %v1857_v61 = vpop.f32.mrf.mxu0  ;;  %v12494_v52 = vpop.f32.mrf.mxu1  ;;  %v11496_v9 = vrot.slane %v4618_v23, 9  ;;  %v11512_v12 = vcombine.low %v4756_v21, %v4759_v43  ;;  %v4764_v25 = vrot.slane %v4762_v27, 4  ;;  %v4776_v23 = vrot.slane %v14558_v22, 5  ;;  %v18768_v22 = vld [vmem:[#allocation23_spill] sm:$0xff] }
 0x163   : > { %v14715_v59 = vadd.f32 %v1857_v61, %v18758_v33  ;;  %v14717_v38 = vadd.f32 %v12490_v58, %v1948_v10  ;;  %v18764_v10 = vld [vmem:[#allocation24_spill] sm:$0xff] }
 0x164   : > { %v12459_v51 = vpop.f32.mrf.mxu0  ;;  %12662 = vmatmul.mubr.msk.bf16.gmra.mxu0 %vm1002_vm5, %v11509_v45  ;;  %v14720_v11 = vpop.f32.mrf.mxu1 }
 0x165   : > { %18759 = vst [vmem:[#allocation14_spill] sm:$0xff] %v14720_v11  ;;  %v1951_v24 = vadd.f32 %v12459_v51, %v18760_v37  ;;  %12665 = vmatprep.mubr.msk.bf16.mxu0 %vm1002_vm5, %v11510_v50  ;;  %v4765_v50 = vrot.slane %v18764_v10, 5  ;;  %v11497_v51 = vrot.slane %v4619_v34, 9  ;;  %v4771_v37 = vrot.slane %v4769_v14, 4 }
 0x166   : > { %v1870_v58 = vpop.f32.mrf.mxu0  ;;  %v12497_v39 = vpop.f32.mrf.mxu1 }
 0x167   : > { %v1949_v44 = vadd.f32 %v1870_v58, %v18763_v20  ;;  %v14735_v45 = vadd.f32 %v12493_v29, %v1951_v24  ;;  %v4772_v29 = vrot.slane %v14525_v16, 5  ;;  %v4763_v58 = vsel %vm13455_vm9, %v11496_v9, %v4762_v27  ;;  %v4620_v16 = vld [vmem:[#allocation2 + $0xcc] sm:$0xe] }
 0x168   : > { %v12460_v26 = vpop.f32.mrf.mxu0  ;;  %v2245_v13 = vpop.f32.mrf.mxu1  ;;  %v4766_v21 = vsel %vm13455_vm9, %v4764_v25, %v4765_v50  ;;  %v4770_v5 = vsel %vm13455_vm9, %v11497_v51, %v4769_v14  ;;  %v11498_v27 = vrot.slane %v4620_v16, 9  ;;  %v4778_v9 = vrot.slane %v4776_v23, 4 }
 0x169   : > { %v1952_v61 = vadd.f32 %v12460_v26, %v18765_v42  ;;  %v14739_v33 = vadd.f32 %v2229_v47, %v1949_v44  ;;  %v18767_v47 = vld [vmem:[#allocation22_spill] sm:$0xff]  ;;  %v4773_v20 = vsel %vm13455_vm9, %v4771_v37, %v4772_v29  ;;  %v18769_v42 = vld [vmem:[#allocation25_spill] sm:$0xff]  ;;  %v4779_v25 = vrot.slane %v14574_v4, 5 }
 0x16a   : > { %v14741_v55 = vpop.f32.mrf.mxu0  ;;  %v12498_v62 = vpop.f32.mrf.mxu1 }
 0x16b   : > { %v14744_v24 = vadd.f32 %v12494_v52, %v1952_v61  ;;  %v4780_v4 = vsel %vm13455_vm9, %v4778_v9, %v4779_v25  ;;  %v18776_v9 = vld [vmem:[#allocation33_spill] sm:$0xff] }
 0x16c   : > { %v12463_v8 = vpop.f32.mrf.mxu0  ;;  %12666 = vmatmul.mubr.msk.bf16.gmra.mxu0 %vm1002_vm5, %v11511_v3  ;;  %v14747_v28 = vpop.f32.mrf.mxu1  ;;  %v11513_v3 = vcombine.low %v4763_v58, %v4766_v21  ;;  %v18772_v58 = vld [vmem:[#allocation29_spill] sm:$0xff] }
 0x16d   : > { %18766 = vst [vmem:[#allocation6_spill] sm:$0xff] %v14747_v28  ;;  %v1955_v40 = vadd.f32 %v12463_v8, %v18767_v47  ;;  %12669 = vmatprep.mubr.msk.bf16.mxu0 %vm1002_vm5, %v11512_v12  ;;  %v11514_v12 = vcombine.low %v4770_v5, %v4773_v20  ;;  %v18773_v20 = vld [vmem:[#allocation30_spill] sm:$0xff] }
 0x16e   : > { %v1886_v52 = vpop.f32.mrf.mxu0  ;;  %v12501_v43 = vpop.f32.mrf.mxu1 }
 0x16f   : > { %v1953_v44 = vadd.f32 %v1886_v52, %v18768_v22  ;;  %v14761_v34 = vadd.f32 %v12497_v39, %v1955_v40 }
 0x170   : > { %v12464_v26 = vpop.f32.mrf.mxu0  ;;  %v2261_v10 = vpop.f32.mrf.mxu1 }
 0x171   : > { %v1956_v50 = vadd.f32 %v12464_v26, %v18769_v42  ;;  %v14764_v61 = vadd.f32 %v2245_v13, %v1953_v44  ;;  %v4777_v13 = vsel %vm13455_vm9, %v11498_v27, %v4776_v23 }
 0x172   : > { %v14767_v14 = vpop.f32.mrf.mxu0  ;;  %v12502_v51 = vpop.f32.mrf.mxu1  ;;  %v11515_v52 = vcombine.low %v4777_v13, %v4780_v4 }
 0x173   : > { %18770 = vst [vmem:[#allocation7_spill] sm:$0xff] %v14767_v14  ;;  %v14769_v37 = vadd.f32 %v12498_v62, %v1956_v50 }
 0x174   : > { %v12467_v29 = vpop.f32.mrf.mxu0  ;;  %12670 = vmatmul.mubr.msk.bf16.gmra.mxu0 %vm1002_vm5, %v11513_v3  ;;  %v14772_v39 = vpop.f32.mrf.mxu1 }
 0x175   : > { %18771 = vst [vmem:[#allocation16_spill] sm:$0xff] %v14772_v39  ;;  %v1959_v8 = vadd.f32 %v12467_v29, %v14538_v18  ;;  %12673 = vmatprep.mubr.msk.bf16.mxu0 %vm1002_vm5, %v11514_v12 }
 0x176   : > { %v1902_v47 = vpop.f32.mrf.mxu0  ;;  %v12505_v40 = vpop.f32.mrf.mxu1 }
 0x177   : > { %v1957_v62 = vadd.f32 %v1902_v47, %v18772_v58  ;;  %v14781_v21 = vadd.f32 %v12501_v43, %v1959_v8 }
 0x178   : > { %v12468_v16 = vpop.f32.mrf.mxu0  ;;  %v2277_v5 = vpop.f32.mrf.mxu1 }
 0x179   : > { %v1960_v22 = vadd.f32 %v12468_v16, %v18773_v20  ;;  %v14784_v18 = vadd.f32 %v2261_v10, %v1957_v62 }
 0x17a   : > { %v14786_v44 = vpop.f32.mrf.mxu0  ;;  %v12506_v26 = vpop.f32.mrf.mxu1 }
 0x17b   : > { %18774 = vst [vmem:[#allocation18_spill] sm:$0xff] %v14786_v44  ;;  %v14788_v23 = vadd.f32 %v12502_v51, %v1960_v22 }
 0x17c   : > { %v12471_v3 = vpop.f32.mrf.mxu0  ;;  %12674 = vmatmul.mubr.msk.bf16.gmra.mxu0 %vm1002_vm5, %v11515_v52  ;;  %v14791_v27 = vpop.f32.mrf.mxu1 }
 0x17d   : > { %18775 = vst [vmem:[#allocation8_spill] sm:$0xff] %v14791_v27  ;;  %v1963_v43 = vadd.f32 %v12471_v3, %v18776_v9 }
 0x17e   : > { %v1918_v42 = vpop.f32.mrf.mxu0  ;;  %v12545_v50 = vpop.f32.mrf.mxu1 }
 0x17f   : > { %v1961_v12 = vadd.f32 %v1918_v42, %v14585_v31  ;;  %v14795_v25 = vadd.f32 %v12505_v40, %v1963_v43 }
 0x180   : > { %v12472_v10 = vpop.f32.mrf.mxu0  ;;  %v3361_v29 = vpop.f32.mrf.mxu1 }
 0x181   : > { %v1964_v8 = vadd.f32 %v12472_v10, %v14589_v15  ;;  %v14798_v13 = vadd.f32 %v2277_v5, %v1961_v12 }
 0x182   : > { %v14800_v51 = vpop.f32.mrf.mxu0  ;;  %v12546_v4 = vpop.f32.mrf.mxu1 }
 0x183   : > { %18777 = vst [vmem:[#allocation17_spill] sm:$0xff] %v14800_v51  ;;  %v14802_v47 = vadd.f32 %v12506_v26, %v1964_v8 }
 0x184   : > { %v12511_v58 = vpop.f32.mrf.mxu0  ;;  %v14804_v62 = vpop.f32.mrf.mxu1 }
 0x185   : > { %v3020_v16 = vadd.f32 %v12511_v58, %v14620_v46 }
 0x186   : > { %v2891_v52 = vpop.f32.mrf.mxu0  ;;  %v12549_v31 = vpop.f32.mrf.mxu1 }
 0x187   : > { %v3018_v40 = vadd.f32 %v2891_v52, %v14628_v1  ;;  %v14808_v20 = vadd.f32 %v12545_v50, %v3020_v16 }
 0x188   : > { %v12512_v22 = vpop.f32.mrf.mxu0  ;;  %v14810_v15 = vpop.f32.mrf.mxu1 }
 0x189   : > { %v3021_v5 = vadd.f32 %v12512_v22, %v14637_v41  ;;  %v14813_v3 = vadd.f32 %v3361_v29, %v3018_v40 }
 0x18a   : > { %v14815_v26 = vpop.f32.mrf.mxu0  ;;  %v12550_v9 = vpop.f32.mrf.mxu1 }
 0x18b   : > { %v14817_v43 = vadd.f32 %v12546_v4, %v3021_v5 }
 0x18c   : > { %v12515_v42 = vpop.f32.mrf.mxu0  ;;  %v14819_v46 = vpop.f32.mrf.mxu1 }
 0x18d   : > { %v3024_v12 = vadd.f32 %v12515_v42, %v14656_v36 }
 0x18e   : > { %v2907_v1 = vpop.f32.mrf.mxu0  ;;  %v12553_v50 = vpop.f32.mrf.mxu1 }
 0x18f   : > { %v14823_v10 = vadd.f32 %v2907_v1, %v14659_v53  ;;  %v14825_v8 = vadd.f32 %v12549_v31, %v3024_v12 }
 0x190   : > { %v12516_v41 = vpop.f32.mrf.mxu0  ;;  %v14827_v29 = vpop.f32.mrf.mxu1 }
 0x191   : > { %v3025_v58 = vadd.f32 %v12516_v41, %v14665_v19 }
 0x192   : > { %v14830_v16 = vpop.f32.mrf.mxu0  ;;  %v12554_v4 = vpop.f32.mrf.mxu1 }
 0x193   : > { %v14832_v52 = vadd.f32 %v12550_v9, %v3025_v58 }
 0x194   : > { %v12519_v40 = vpop.f32.mrf.mxu0  ;;  %v14834_v22 = vpop.f32.mrf.mxu1 }
 0x195   : > { %v3028_v36 = vadd.f32 %v12519_v40, %v14679_v48 }
 0x196   : > { %v2923_v5 = vpop.f32.mrf.mxu0  ;;  %v12557_v53 = vpop.f32.mrf.mxu1 }
 0x197   : > { %v14838_v31 = vadd.f32 %v2923_v5, %v14683_v54  ;;  %v14840_v42 = vadd.f32 %v12553_v50, %v3028_v36 }
 0x198   : > { %v12520_v12 = vpop.f32.mrf.mxu0  ;;  %v14842_v1 = vpop.f32.mrf.mxu1 }
 0x199   : > { %v3029_v19 = vadd.f32 %v12520_v12, %v14689_v7 }
 0x19a   : > { %v14845_v41 = vpop.f32.mrf.mxu0  ;;  %v12558_v9 = vpop.f32.mrf.mxu1 }
 0x19b   : > { %v14847_v58 = vadd.f32 %v12554_v4, %v3029_v19 }
 0x19c   : > { %v12523_v30 = vpop.f32.mrf.mxu0  ;;  %v14849_v32 = vpop.f32.mrf.mxu1 }
 0x19d   : > { %v3032_v48 = vadd.f32 %v12523_v30, %v14707_v56 }
 0x19e   : > { %v2939_v40 = vpop.f32.mrf.mxu0  ;;  %v12561_v54 = vpop.f32.mrf.mxu1 }
 0x19f   : > { %v14853_v50 = vadd.f32 %v2939_v40, %v14711_v63  ;;  %v14855_v36 = vadd.f32 %v12557_v53, %v3032_v48 }
 0x1a0   : > { %v12524_v5 = vpop.f32.mrf.mxu0  ;;  %v14857_v27 = vpop.f32.mrf.mxu1 }
 0x1a1   : > { %18778 = vst [vmem:[#allocation9_spill] sm:$0xff] %v14857_v27  ;;  %v3033_v7 = vadd.f32 %v12524_v5, %v14717_v38 }
 0x1a2   : > { %v14860_v12 = vpop.f32.mrf.mxu0  ;;  %v12562_v4 = vpop.f32.mrf.mxu1 }
 0x1a3   : > { %v14862_v19 = vadd.f32 %v12558_v9, %v3033_v7 }
 0x1a4   : > { %v12527_v51 = vpop.f32.mrf.mxu0  ;;  %v14864_v57 = vpop.f32.mrf.mxu1 }
 0x1a5   : > { %18779 = vst [vmem:[#allocation10_spill] sm:$0xff] %v14864_v57  ;;  %v3036_v30 = vadd.f32 %v12527_v51, %v14735_v45 }
 0x1a6   : > { %v2955_v56 = vpop.f32.mrf.mxu0  ;;  %v12565_v63 = vpop.f32.mrf.mxu1 }
 0x1a7   : > { %v14868_v53 = vadd.f32 %v2955_v56, %v14739_v33  ;;  %v14870_v48 = vadd.f32 %v12561_v54, %v3036_v30 }
 0x1a8   : > { %v12528_v40 = vpop.f32.mrf.mxu0  ;;  %v14872_v39 = vpop.f32.mrf.mxu1 }
 0x1a9   : > { %18780 = vst [vmem:[#allocation11_spill] sm:$0xff] %v14868_v53  ;;  %18781 = vst [vmem:[#allocation21_spill] sm:$0xff] %v14872_v39  ;;  %v3037_v38 = vadd.f32 %v12528_v40, %v14744_v24 }
 0x1aa   : > { %v14875_v5 = vpop.f32.mrf.mxu0  ;;  %v12566_v9 = vpop.f32.mrf.mxu1 }
 0x1ab   : > { %18782 = vst [vmem:[#allocation27_spill] sm:$0xff] %v14875_v5  ;;  %v14877_v7 = vadd.f32 %v12562_v4, %v3037_v38 }
 0x1ac   : > { %v12531_v44 = vpop.f32.mrf.mxu0  ;;  %v14879_v28 = vpop.f32.mrf.mxu1 }
 0x1ad   : > { %18783 = vst [vmem:[#allocation12_spill] sm:$0xff] %v14879_v28  ;;  %v3040_v45 = vadd.f32 %v12531_v44, %v14761_v34 }
 0x1ae   : > { %v2971_v51 = vpop.f32.mrf.mxu0  ;;  %v12569_v33 = vpop.f32.mrf.mxu1 }
 0x1af   : > { %v14883_v54 = vadd.f32 %v2971_v51, %v14764_v61  ;;  %v14885_v30 = vadd.f32 %v12565_v63, %v3040_v45 }
 0x1b0   : > { %v12532_v56 = vpop.f32.mrf.mxu0  ;;  %v14887_v39 = vpop.f32.mrf.mxu1 }
 0x1b1   : > { %18784 = vst [vmem:[#allocation24_spill] sm:$0xff] %v14883_v54  ;;  %18785 = vst [vmem:[#allocation13_spill] sm:$0xff] %v14887_v39  ;;  %v3041_v24 = vadd.f32 %v12532_v56, %v14769_v37 }
 0x1b2   : > { %v14890_v40 = vpop.f32.mrf.mxu0  ;;  %v12570_v4 = vpop.f32.mrf.mxu1 }
 0x1b3   : > { %18786 = vst [vmem:[#allocation22_spill] sm:$0xff] %v14890_v40  ;;  %v14892_v38 = vadd.f32 %v12566_v9, %v3041_v24 }
 0x1b4   : > { %v12535_v28 = vpop.f32.mrf.mxu0  ;;  %v14894_v57 = vpop.f32.mrf.mxu1 }
 0x1b5   : > { %18787 = vst [vmem:[#allocation23_spill] sm:$0xff] %v14894_v57  ;;  %v3044_v34 = vadd.f32 %v12535_v28, %v14781_v21 }
 0x1b6   : > { %v2987_v44 = vpop.f32.mrf.mxu0  ;;  %v12573_v61 = vpop.f32.mrf.mxu1 }
 0x1b7   : > { %v14898_v63 = vadd.f32 %v2987_v44, %v14784_v18  ;;  %v14900_v45 = vadd.f32 %v12569_v33, %v3044_v34 }
 0x1b8   : > { %v12536_v51 = vpop.f32.mrf.mxu0  ;;  %v14902_v39 = vpop.f32.mrf.mxu1 }
 0x1b9   : > { %18788 = vst [vmem:[#allocation25_spill] sm:$0xff] %v14898_v63  ;;  %18789 = vst [vmem:[#allocation29_spill] sm:$0xff] %v14902_v39  ;;  %v3045_v37 = vadd.f32 %v12536_v51, %v14788_v23 }
 0x1ba   : > { %v14905_v56 = vpop.f32.mrf.mxu0  ;;  %v12574_v9 = vpop.f32.mrf.mxu1 }
 0x1bb   : > { %18790 = vst [vmem:[#allocation30_spill] sm:$0xff] %v14905_v56  ;;  %v14907_v24 = vadd.f32 %v12570_v4, %v3045_v37 }
 0x1bc   : > { %v12539_v57 = vpop.f32.mrf.mxu0  ;;  %v14910_v54 = vpop.f32.mrf.mxu1 }
 0x1bd   : > { %v3048_v28 = vadd.f32 %v12539_v57, %v14795_v25  ;;  %18791 = vst [vmem:[#allocation33_spill] sm:$0xff] %v14910_v54 }
 0x1be   : > { %v3003_v21 = vpop.f32.mrf.mxu0 }
 0x1bf   : > { %v14913_v18 = vadd.f32 %v3003_v21, %v14798_v13  ;;  %v14915_v33 = vadd.f32 %v12573_v61, %v3048_v28  ;;  %v14920_v51 = vpop.f32.mrf.mxu1 }
 0x1c0   : > { %v12540_v34 = vpop.f32.mrf.mxu0 }
 0x1c1   : > { %18792 = vst [vmem:[#allocation35_spill] sm:$0xff] %v14913_v18  ;;  %v3049_v44 = vadd.f32 %v12540_v34, %v14802_v47  ;;  %v14927_v54 = vpop.f32.mrf.mxu1 }
 0x1c2   : > { %v14918_v23 = vpop.f32.mrf.mxu0 }
 0x1c3   : > { %18793 = vst [vmem:[#allocation36_spill] sm:$0xff] %v14918_v23  ;;  %v14922_v4 = vadd.f32 %v12574_v9, %v3049_v44  ;;  %v14937_v21 = vpop.f32.mrf.mxu1 }
 0x1c4   : > { %v12579_v37 = vpop.f32.mrf.mxu0 }
 0x1c5   : > { %v14925_v57 = vadd.f32 %v12579_v37, %v14808_v20  ;;  %v14942_v20 = vpop.f32.mrf.mxu1 }
 0x1c6   : > { %v3720_v25 = vpop.f32.mrf.mxu0 }
 0x1c7   : > { %v14930_v13 = vadd.f32 %v3720_v25, %v14813_v3 }
 0x1c8   : > { %v12580_v61 = vpop.f32.mrf.mxu0 }
 0x1c9   : > { %v14933_v28 = vadd.f32 %v12580_v61, %v14817_v43 }
 0x1ca   : > { %v14935_v47 = vpop.f32.mrf.mxu0  ;;  %v14949_v25 = vpop.f32.mrf.mxu1 }
 0x1cc   : > { %v12583_v9 = vpop.f32.mrf.mxu0  ;;  %v14956_v18 = vpop.f32.mrf.mxu1 }
 0x1cd   : > { %v14940_v34 = vadd.f32 %v12583_v9, %v14825_v8 }
 0x1ce   : > { %v14944_v44 = vpop.f32.mrf.mxu0  ;;  %v14963_v63 = vpop.f32.mrf.mxu1 }
 0x1d0   : > { %v12584_v37 = vpop.f32.mrf.mxu0  ;;  %v14970_v40 = vpop.f32.mrf.mxu1 }
 0x1d1   : > { %v14947_v3 = vadd.f32 %v12584_v37, %v14832_v52 }
 0x1d2   : > { %v14951_v43 = vpop.f32.mrf.mxu0 }
 0x1d4   : > { %v12587_v61 = vpop.f32.mrf.mxu0  ;;  %v14977_v27 = vpop.f32.mrf.mxu1 }
 0x1d5   : > { %v14954_v39 = vadd.f32 %v12587_v61, %v14840_v42 }
 0x1d6   : > { %v14958_v8 = vpop.f32.mrf.mxu0  ;;  %v14984_v5 = vpop.f32.mrf.mxu1 }
 0x1d8   : > { %v12588_v9 = vpop.f32.mrf.mxu0  ;;  %v14991_v11 = vpop.f32.mrf.mxu1 }
 0x1d9   : > { %v14961_v23 = vadd.f32 %v12588_v9, %v14847_v58 }
 0x1da   : > { %v14965_v52 = vpop.f32.mrf.mxu0 }
 0x1dc   : > { %v12591_v37 = vpop.f32.mrf.mxu0 }
 0x1dd   : > { %v14968_v56 = vadd.f32 %v12591_v37, %v14855_v36 }
 0x1de   : > { %v14972_v42 = vpop.f32.mrf.mxu0 }
 0x1df   : > { %18794 = vst [vmem:[#allocation37_spill] sm:$0xff] %v14968_v56 }
 0x1e0   : > { %v12592_v61 = vpop.f32.mrf.mxu0 }
 0x1e1   : > { %v14975_v14 = vadd.f32 %v12592_v61, %v14862_v19 }
 0x1e2   : > { %v14979_v58 = vpop.f32.mrf.mxu0 }
 0x1e3   : > { %18795 = vst [vmem:[#allocation38_spill] sm:$0xff] %v14975_v14  ;;  %18796 = vst [vmem:[#allocation39_spill] sm:$0xff] %v14979_v58  ;;  %v14998_v58 = vpop.f32.mrf.mxu1 }
 0x1e4   : > { %v12595_v9 = vpop.f32.mrf.mxu0 }
 0x1e5   : > { %v14982_v53 = vadd.f32 %v12595_v9, %v14870_v48 }
 0x1e6   : > { %v14986_v36 = vpop.f32.mrf.mxu0 }
 0x1e7   : > { %18797 = vst [vmem:[#allocation40_spill] sm:$0xff] %v14982_v53  ;;  %18798 = vst [vmem:[#allocation41_spill] sm:$0xff] %v14986_v36  ;;  %v15005_v36 = vpop.f32.mrf.mxu1 }
 0x1e8   : > { %v12596_v37 = vpop.f32.mrf.mxu0 }
 0x1e9   : > { %v14989_v56 = vadd.f32 %v12596_v37, %v14877_v7 }
 0x1ea   : > { %v14993_v19 = vpop.f32.mrf.mxu0 }
 0x1eb   : > { %18799 = vst [vmem:[#allocation42_spill] sm:$0xff] %v14989_v56  ;;  %18800 = vst [vmem:[#allocation43_spill] sm:$0xff] %v14993_v19  ;;  %v15012_v19 = vpop.f32.mrf.mxu1 }
 0x1ec   : > { %v12599_v61 = vpop.f32.mrf.mxu0 }
 0x1ed   : > { %v14996_v14 = vadd.f32 %v12599_v61, %v14885_v30 }
 0x1ee   : > { %v15000_v48 = vpop.f32.mrf.mxu0 }
 0x1ef   : > { %18801 = vst [vmem:[#allocation44_spill] sm:$0xff] %v14996_v14  ;;  %18802 = vst [vmem:[#allocation45_spill] sm:$0xff] %v15000_v48  ;;  %v15019_v48 = vpop.f32.mrf.mxu1 }
 0x1f0   : > { %v12600_v9 = vpop.f32.mrf.mxu0 }
 0x1f1   : > { %v15003_v53 = vadd.f32 %v12600_v9, %v14892_v38 }
 0x1f2   : > { %v15007_v7 = vpop.f32.mrf.mxu0 }
 0x1f3   : > { %18803 = vst [vmem:[#allocation46_spill] sm:$0xff] %v15003_v53  ;;  %18804 = vst [vmem:[#allocation47_spill] sm:$0xff] %v15007_v7  ;;  %v2293_v53 = vadd.f32 %v14599_v35, %v14635_v0  ;;  %v2297_v0 = vadd.f32 %v14640_v60, %v14663_v2 }
 0x1f4   : > { %v12603_v37 = vpop.f32.mrf.mxu0 }
 0x1f5   : > { %v15010_v56 = vadd.f32 %v12603_v37, %v14900_v45  ;;  %v15028_v45 = vpop.f32.mrf.mxu1 }
 0x1f6   : > { %v15014_v30 = vpop.f32.mrf.mxu0 }
 0x1f7   : > { %18805 = vst [vmem:[#allocation48_spill] sm:$0xff] %v15010_v56  ;;  %18806 = vst [vmem:[#allocation49_spill] sm:$0xff] %v15014_v30  ;;  %v3019_v56 = vadd.f32 %v14815_v26, %v2293_v53 }
 0x1f8   : > { %v12604_v61 = vpop.f32.mrf.mxu0 }
 0x1f9   : > { %v15017_v14 = vadd.f32 %v12604_v61, %v14907_v24  ;;  %v15036_v61 = vpop.f32.mrf.mxu1 }
 0x1fa   : > { %v15021_v38 = vpop.f32.mrf.mxu0 }
 0x1fb   : > { %18807 = vst [vmem:[#allocation50_spill] sm:$0xff] %v15017_v14  ;;  %18808 = vst [vmem:[#allocation51_spill] sm:$0xff] %v15021_v38  ;;  %v3489_v38 = vadd.f32 %v14804_v62, %v3019_v56  ;;  %v15046_v26 = vpop.f32.mrf.mxu1  ;;  %v4575_v56 = vadd.f32 %v14920_v51, %v14925_v57 }
 0x1fc   : > { %v12607_v9 = vpop.f32.mrf.mxu0 }
 0x1fd   : > { %v15026_v7 = vadd.f32 %v12607_v9, %v14915_v33  ;;  %v3848_v33 = vadd.f32 %v14935_v47, %v3489_v38  ;;  %v3492_v9 = vadd.f32 %v14810_v15, %v14823_v10  ;;  %v15057_v47 = vpop.f32.mrf.mxu1 }
 0x1fe   : > { %v15030_v37 = vpop.f32.mrf.mxu0 }
 0x1ff   : > { %v4574_v60 = vadd.f32 %v14942_v20, %v3848_v33 }
 0x200   : > { %v12608_v30 = vpop.f32.mrf.mxu0 }
 0x201   : > { %v15034_v24 = vadd.f32 %v12608_v30, %v14922_v4  ;;  %v3023_v4 = vadd.f32 %v14830_v16, %v2297_v0  ;;  %v4573_v30 = vadd.f32 %v14927_v54, %v14930_v13  ;;  %v4576_v16 = vadd.f32 %v14937_v21, %v14933_v28  ;;  %v15077_v21 = vpop.f32.mrf.mxu1 }
 0x202   : > { %v15038_v14 = vpop.f32.mrf.mxu0  ;;  %v2301_v13 = vadd.f32 %v14668_v49, %v14687_v6  ;;  %v3496_v49 = vadd.f32 %v14827_v29, %v14838_v31 }
 0x203   : > { %18809 = vst [vmem:[#allocation52_spill] sm:$0xff] %v15034_v24  ;;  %v3851_v24 = vadd.f32 %v14944_v44, %v3492_v9  ;;  %v3493_v10 = vadd.f32 %v14819_v46, %v3023_v4  ;;  %v4579_v9 = vadd.f32 %v14949_v25, %v14940_v34  ;;  %v15092_v29 = vpop.f32.mrf.mxu1  ;;  %v2305_v25 = vadd.f32 %v14692_v17, %v14715_v59 }
 0x204   : > { %v12647_v35 = vpop.f32.mrf.mxu0  ;;  %v3027_v28 = vadd.f32 %v14845_v41, %v2301_v13  ;;  %v3855_v41 = vadd.f32 %v14958_v8, %v3496_v49  ;;  %v18811_v13 = vld [vmem:[#allocation15_spill] sm:$0xff]  ;;  %v3500_v59 = vadd.f32 %v14842_v1, %v14853_v50 }
 0x205   : > { %v15062_v38 = vadd.f32 %v12647_v35, %v4575_v56  ;;  %v4577_v51 = vadd.f32 %v14956_v18, %v3851_v24  ;;  %v3852_v20 = vadd.f32 %v14951_v43, %v3493_v10  ;;  %v4580_v56 = vadd.f32 %v14963_v63, %v14947_v3  ;;  %v18810_v3 = vld [vmem:[#allocation19_spill] sm:$0xff] }
 0x206   : > { %v4916_v53 = vpop.f32.mrf.mxu0  ;;  %v3859_v49 = vadd.f32 %v14972_v42, %v3500_v59  ;;  %v18812_v42 = vld [vmem:[#allocation14_spill] sm:$0xff]  ;;  %v18820_v59 = vld [vmem:[#allocation37_spill] sm:$0xff] }
 0x207   : > { %v15055_v2 = vadd.f32 %v4916_v53, %v4573_v30  ;;  %v5078_v6 = vsel %vm1002_vm5, %v15062_v38, 0.0  ;;  %v4578_v53 = vadd.f32 %v14970_v40, %v3852_v20  ;;  %v3497_v30 = vadd.f32 %v14834_v22, %v3027_v28  ;;  %v15113_v20 = vpop.f32.mrf.mxu1 }
 0x208   : > { %v12648_v62 = vpop.f32.mrf.mxu0  ;;  %v4581_v22 = vadd.f32 %v14984_v5, %v3855_v41 }
 0x209   : > { %v5075_v44 = vsel %vm1002_vm5, %v15055_v2, 0.0  ;;  %v15072_v0 = vadd.f32 %v12648_v62, %v4576_v16  ;;  %v3856_v10 = vadd.f32 %v14965_v52, %v3497_v30  ;;  %v15129_v50 = vpop.f32.mrf.mxu1 }
 0x20a   : > { %v4919_v15 = vpop.f32.mrf.mxu0 }
 0x20b   : > { %v15064_v54 = vadd.f32 %v4919_v15, %v4574_v60  ;;  %v5080_v4 = vsel %vm1002_vm5, %v15072_v0, 0.0 }
 0x20c   : > { %v12651_v57 = vpop.f32.mrf.mxu0 }
 0x20d   : > { %v5076_v46 = vsel %vm1002_vm5, %v15064_v54, 0.0  ;;  %v15096_v60 = vadd.f32 %v12651_v57, %v4579_v9  ;;  %v3031_v57 = vadd.f32 %v14860_v12, %v2305_v25  ;;  %v4582_v12 = vadd.f32 %v14998_v58, %v3856_v10  ;;  %v18817_v10 = vld [vmem:[#allocation11_spill] sm:$0xff] }
 0x20e   : > { %v5077_v35 = vadd.f32 %v5076_v46, %v5075_v44  ;;  %v4932_v33 = vpop.f32.mrf.mxu0 }
 0x20f   : > { %v15083_v18 = vadd.f32 %v4932_v33, %v4577_v51  ;;  %v1449_v51 = vadd.f32 %v18811_v13, %v18810_v3  ;;  %v5086_v5 = vsel %vm1002_vm5, %v15096_v60, 0.0  ;;  %v4583_v33 = vadd.f32 %v14977_v27, %v14954_v39 }
 0x210   : > { %v5079_v43 = vadd.f32 %v5078_v6, %v5077_v35  ;;  %v12652_v24 = vpop.f32.mrf.mxu0  ;;  %v3501_v1 = vadd.f32 %v14849_v32, %v3031_v57  ;;  %v4585_v32 = vadd.f32 %v15012_v19, %v3859_v49 }
 0x211   : > { %v5082_v34 = vsel %vm1002_vm5, %v15083_v18, 0.0  ;;  %v15106_v16 = vadd.f32 %v12652_v24, %v4580_v56  ;;  %v1950_v46 = vadd.f32 %v14741_v55, %v1449_v51  ;;  %v4584_v55 = vadd.f32 %v14991_v11, %v14961_v23  ;;  %v18814_v23 = vld [vmem:[#allocation26_spill] sm:$0xff]  ;;  %v18819_v51 = vld [vmem:[#allocation7_spill] sm:$0xff] }
 0x212   : > { %v5081_v31 = vadd.f32 %v5080_v4, %v5079_v43  ;;  %v4935_v62 = vpop.f32.mrf.mxu0  ;;  %v18813_v4 = vld [vmem:[#allocation39_spill] sm:$0xff] }
 0x213   : > { %v15100_v40 = vadd.f32 %v4935_v62, %v4578_v53  ;;  %v5088_v6 = vsel %vm1002_vm5, %v15106_v16, 0.0  ;;  %v2309_v58 = vadd.f32 %v18812_v42, %v1950_v46  ;;  %v3860_v30 = vadd.f32 %v18813_v4, %v3501_v1  ;;  %v18815_v62 = vld [vmem:[#allocation20_spill] sm:$0xff]  ;;  %v18824_v42 = vld [vmem:[#allocation6_spill] sm:$0xff] }
 0x214   : > { %v5083_v8 = vadd.f32 %v5082_v34, %v5081_v31  ;;  %v12655_v15 = vpop.f32.mrf.mxu0  ;;  %v1465_v56 = vadd.f32 %v18815_v62, %v18814_v23  ;;  %v18816_v34 = vld [vmem:[#allocation27_spill] sm:$0xff]  ;;  %v18827_v62 = vld [vmem:[#allocation28_spill] sm:$0xff] }
 0x215   : > { %v5084_v63 = vsel %vm1002_vm5, %v15100_v40, 0.0  ;;  %v15133_v9 = vadd.f32 %v12655_v15, %v4583_v33  ;;  %v3035_v25 = vadd.f32 %v18816_v34, %v2309_v58  ;;  %v4586_v46 = vadd.f32 %v15028_v45, %v3860_v30  ;;  %v18825_v30 = vld [vmem:[#allocation43_spill] sm:$0xff]  ;;  %v18828_v34 = vld [vmem:[#allocation22_spill] sm:$0xff] }
 0x216   : > { %v5085_v44 = vadd.f32 %v5084_v63, %v5083_v8  ;;  %v4948_v17 = vpop.f32.mrf.mxu0  ;;  %v15149_v8 = vpop.f32.mrf.mxu1  ;;  %v18818_v63 = vld [vmem:[#allocation9_spill] sm:$0xff]  ;;  %v1954_v57 = vadd.f32 %v18819_v51, %v1465_v56 }
 0x217   : > { %v15119_v52 = vadd.f32 %v4948_v17, %v4581_v22  ;;  %v3504_v3 = vadd.f32 %v18818_v63, %v18817_v10  ;;  %v5094_v19 = vsel %vm1002_vm5, %v15133_v9, 0.0  ;;  %v18829_v63 = vld [vmem:[#allocation24_spill] sm:$0xff] }
 0x218   : > { %v5087_v28 = vadd.f32 %v5086_v5, %v5085_v44  ;;  %v12656_v35 = vpop.f32.mrf.mxu0  ;;  %v4587_v5 = vadd.f32 %v15005_v36, %v18820_v59  ;;  %v2313_v58 = vadd.f32 %v18824_v42, %v1954_v57  ;;  %v18831_v57 = vld [vmem:[#allocation18_spill] sm:$0xff] }
 0x219   : > { %v5090_v39 = vsel %vm1002_vm5, %v15119_v52, 0.0  ;;  %v15142_v31 = vadd.f32 %v12656_v35, %v4584_v55 }
 0x21a   : > { %v5089_v43 = vadd.f32 %v5088_v6, %v5087_v28  ;;  %v4951_v24 = vpop.f32.mrf.mxu0  ;;  %v18821_v28 = vld [vmem:[#allocation41_spill] sm:$0xff]  ;;  %v15165_v6 = vpop.f32.mrf.mxu1 }
 0x21b   : > { %v15137_v27 = vadd.f32 %v4951_v24, %v4582_v12  ;;  %v3863_v35 = vadd.f32 %v18821_v28, %v3504_v3  ;;  %v5096_v33 = vsel %vm1002_vm5, %v15142_v31, 0.0  ;;  %v18822_v12 = vld [vmem:[#allocation10_spill] sm:$0xff]  ;;  %v18830_v3 = vld [vmem:[#allocation21_spill] sm:$0xff] }
 0x21c   : > { %v5091_v53 = vadd.f32 %v5090_v39, %v5089_v43  ;;  %v12659_v41 = vpop.f32.mrf.mxu0  ;;  %v3505_v49 = vadd.f32 %v18822_v12, %v3035_v25  ;;  %v18823_v24 = vld [vmem:[#allocation38_spill] sm:$0xff]  ;;  %v3039_v25 = vadd.f32 %v18828_v34, %v2313_v58  ;;  %v18839_v34 = vld [vmem:[#allocation32_spill] sm:$0xff] }
 0x21d   : > { %v5092_v11 = vsel %vm1002_vm5, %v15137_v27, 0.0  ;;  %v4588_v55 = vadd.f32 %v15019_v48, %v18823_v24  ;;  %v15169_v39 = vadd.f32 %v12659_v41, %v4587_v5  ;;  %v4589_v4 = vadd.f32 %v15046_v26, %v3863_v35  ;;  %v18826_v41 = vld [vmem:[#allocation31_spill] sm:$0xff]  ;;  %v18832_v5 = vld [vmem:[#allocation40_spill] sm:$0xff]  ;;  %v18833_v35 = vld [vmem:[#allocation45_spill] sm:$0xff] }
 0x21e   : > { %v5093_v15 = vadd.f32 %v5092_v11, %v5091_v53  ;;  %v4964_v22 = vpop.f32.mrf.mxu0  ;;  %v3864_v11 = vadd.f32 %v18825_v30, %v3505_v49  ;;  %v1481_v56 = vadd.f32 %v18827_v62, %v18826_v41  ;;  %v18834_v49 = vld [vmem:[#allocation12_spill] sm:$0xff]  ;;  %v18837_v41 = vld [vmem:[#allocation47_spill] sm:$0xff] }
 0x21f   : > { %v15155_v13 = vadd.f32 %v4964_v22, %v4585_v32  ;;  %v5102_v26 = vsel %vm1002_vm5, %v15169_v39, 0.0 }
 0x220   : > { %v5095_v44 = vadd.f32 %v5094_v19, %v5093_v15  ;;  %v12660_v17 = vpop.f32.mrf.mxu0  ;;  %v4542_v15 = vpop.f32.mrf.mxu1  ;;  %v3508_v19 = vadd.f32 %v18830_v3, %v18829_v63  ;;  %v4590_v28 = vadd.f32 %v15077_v21, %v3864_v11  ;;  %v18836_v21 = vld [vmem:[#allocation16_spill] sm:$0xff] }
 0x221   : > { %v5098_v36 = vsel %vm1002_vm5, %v15155_v13, 0.0  ;;  %v15178_v23 = vadd.f32 %v12660_v17, %v4588_v55 }
 0x222   : > { %v5097_v1 = vadd.f32 %v5096_v33, %v5095_v44  ;;  %v4967_v43 = vpop.f32.mrf.mxu0  ;;  %v1958_v44 = vadd.f32 %v18831_v57, %v1481_v56  ;;  %v3867_v33 = vadd.f32 %v18833_v35, %v3508_v19  ;;  %v18842_v57 = vld [vmem:[#allocation13_spill] sm:$0xff]  ;;  %v18844_v35 = vld [vmem:[#allocation44_spill] sm:$0xff] }
 0x223   : > { %v15173_v45 = vadd.f32 %v4967_v43, %v4586_v46  ;;  %v4591_v46 = vadd.f32 %v15036_v61, %v18832_v5  ;;  %v5104_v12 = vsel %vm1002_vm5, %v15178_v23, 0.0  ;;  %v12638_v43 = vpop.f32.mrf.mxu1 }
 0x224   : > { %v5099_v53 = vadd.f32 %v5098_v36, %v5097_v1  ;;  %v12663_v32 = vpop.f32.mrf.mxu0  ;;  %v3509_v1 = vadd.f32 %v18834_v49, %v3039_v25  ;;  %v18835_v36 = vld [vmem:[#allocation42_spill] sm:$0xff]  ;;  %v18845_v49 = vld [vmem:[#allocation49_spill] sm:$0xff] }
 0x225   : > { %v5100_v48 = vsel %vm1002_vm5, %v15173_v45, 0.0  ;;  %v4592_v42 = vadd.f32 %v15057_v47, %v18835_v36  ;;  %v15201_v58 = vadd.f32 %v12663_v32, %v4591_v46  ;;  %v18838_v32 = vld [vmem:[#allocation34_spill] sm:$0xff]  ;;  %v4545_v63 = vpop.f32.mrf.mxu1 }
 0x226   : > { %v5101_v22 = vadd.f32 %v5100_v48, %v5099_v53  ;;  %v4980_v10 = vpop.f32.mrf.mxu0  ;;  %v4593_v48 = vadd.f32 %v15113_v20, %v3867_v33  ;;  %v3868_v62 = vadd.f32 %v18837_v41, %v3509_v1  ;;  %v1497_v25 = vadd.f32 %v18839_v34, %v18838_v32 }
 0x227   : > { %v15189_v51 = vadd.f32 %v4980_v10, %v4589_v4  ;;  %v2317_v4 = vadd.f32 %v18836_v21, %v1958_v44  ;;  %v5110_v20 = vsel %vm1002_vm5, %v15201_v58, 0.0  ;;  %v4595_v33 = vadd.f32 %v15092_v29, %v18844_v35 }
 0x228   : > { %v5103_v17 = vadd.f32 %v5102_v26, %v5101_v22  ;;  %v12664_v59 = vpop.f32.mrf.mxu0  ;;  %v18840_v22 = vld [vmem:[#allocation30_spill] sm:$0xff]  ;;  %v18841_v26 = vld [vmem:[#allocation25_spill] sm:$0xff] }
 0x229   : > { %v5106_v61 = vsel %vm1002_vm5, %v15189_v51, 0.0  ;;  %v15210_v56 = vadd.f32 %v12664_v59, %v4592_v42  ;;  %v3043_v10 = vadd.f32 %v18840_v22, %v2317_v4  ;;  %v3512_v44 = vadd.f32 %v18842_v57, %v18841_v26  ;;  %v18843_v59 = vld [vmem:[#allocation17_spill] sm:$0xff]  ;;  %v12641_v42 = vpop.f32.mrf.mxu1  ;;  %v18847_v4 = vld [vmem:[#allocation46_spill] sm:$0xff] }
 0x22a   : > { %v5105_v24 = vadd.f32 %v5104_v12, %v5103_v17  ;;  %v4983_v55 = vpop.f32.mrf.mxu0  ;;  %v1962_v5 = vadd.f32 %v18843_v59, %v1497_v25  ;;  %v4594_v12 = vadd.f32 %v15149_v8, %v3868_v62  ;;  %v18848_v8 = vld [vmem:[#allocation8_spill] sm:$0xff]  ;;  %v18849_v25 = vld [vmem:[#allocation51_spill] sm:$0xff] }
 0x22b   : > { %v15205_v53 = vadd.f32 %v4983_v55, %v4590_v28  ;;  %v3871_v1 = vadd.f32 %v18845_v49, %v3512_v44  ;;  %v18846_v55 = vld [vmem:[#allocation23_spill] sm:$0xff] }
 0x22c   : > { %v5107_v30 = vadd.f32 %v5106_v61, %v5105_v24  ;;  %v12667_v11 = vpop.f32.mrf.mxu0  ;;  %v5112_v24 = vsel %vm1002_vm5, %v15210_v56, 0.0  ;;  %v3513_v36 = vadd.f32 %v18846_v55, %v3043_v10  ;;  %v2321_v62 = vadd.f32 %v18848_v8, %v1962_v5  ;;  %v18851_v44 = vld [vmem:[#allocation35_spill] sm:$0xff] }
 0x22d   : > { %v5108_v47 = vsel %vm1002_vm5, %v15205_v53, 0.0  ;;  %v4597_v34 = vadd.f32 %v4542_v15, %v3871_v1 }
 0x22e   : > { %v5109_v3 = vadd.f32 %v5108_v47, %v5107_v30  ;;  %v4996_v19 = vpop.f32.mrf.mxu0  ;;  %v4596_v30 = vadd.f32 %v15129_v50, %v18847_v4  ;;  %v3872_v22 = vadd.f32 %v18849_v25, %v3513_v36  ;;  %v18850_v50 = vld [vmem:[#allocation36_spill] sm:$0xff]  ;;  %v18855_v4 = vld [vmem:[#allocation50_spill] sm:$0xff] }
 0x22f   : > { %v15221_v17 = vadd.f32 %v4996_v19, %v4593_v48  ;;  %v15233_v48 = vadd.f32 %v12667_v11, %v4595_v33  ;;  %v3047_v11 = vadd.f32 %v18850_v50, %v2321_v62  ;;  %v4558_v19 = vpop.f32.mrf.mxu1 }
 0x230   : > { %v5111_v46 = vadd.f32 %v5110_v20, %v5109_v3  ;;  %v12668_v28 = vpop.f32.mrf.mxu0  ;;  %v18852_v20 = vld [vmem:[#allocation29_spill] sm:$0xff] }
 0x231   : > { %v5114_v29 = vsel %vm1002_vm5, %v15221_v17, 0.0  ;;  %v15241_v10 = vadd.f32 %v12668_v28, %v4596_v30  ;;  %v3516_v59 = vadd.f32 %v18852_v20, %v18851_v44  ;;  %v5118_v5 = vsel %vm1002_vm5, %v15233_v48, 0.0  ;;  %v18853_v28 = vld [vmem:[#allocation48_spill] sm:$0xff]  ;;  %v12642_v36 = vpop.f32.mrf.mxu1 }
 0x232   : > { %v5113_v61 = vadd.f32 %v5112_v24, %v5111_v46  ;;  %v4999_v21 = vpop.f32.mrf.mxu0  ;;  %v4599_v33 = vadd.f32 %v15165_v6, %v18853_v28  ;;  %v18854_v24 = vld [vmem:[#allocation33_spill] sm:$0xff]  ;;  %v4600_v30 = vadd.f32 %v12638_v43, %v18855_v4 }
 0x233   : > { %v15237_v41 = vadd.f32 %v4999_v21, %v4594_v12  ;;  %v4598_v12 = vadd.f32 %v4545_v63, %v3872_v22  ;;  %v3875_v49 = vadd.f32 %v15030_v37, %v3516_v59  ;;  %v5120_v1 = vsel %vm1002_vm5, %v15241_v10, 0.0  ;;  %v4561_v22 = vpop.f32.mrf.mxu1 }
 0x234   : > { %v5115_v47 = vadd.f32 %v5114_v29, %v5113_v61  ;;  %v12671_v32 = vpop.f32.mrf.mxu0  ;;  %v3517_v55 = vadd.f32 %v18854_v24, %v3047_v11 }
 0x235   : > { %v5116_v3 = vsel %vm1002_vm5, %v15237_v41, 0.0  ;;  %v5069_v29 = vadd.f32 %v12671_v32, %v4599_v33  ;;  %v4601_v63 = vadd.f32 %v4558_v19, %v3875_v49 }
 0x236   : > { %v5117_v26 = vadd.f32 %v5116_v3, %v5115_v47  ;;  %v5012_v57 = vpop.f32.mrf.mxu0  ;;  %v3876_v37 = vadd.f32 %v15038_v14, %v3517_v55 }
 0x237   : > { %v15250_v46 = vadd.f32 %v5012_v57, %v4597_v34  ;;  %v5126_v11 = vsel %vm1002_vm5, %v5069_v29, 0.0  ;;  %v4603_v57 = vadd.f32 %v12641_v42, %v15026_v7 }
 0x238   : > { %v5119_v15 = vadd.f32 %v5118_v5, %v5117_v26  ;;  %v12672_v35 = vpop.f32.mrf.mxu0  ;;  %v4602_v44 = vadd.f32 %v4561_v22, %v3876_v37  ;;  %v18856_v5 = vld [vmem:[#allocation52_spill] sm:$0xff] }
 0x239   : > { %v5122_v8 = vsel %vm1002_vm5, %v15250_v46, 0.0  ;;  %v5070_v34 = vadd.f32 %v12672_v35, %v4600_v30  ;;  %v4604_v14 = vadd.f32 %v12642_v36, %v18856_v5 }
 0x23a   : > { %v5121_v61 = vadd.f32 %v5120_v1, %v5119_v15  ;;  %v5015_v21 = vpop.f32.mrf.mxu0 }
 0x23b   : > { %v5068_v62 = vadd.f32 %v5015_v21, %v4598_v12  ;;  %v5128_v20 = vsel %vm1002_vm5, %v5070_v34, 0.0 }
 0x23c   : > { %v5123_v47 = vadd.f32 %v5122_v8, %v5121_v61  ;;  %v12675_v6 = vpop.f32.mrf.mxu0 }
 0x23d   : > { %v5124_v25 = vsel %vm1002_vm5, %v5068_v62, 0.0  ;;  %v5073_v15 = vadd.f32 %v12675_v6, %v4603_v57 }
 0x23e   : > { %v5125_v3 = vadd.f32 %v5124_v25, %v5123_v47  ;;  %v5028_v50 = vpop.f32.mrf.mxu0 }
 0x23f   : > { %v5071_v26 = vadd.f32 %v5028_v50, %v4601_v63  ;;  %v5134_v24 = vsel %vm1002_vm5, %v5073_v15, 0.0 }
 0x240   : > { %v5127_v43 = vadd.f32 %v5126_v11, %v5125_v3  ;;  %v12676_v32 = vpop.f32.mrf.mxu0 }
 0x241   : > { %v5130_v35 = vsel %vm1002_vm5, %v5071_v26, 0.0  ;;  %v5074_v12 = vadd.f32 %v12676_v32, %v4604_v14 }
 0x242   : > { %v5129_v59 = vadd.f32 %v5128_v20, %v5127_v43  ;;  %v5031_v19 = vpop.f32.mrf.mxu0 }
 0x243   : > { %v5072_v28 = vadd.f32 %v5031_v19, %v4602_v44  ;;  %v5136_v7 = vsel %vm1002_vm5, %v5074_v12, 0.0 }
 0x244   : > { %v5131_v33 = vadd.f32 %v5130_v35, %v5129_v59 }
 0x245   : > { %v5132_v49 = vsel %vm1002_vm5, %v5072_v28, 0.0 }
 0x246   : > { %v5133_v1 = vadd.f32 %v5132_v49, %v5131_v33 }
 0x248   : > { %v5135_v55 = vadd.f32 %v5134_v24, %v5133_v1 }
 0x24a   : > { %v5137_v42 = vadd.f32 %v5136_v7, %v5135_v55 }
 0x24c   : > { %v5138_v61 = vrot.slane %v5137_v42, 4 }
 0x24e   : > { %v5139_v21 = vadd.f32 %v5138_v61, %v5137_v42 }
 0x250   : > { %v5140_v4 = vrot.slane %v5139_v21, 2 }
 0x252   : > { %v5141_v30 = vadd.f32 %v5140_v4, %v5139_v21 }
 0x254   : > { %v5142_v36 = vrot.slane %v5141_v30, 1 }
 0x256   : > { %v5143_v8 = vadd.f32 %v5142_v36, %v5141_v30 }
 0x258   : > { %v5144_v47 = vmul.f32 0.00390625, %v5143_v8 }
 0x25a   : > { %v15272_v6 = vsub.f32 %v15137_v27, %v5144_v47  ;;  %v15275_v63 = vsub.f32 %v15155_v13, %v5144_v47  ;;  %v15278_v37 = vsub.f32 %v15173_v45, %v5144_v47  ;;  %v15281_v25 = vsub.f32 %v15169_v39, %v5144_v47 }
 0x25b   : > { %v15284_v22 = vsub.f32 %v15178_v23, %v5144_v47  ;;  %v15287_v3 = vsub.f32 %v15189_v51, %v5144_v47  ;;  %v15290_v50 = vsub.f32 %v15205_v53, %v5144_v47  ;;  %v15293_v27 = vsub.f32 %v15201_v58, %v5144_v47 }
 0x25c   : > { %v15296_v13 = vsub.f32 %v15210_v56, %v5144_v47  ;;  %v15299_v45 = vsub.f32 %v15221_v17, %v5144_v47  ;;  %v15302_v39 = vsub.f32 %v15237_v41, %v5144_v47  ;;  %v15305_v23 = vsub.f32 %v15233_v48, %v5144_v47 }
 0x25d   : > { %v15308_v51 = vsub.f32 %v15241_v10, %v5144_v47  ;;  %v15311_v53 = vsub.f32 %v15250_v46, %v5144_v47  ;;  %v15313_v58 = vsub.f32 %v5068_v62, %v5144_v47  ;;  %v15315_v11 = vsub.f32 %v5069_v29, %v5144_v47 }
 0x25e   : > { %v15317_v56 = vsub.f32 %v5070_v34, %v5144_v47  ;;  %v15319_v17 = vsub.f32 %v5071_v26, %v5144_v47  ;;  %v15321_v43 = vsub.f32 %v5072_v28, %v5144_v47  ;;  %v15323_v41 = vsub.f32 %v5073_v15, %v5144_v47 }
 0x25f   : > { %v15325_v48 = vsub.f32 %v5074_v12, %v5144_v47  ;;  %v15328_v10 = vsub.f32 %v15055_v2, %v5144_v47  ;;  %v15331_v46 = vsub.f32 %v15064_v54, %v5144_v47  ;;  %v15334_v62 = vsub.f32 %v15062_v38, %v5144_v47 }
 0x260   : > { %v15337_v29 = vsub.f32 %v15072_v0, %v5144_v47  ;;  %v15344_v32 = vsub.f32 %v15083_v18, %v5144_v47  ;;  %v15349_v54 = vsub.f32 %v15100_v40, %v5144_v47  ;;  %v15356_v20 = vsub.f32 %v15096_v60, %v5144_v47 }
 0x261   : > { %v5177_v34 = vmul.f32 %v15328_v10, %v15328_v10  ;;  %v5178_v26 = vmul.f32 %v15331_v46, %v15331_v46  ;;  %v5179_v2 = vmul.f32 %v15334_v62, %v15334_v62  ;;  %v15362_v40 = vsub.f32 %v15106_v16, %v5144_v47 }
 0x262   : > { %v5180_v38 = vmul.f32 %v15337_v29, %v15337_v29  ;;  %v5181_v18 = vmul.f32 %v15344_v32, %v15344_v32  ;;  %v5182_v5 = vmul.f32 %v15349_v54, %v15349_v54  ;;  %v15368_v35 = vsub.f32 %v15119_v52, %v5144_v47 }
 0x263   : > { %v5209_v0 = vsel %vm1002_vm5, %v5177_v34, 0.0  ;;  %v5210_v57 = vsel %vm1002_vm5, %v5178_v26, 0.0  ;;  %v5212_v59 = vsel %vm1002_vm5, %v5179_v2, 0.0  ;;  %v5183_v60 = vmul.f32 %v15356_v20, %v15356_v20 }
 0x264   : > { %v5211_v44 = vadd.f32 %v5210_v57, %v5209_v0  ;;  %v5214_v14 = vsel %vm1002_vm5, %v5180_v38, 0.0  ;;  %v5216_v28 = vsel %vm1002_vm5, %v5181_v18, 0.0  ;;  %v5184_v12 = vmul.f32 %v15362_v40, %v15362_v40 }
 0x265   : > { %v5218_v16 = vsel %vm1002_vm5, %v5182_v5, 0.0  ;;  %v15377_v1 = vsub.f32 %v15133_v9, %v5144_v47  ;;  %v5185_v24 = vmul.f32 %v15368_v35, %v15368_v35  ;;  %v5220_v52 = vsel %vm1002_vm5, %v5183_v60, 0.0 }
 0x266   : > { %v5213_v19 = vadd.f32 %v5212_v59, %v5211_v44  ;;  %v15383_v7 = vsub.f32 %v15142_v31, %v5144_v47  ;;  %v5186_v42 = vmul.f32 %v15272_v6, %v15272_v6  ;;  %v5222_v61 = vsel %vm1002_vm5, %v5184_v12, 0.0 }
 0x267   : > { %v5187_v4 = vmul.f32 %v15377_v1, %v15377_v1  ;;  %v5224_v9 = vsel %vm1002_vm5, %v5185_v24, 0.0  ;;  %v5189_v31 = vmul.f32 %v15275_v63, %v15275_v63  ;;  %v5190_v2 = vmul.f32 %v15278_v37, %v15278_v37 }
 0x268   : > { %v5215_v15 = vadd.f32 %v5214_v14, %v5213_v19  ;;  %v5188_v36 = vmul.f32 %v15383_v7, %v15383_v7  ;;  %v5226_v8 = vsel %vm1002_vm5, %v5186_v42, 0.0  ;;  %v5191_v57 = vmul.f32 %v15281_v25, %v15281_v25 }
 0x269   : > { %v5228_v47 = vsel %vm1002_vm5, %v5187_v4, 0.0  ;;  %v5232_v44 = vsel %vm1002_vm5, %v5189_v31, 0.0  ;;  %v5192_v59 = vmul.f32 %v15284_v22, %v15284_v22  ;;  %v5234_v19 = vsel %vm1002_vm5, %v5190_v2, 0.0 }
 0x26a   : > { %v5217_v33 = vadd.f32 %v5216_v28, %v5215_v15  ;;  %v5230_v38 = vsel %vm1002_vm5, %v5188_v36, 0.0  ;;  %v5193_v14 = vmul.f32 %v15287_v3, %v15287_v3  ;;  %v5236_v15 = vsel %vm1002_vm5, %v5191_v57, 0.0 }
 0x26b   : > { %v5194_v28 = vmul.f32 %v15290_v50, %v15290_v50 }
 0x26c   : > { %v5219_v49 = vadd.f32 %v5218_v16, %v5217_v33  ;;  %v5238_v33 = vsel %vm1002_vm5, %v5192_v59, 0.0  ;;  %v5195_v16 = vmul.f32 %v15293_v27, %v15293_v27 }
 0x26e   : > { %v5221_v55 = vadd.f32 %v5220_v52, %v5219_v49  ;;  %v5240_v49 = vsel %vm1002_vm5, %v5193_v14, 0.0  ;;  %v5196_v52 = vmul.f32 %v15296_v13, %v15296_v13 }
 0x270   : > { %v5223_v21 = vadd.f32 %v5222_v61, %v5221_v55  ;;  %v5242_v55 = vsel %vm1002_vm5, %v5194_v28, 0.0  ;;  %v5197_v61 = vmul.f32 %v15299_v45, %v15299_v45 }
 0x272   : > { %v5225_v30 = vadd.f32 %v5224_v9, %v5223_v21  ;;  %v5244_v21 = vsel %vm1002_vm5, %v5195_v16, 0.0  ;;  %v5198_v9 = vmul.f32 %v15302_v39, %v15302_v39 }
 0x274   : > { %v5227_v34 = vadd.f32 %v5226_v8, %v5225_v30  ;;  %v5246_v30 = vsel %vm1002_vm5, %v5196_v52, 0.0  ;;  %v5199_v8 = vmul.f32 %v15305_v23, %v15305_v23 }
 0x276   : > { %v5229_v26 = vadd.f32 %v5228_v47, %v5227_v34  ;;  %v5248_v34 = vsel %vm1002_vm5, %v5197_v61, 0.0  ;;  %v5200_v47 = vmul.f32 %v15308_v51, %v15308_v51 }
 0x278   : > { %v5231_v0 = vadd.f32 %v5230_v38, %v5229_v26  ;;  %v5250_v26 = vsel %vm1002_vm5, %v5198_v9, 0.0  ;;  %v5201_v38 = vmul.f32 %v15311_v53, %v15311_v53 }
 0x27a   : > { %v5233_v18 = vadd.f32 %v5232_v44, %v5231_v0  ;;  %v5252_v0 = vsel %vm1002_vm5, %v5199_v8, 0.0  ;;  %v5202_v44 = vmul.f32 %v15313_v58, %v15313_v58 }
 0x27c   : > { %v5235_v5 = vadd.f32 %v5234_v19, %v5233_v18  ;;  %v5254_v18 = vsel %vm1002_vm5, %v5200_v47, 0.0  ;;  %v5203_v19 = vmul.f32 %v15315_v11, %v15315_v11 }
 0x27e   : > { %v5237_v60 = vadd.f32 %v5236_v15, %v5235_v5  ;;  %v5256_v5 = vsel %vm1002_vm5, %v5201_v38, 0.0  ;;  %v5204_v15 = vmul.f32 %v15317_v56, %v15317_v56 }
 0x280   : > { %v5239_v12 = vadd.f32 %v5238_v33, %v5237_v60  ;;  %v5258_v60 = vsel %vm1002_vm5, %v5202_v44, 0.0  ;;  %v5205_v33 = vmul.f32 %v15319_v17, %v15319_v17 }
 0x282   : > { %v5241_v24 = vadd.f32 %v5240_v49, %v5239_v12  ;;  %v5260_v12 = vsel %vm1002_vm5, %v5203_v19, 0.0  ;;  %v5206_v49 = vmul.f32 %v15321_v43, %v15321_v43 }
 0x284   : > { %v5243_v42 = vadd.f32 %v5242_v55, %v5241_v24  ;;  %v5262_v24 = vsel %vm1002_vm5, %v5204_v15, 0.0  ;;  %v5207_v55 = vmul.f32 %v15323_v41, %v15323_v41 }
 0x286   : > { %v5245_v4 = vadd.f32 %v5244_v21, %v5243_v42  ;;  %v5264_v42 = vsel %vm1002_vm5, %v5205_v33, 0.0  ;;  %v5208_v21 = vmul.f32 %v15325_v48, %v15325_v48 }
 0x288   : > { %v5247_v36 = vadd.f32 %v5246_v30, %v5245_v4  ;;  %v5266_v4 = vsel %vm1002_vm5, %v5206_v49, 0.0  ;;  %v5268_v30 = vsel %vm1002_vm5, %v5207_v55, 0.0  ;;  %v5270_v8 = vsel %vm1002_vm5, %v5208_v21, 0.0 }
 0x28a   : > { %v5249_v31 = vadd.f32 %v5248_v34, %v5247_v36 }
 0x28c   : > { %v5251_v2 = vadd.f32 %v5250_v26, %v5249_v31  ;;  %v11600_v26 = vld [vmem:[%s18682_s2 + $0x2] sm:$0x3] }
 0x28d   : > { %12992 = vmatprep.subr.msk.bf16.mxu1 %vm1051_vm0, %v11600_v26 }
 0x28e   : > { %v5253_v57 = vadd.f32 %v5252_v0, %v5251_v2  ;;  %v6218_v2 = vld [vmem:[%s18682_s2] sm:$0x3]  ;;  %v6718_v0 = vsel %vm1051_vm0, %v11600_v26, 0 }
 0x28f   : > { %12993 = vmatprep.subr.msk.bf16.mxu0 %vm1051_vm0, %v6218_v2  ;;  %12678 = vmatpush3.bf16.msra.mxu1 %v6718_v0 }
 0x290   : > { %v5255_v59 = vadd.f32 %v5254_v18, %v5253_v57  ;;  %v7010_v57 = vsel %vm1051_vm0, %v6218_v2, 0 }
 0x291   : > { %12712 = vmatpush3.bf16.msra.mxu0 %v7010_v57 }
 0x292   : > { %v5257_v14 = vadd.f32 %v5256_v5, %v5255_v59 }
 0x294   : > { %v5259_v28 = vadd.f32 %v5258_v60, %v5257_v14  ;;  %v11681_v14 = vld [vmem:[%s18682_s2 + $0x4] sm:$0x3] }
 0x295   : > { %12994 = vmatprep.subr.msk.bf16.mxu1 %vm1051_vm0, %v11681_v14  ;;  %v15471_v60 = vsel %vm1051_vm0, %v11681_v14, 0 }
 0x296   : > { %v5261_v16 = vadd.f32 %v5260_v12, %v5259_v28  ;;  %18857 = vst [vmem:[#allocation19_spill] sm:$0xff] %v15471_v60  ;;  %v5819_v60 = vld [vmem:[#allocation3 + $0x60] sm:$0xf] }
 0x298   : > { %v5263_v52 = vadd.f32 %v5262_v24, %v5261_v16 }
 0x29a   : > { %v5265_v61 = vadd.f32 %v5264_v42, %v5263_v52 }
 0x29c   : > { %v5267_v9 = vadd.f32 %v5266_v4, %v5265_v61 }
 0x29e   : > { %v5269_v36 = vadd.f32 %v5268_v30, %v5267_v9 }
 0x2a0   : > { %v5271_v34 = vadd.f32 %v5270_v8, %v5269_v36  ;;  %v5894_v36 = vld [vmem:[#allocation3 + $0xd4] sm:$0x1] }
 0x2a2   : > { %v5272_v31 = vrot.slane %v5271_v34, 4 }
 0x2a4   : > { %v5273_v47 = vadd.f32 %v5272_v31, %v5271_v34 }
 0x2a6   : > { %v5274_v38 = vrot.slane %v5273_v47, 2 }
 0x2a8   : > { %v5275_v44 = vadd.f32 %v5274_v38, %v5273_v47 }
 0x2aa   : > { %v5276_v18 = vrot.slane %v5275_v44, 1 }
 0x2ac   : > { %v5277_v59 = vadd.f32 %v5276_v18, %v5275_v44 }
 0x2ae   : > { %v5278_v19 = vmul.f32 0.00390625, %v5277_v59 }
 0x2b0   : > { %v5279_v5 = vadd.f32 1e-05, %v5278_v19 }
 0x2b2   : > { %13106 = vrsqrt.f32 %v5279_v5 }
 0x2bf   : > { %v13107_v15 = vpop.eup %13106 }
 0x2c0   : > { %v5309_v28 = vmul.f32 %v13107_v15, %v15319_v17  ;;  %v5310_v33 = vmul.f32 %v13107_v15, %v15321_v43  ;;  %v15476_v12 = vmul.f32 %v13107_v15, %v15328_v10  ;;  %v15479_v16 = vmul.f32 %v13107_v15, %v15331_v46 }
 0x2c1   : > { %v15482_v49 = vmul.f32 %v13107_v15, %v15334_v62  ;;  %v15485_v24 = vmul.f32 %v13107_v15, %v15337_v29  ;;  %v15488_v52 = vmul.f32 %v13107_v15, %v15344_v32  ;;  %v15491_v55 = vmul.f32 %v13107_v15, %v15349_v54 }
 0x2c2   : > { %v5341_v17 = vmax.f32 %v5309_v28, 0.0  ;;  %v5342_v43 = vmax.f32 %v5310_v33, 0.0  ;;  %v15494_v10 = vmul.f32 %v13107_v15, %v15356_v20  ;;  %v15497_v46 = vmul.f32 %v13107_v15, %v15362_v40 }
 0x2c3   : > { %v15500_v62 = vmul.f32 %v13107_v15, %v15368_v35  ;;  %v15503_v29 = vmul.f32 %v13107_v15, %v15272_v6  ;;  %v15506_v32 = vmul.f32 %v13107_v15, %v15377_v1  ;;  %v15509_v54 = vmul.f32 %v13107_v15, %v15383_v7 }
 0x2c4   : > { %v15511_v42 = vpack.c.bf16 %v5341_v17, %v5341_v17  ;;  %v12062_v61 = vpack.c.bf16 %v5342_v43, %v5342_v43  ;;  %v15514_v20 = vmul.f32 %v13107_v15, %v15275_v63  ;;  %v15517_v40 = vmul.f32 %v13107_v15, %v15278_v37 }
 0x2c5   : > { %v15520_v35 = vmul.f32 %v13107_v15, %v15281_v25  ;;  %v15523_v6 = vmul.f32 %v13107_v15, %v15284_v22  ;;  %v15526_v1 = vmul.f32 %v13107_v15, %v15287_v3  ;;  %v15529_v7 = vmul.f32 %v13107_v15, %v15290_v50  ;;  %v5882_v50 = vld [vmem:[#allocation3] sm:$0xf] }
 0x2c6   : > { %v5683_v21 = vshrl.u32 %v15511_v42, 16  ;;  %v5691_v4 = vshrl.u32 %v12062_v61, 16  ;;  %v5694_v63 = vshll.u32 %v12062_v61, 16  ;;  %v15533_v9 = vmul.f32 %v13107_v15, %v15293_v27 }
 0x2c7   : > { %v15536_v37 = vmul.f32 %v13107_v15, %v15296_v13  ;;  %v15539_v25 = vmul.f32 %v13107_v15, %v15299_v45  ;;  %v15542_v22 = vmul.f32 %v13107_v15, %v15302_v39  ;;  %v15545_v3 = vmul.f32 %v13107_v15, %v15305_v23  ;;  %v5872_v23 = vld [vmem:[#allocation3 + $0xbc] sm:$0x1] }
 0x2c8   : > { %v15553_v27 = vrot.slane %v5683_v21, 7  ;;  %v5693_v30 = vrot.slane %v5691_v4, 7  ;;  %v15556_v13 = vmul.f32 %v13107_v15, %v15308_v51  ;;  %v15559_v45 = vmul.f32 %v13107_v15, %v15311_v53 }
 0x2c9   : > { %v15568_v8 = vmul.f32 %v13107_v15, %v15313_v58  ;;  %v15571_v34 = vmul.f32 %v13107_v15, %v15315_v11  ;;  %v15574_v51 = vmul.f32 %v13107_v15, %v15317_v56  ;;  %v15577_v53 = vmul.f32 %v13107_v15, %v15323_v41 }
 0x2ca   : > { %v5689_v31 = vrot.slane %v15553_v27, 4  ;;  %v5696_v47 = vor.u32 %v5694_v63, %v5693_v30  ;;  %v5698_v26 = vrot.slane %v5693_v30, 4  ;;  %v15581_v2 = vmul.f32 %v13107_v15, %v15325_v48 }
 0x2cb   : > { %v5686_v58 = vshll.u32 %v15511_v42, 16  ;;  %v5313_v38 = vmax.f32 %v15476_v12, 0.0  ;;  %v5314_v11 = vmax.f32 %v15479_v16, 0.0  ;;  %v5315_v56 = vmax.f32 %v15482_v49, 0.0  ;;  %v5805_v42 = vld [vmem:[#allocation3 + $0x48] sm:$0xf] }
 0x2cc   : > { %v5697_v41 = vsel %vm15549_vm12, %v5689_v31, %v5696_v47  ;;  %v5873_v0 = vsel %vm15563_vm13, %v5698_v26, %v5872_v23  ;;  %v5895_v57 = vsel %vm15563_vm13, %v5698_v26, %v5894_v36  ;;  %v5316_v48 = vmax.f32 %v15485_v24, 0.0 }
 0x2cd   : > { %5871 = vst.msk [vmem:[#allocation3 + $0xb8] sm:$0xf] %vm460_vm1, %v5697_v41  ;;  %5874 = vst [vmem:[#allocation3 + $0xbc] sm:$0x1] %v5873_v0  ;;  %v5317_v44 = vmax.f32 %v15488_v52, 0.0  ;;  %v5318_v18 = vmax.f32 %v15491_v55, 0.0  ;;  %v12035_v4 = vpack.c.bf16 %v5315_v56, %v5315_v56 }
 0x2ce   : > { %5893 = vst.msk [vmem:[#allocation3 + $0xd0] sm:$0xf] %vm460_vm1, %v5697_v41  ;;  %5896 = vst [vmem:[#allocation3 + $0xd4] sm:$0x1] %v5895_v57  ;;  %v5319_v59 = vmax.f32 %v15494_v10, 0.0  ;;  %v5320_v19 = vmax.f32 %v15497_v46, 0.0  ;;  %v12036_v63 = vpack.c.bf16 %v5316_v48, %v5316_v48 }
 0x2cf   : > { %v5321_v5 = vmax.f32 %v15500_v62, 0.0  ;;  %v5322_v14 = vmax.f32 %v15503_v29, 0.0  ;;  %v5323_v15 = vmax.f32 %v15506_v32, 0.0  ;;  %v5324_v28 = vmax.f32 %v15509_v54, 0.0 }
 0x2d0   : > { %v5325_v33 = vmax.f32 %v15514_v20, 0.0  ;;  %v5326_v12 = vmax.f32 %v15517_v40, 0.0  ;;  %v5327_v16 = vmax.f32 %v15520_v35, 0.0  ;;  %v5328_v49 = vmax.f32 %v15523_v6, 0.0 }
 0x2d1   : > { %v5329_v24 = vmax.f32 %v15526_v1, 0.0  ;;  %v5330_v52 = vmax.f32 %v15529_v7, 0.0  ;;  %v5331_v55 = vmax.f32 %v15533_v9, 0.0  ;;  %v5332_v17 = vmax.f32 %v15536_v37, 0.0 }
 0x2d2   : > { %v5333_v43 = vmax.f32 %v15539_v25, 0.0  ;;  %v5334_v10 = vmax.f32 %v15542_v22, 0.0  ;;  %v5335_v46 = vmax.f32 %v15545_v3, 0.0  ;;  %v5336_v62 = vmax.f32 %v15556_v13, 0.0 }
 0x2d3   : > { %v5337_v29 = vmax.f32 %v15559_v45, 0.0  ;;  %v5338_v32 = vmax.f32 %v15568_v8, 0.0  ;;  %v5339_v54 = vmax.f32 %v15571_v34, 0.0  ;;  %v5340_v61 = vmax.f32 %v15574_v51, 0.0 }
 0x2d4   : > { %v5343_v20 = vmax.f32 %v15577_v53, 0.0  ;;  %v5344_v40 = vmax.f32 %v15581_v2, 0.0  ;;  %v12033_v35 = vpack.c.bf16 %v5313_v38, %v5313_v38  ;;  %v12034_v6 = vpack.c.bf16 %v5314_v11, %v5314_v11  ;;  %v6056_v7 = vld [vmem:[#allocation3 + $0xb8] sm:$0x8]  ;;  %v6177_v3 = vld [vmem:[#allocation3 + $0xbc] sm:$0x1] }
 0x2d5   : > { %v18862_v1 = vmov 0  ;;  %v6058_v21 = vld [vmem:[#allocation3 + $0xd0] sm:$0x8]  ;;  %v15628_v9 = vpack.c.bf16 %v5317_v44, %v5317_v44  ;;  %v15630_v37 = vpack.c.bf16 %v5318_v18, %v5318_v18  ;;  %v11597_v25 = vrot.slane %v6056_v7, 11  ;;  %v6183_v45 = vld [vmem:[#allocation3 + $0xd4] sm:$0x1] }
 0x2d6   : > { %v18863_v1 = vsel %vm15624_vm15, 4294967295, %v18862_v1  ;;  %v11599_v22 = vrot.slane %v6058_v21, 11  ;;  %v15632_v30 = vpack.c.bf16 %v5319_v59, %v5319_v59  ;;  %v15634_v13 = vpack.c.bf16 %v5320_v19, %v5320_v19 }
 0x2d7   : > { %18864 = vst [vmem:[#allocation15_spill] sm:$0xff] %v18863_v1  ;;  %v15636_v23 = vpack.c.bf16 %v5321_v5, %v5321_v5  ;;  %v15638_v36 = vpack.c.bf16 %v5322_v14, %v5322_v14  ;;  %v15640_v8 = vpack.c.bf16 %v5323_v15, %v5323_v15  ;;  %v15642_v34 = vpack.c.bf16 %v5324_v28, %v5324_v28  ;;  %v5840_v1 = vld [vmem:[#allocation3 + $0x84] sm:$0xf] }
 0x2d8   : > { %v6178_v51 = vsel %vm15624_vm15, %v11597_v25, %v6177_v3  ;;  %v6184_v53 = vsel %vm15624_vm15, %v11599_v22, %v6183_v45  ;;  %v15648_v31 = vpack.c.bf16 %v5325_v33, %v5325_v33  ;;  %v15650_v47 = vpack.c.bf16 %v5326_v12, %v5326_v12 }
 0x2d9   : > { %6179 = vst [vmem:[#allocation3 + $0xbc] sm:$0x1] %v6178_v51  ;;  %6185 = vst [vmem:[#allocation3 + $0xd4] sm:$0x1] %v6184_v53  ;;  %v15652_v26 = vpack.c.bf16 %v5327_v16, %v5327_v16  ;;  %v15654_v2 = vpack.c.bf16 %v5328_v49, %v5328_v49  ;;  %v15656_v38 = vpack.c.bf16 %v5329_v24, %v5329_v24  ;;  %v5445_v28 = vshrl.u32 %v12033_v35, 16 }
 0x2da   : > { %v15658_v11 = vpack.c.bf16 %v5330_v52, %v5330_v52  ;;  %v15660_v56 = vpack.c.bf16 %v5331_v55, %v5331_v55  ;;  %v15662_v41 = vpack.c.bf16 %v5332_v17, %v5332_v17  ;;  %v15664_v0 = vpack.c.bf16 %v5333_v43, %v5333_v43 }
 0x2db   : > { %v15666_v57 = vpack.c.bf16 %v5334_v10, %v5334_v10  ;;  %v15668_v48 = vpack.c.bf16 %v5335_v46, %v5335_v46  ;;  %v15670_v44 = vpack.c.bf16 %v5336_v62, %v5336_v62  ;;  %v15672_v18 = vpack.c.bf16 %v5337_v29, %v5337_v29 }
 0x2dc   : > { %v15674_v59 = vpack.c.bf16 %v5338_v32, %v5338_v32  ;;  %v15676_v19 = vpack.c.bf16 %v5339_v54, %v5339_v54  ;;  %v15678_v5 = vpack.c.bf16 %v5340_v61, %v5340_v61  ;;  %v15680_v14 = vpack.c.bf16 %v5343_v20, %v5343_v20 }
 0x2dd   : > { %v15682_v15 = vpack.c.bf16 %v5344_v40, %v5344_v40  ;;  %v5448_v33 = vshll.u32 %v12033_v35, 16  ;;  %v5453_v12 = vshrl.u32 %v12034_v6, 16  ;;  %v5456_v16 = vshll.u32 %v12034_v6, 16 }
 0x2de   : > { %v5462_v49 = vshrl.u32 %v12035_v4, 16  ;;  %v5465_v24 = vshll.u32 %v12035_v4, 16  ;;  %v5470_v52 = vshrl.u32 %v12036_v63, 16  ;;  %v5473_v55 = vshll.u32 %v12036_v63, 16 }
 0x2df   : > { %v5447_v17 = vrot.slane %v5445_v28, 7  ;;  %v15684_v43 = vrot.slane %v5453_v12, 7  ;;  %v5479_v10 = vshrl.u32 %v15628_v9, 16  ;;  %v5482_v46 = vshll.u32 %v15628_v9, 16 }
 0x2e0   : > { %v5464_v62 = vrot.slane %v5462_v49, 7  ;;  %v15688_v29 = vrot.slane %v5470_v52, 7  ;;  %v5487_v32 = vshrl.u32 %v15630_v37, 16  ;;  %v5490_v54 = vshll.u32 %v15630_v37, 16 }
 0x2e1   : > { %v15692_v61 = vor.u32 %v5448_v33, %v5447_v17  ;;  %v5451_v20 = vrot.slane %v5447_v17, 4  ;;  %v5458_v40 = vor.u32 %v5456_v16, %v15684_v43  ;;  %v5481_v9 = vrot.slane %v5479_v10, 7 }
 0x2e2   : > { %v15696_v6 = vor.u32 %v5465_v24, %v5464_v62  ;;  %v5468_v7 = vrot.slane %v5464_v62, 4  ;;  %v5475_v21 = vor.u32 %v5473_v55, %v15688_v29  ;;  %v15702_v25 = vrot.slane %v5487_v32, 7  ;;  %v5816_v32 = vld [vmem:[#allocation3 + $0x5c] sm:$0x1] }
 0x2e3   : > { %v5459_v63 = vsel %vm15549_vm12, %v5451_v20, %v5458_v40  ;;  %v5496_v37 = vshrl.u32 %v15632_v30, 16  ;;  %v5499_v3 = vshll.u32 %v15632_v30, 16  ;;  %v5504_v45 = vshrl.u32 %v15634_v13, 16 }
 0x2e4   : > { %v5476_v22 = vsel %vm15549_vm12, %v5468_v7, %v5475_v21  ;;  %v5507_v51 = vshll.u32 %v15634_v13, 16  ;;  %5771 = vst.msk [vmem:[#allocation3 + $0x10] sm:$0xf] %vm460_vm1, %v5459_v63  ;;  %v15711_v53 = vor.u32 %v5482_v46, %v5481_v9  ;;  %v5485_v28 = vrot.slane %v5481_v9, 4 }
 0x2e5   : > { %v5492_v33 = vor.u32 %v5490_v54, %v15702_v25  ;;  %5780 = vst.msk [vmem:[#allocation3 + $0x1c] sm:$0xf] %vm460_vm1, %v5476_v22  ;;  %5885 = vst.msk [vmem:[#allocation3 + $0x4] sm:$0xf] %vm460_vm1, %v5476_v22  ;;  %v5498_v16 = vrot.slane %v5496_v37, 7  ;;  %v15717_v49 = vrot.slane %v5504_v45, 7 }
 0x2e6   : > { %v5513_v30 = vshrl.u32 %v15636_v23, 16  ;;  %v5516_v13 = vshll.u32 %v15636_v23, 16  ;;  %v5521_v52 = vshrl.u32 %v15638_v36, 16  ;;  %v5524_v55 = vshll.u32 %v15638_v36, 16 }
 0x2e7   : > { %v5493_v24 = vsel %vm15549_vm12, %v5485_v28, %v5492_v33  ;;  %v5530_v17 = vshrl.u32 %v15640_v8, 16  ;;  %v15726_v10 = vor.u32 %v5499_v3, %v5498_v16  ;;  %v5502_v46 = vrot.slane %v5498_v16, 4 }
 0x2e8   : > { %v5509_v62 = vor.u32 %v5507_v51, %v15717_v49  ;;  %5787 = vst.msk [vmem:[#allocation3 + $0x28] sm:$0xf] %vm460_vm1, %v5493_v24  ;;  %v5515_v54 = vrot.slane %v5513_v30, 7  ;;  %v15731_v23 = vrot.slane %v5521_v52, 7  ;;  %v5533_v40 = vshll.u32 %v15640_v8, 16 }
 0x2e9   : > { %v5532_v20 = vrot.slane %v5530_v17, 7  ;;  %v5538_v7 = vshrl.u32 %v15642_v34, 16  ;;  %v5541_v21 = vshll.u32 %v15642_v34, 16  ;;  %v5547_v63 = vshrl.u32 %v15648_v31, 16 }
 0x2ea   : > { %v5510_v36 = vsel %vm15549_vm12, %v5502_v46, %v5509_v62  ;;  %v15739_v9 = vor.u32 %v5516_v13, %v5515_v54  ;;  %v5519_v37 = vrot.slane %v5515_v54, 4  ;;  %v5526_v22 = vor.u32 %v5524_v55, %v15731_v23 }
 0x2eb   : > { %5794 = vst.msk [vmem:[#allocation3 + $0x34] sm:$0xf] %vm460_vm1, %v5510_v36  ;;  %v15744_v45 = vor.u32 %v5533_v40, %v5532_v20  ;;  %v5536_v8 = vrot.slane %v5532_v20, 4  ;;  %v15746_v51 = vrot.slane %v5538_v7, 7  ;;  %v5549_v28 = vrot.slane %v5547_v63, 7 }
 0x2ec   : > { %v5527_v34 = vsel %vm15549_vm12, %v5519_v37, %v5526_v22  ;;  %v5550_v33 = vshll.u32 %v15648_v31, 16  ;;  %v5555_v16 = vshrl.u32 %v15650_v47, 16  ;;  %v5558_v30 = vshll.u32 %v15650_v47, 16 }
 0x2ed   : > { %v5543_v13 = vor.u32 %v5541_v21, %v15746_v51  ;;  %v5553_v52 = vrot.slane %v5549_v28, 4  ;;  %v5564_v55 = vshrl.u32 %v15652_v26, 16  ;;  %5801 = vst.msk [vmem:[#allocation3 + $0x40] sm:$0xf] %vm460_vm1, %v5527_v34  ;;  %v5567_v62 = vshll.u32 %v15652_v26, 16 }
 0x2ee   : > { %v15757_v17 = vor.u32 %v5550_v33, %v5549_v28  ;;  %v15759_v46 = vrot.slane %v5555_v16, 7  ;;  %v5572_v31 = vshrl.u32 %v15654_v2, 16  ;;  %v5575_v20 = vshll.u32 %v15654_v2, 16 }
 0x2ef   : > { %v5544_v47 = vsel %vm15549_vm12, %v5536_v8, %v5543_v13  ;;  %v5566_v54 = vrot.slane %v5564_v55, 7  ;;  %v5581_v40 = vshrl.u32 %v15656_v38, 16  ;;  %v5584_v63 = vshll.u32 %v15656_v38, 16  ;;  %v11714_v55 = vld [vmem:[%s18682_s2 + $0x6] sm:$0x3] }
 0x2f0   : > { %v5560_v36 = vor.u32 %v5558_v30, %v15759_v46  ;;  %v15769_v21 = vrot.slane %v5572_v31, 7  ;;  %5808 = vst.msk [vmem:[#allocation3 + $0x4c] sm:$0xf] %vm460_vm1, %v5544_v47  ;;  %v5589_v8 = vshrl.u32 %v15658_v11, 16  ;;  %v5592_v33 = vshll.u32 %v15658_v11, 16  ;;  %12995 = vmatprep.subr.msk.bf16.mxu0 %vm1051_vm0, %v11714_v55 }
 0x2f1   : > { %v15773_v26 = vor.u32 %v5567_v62, %v5566_v54  ;;  %v5570_v37 = vrot.slane %v5566_v54, 4  ;;  %v5583_v22 = vrot.slane %v5581_v40, 7  ;;  %v5598_v13 = vshrl.u32 %v15660_v56, 16  ;;  %v5802_v54 = vld [vmem:[#allocation3 + $0x44] sm:$0x1] }
 0x2f2   : > { %v5561_v2 = vsel %vm15549_vm12, %v5553_v52, %v5560_v36  ;;  %v5577_v28 = vor.u32 %v5575_v20, %v15769_v21  ;;  %v15783_v30 = vrot.slane %v5589_v8, 7  ;;  %v5601_v62 = vshll.u32 %v15660_v56, 16 }
 0x2f3   : > { %v15781_v16 = vor.u32 %v5584_v63, %v5583_v22  ;;  %v5587_v38 = vrot.slane %v5583_v22, 4  ;;  %5815 = vst.msk [vmem:[#allocation3 + $0x58] sm:$0xf] %vm460_vm1, %v5561_v2  ;;  %v5606_v11 = vshrl.u32 %v15662_v41, 16  ;;  %v5609_v31 = vshll.u32 %v15662_v41, 16 }
 0x2f4   : > { %v5578_v52 = vsel %vm15549_vm12, %v5570_v37, %v5577_v28  ;;  %v5594_v47 = vor.u32 %v5592_v33, %v15783_v30  ;;  %v5600_v20 = vrot.slane %v5598_v13, 7  ;;  %v5615_v40 = vshrl.u32 %v15664_v0, 16 }
 0x2f5   : > { %5822 = vst.msk [vmem:[#allocation3 + $0x64] sm:$0xf] %vm460_vm1, %v5578_v52  ;;  %v15800_v36 = vrot.slane %v5606_v11, 7  ;;  %v5618_v63 = vshll.u32 %v15664_v0, 16  ;;  %v5623_v56 = vshrl.u32 %v15666_v57, 16  ;;  %v5626_v37 = vshll.u32 %v15666_v57, 16 }
 0x2f6   : > { %v5595_v41 = vsel %vm15549_vm12, %v5587_v38, %v5594_v47  ;;  %v15807_v22 = vor.u32 %v5601_v62, %v5600_v20  ;;  %v5604_v8 = vrot.slane %v5600_v20, 4  ;;  %v5617_v2 = vrot.slane %v5615_v40, 7 }
 0x2f7   : > { %v5611_v28 = vor.u32 %v5609_v31, %v15800_v36  ;;  %v15811_v13 = vrot.slane %v5623_v56, 7  ;;  %v5632_v55 = vshrl.u32 %v15668_v48, 16  ;;  %5829 = vst.msk [vmem:[#allocation3 + $0x70] sm:$0xf] %vm460_vm1, %v5595_v41  ;;  %v5635_v52 = vshll.u32 %v15668_v48, 16 }
 0x2f8   : > { %v15815_v0 = vor.u32 %v5618_v63, %v5617_v2  ;;  %v5621_v57 = vrot.slane %v5617_v2, 4  ;;  %v5640_v38 = vshrl.u32 %v15670_v44, 16  ;;  %v5643_v40 = vshll.u32 %v15670_v44, 16 }
 0x2f9   : > { %v5612_v62 = vsel %vm15549_vm12, %v5604_v8, %v5611_v28  ;;  %v5628_v11 = vor.u32 %v5626_v37, %v15811_v13  ;;  %v5634_v47 = vrot.slane %v5632_v55, 7  ;;  %v5649_v63 = vshrl.u32 %v15672_v18, 16 }
 0x2fa   : > { %v15823_v20 = vrot.slane %v5640_v38, 7  ;;  %v5652_v56 = vshll.u32 %v15672_v18, 16  ;;  %5836 = vst.msk [vmem:[#allocation3 + $0x7c] sm:$0xf] %vm460_vm1, %v5612_v62  ;;  %v5657_v37 = vshrl.u32 %v15674_v59, 16  ;;  %v5660_v44 = vshll.u32 %v15674_v59, 16 }
 0x2fb   : > { %v5629_v48 = vsel %vm15549_vm12, %v5621_v57, %v5628_v11  ;;  %v15831_v41 = vor.u32 %v5635_v52, %v5634_v47  ;;  %v5638_v8 = vrot.slane %v5634_v47, 4  ;;  %v5651_v55 = vrot.slane %v5649_v63, 7  ;;  %v5777_v62 = vld [vmem:[#allocation3 + $0x18] sm:$0xf]  ;;  %v5768_v11 = vld [vmem:[#allocation3 + $0xc] sm:$0xf] }
 0x2fc   : > { %v5645_v2 = vor.u32 %v5643_v40, %v15823_v20  ;;  %5843 = vst.msk [vmem:[#allocation3 + $0x88] sm:$0xf] %vm460_vm1, %v5629_v48  ;;  %v15838_v18 = vrot.slane %v5657_v37, 7  ;;  %v5666_v38 = vshrl.u32 %v15676_v19, 16  ;;  %v5669_v57 = vshll.u32 %v15676_v19, 16 }
 0x2fd   : > { %v5674_v52 = vshrl.u32 %v15678_v5, 16  ;;  %v5774_v47 = vld [vmem:[#allocation3 + $0x14] sm:$0x1]  ;;  %v15845_v28 = vor.u32 %v5652_v56, %v5651_v55  ;;  %v5655_v63 = vrot.slane %v5651_v55, 4  ;;  %v5677_v59 = vshll.u32 %v15678_v5, 16 }
 0x2fe   : > { %v5646_v40 = vsel %vm15549_vm12, %v5638_v8, %v5645_v2  ;;  %v5662_v48 = vor.u32 %v5660_v44, %v15838_v18  ;;  %v5668_v31 = vrot.slane %v5666_v38, 7  ;;  %v5781_v56 = vld [vmem:[#allocation3 + $0x20] sm:$0x1]  ;;  %v5791_v8 = vld [vmem:[#allocation3 + $0x30] sm:$0xf]  ;;  %v15862_v5 = vor.u32 %v5686_v58, %v15553_v27 }
 0x2ff   : > { %v15850_v33 = vrot.slane %v5674_v52, 7  ;;  %5850 = vst.msk [vmem:[#allocation3 + $0x94] sm:$0xf] %vm460_vm1, %v5646_v40  ;;  %v5784_v2 = vld [vmem:[#allocation3 + $0x24] sm:$0xf]  ;;  %v5700_v44 = vshrl.u32 %v15680_v14, 16 }
 0x300   : > { %v5788_v55 = vld [vmem:[#allocation3 + $0x2c] sm:$0x1]  ;;  %18868 = vst [vmem:[#allocation39_spill] sm:$0xff] %v15862_v5  ;;  %v5703_v38 = vshll.u32 %v15680_v14, 16  ;;  %v5708_v52 = vshrl.u32 %v15682_v15, 16  ;;  %v5663_v34 = vsel %vm15549_vm12, %v5655_v63, %v5662_v48  ;;  %v15869_v7 = vor.u32 %v5669_v57, %v5668_v31 }
 0x301   : > { %18865 = vst [vmem:[#allocation14_spill] sm:$0xff] %v15850_v33  ;;  %v5795_v40 = vld [vmem:[#allocation3 + $0x38] sm:$0x1]  ;;  %v5798_v37 = vld [vmem:[#allocation3 + $0x3c] sm:$0xf]  ;;  %v5672_v24 = vrot.slane %v5668_v31, 4  ;;  %v5679_v3 = vor.u32 %v5677_v59, %v15850_v33  ;;  %v5769_v59 = vsel %vm15855_vm2, %v15692_v61, %v5768_v11 }
 0x302   : > { %v5809_v27 = vld [vmem:[#allocation3 + $0x50] sm:$0x1]  ;;  %v5812_v58 = vld [vmem:[#allocation3 + $0x54] sm:$0xf]  ;;  %v5702_v14 = vrot.slane %v5700_v44, 7  ;;  %v15873_v4 = vrot.slane %v5708_v52, 7 }
 0x303   : > { %v5711_v35 = vshll.u32 %v15682_v15, 16  ;;  %5857 = vst.msk [vmem:[#allocation3 + $0xa0] sm:$0xf] %vm460_vm1, %v5663_v34  ;;  %v5823_v63 = vld [vmem:[#allocation3 + $0x68] sm:$0x1]  ;;  %v5680_v31 = vsel %vm15549_vm12, %v5672_v24, %v5679_v3  ;;  %v18869_v12 = vrot.slane %v15684_v43, 4  ;;  %v5778_v15 = vsel %vm15855_vm2, %v15696_v6, %v5777_v62 }
 0x304   : > { %v5826_v57 = vld [vmem:[#allocation3 + $0x6c] sm:$0xf]  ;;  %v5830_v48 = vld [vmem:[#allocation3 + $0x74] sm:$0x1]  ;;  %v5833_v34 = vld [vmem:[#allocation3 + $0x78] sm:$0xf]  ;;  %v15889_v5 = vor.u32 %v5703_v38, %v5702_v14 }
 0x305   : > { %v5775_v44 = vsel %vm15563_vm13, %v18869_v12, %v5774_v47  ;;  %v5837_v52 = vld [vmem:[#allocation3 + $0x80] sm:$0x1]  ;;  %v5706_v33 = vrot.slane %v5702_v14, 4  ;;  %v5713_v3 = vor.u32 %v5711_v35, %v15873_v4  ;;  %5770 = vst [vmem:[#allocation3 + $0xc] sm:$0xf] %v5769_v59  ;;  %v18870_v62 = vrot.slane %v15688_v29, 4 }
 0x306   : > { %5776 = vst [vmem:[#allocation3 + $0x14] sm:$0x1] %v5775_v44  ;;  %5779 = vst [vmem:[#allocation3 + $0x18] sm:$0xf] %v5778_v15  ;;  %v5847_v43 = vld [vmem:[#allocation3 + $0x90] sm:$0xf]  ;;  %v5785_v35 = vsel %vm15855_vm2, %v15711_v53, %v5784_v2 }
 0x307   : > { %5864 = vst.msk [vmem:[#allocation3 + $0xac] sm:$0xf] %vm460_vm1, %v5680_v31  ;;  %v5851_v61 = vld [vmem:[#allocation3 + $0x98] sm:$0x1]  ;;  %v5844_v12 = vld [vmem:[#allocation3 + $0x8c] sm:$0x1]  ;;  %v5782_v47 = vsel %vm15563_vm13, %v18870_v62, %v5781_v56  ;;  %v5792_v31 = vsel %vm15855_vm2, %v15726_v10, %v5791_v8  ;;  %v5714_v56 = vsel %vm15549_vm12, %v5706_v33, %v5713_v3  ;;  %v5799_v10 = vsel %vm15855_vm2, %v15739_v9, %v5798_v37 }
 0x308   : > { %v5854_v11 = vld [vmem:[#allocation3 + $0x9c] sm:$0xf]  ;;  %v18871_v38 = vrot.slane %v15702_v25, 4  ;;  %v5861_v59 = vld [vmem:[#allocation3 + $0xa8] sm:$0xf]  ;;  %v18872_v25 = vrot.slane %v15717_v49, 4  ;;  %v5806_v49 = vsel %vm15855_vm2, %v15744_v45, %v5805_v42  ;;  %v5820_v45 = vsel %vm15855_vm2, %v15773_v26, %v5819_v60 }
 0x309   : > { %v5865_v44 = vld [vmem:[#allocation3 + $0xb0] sm:$0x1]  ;;  %v5858_v15 = vld [vmem:[#allocation3 + $0xa4] sm:$0x1]  ;;  %v5875_v24 = vld [vmem:[#allocation3 + $0xc0] sm:$0xf]  ;;  %v5834_v60 = vsel %vm15855_vm2, %v15807_v22, %v5833_v34 }
 0x30a   : > { %v5789_v14 = vsel %vm15563_vm13, %v18871_v38, %v5788_v55  ;;  %5783 = vst [vmem:[#allocation3 + $0x20] sm:$0x1] %v5782_v47  ;;  %5786 = vst [vmem:[#allocation3 + $0x24] sm:$0xf] %v5785_v35  ;;  %v5796_v53 = vsel %vm15563_vm13, %v18872_v25, %v5795_v40  ;;  %v18873_v8 = vrot.slane %v15731_v23, 4  ;;  %v18874_v40 = vrot.slane %v15746_v51, 4 }
 0x30b   : > { %5790 = vst [vmem:[#allocation3 + $0x2c] sm:$0x1] %v5789_v14  ;;  %5793 = vst [vmem:[#allocation3 + $0x30] sm:$0xf] %v5792_v31  ;;  %v5886_v33 = vld [vmem:[#allocation3 + $0x8] sm:$0x1]  ;;  %v5813_v23 = vsel %vm15855_vm2, %v15757_v17, %v5812_v58 }
 0x30c   : > { %v5803_v2 = vsel %vm15563_vm13, %v18873_v8, %v5802_v54  ;;  %v5868_v55 = vld [vmem:[#allocation3 + $0xb4] sm:$0xf]  ;;  %5797 = vst [vmem:[#allocation3 + $0x38] sm:$0x1] %v5796_v53  ;;  %5800 = vst [vmem:[#allocation3 + $0x3c] sm:$0xf] %v5799_v10  ;;  %v5810_v9 = vsel %vm15563_vm13, %v18874_v40, %v5809_v27 }
 0x30d   : > { %5804 = vst [vmem:[#allocation3 + $0x44] sm:$0x1] %v5803_v2  ;;  %v18875_v54 = vrot.slane %v15759_v46, 4  ;;  %5878 = vst.msk [vmem:[#allocation3 + $0xc4] sm:$0xf] %vm460_vm1, %v5714_v56  ;;  %v18876_v51 = vrot.slane %v15769_v21, 4  ;;  %v5827_v46 = vsel %vm15855_vm2, %v15781_v16, %v5826_v57  ;;  %v5841_v16 = vsel %vm15855_vm2, %v15815_v0, %v5840_v1 }
 0x30e   : > { %5807 = vst [vmem:[#allocation3 + $0x48] sm:$0xf] %v5806_v49  ;;  %5811 = vst [vmem:[#allocation3 + $0x50] sm:$0x1] %v5810_v9  ;;  %v5890_v27 = vld [vmem:[#allocation3 + $0xcc] sm:$0xf]  ;;  %v5855_v1 = vsel %vm15855_vm2, %v15845_v28, %v5854_v11  ;;  %v18886_v11 = vmov %v18870_v62 }
 0x30f   : > { %v5817_v37 = vsel %vm15563_vm13, %v18875_v54, %v5816_v32  ;;  %5814 = vst [vmem:[#allocation3 + $0x54] sm:$0xf] %v5813_v23  ;;  %v5824_v17 = vsel %vm15563_vm13, %v18876_v51, %v5823_v63  ;;  %v18877_v32 = vrot.slane %v15783_v30, 4  ;;  %v5879_v58 = vld [vmem:[#allocation3 + $0xc8] sm:$0x1]  ;;  %v18878_v21 = vrot.slane %v15800_v36, 4 }
 0x310   : > { %5818 = vst [vmem:[#allocation3 + $0x5c] sm:$0x1] %v5817_v37  ;;  %5821 = vst [vmem:[#allocation3 + $0x60] sm:$0xf] %v5820_v45  ;;  %v18879_v30 = vrot.slane %v15811_v13, 4  ;;  %v5848_v36 = vsel %vm15855_vm2, %v15831_v41, %v5847_v43  ;;  %v18880_v22 = vrot.slane %v15823_v20, 4  ;;  %v5862_v20 = vsel %vm15855_vm2, %v15869_v7, %v5861_v59 }
 0x311   : > { %v5831_v42 = vsel %vm15563_vm13, %v18877_v32, %v5830_v48  ;;  %5825 = vst [vmem:[#allocation3 + $0x68] sm:$0x1] %v5824_v17  ;;  %5828 = vst [vmem:[#allocation3 + $0x6c] sm:$0xf] %v5827_v46  ;;  %v5838_v26 = vsel %vm15563_vm13, %v18878_v21, %v5837_v52  ;;  %v18881_v13 = vrot.slane %v15838_v18, 4  ;;  %v18882_v41 = vld [vmem:[#allocation14_spill] sm:$0xff]  ;;  %v5876_v18 = vsel %vm15855_vm2, %v15889_v5, %v5875_v24 }
 0x312   : > { %5832 = vst [vmem:[#allocation3 + $0x74] sm:$0x1] %v5831_v42  ;;  %v5845_v63 = vsel %vm15563_vm13, %v18879_v30, %v5844_v12  ;;  %5835 = vst [vmem:[#allocation3 + $0x78] sm:$0xf] %v5834_v60  ;;  %v5852_v57 = vsel %vm15563_vm13, %v18880_v22, %v5851_v61  ;;  %v18883_v48 = vrot.slane %v18882_v41, 4  ;;  %v18884_v52 = vld [vmem:[#allocation39_spill] sm:$0xff]  ;;  %v5883_v12 = vsel %vm15855_vm2, %v15696_v6, %v5882_v50 }
 0x313   : > { %5839 = vst [vmem:[#allocation3 + $0x80] sm:$0x1] %v5838_v26  ;;  %5842 = vst [vmem:[#allocation3 + $0x84] sm:$0xf] %v5841_v16  ;;  %v5859_v0 = vsel %vm15563_vm13, %v18881_v13, %v5858_v15  ;;  %v5869_v28 = vsel %vm15855_vm2, %v18884_v52, %v5868_v55  ;;  %v5898_v3 = vld [vmem:[#allocation3 + $0xc] sm:$0x2]  ;;  %v5887_v5 = vsel %vm15563_vm13, %v18886_v11, %v5886_v33 }
 0x314   : > { %5846 = vst [vmem:[#allocation3 + $0x8c] sm:$0x1] %v5845_v63  ;;  %5849 = vst [vmem:[#allocation3 + $0x90] sm:$0xf] %v5848_v36  ;;  %v5866_v34 = vsel %vm15563_vm13, %v18883_v48, %v5865_v44  ;;  %v5899_v43 = vld [vmem:[#allocation3 + $0x18] sm:$0x2]  ;;  %v5891_v24 = vsel %vm15855_vm2, %v18884_v52, %v5890_v27 }
 0x315   : > { %5853 = vst [vmem:[#allocation3 + $0x98] sm:$0x1] %v5852_v57  ;;  %5856 = vst [vmem:[#allocation3 + $0x9c] sm:$0xf] %v5855_v1  ;;  %v18885_v7 = vrot.slane %v15873_v4, 4  ;;  %v11565_v6 = vrot.slane %v5898_v3, 9 }
 0x316   : > { %5860 = vst [vmem:[#allocation3 + $0xa4] sm:$0x1] %v5859_v0  ;;  %5863 = vst [vmem:[#allocation3 + $0xa8] sm:$0xf] %v5862_v20  ;;  %v5990_v62 = vld [vmem:[#allocation3 + $0xc] sm:$0x1] }
 0x317   : > { %5867 = vst [vmem:[#allocation3 + $0xb0] sm:$0x1] %v5866_v34  ;;  %5870 = vst [vmem:[#allocation3 + $0xb4] sm:$0xf] %v5869_v28  ;;  %v5880_v61 = vsel %vm15563_vm13, %v18885_v7, %v5879_v58  ;;  %v5993_v47 = vld [vmem:[#allocation3 + $0x18] sm:$0x1]  ;;  %v5991_v25 = vsel %vm15563_vm13, %v11565_v6, %v5990_v62 }
 0x318   : > { %5877 = vst [vmem:[#allocation3 + $0xc0] sm:$0xf] %v5876_v18  ;;  %v16005_v35 = vld [vmem:[#allocation3 + $0x4] sm:$0x8]  ;;  %5881 = vst [vmem:[#allocation3 + $0xc8] sm:$0x1] %v5880_v61 }
 0x319   : > { %5884 = vst [vmem:[#allocation3] sm:$0xf] %v5883_v12  ;;  %5888 = vst [vmem:[#allocation3 + $0x8] sm:$0x1] %v5887_v5  ;;  %v5900_v4 = vld [vmem:[#allocation3 + $0x24] sm:$0x2] }
 0x31a   : > { %5892 = vst [vmem:[#allocation3 + $0xcc] sm:$0xf] %v5891_v24  ;;  %v5901_v38 = vld [vmem:[#allocation3 + $0x30] sm:$0x2]  ;;  %v11566_v14 = vrot.slane %v5899_v43, 9  ;;  %v11567_v31 = vrot.slane %v5900_v4, 9 }
 0x31b   : > { %v5902_v29 = vld [vmem:[#allocation3 + $0x3c] sm:$0x2]  ;;  %v11568_v59 = vrot.slane %v5901_v38, 9  ;;  %v5996_v44 = vld [vmem:[#allocation3 + $0x24] sm:$0x1]  ;;  %v11582_v10 = vrot.slane %v16005_v35, 11 }
 0x31c   : > { %v5903_v15 = vld [vmem:[#allocation3 + $0x48] sm:$0x2]  ;;  %v5904_v56 = vld [vmem:[#allocation3 + $0x54] sm:$0x2]  ;;  %v11569_v19 = vrot.slane %v5902_v29, 9  ;;  %v5994_v53 = vsel %vm15563_vm13, %v11566_v14, %v5993_v47  ;;  %v5997_v55 = vsel %vm15563_vm13, %v11567_v31, %v5996_v44 }
 0x31d   : > { %v5905_v8 = vld [vmem:[#allocation3 + $0x60] sm:$0x2]  ;;  %v16012_v2 = vld [vmem:[#allocation3 + $0x6c] sm:$0x2]  ;;  %v11570_v50 = vrot.slane %v5903_v15, 9  ;;  %v11571_v33 = vrot.slane %v5904_v56, 9 }
 0x31e   : > { %5992 = vst [vmem:[#allocation3 + $0xc] sm:$0x1] %v5991_v25  ;;  %5995 = vst [vmem:[#allocation3 + $0x18] sm:$0x1] %v5994_v53  ;;  %v5907_v49 = vld [vmem:[#allocation3 + $0x78] sm:$0x2] }
 0x31f   : > { %v5908_v40 = vld [vmem:[#allocation3 + $0x84] sm:$0x2]  ;;  %v11572_v9 = vrot.slane %v5905_v8, 9  ;;  %v11573_v23 = vrot.slane %v16012_v2, 9  ;;  %5998 = vst [vmem:[#allocation3 + $0x24] sm:$0x1] %v5997_v55 }
 0x320   : > { %v6042_v54 = vld [vmem:[#allocation3 + $0x10] sm:$0x8]  ;;  %v16017_v37 = vld [vmem:[#allocation3 + $0x90] sm:$0x2]  ;;  %v16019_v45 = vld [vmem:[#allocation3 + $0x9c] sm:$0x2] }
 0x321   : > { %v11574_v51 = vrot.slane %v5907_v49, 9  ;;  %v11575_v17 = vrot.slane %v5908_v40, 9  ;;  %v5911_v46 = vld [vmem:[#allocation3 + $0xa8] sm:$0x2]  ;;  %v16021_v32 = vld [vmem:[#allocation3 + $0xb4] sm:$0x2] }
 0x322   : > { %v16023_v42 = vld [vmem:[#allocation3 + $0xc0] sm:$0x2]  ;;  %v16025_v58 = vld [vmem:[#allocation3 + $0xcc] sm:$0x2]  ;;  %v11576_v60 = vrot.slane %v16017_v37, 9  ;;  %v11577_v21 = vrot.slane %v16019_v45, 9 }
 0x323   : > { %v5897_v27 = vld [vmem:[#allocation3] sm:$0x2]  ;;  %v11578_v16 = vrot.slane %v5911_v46, 9  ;;  %v11579_v30 = vrot.slane %v16021_v32, 9  ;;  %v11580_v63 = vrot.slane %v16023_v42, 9  ;;  %v11581_v57 = vrot.slane %v16025_v58, 9 }
 0x324   : > { %v11564_v26 = vrot.slane %v5897_v27, 9  ;;  %v5987_v36 = vld [vmem:[#allocation3] sm:$0x1]  ;;  %v6135_v22 = vld [vmem:[#allocation3 + $0x14] sm:$0x1]  ;;  %v11583_v20 = vrot.slane %v6042_v54, 11 }
 0x325   : > { %v5999_v1 = vld [vmem:[#allocation3 + $0x30] sm:$0x1]  ;;  %v6002_v13 = vld [vmem:[#allocation3 + $0x3c] sm:$0x1]  ;;  %v16032_v0 = vld [vmem:[#allocation3 + $0x1c] sm:$0x8] }
 0x326   : > { %v5988_v41 = vsel %vm15563_vm13, %v11564_v26, %v5987_v36  ;;  %v6000_v48 = vsel %vm15563_vm13, %v11568_v59, %v5999_v1  ;;  %v6003_v34 = vsel %vm15563_vm13, %v11569_v19, %v6002_v13  ;;  %v6005_v52 = vld [vmem:[#allocation3 + $0x48] sm:$0x1]  ;;  %v6008_v28 = vld [vmem:[#allocation3 + $0x54] sm:$0x1]  ;;  %v6011_v18 = vld [vmem:[#allocation3 + $0x60] sm:$0x1]  ;;  %v6136_v31 = vsel %vm15624_vm15, %v11583_v20, %v6135_v22 }
 0x327   : > { %v16040_v3 = vld [vmem:[#allocation3 + $0x28] sm:$0x8]  ;;  %v16042_v43 = vld [vmem:[#allocation3 + $0x34] sm:$0x8]  ;;  %v16044_v7 = vld [vmem:[#allocation3 + $0x40] sm:$0x8]  ;;  %v6006_v12 = vsel %vm15563_vm13, %v11570_v50, %v6005_v52  ;;  %v6009_v11 = vsel %vm15563_vm13, %v11571_v33, %v6008_v28  ;;  %v6012_v5 = vsel %vm15563_vm13, %v11572_v9, %v6011_v18 }
 0x328   : > { %v16046_v61 = vld [vmem:[#allocation3 + $0x4c] sm:$0x8]  ;;  %5989 = vst [vmem:[#allocation3] sm:$0x1] %v5988_v41  ;;  %6001 = vst [vmem:[#allocation3 + $0x30] sm:$0x1] %v6000_v48 }
 0x329   : > { %6004 = vst [vmem:[#allocation3 + $0x3c] sm:$0x1] %v6003_v34  ;;  %v6014_v24 = vld [vmem:[#allocation3 + $0x6c] sm:$0x1]  ;;  %v6017_v62 = vld [vmem:[#allocation3 + $0x78] sm:$0x1] }
 0x32a   : > { %v6020_v47 = vld [vmem:[#allocation3 + $0x84] sm:$0x1]  ;;  %v16054_v4 = vld [vmem:[#allocation3 + $0x58] sm:$0x8]  ;;  %v16056_v38 = vld [vmem:[#allocation3 + $0x64] sm:$0x8]  ;;  %v6015_v59 = vsel %vm15563_vm13, %v11573_v23, %v6014_v24  ;;  %v6018_v44 = vsel %vm15563_vm13, %v11574_v51, %v6017_v62 }
 0x32b   : > { %v16058_v6 = vld [vmem:[#allocation3 + $0x70] sm:$0x8]  ;;  %v16060_v14 = vld [vmem:[#allocation3 + $0x7c] sm:$0x8]  ;;  %6007 = vst [vmem:[#allocation3 + $0x48] sm:$0x1] %v6006_v12  ;;  %v6021_v15 = vsel %vm15563_vm13, %v11575_v17, %v6020_v47 }
 0x32c   : > { %6010 = vst [vmem:[#allocation3 + $0x54] sm:$0x1] %v6009_v11  ;;  %6013 = vst [vmem:[#allocation3 + $0x60] sm:$0x1] %v6012_v5  ;;  %v6023_v56 = vld [vmem:[#allocation3 + $0x90] sm:$0x1] }
 0x32d   : > { %v6026_v19 = vld [vmem:[#allocation3 + $0x9c] sm:$0x1]  ;;  %v6029_v25 = vld [vmem:[#allocation3 + $0xa8] sm:$0x1]  ;;  %v16070_v53 = vld [vmem:[#allocation3 + $0x88] sm:$0x8]  ;;  %v6024_v50 = vsel %vm15563_vm13, %v11576_v60, %v6023_v56 }
 0x32e   : > { %v16072_v8 = vld [vmem:[#allocation3 + $0x94] sm:$0x8]  ;;  %v16074_v2 = vld [vmem:[#allocation3 + $0xa0] sm:$0x8]  ;;  %6137 = vst [vmem:[#allocation3 + $0x14] sm:$0x1] %v6136_v31  ;;  %v6027_v33 = vsel %vm15563_vm13, %v11577_v21, %v6026_v19  ;;  %v6030_v55 = vsel %vm15563_vm13, %v11578_v16, %v6029_v25 }
 0x32f   : > { %6016 = vst [vmem:[#allocation3 + $0x6c] sm:$0x1] %v6015_v59  ;;  %6019 = vst [vmem:[#allocation3 + $0x78] sm:$0x1] %v6018_v44  ;;  %v6032_v49 = vld [vmem:[#allocation3 + $0xb4] sm:$0x1] }
 0x330   : > { %6022 = vst [vmem:[#allocation3 + $0x84] sm:$0x1] %v6021_v15  ;;  %v6035_v40 = vld [vmem:[#allocation3 + $0xc0] sm:$0x1]  ;;  %v6038_v9 = vld [vmem:[#allocation3 + $0xcc] sm:$0x1]  ;;  %v6033_v23 = vsel %vm15563_vm13, %v11579_v30, %v6032_v49 }
 0x331   : > { %6025 = vst [vmem:[#allocation3 + $0x90] sm:$0x1] %v6024_v50  ;;  %6028 = vst [vmem:[#allocation3 + $0x9c] sm:$0x1] %v6027_v33  ;;  %v6036_v54 = vsel %vm15563_vm13, %v11580_v63, %v6035_v40  ;;  %v6039_v37 = vsel %vm15563_vm13, %v11581_v57, %v6038_v9  ;;  %v16088_v45 = vld [vmem:[#allocation3 + $0xac] sm:$0x8] }
 0x332   : > { %6031 = vst [vmem:[#allocation3 + $0xa8] sm:$0x1] %v6030_v55  ;;  %v16090_v51 = vld [vmem:[#allocation3 + $0xc4] sm:$0x8]  ;;  %v11584_v17 = vrot.slane %v16032_v0, 11  ;;  %v11585_v46 = vrot.slane %v16040_v3, 11 }
 0x333   : > { %6034 = vst [vmem:[#allocation3 + $0xb4] sm:$0x1] %v6033_v23  ;;  %6037 = vst [vmem:[#allocation3 + $0xc0] sm:$0x1] %v6036_v54  ;;  %v11586_v32 = vrot.slane %v16042_v43, 11  ;;  %v11587_v42 = vrot.slane %v16044_v7, 11 }
 0x334   : > { %6040 = vst [vmem:[#allocation3 + $0xcc] sm:$0x1] %v6039_v37  ;;  %v11588_v27 = vrot.slane %v16046_v61, 11  ;;  %v6132_v58 = vld [vmem:[#allocation3 + $0x8] sm:$0x1]  ;;  %v11589_v60 = vrot.slane %v16054_v4, 11 }
 0x335   : > { %v6138_v39 = vld [vmem:[#allocation3 + $0x20] sm:$0x1]  ;;  %v11590_v21 = vrot.slane %v16056_v38, 11  ;;  %v11591_v26 = vrot.slane %v16058_v6, 11  ;;  %v11592_v16 = vrot.slane %v16060_v14, 11  ;;  %v11593_v63 = vrot.slane %v16070_v53, 11 }
 0x336   : > { %v6141_v30 = vld [vmem:[#allocation3 + $0x2c] sm:$0x1]  ;;  %v11594_v36 = vrot.slane %v16072_v8, 11  ;;  %v11595_v22 = vrot.slane %v16074_v2, 11  ;;  %v11596_v57 = vrot.slane %v16088_v45, 11  ;;  %v11598_v0 = vrot.slane %v16090_v51, 11 }
 0x337   : > { %v6144_v1 = vld [vmem:[#allocation3 + $0x38] sm:$0x1]  ;;  %v16105_v13 = vld [vmem:[#allocation3 + $0x4] sm:$0xf]  ;;  %v6133_v20 = vsel %vm15624_vm15, %v11582_v10, %v6132_v58  ;;  %v6139_v41 = vsel %vm15624_vm15, %v11584_v17, %v6138_v39  ;;  %v6142_v48 = vsel %vm15624_vm15, %v11585_v46, %v6141_v30  ;;  %v6150_v52 = vld [vmem:[#allocation3 + $0x50] sm:$0x1] }
 0x338   : > { %v6147_v34 = vld [vmem:[#allocation3 + $0x44] sm:$0x1]  ;;  %6134 = vst [vmem:[#allocation3 + $0x8] sm:$0x1] %v6133_v20  ;;  %6140 = vst [vmem:[#allocation3 + $0x20] sm:$0x1] %v6139_v41  ;;  %v6145_v28 = vsel %vm15624_vm15, %v11586_v32, %v6144_v1  ;;  %v6151_v10 = vsel %vm15624_vm15, %v11588_v27, %v6150_v52 }
 0x339   : > { %6143 = vst [vmem:[#allocation3 + $0x2c] sm:$0x1] %v6142_v48  ;;  %v6148_v35 = vsel %vm15624_vm15, %v11587_v42, %v6147_v34  ;;  %v6153_v18 = vld [vmem:[#allocation3 + $0x5c] sm:$0x1]  ;;  %v6156_v3 = vld [vmem:[#allocation3 + $0x68] sm:$0x1] }
 0x33a   : > { %v6159_v43 = vld [vmem:[#allocation3 + $0x74] sm:$0x1]  ;;  %v16122_v7 = vld [vmem:[#allocation3 + $0x10] sm:$0xf]  ;;  %6146 = vst [vmem:[#allocation3 + $0x38] sm:$0x1] %v6145_v28  ;;  %v6154_v61 = vsel %vm15624_vm15, %v11589_v60, %v6153_v18  ;;  %v6157_v12 = vsel %vm15624_vm15, %v11590_v21, %v6156_v3 }
 0x33b   : > { %6149 = vst [vmem:[#allocation3 + $0x44] sm:$0x1] %v6148_v35  ;;  %6152 = vst [vmem:[#allocation3 + $0x50] sm:$0x1] %v6151_v10  ;;  %v6160_v11 = vsel %vm15624_vm15, %v11591_v26, %v6159_v43  ;;  %v6162_v5 = vld [vmem:[#allocation3 + $0x80] sm:$0x1] }
 0x33c   : > { %v6165_v24 = vld [vmem:[#allocation3 + $0x8c] sm:$0x1]  ;;  %v6168_v62 = vld [vmem:[#allocation3 + $0x98] sm:$0x1]  ;;  %6155 = vst [vmem:[#allocation3 + $0x5c] sm:$0x1] %v6154_v61  ;;  %v6163_v47 = vsel %vm15624_vm15, %v11592_v16, %v6162_v5 }
 0x33d   : > { %6158 = vst [vmem:[#allocation3 + $0x68] sm:$0x1] %v6157_v12  ;;  %6161 = vst [vmem:[#allocation3 + $0x74] sm:$0x1] %v6160_v11  ;;  %v6166_v4 = vsel %vm15624_vm15, %v11593_v63, %v6165_v24  ;;  %v6169_v38 = vsel %vm15624_vm15, %v11594_v36, %v6168_v62  ;;  %v6171_v6 = vld [vmem:[#allocation3 + $0xa4] sm:$0x1] }
 0x33e   : > { %v6174_v14 = vld [vmem:[#allocation3 + $0xb0] sm:$0x1]  ;;  %v6180_v31 = vld [vmem:[#allocation3 + $0xc8] sm:$0x1]  ;;  %v16136_v59 = vld [vmem:[#allocation3 + $0x1c] sm:$0xf]  ;;  %v6172_v44 = vsel %vm15624_vm15, %v11595_v22, %v6171_v6 }
 0x33f   : > { %6164 = vst [vmem:[#allocation3 + $0x80] sm:$0x1] %v6163_v47  ;;  %6167 = vst [vmem:[#allocation3 + $0x8c] sm:$0x1] %v6166_v4  ;;  %v6175_v15 = vsel %vm15624_vm15, %v11596_v57, %v6174_v14  ;;  %v6181_v56 = vsel %vm15624_vm15, %v11598_v0, %v6180_v31  ;;  %v6186_v19 = vld [vmem:[#allocation3] sm:$0xf] }
 0x340   : > { %6170 = vst [vmem:[#allocation3 + $0x98] sm:$0x1] %v6169_v38  ;;  %v6249_v25 = vshrl.u32 %v16105_v13, 16  ;;  %v6188_v53 = vld [vmem:[#allocation3 + $0xc] sm:$0xf]  ;;  %v6236_v8 = vshrl.u32 %v6186_v19, 16  ;;  %v11633_v50 = vcombine.low %v6186_v19, %v16105_v13 }
 0x341   : > { %6173 = vst [vmem:[#allocation3 + $0xa4] sm:$0x1] %v6172_v44  ;;  %6176 = vst [vmem:[#allocation3 + $0xb0] sm:$0x1] %v6175_v15  ;;  %v6239_v2 = vshll.u32 %v6186_v19, 16  ;;  %v6260_v33 = vshrl.u32 %v6188_v53, 16  ;;  %v11634_v9 = vcombine.low %v6188_v53, %v16122_v7 }
 0x342   : > { %6182 = vst [vmem:[#allocation3 + $0xc8] sm:$0x1] %v6181_v56  ;;  %v6190_v55 = vld [vmem:[#allocation3 + $0x18] sm:$0xf]  ;;  %v6263_v49 = vshll.u32 %v6188_v53, 16  ;;  %v6273_v40 = vshrl.u32 %v16122_v7, 16  ;;  %12713 = vmatprep.mubr.msk.bf16.mxu0 %vm1002_vm5, %v11633_v50 }
 0x343   : > { %v6284_v29 = vshrl.u32 %v6190_v55, 16  ;;  %v16148_v23 = vld [vmem:[#allocation3 + $0x28] sm:$0xf]  ;;  %v6238_v54 = vrot.slane %v6236_v8, 4  ;;  %v6241_v37 = vrot.slane %v6239_v2, 5  ;;  %v6262_v45 = vrot.slane %v6260_v33, 4  ;;  %12714 = vmatmul.mubr.msk.bf16.vlgmr.msra.gmra.mxu0 %vm1002_vm5, %v11634_v9 }
 0x344   : > { %v6287_v51 = vshll.u32 %v6190_v55, 16  ;;  %v6192_v17 = vld [vmem:[#allocation3 + $0x24] sm:$0xf]  ;;  %v6265_v46 = vrot.slane %v6263_v49, 5  ;;  %v6297_v42 = vshrl.u32 %v16136_v59, 16  ;;  %v11635_v27 = vcombine.low %v6190_v55, %v16136_v59 }
 0x345   : > { %v6286_v32 = vrot.slane %v6284_v29, 4  ;;  %v16154_v58 = vld [vmem:[#allocation3 + $0x8] sm:$0x1]  ;;  %v6242_v60 = vor.u32 %v6241_v37, %v6238_v54  ;;  %v6245_v21 = vshll.u32 %v16105_v13, 16  ;;  %v6251_v26 = vrot.slane %v6249_v25, 4 }
 0x346   : > { %v6289_v39 = vrot.slane %v6287_v51, 5  ;;  %12717 = vmatprep.mubr.msk.bf16.mxu0 %vm1002_vm5, %v11635_v27  ;;  %v6255_v16 = vshll.u32 %v16154_v58, 16  ;;  %v6308_v30 = vshrl.u32 %v6192_v17, 16  ;;  %v6311_v63 = vshll.u32 %v6192_v17, 16  ;;  %v16161_v0 = vld [vmem:[#allocation3 + $0x14] sm:$0x1] }
 0x347   : > { %v6321_v36 = vshrl.u32 %v16148_v23, 16  ;;  %v6243_v22 = vrot.slane %v6242_v60, 4  ;;  %v6247_v57 = vrot.slane %v6245_v21, 5  ;;  %v11636_v1 = vcombine.low %v6192_v17, %v16148_v23  ;;  %v6194_v41 = vld [vmem:[#allocation3 + $0x30] sm:$0xf] }
 0x348   : > { %v6266_v20 = vor.u32 %v6265_v46, %v6262_v45  ;;  %v6257_v48 = vrot.slane %v6255_v16, 5  ;;  %v6310_v34 = vrot.slane %v6308_v30, 4  ;;  %v6313_v52 = vrot.slane %v6311_v63, 5  ;;  %v16164_v35 = vld [vmem:[#allocation3 + $0x34] sm:$0xf] }
 0x349   : > { %v6269_v28 = vshll.u32 %v16122_v7, 16  ;;  %v6248_v18 = vsel %vm13278_vm6, %v6243_v22, %v6247_v57  ;;  %v6252_v3 = vor.u32 %v6251_v26, %v6247_v57  ;;  %v6275_v61 = vrot.slane %v6273_v40, 4  ;;  %v16171_v38 = vld [vmem:[#allocation3 + $0x20] sm:$0x1]  ;;  %v6196_v56 = vld [vmem:[#allocation3 + $0x3c] sm:$0xf] }
 0x34a   : > { %v6267_v43 = vrot.slane %v6266_v20, 4  ;;  %v6279_v11 = vshll.u32 %v16161_v0, 16  ;;  %v6332_v5 = vshrl.u32 %v6194_v41, 16  ;;  %v6335_v24 = vshll.u32 %v6194_v41, 16  ;;  %v16176_v19 = vld [vmem:[#allocation3 + $0x40] sm:$0xf] }
 0x34b   : > { %v6271_v12 = vrot.slane %v6269_v28, 5  ;;  %v6253_v62 = vrot.slane %v6252_v3, 4  ;;  %v6345_v47 = vshrl.u32 %v16164_v35, 16  ;;  %v11637_v4 = vcombine.low %v6194_v41, %v16164_v35  ;;  %12718 = vmatmul.mubr.msk.bf16.gmra.mxu0 %vm1002_vm5, %v11636_v1  ;;  %v16188_v17 = vld [vmem:[#allocation3 + $0x2c] sm:$0x1] }
 0x34c   : > { %v6290_v6 = vor.u32 %v6289_v39, %v6286_v32  ;;  %v6281_v44 = vrot.slane %v6279_v11, 5  ;;  %v6334_v15 = vrot.slane %v6332_v5, 4  ;;  %v6337_v53 = vrot.slane %v6335_v24, 5  ;;  %v6198_v32 = vld [vmem:[#allocation3 + $0x48] sm:$0xf] }
 0x34d   : > { %v6272_v14 = vsel %vm13278_vm6, %v6267_v43, %v6271_v12  ;;  %v6276_v31 = vor.u32 %v6275_v61, %v6271_v12  ;;  %v6258_v25 = vsel %vm13278_vm6, %v6253_v62, %v6257_v48  ;;  %12721 = vmatprep.mubr.msk.bf16.mxu0 %vm1002_vm5, %v11637_v4  ;;  %v6293_v2 = vshll.u32 %v16136_v59, 16  ;;  %v16192_v21 = vld [vmem:[#allocation3 + $0x4c] sm:$0xf]  ;;  %v16198_v22 = vld [vmem:[%s18682_s2 + $0x8] sm:$0x3] }
 0x34e   : > { %v6291_v8 = vrot.slane %v6290_v6, 4  ;;  %v11601_v50 = vcombine.low %v6248_v18, %v6258_v25  ;;  %v6299_v55 = vrot.slane %v6297_v42, 4  ;;  %v6303_v49 = vshll.u32 %v16171_v38, 16  ;;  %v18889_v48 = vld [vmem:[#allocation19_spill] sm:$0xff]  ;;  %v16206_v28 = vld [vmem:[#allocation3 + $0x38] sm:$0x1] }
 0x34f   : > { %v6277_v33 = vrot.slane %v6276_v31, 4  ;;  %v6295_v40 = vrot.slane %v6293_v2, 5  ;;  %v6356_v9 = vshrl.u32 %v6196_v56, 16  ;;  %v6359_v29 = vshll.u32 %v6196_v56, 16  ;;  %v6200_v3 = vld [vmem:[#allocation3 + $0x54] sm:$0xf] }
 0x350   : > { %v6369_v54 = vshrl.u32 %v16176_v19, 16  ;;  %12679 = vmatprep.mubr.msk.bf16.mxu1 %vm1002_vm5, %v11601_v50  ;;  %v6305_v45 = vrot.slane %v6303_v49, 5  ;;  %v11638_v51 = vcombine.low %v6196_v56, %v16176_v19  ;;  %v6314_v46 = vor.u32 %v6313_v52, %v6310_v34  ;;  %v16210_v5 = vld [vmem:[#allocation3 + $0x58] sm:$0xf]  ;;  %v16221_v56 = vld [vmem:[#allocation3 + $0x44] sm:$0x1] }
 0x351   : > { %v6282_v37 = vsel %vm13278_vm6, %v6277_v33, %v6281_v44  ;;  %v6296_v27 = vsel %vm13278_vm6, %v6291_v8, %v6295_v40  ;;  %v6300_v39 = vor.u32 %v6299_v55, %v6295_v40  ;;  %v6358_v60 = vrot.slane %v6356_v9, 4  ;;  %v6202_v25 = vld [vmem:[#allocation3 + $0x60] sm:$0xf]  ;;  %v10270_v10 = vld [vmem:[#allocation3 + $0x48] sm:$0xe] }
 0x352   : > { %v11602_v42 = vcombine.low %v6272_v14, %v6282_v37  ;;  %v6361_v26 = vrot.slane %v6359_v29, 5  ;;  %v6315_v16 = vrot.slane %v6314_v46, 4  ;;  %v6317_v30 = vshll.u32 %v16148_v23, 16 }
 0x353   : > { %v6323_v63 = vrot.slane %v6321_v36, 4  ;;  %v6301_v57 = vrot.slane %v6300_v39, 4  ;;  %v6327_v1 = vshll.u32 %v16188_v17, 16  ;;  %v6380_v20 = vshrl.u32 %v6198_v32, 16  ;;  %12722 = vmatmul.mubr.msk.bf16.gmra.mxu0 %vm1002_vm5, %v11638_v51 }
 0x354   : > { %12680 = vmatmul.mubr.msk.bf16.vlgmr.msra.gmra.mxu1 %vm1002_vm5, %v11602_v42  ;;  %v6383_v41 = vshll.u32 %v6198_v32, 16  ;;  %v6319_v34 = vrot.slane %v6317_v30, 5  ;;  %v6393_v52 = vshrl.u32 %v16192_v21, 16  ;;  %v11639_v36 = vcombine.low %v6198_v32, %v16192_v21 }
 0x355   : > { %12746 = vmatpush3.bf16.msra.mxu1 %v18889_v48  ;;  %v6338_v18 = vor.u32 %v6337_v53, %v6334_v15  ;;  %v6306_v43 = vsel %vm13278_vm6, %v6301_v57, %v6305_v45  ;;  %v6329_v61 = vrot.slane %v6327_v1, 5  ;;  %v6382_v12 = vrot.slane %v6380_v20, 4  ;;  %v16229_v45 = vld [vmem:[#allocation3 + $0x64] sm:$0xf]  ;;  %v16240_v57 = vld [vmem:[#allocation3 + $0x50] sm:$0x1] }
 0x356   : > { %v6385_v11 = vrot.slane %v6383_v41, 5  ;;  %12996 = vmatprep.subr.msk.bf16.mxu1 %vm1051_vm0, %v16198_v22  ;;  %v11603_v24 = vcombine.low %v6296_v27, %v6306_v43  ;;  %v6320_v62 = vsel %vm13278_vm6, %v6315_v16, %v6319_v34  ;;  %v6324_v4 = vor.u32 %v6323_v63, %v6319_v34  ;;  %12725 = vmatprep.mubr.msk.bf16.mxu0 %vm1002_vm5, %v11639_v36  ;;  %v16235_v16 = vld [vmem:[#allocation3 + $0x70] sm:$0xf]  ;;  %v6204_v36 = vld [vmem:[#allocation3 + $0x6c] sm:$0xf] }
 0x357   : > { %v6339_v6 = vrot.slane %v6338_v18, 4  ;;  %v6341_v14 = vshll.u32 %v16164_v35, 16  ;;  %v6347_v31 = vrot.slane %v6345_v47, 4  ;;  %v6351_v44 = vshll.u32 %v16206_v28, 16 }
 0x358   : > { %v6404_v15 = vshrl.u32 %v6200_v3, 16  ;;  %12683 = vmatprep.mubr.msk.bf16.mxu1 %vm1002_vm5, %v11603_v24  ;;  %v6325_v53 = vrot.slane %v6324_v4, 4  ;;  %v6407_v8 = vshll.u32 %v6200_v3, 16  ;;  %v6417_v2 = vshrl.u32 %v16210_v5, 16 }
 0x359   : > { %v11640_v50 = vcombine.low %v6200_v3, %v16210_v5  ;;  %v6343_v33 = vrot.slane %v6341_v14, 5  ;;  %v6353_v55 = vrot.slane %v6351_v44, 5  ;;  %v6362_v40 = vor.u32 %v6361_v26, %v6358_v60  ;;  %v16252_v44 = vld [vmem:[#allocation3 + $0x5c] sm:$0x1] }
 0x35a   : > { %v6406_v49 = vrot.slane %v6404_v15, 4  ;;  %v6330_v47 = vsel %vm13278_vm6, %v6325_v53, %v6329_v61  ;;  %v6409_v9 = vrot.slane %v6407_v8, 5  ;;  %v6365_v29 = vshll.u32 %v16176_v19, 16 }
 0x35b   : > { %v6371_v37 = vrot.slane %v6369_v54, 4  ;;  %v11604_v51 = vcombine.low %v6320_v62, %v6330_v47  ;;  %v6344_v46 = vsel %vm13278_vm6, %v6339_v6, %v6343_v33  ;;  %v6348_v32 = vor.u32 %v6347_v31, %v6343_v33  ;;  %12726 = vmatmul.mubr.msk.bf16.gmra.mxu0 %vm1002_vm5, %v11640_v50  ;;  %v6206_v50 = vld [vmem:[#allocation3 + $0x78] sm:$0xf]  ;;  %v16260_v47 = vld [vmem:[#allocation3 + $0x7c] sm:$0xf] }
 0x35c   : > { %v6363_v42 = vrot.slane %v6362_v40, 4  ;;  %v6367_v27 = vrot.slane %v6365_v29, 5  ;;  %v6375_v39 = vshll.u32 %v16221_v56, 16  ;;  %v6428_v60 = vshrl.u32 %v6202_v25, 16 }
 0x35d   : > { %v6431_v26 = vshll.u32 %v6202_v25, 16  ;;  %12684 = vmatmul.mubr.msk.bf16.gmra.mxu1 %vm1002_vm5, %v11604_v51  ;;  %v6349_v54 = vrot.slane %v6348_v32, 4  ;;  %v6441_v30 = vshrl.u32 %v16229_v45, 16  ;;  %v11641_v63 = vcombine.low %v6202_v25, %v16229_v45 }
 0x35e   : > { %v6386_v1 = vor.u32 %v6385_v11, %v6382_v12  ;;  %v6368_v20 = vsel %vm13278_vm6, %v6363_v42, %v6367_v27  ;;  %v6372_v41 = vor.u32 %v6371_v37, %v6367_v27  ;;  %v6377_v48 = vrot.slane %v6375_v39, 5  ;;  %v16266_v27 = vld [vmem:[#allocation3 + $0x68] sm:$0x1] }
 0x35f   : > { %v6430_v34 = vrot.slane %v6428_v60, 4  ;;  %v6354_v18 = vsel %vm13278_vm6, %v6349_v54, %v6353_v55  ;;  %v6433_v3 = vrot.slane %v6431_v26, 5  ;;  %12729 = vmatprep.mubr.msk.bf16.mxu0 %vm1002_vm5, %v11641_v63  ;;  %v6389_v61 = vshll.u32 %v16192_v21, 16  ;;  %v16268_v39 = vld [vmem:[#allocation3 + $0x88] sm:$0xf] }
 0x360   : > { %v6387_v43 = vrot.slane %v6386_v1, 4  ;;  %v11605_v24 = vcombine.low %v6344_v46, %v6354_v18  ;;  %v6373_v62 = vrot.slane %v6372_v41, 4  ;;  %v6395_v12 = vrot.slane %v6393_v52, 4  ;;  %v6208_v1 = vld [vmem:[#allocation3 + $0x84] sm:$0xf] }
 0x361   : > { %v6399_v11 = vshll.u32 %v16240_v57, 16  ;;  %v6391_v4 = vrot.slane %v6389_v61, 5  ;;  %v6452_v6 = vshrl.u32 %v6204_v36, 16  ;;  %v6455_v14 = vshll.u32 %v6204_v36, 16 }
 0x362   : > { %v6465_v31 = vshrl.u32 %v16235_v16, 16  ;;  %12687 = vmatprep.mubr.msk.bf16.mxu1 %vm1002_vm5, %v11605_v24  ;;  %v6378_v15 = vsel %vm13278_vm6, %v6373_v62, %v6377_v48  ;;  %v11642_v53 = vcombine.low %v6204_v36, %v16235_v16  ;;  %v6410_v8 = vor.u32 %v6409_v9, %v6406_v49 }
 0x363   : > { %v6401_v25 = vrot.slane %v6399_v11, 5  ;;  %v11606_v52 = vcombine.low %v6368_v20, %v6378_v15  ;;  %v6392_v33 = vsel %vm13278_vm6, %v6387_v43, %v6391_v4  ;;  %v6396_v55 = vor.u32 %v6395_v12, %v6391_v4  ;;  %v16279_v12 = vld [vmem:[#allocation3 + $0x74] sm:$0x1]  ;;  %v6210_v15 = vld [vmem:[#allocation3 + $0x90] sm:$0xf] }
 0x364   : > { %v6454_v40 = vrot.slane %v6452_v6, 4  ;;  %v6457_v29 = vrot.slane %v6455_v14, 5  ;;  %12730 = vmatmul.mubr.msk.bf16.gmra.mxu0 %vm1002_vm5, %v11642_v53  ;;  %v6411_v37 = vrot.slane %v6410_v8, 4  ;;  %v6413_v51 = vshll.u32 %v16210_v5, 16 }
 0x365   : > { %v6419_v46 = vrot.slane %v6417_v2, 4  ;;  %12688 = vmatmul.mubr.msk.bf16.gmra.mxu1 %vm1002_vm5, %v11606_v52  ;;  %v6397_v32 = vrot.slane %v6396_v55, 4  ;;  %v6423_v49 = vshll.u32 %v16252_v44, 16  ;;  %v6476_v9 = vshrl.u32 %v6206_v50, 16 }
 0x366   : > { %v6479_v42 = vshll.u32 %v6206_v50, 16  ;;  %v6415_v60 = vrot.slane %v6413_v51, 5  ;;  %v6489_v26 = vshrl.u32 %v16260_v47, 16  ;;  %v11643_v54 = vcombine.low %v6206_v50, %v16260_v47 }
 0x367   : > { %v6434_v63 = vor.u32 %v6433_v3, %v6430_v34  ;;  %v6402_v2 = vsel %vm13278_vm6, %v6397_v32, %v6401_v25  ;;  %v6425_v20 = vrot.slane %v6423_v49, 5  ;;  %v6478_v41 = vrot.slane %v6476_v9, 4 }
 0x368   : > { %v6481_v48 = vrot.slane %v6479_v42, 5  ;;  %v11607_v36 = vcombine.low %v6392_v33, %v6402_v2  ;;  %v6416_v18 = vsel %vm13278_vm6, %v6411_v37, %v6415_v60  ;;  %v6420_v43 = vor.u32 %v6419_v46, %v6415_v60  ;;  %12733 = vmatprep.mubr.msk.bf16.mxu0 %vm1002_vm5, %v11643_v54  ;;  %v16288_v37 = vld [vmem:[#allocation3 + $0x94] sm:$0xf] }
 0x369   : > { %v6435_v61 = vrot.slane %v6434_v63, 4  ;;  %v6437_v24 = vshll.u32 %v16229_v45, 16  ;;  %v6443_v62 = vrot.slane %v6441_v30, 4  ;;  %v6447_v34 = vshll.u32 %v16266_v27, 16  ;;  %v16296_v63 = vld [vmem:[#allocation3 + $0x80] sm:$0x1] }
 0x36a   : > { %v6500_v3 = vshrl.u32 %v6208_v1, 16  ;;  %12691 = vmatprep.mubr.msk.bf16.mxu1 %vm1002_vm5, %v11607_v36  ;;  %v6421_v11 = vrot.slane %v6420_v43, 4  ;;  %v6503_v4 = vshll.u32 %v6208_v1, 16  ;;  %v6513_v6 = vshrl.u32 %v16268_v39, 16  ;;  %v6212_v43 = vld [vmem:[#allocation3 + $0x9c] sm:$0xf] }
 0x36b   : > { %v11644_v14 = vcombine.low %v6208_v1, %v16268_v39  ;;  %v6439_v25 = vrot.slane %v6437_v24, 5  ;;  %v6449_v53 = vrot.slane %v6447_v34, 5  ;;  %v6458_v50 = vor.u32 %v6457_v29, %v6454_v40 }
 0x36c   : > { %v6502_v8 = vrot.slane %v6500_v3, 4  ;;  %v6426_v30 = vsel %vm13278_vm6, %v6421_v11, %v6425_v20  ;;  %v6505_v52 = vrot.slane %v6503_v4, 5  ;;  %v6461_v33 = vshll.u32 %v16235_v16, 16 }
 0x36d   : > { %12734 = vmatmul.mubr.msk.bf16.gmra.mxu0 %vm1002_vm5, %v11644_v14  ;;  %v6467_v55 = vrot.slane %v6465_v31, 4  ;;  %v11608_v51 = vcombine.low %v6416_v18, %v6426_v30  ;;  %v6440_v46 = vsel %vm13278_vm6, %v6435_v61, %v6439_v25  ;;  %v6444_v32 = vor.u32 %v6443_v62, %v6439_v25  ;;  %v16300_v61 = vld [vmem:[#allocation3 + $0xa0] sm:$0xf] }
 0x36e   : > { %v6459_v49 = vrot.slane %v6458_v50, 4  ;;  %v6463_v9 = vrot.slane %v6461_v33, 5  ;;  %v6471_v40 = vshll.u32 %v16279_v12, 16  ;;  %v6524_v29 = vshrl.u32 %v6210_v15, 16 }
 0x36f   : > { %v6527_v42 = vshll.u32 %v6210_v15, 16  ;;  %12692 = vmatmul.mubr.msk.bf16.gmra.mxu1 %vm1002_vm5, %v11608_v51  ;;  %v6445_v60 = vrot.slane %v6444_v32, 4  ;;  %v6537_v54 = vshrl.u32 %v16288_v37, 16  ;;  %v11645_v31 = vcombine.low %v6210_v15, %v16288_v37 }
 0x370   : > { %v6482_v1 = vor.u32 %v6481_v48, %v6478_v41  ;;  %v6464_v2 = vsel %vm13278_vm6, %v6459_v49, %v6463_v9  ;;  %v6468_v20 = vor.u32 %v6467_v55, %v6463_v9  ;;  %v6473_v36 = vrot.slane %v6471_v40, 5  ;;  %v16312_v55 = vld [vmem:[#allocation3 + $0x8c] sm:$0x1] }
 0x371   : > { %v6526_v18 = vrot.slane %v6524_v29, 4  ;;  %v6450_v24 = vsel %vm13278_vm6, %v6445_v60, %v6449_v53  ;;  %v6529_v62 = vrot.slane %v6527_v42, 5  ;;  %12737 = vmatprep.mubr.msk.bf16.mxu0 %vm1002_vm5, %v11645_v31  ;;  %v6485_v3 = vshll.u32 %v16260_v47, 16  ;;  %v16316_v40 = vld [vmem:[#allocation3 + $0xac] sm:$0xf] }
 0x372   : > { %v6483_v34 = vrot.slane %v6482_v1, 4  ;;  %v11609_v11 = vcombine.low %v6440_v46, %v6450_v24  ;;  %v6469_v41 = vrot.slane %v6468_v20, 4  ;;  %v6491_v48 = vrot.slane %v6489_v26, 4  ;;  %v6214_v46 = vld [vmem:[#allocation3 + $0xa8] sm:$0xf] }
 0x373   : > { %v6495_v4 = vshll.u32 %v16296_v63, 16  ;;  %v6487_v14 = vrot.slane %v6485_v3, 5  ;;  %v6548_v15 = vshrl.u32 %v6212_v43, 16  ;;  %v6551_v25 = vshll.u32 %v6212_v43, 16  ;;  %v16324_v24 = vld [vmem:[#allocation3 + $0x98] sm:$0x1] }
 0x374   : > { %v6561_v50 = vshrl.u32 %v16300_v61, 16  ;;  %12695 = vmatprep.mubr.msk.bf16.mxu1 %vm1002_vm5, %v11609_v11  ;;  %v6474_v53 = vsel %vm13278_vm6, %v6469_v41, %v6473_v36  ;;  %v11646_v33 = vcombine.low %v6212_v43, %v16300_v61  ;;  %v6506_v51 = vor.u32 %v6505_v52, %v6502_v8  ;;  %v6216_v3 = vld [vmem:[#allocation3 + $0xb4] sm:$0xf] }
 0x375   : > { %v6497_v30 = vrot.slane %v6495_v4, 5  ;;  %v11610_v26 = vcombine.low %v6464_v2, %v6474_v53  ;;  %v6488_v32 = vsel %vm13278_vm6, %v6483_v34, %v6487_v14  ;;  %v6492_v49 = vor.u32 %v6491_v48, %v6487_v14  ;;  %v16328_v4 = vld [vmem:[#allocation3 + $0xb8] sm:$0xf] }
 0x376   : > { %v6550_v9 = vrot.slane %v6548_v15, 4  ;;  %v6553_v29 = vrot.slane %v6551_v25, 5  ;;  %12738 = vmatmul.mubr.msk.bf16.gmra.mxu0 %vm1002_vm5, %v11646_v33  ;;  %v6507_v42 = vrot.slane %v6506_v51, 4  ;;  %v6509_v60 = vshll.u32 %v16268_v39, 16 }
 0x377   : > { %v6515_v31 = vrot.slane %v6513_v6, 4  ;;  %12696 = vmatmul.mubr.msk.bf16.gmra.mxu1 %vm1002_vm5, %v11610_v26  ;;  %v6493_v1 = vrot.slane %v6492_v49, 4  ;;  %v6519_v8 = vshll.u32 %v16312_v55, 16  ;;  %v6572_v52 = vshrl.u32 %v6214_v46, 16 }
 0x378   : > { %v6575_v2 = vshll.u32 %v6214_v46, 16  ;;  %v6511_v20 = vrot.slane %v6509_v60, 5  ;;  %v6585_v36 = vshrl.u32 %v16316_v40, 16  ;;  %v11647_v43 = vcombine.low %v6214_v46, %v16316_v40 }
 0x379   : > { %v6530_v34 = vor.u32 %v6529_v62, %v6526_v18  ;;  %v6498_v11 = vsel %vm13278_vm6, %v6493_v1, %v6497_v30  ;;  %v6521_v6 = vrot.slane %v6519_v8, 5  ;;  %v6574_v41 = vrot.slane %v6572_v52, 4  ;;  %v13074_v8 = vld [vmem:[#allocation3 + $0xc] sm:$0xff]  }
 0x37a   : > { %v6577_v48 = vrot.slane %v6575_v2, 5  ;;  %v11611_v14 = vcombine.low %v6488_v32, %v6498_v11  ;;  %v6512_v15 = vsel %vm13278_vm6, %v6507_v42, %v6511_v20  ;;  %v6516_v25 = vor.u32 %v6515_v31, %v6511_v20  ;;  %12741 = vmatprep.mubr.msk.bf16.mxu0 %vm1002_vm5, %v11647_v43  ;;  %v16338_v31 = vld [vmem:[#allocation3 + $0xa4] sm:$0x1]  ;;  %v16344_v43 = vld [vmem:[#allocation3 + $0xb0] sm:$0x1] }
 0x37b   : > { %v6531_v53 = vrot.slane %v6530_v34, 4  ;;  %v6533_v33 = vshll.u32 %v16288_v37, 16  ;;  %v6539_v18 = vrot.slane %v6537_v54, 4  ;;  %v6543_v62 = vshll.u32 %v16324_v24, 16 }
 0x37c   : > { %v6596_v51 = vshrl.u32 %v6216_v3, 16  ;;  %12699 = vmatprep.mubr.msk.bf16.mxu1 %vm1002_vm5, %v11611_v14  ;;  %v6517_v30 = vrot.slane %v6516_v25, 4  ;;  %v6599_v46 = vshll.u32 %v6216_v3, 16  ;;  %v6609_v26 = vshrl.u32 %v16328_v4, 16 }
 0x37d   : > { %v11648_v32 = vcombine.low %v6216_v3, %v16328_v4  ;;  %v6535_v49 = vrot.slane %v6533_v33, 5  ;;  %v6545_v42 = vrot.slane %v6543_v62, 5  ;;  %v6554_v1 = vor.u32 %v6553_v29, %v6550_v9 }
 0x37e   : > { %v6598_v60 = vrot.slane %v6596_v51, 4  ;;  %v6522_v54 = vsel %vm13278_vm6, %v6517_v30, %v6521_v6  ;;  %v6601_v52 = vrot.slane %v6599_v46, 5  ;;  %v6557_v2 = vshll.u32 %v16300_v61, 16  ;;  %v16364_v46 = vld [vmem:[#allocation3 + $0xbc] sm:$0x1] }
 0x37f   : > { %12742 = vmatmul.mubr.msk.bf16.gmra.mxu0 %vm1002_vm5, %v11648_v32  ;;  %v6563_v20 = vrot.slane %v6561_v50, 4  ;;  %v11612_v34 = vcombine.low %v6512_v15, %v6522_v54  ;;  %v6536_v3 = vsel %vm13278_vm6, %v6531_v53, %v6535_v49  ;;  %v6540_v11 = vor.u32 %v6539_v18, %v6535_v49  ;;  %v16354_v50 = vld [vmem:[%s18682_s2 + $0xa] sm:$0x3]  ;;  %v13111_v18 = vld [vmem:[%s18682_s2 + $0x6] sm:$0x3] }
 0x380   : > { %v6555_v14 = vrot.slane %v6554_v1, 4  ;;  %12781 = vmatprep.mubr.msk.bf16.mxu0 %vm1002_vm5, %v13074_v8  ;;  %v6559_v9 = vrot.slane %v6557_v2, 5  ;;  %v6567_v29 = vshll.u32 %v16338_v31, 16  ;;  %v6578_v6 = vor.u32 %v6577_v48, %v6574_v41  ;;  %v7173_v8 = vld [vmem:[#allocation3] sm:$0xe] }
 0x381   : > { %v6581_v25 = vshll.u32 %v16316_v40, 16  ;;  %12700 = vmatmul.mubr.msk.bf16.gmra.mxu1 %vm1002_vm5, %v11612_v34  ;;  %v6541_v15 = vrot.slane %v6540_v11, 4  ;;  %v6587_v33 = vrot.slane %v6585_v36, 4  ;;  %v6591_v53 = vshll.u32 %v16344_v43, 16  ;;  %v13075_v34 = vld [vmem:[#allocation3 + $0x18] sm:$0xff]  }
 0x382   : > { %v7790_v62 = vsel %vm1051_vm0, %v13111_v18, 0  ;;  %v6560_v41 = vsel %vm13278_vm6, %v6555_v14, %v6559_v9  ;;  %v6564_v48 = vor.u32 %v6563_v20, %v6559_v9  ;;  %v6569_v51 = vrot.slane %v6567_v29, 5 }
 0x383   : > { %v6579_v30 = vrot.slane %v6578_v6, 4  ;;  %12780 = vmatpush3.bf16.msra.mxu0 %v7790_v62  ;;  %v6546_v36 = vsel %vm13278_vm6, %v6541_v15, %v6545_v42  ;;  %v6583_v32 = vrot.slane %v6581_v25, 5  ;;  %v6593_v49 = vrot.slane %v6591_v53, 5  ;;  %v13076_v6 = vld [vmem:[#allocation3 + $0x24] sm:$0xff]  }
 0x384   : > { %v6602_v1 = vor.u32 %v6601_v52, %v6598_v60  ;;  %12997 = vmatprep.subr.msk.bf16.mxu0 %vm1051_vm0, %v16354_v50  ;;  %v11613_v54 = vcombine.low %v6536_v3, %v6546_v36  ;;  %v6565_v2 = vrot.slane %v6564_v48, 4  ;;  %v6605_v20 = vshll.u32 %v16328_v4, 16 }
 0x385   : > { %v6611_v11 = vrot.slane %v6609_v26, 4  ;;  %v6584_v14 = vsel %vm13278_vm6, %v6579_v30, %v6583_v32  ;;  %v6588_v9 = vor.u32 %v6587_v33, %v6583_v32  ;;  %v6615_v42 = vshll.u32 %v16364_v46, 16  ;;  %v7174_v26 = vld [vmem:[#allocation3 + $0xc] sm:$0xe]  ;;  %v7175_v32 = vld [vmem:[#allocation3 + $0x18] sm:$0xe] }
 0x386   : > { %v6603_v29 = vrot.slane %v6602_v1, 4  ;;  %12703 = vmatprep.mubr.msk.bf16.mxu1 %vm1002_vm5, %v11613_v54  ;;  %v6570_v60 = vsel %vm13278_vm6, %v6565_v2, %v6569_v51  ;;  %v6607_v52 = vrot.slane %v6605_v20, 5  ;;  %v11665_v3 = vrot.slane %v7173_v8, 9 }
 0x387   : > { %12782 = vmatmul.mubr.msk.bf16.vlgmr.msra.gmra.mxu0 %vm1002_vm5, %v13075_v34  ;;  %v7223_v25 = vrot.slane %v16105_v13, 5  ;;  %v11614_v15 = vcombine.low %v6560_v41, %v6570_v60  ;;  %v6589_v53 = vrot.slane %v6588_v9, 4  ;;  %v6617_v18 = vrot.slane %v6615_v42, 5 }
 0x388   : > { %12785 = vmatprep.mubr.msk.bf16.mxu0 %vm1002_vm5, %v13076_v6  ;;  %v7226_v33 = vrot.slane %v16154_v58, 5  ;;  %v6608_v62 = vsel %vm13278_vm6, %v6603_v29, %v6607_v52  ;;  %v6612_v48 = vor.u32 %v6611_v11, %v6607_v52  ;;  %v11666_v41 = vrot.slane %v7174_v26, 9  ;;  %v7176_v58 = vld [vmem:[#allocation3 + $0x24] sm:$0xe] }
 0x389   : > { %v7224_v51 = vsel %vm13455_vm9, %v11665_v3, %v7223_v25  ;;  %v7225_v36 = vrot.slane %v7223_v25, 4  ;;  %12704 = vmatmul.mubr.msk.bf16.gmra.mxu1 %vm1002_vm5, %v11614_v15  ;;  %v6594_v13 = vsel %vm13278_vm6, %v6589_v53, %v6593_v49  ;;  %v7230_v1 = vrot.slane %v16122_v7, 5  ;;  %v7177_v7 = vld [vmem:[#allocation3 + $0x30] sm:$0xe]  ;;  %v13078_v3 = vld [vmem:[#allocation3 + $0x3c] sm:$0xff]  }
 0x38a   : > { %v7233_v8 = vrot.slane %v16161_v0, 5  ;;  %v11615_v54 = vcombine.low %v6584_v14, %v6594_v13  ;;  %v6613_v2 = vrot.slane %v6612_v48, 4  ;;  %v16394_v20 = vsel %vm1051_vm0, %v16198_v22, 0  ;;  %v13077_v14 = vld [vmem:[#allocation3 + $0x30] sm:$0xff]   ;;  %v7178_v15 = vld [vmem:[#allocation3 + $0x3c] sm:$0xe] }
 0x38b   : > { %v7227_v34 = vsel %vm13455_vm9, %v7225_v36, %v7226_v33  ;;  %v16398_v9 = vsel %vm13455_vm9, %v11666_v41, %v7230_v1  ;;  %v7232_v49 = vrot.slane %v7230_v1, 4  ;;  %v11667_v29 = vrot.slane %v7175_v32, 9  ;;  %v7179_v48 = vld [vmem:[#allocation3 + $0x48] sm:$0xe]  ;;  %v7180_v41 = vld [vmem:[#allocation3 + $0x54] sm:$0xe] }
 0x38c   : > { %v11682_v11 = vcombine.low %v7224_v51, %v7227_v34  ;;  %12707 = vmatprep.mubr.msk.bf16.mxu1 %vm1002_vm5, %v11615_v54  ;;  %v6618_v0 = vsel %vm13278_vm6, %v6613_v2, %v6617_v18  ;;  %v7237_v42 = vrot.slane %v16136_v59, 5  ;;  %v7240_v6 = vrot.slane %v16171_v38, 5  ;;  %v7181_v2 = vld [vmem:[#allocation3 + $0x60] sm:$0xe] }
 0x38d   : > { %v11668_v22 = vrot.slane %v7176_v58, 9  ;;  %v11616_v60 = vcombine.low %v6608_v62, %v6618_v0  ;;  %v16407_v52 = vsel %vm13455_vm9, %v7232_v49, %v7233_v8  ;;  %v7244_v25 = vrot.slane %v16148_v23, 5 }
 0x38e   : > { %v7247_v26 = vrot.slane %v16188_v17, 5  ;;  %v11683_v53 = vcombine.low %v16398_v9, %v16407_v52  ;;  %v16416_v59 = vsel %vm13455_vm9, %v11667_v29, %v7237_v42  ;;  %v7239_v38 = vrot.slane %v7237_v42, 4 }
 0x38f   : > { %12786 = vmatmul.mubr.msk.bf16.gmra.mxu0 %vm1002_vm5, %v13077_v14  ;;  %v11669_v18 = vrot.slane %v7177_v7, 9  ;;  %v16421_v33 = vsel %vm13455_vm9, %v11668_v22, %v7244_v25  ;;  %v7246_v23 = vrot.slane %v7244_v25, 4  ;;  %v7251_v17 = vrot.slane %v16164_v35, 5  ;;  %v13080_v22 = vld [vmem:[#allocation3 + $0x54] sm:$0xff]  }
 0x390   : > { %12789 = vmatprep.mubr.msk.bf16.mxu0 %vm1002_vm5, %v13078_v3  ;;  %v7254_v62 = vrot.slane %v16206_v28, 5  ;;  %v7241_v51 = vsel %vm13455_vm9, %v7239_v38, %v7240_v6  ;;  %v11670_v36 = vrot.slane %v7178_v15, 9  ;;  %v7258_v32 = vrot.slane %v16176_v19, 5  ;;  %v7182_v6 = vld [vmem:[#allocation3 + $0x6c] sm:$0xe] }
 0x391   : > { %v7261_v13 = vrot.slane %v16221_v56, 5  ;;  %12708 = vmatmul.mubr.msk.bf16.gmra.mxu1 %vm1002_vm5, %v11616_v60  ;;  %v11684_v1 = vcombine.low %v16416_v59, %v7241_v51  ;;  %v16433_v8 = vsel %vm13455_vm9, %v7246_v23, %v7247_v26  ;;  %v16437_v35 = vsel %vm13455_vm9, %v11669_v18, %v7251_v17  ;;  %v7183_v26 = vld [vmem:[#allocation3 + $0x78] sm:$0xe]  ;;  %v7184_v23 = vld [vmem:[#allocation3 + $0x84] sm:$0xe] }
 0x392   : > { %v7253_v28 = vrot.slane %v7251_v17, 4  ;;  %12747 = vmatprep.mubr.msk.bf16.mxu1 %vm1002_vm5, %v11682_v11  ;;  %v11685_v19 = vcombine.low %v16421_v33, %v16433_v8  ;;  %v16444_v56 = vsel %vm13455_vm9, %v11670_v36, %v7258_v32  ;;  %v7260_v58 = vrot.slane %v7258_v32, 4  ;;  %v13079_v11 = vld [vmem:[#allocation3 + $0x48] sm:$0xff]   ;;  %v7185_v32 = vld [vmem:[#allocation3 + $0x90] sm:$0xe] }
 0x393   : > { %v11671_v54 = vrot.slane %v7179_v48, 9  ;;  %v7265_v9 = vrot.slane %v16192_v21, 5  ;;  %v7268_v49 = vrot.slane %v16240_v57, 5  ;;  %v11672_v29 = vrot.slane %v7180_v41, 9  ;;  %v16493_v48 = vld [vmem:[%s18682_s2 + $0xc] sm:$0x3] }
 0x394   : > { %v16448_v34 = vsel %vm13455_vm9, %v7253_v28, %v7254_v62  ;;  %v16456_v0 = vsel %vm13455_vm9, %v7260_v58, %v7261_v13  ;;  %v7272_v14 = vrot.slane %v16210_v5, 5  ;;  %v7275_v42 = vrot.slane %v16252_v44, 5 }
 0x395   : > { %v11686_v7 = vcombine.low %v16437_v35, %v16448_v34  ;;  %v11687_v21 = vcombine.low %v16444_v56, %v16456_v0  ;;  %v16464_v57 = vsel %vm13455_vm9, %v11671_v54, %v7265_v9  ;;  %v7267_v60 = vrot.slane %v7265_v9, 4  ;;  %v13081_v9 = vld [vmem:[#allocation3 + $0x60] sm:$0xff]  }
 0x396   : > { %v11673_v52 = vrot.slane %v7181_v2, 9  ;;  %v16469_v3 = vsel %vm13455_vm9, %v11672_v29, %v7272_v14  ;;  %v7274_v5 = vrot.slane %v7272_v14, 4  ;;  %v7279_v44 = vrot.slane %v16229_v45, 5  ;;  %v7186_v2 = vld [vmem:[#allocation3 + $0x9c] sm:$0xe] }
 0x397   : > { %12790 = vmatmul.mubr.msk.bf16.gmra.mxu0 %vm1002_vm5, %v13079_v11  ;;  %v7282_v25 = vrot.slane %v16266_v27, 5  ;;  %v16476_v15 = vsel %vm13455_vm9, %v7267_v60, %v7268_v49  ;;  %v11674_v59 = vrot.slane %v7182_v6, 9  ;;  %v7286_v38 = vrot.slane %v16235_v16, 5  ;;  %v16526_v11 = vld [vmem:[#allocation3 + $0x10] sm:$0xf] }
 0x398   : > { %12793 = vmatprep.mubr.msk.bf16.mxu0 %vm1002_vm5, %v13080_v22  ;;  %v7289_v18 = vrot.slane %v16279_v12, 5  ;;  %v11688_v17 = vcombine.low %v16464_v57, %v16476_v15  ;;  %v16484_v45 = vsel %vm13455_vm9, %v7274_v5, %v7275_v42  ;;  %v16488_v27 = vsel %vm13455_vm9, %v11673_v52, %v7279_v44  ;;  %v16528_v14 = vld [vmem:[#allocation3 + $0x14] sm:$0x1]  ;;  %v8711_v60 = vld [vmem:[#allocation3 + $0xc] sm:$0xe] }
 0x399   : > { %v7281_v62 = vrot.slane %v7279_v44, 4  ;;  %12748 = vmatmul.mubr.msk.bf16.vlgmr.msra.gmra.mxu1 %vm1002_vm5, %v11683_v53  ;;  %v11689_v16 = vcombine.low %v16469_v3, %v16484_v45  ;;  %v16500_v12 = vsel %vm13455_vm9, %v11674_v59, %v7286_v38  ;;  %v7288_v51 = vrot.slane %v7286_v38, 4  ;;  %v7988_v15 = vld [vmem:[#allocation3 + $0x18] sm:$0xf] }
 0x39a   : > { %v11675_v36 = vrot.slane %v7183_v26, 9  ;;  %12814 = vmatpush3.bf16.msra.mxu1 %v16394_v20  ;;  %12751 = vmatprep.mubr.msk.bf16.mxu1 %vm1002_vm5, %v11684_v1  ;;  %v7293_v53 = vrot.slane %v16260_v47, 5  ;;  %v7296_v41 = vrot.slane %v16296_v63, 5  ;;  %v11676_v28 = vrot.slane %v7184_v23, 9  ;;  %v7187_v26 = vld [vmem:[#allocation3 + $0xa8] sm:$0xe] }
 0x39b   : > { %v16506_v13 = vsel %vm13455_vm9, %v7281_v62, %v7282_v25  ;;  %v16514_v54 = vsel %vm13455_vm9, %v7288_v51, %v7289_v18  ;;  %v7300_v20 = vrot.slane %v16268_v39, 5  ;;  %v7303_v1 = vrot.slane %v16312_v55, 5  ;;  %12998 = vmatprep.subr.msk.bf16.mxu1 %vm1051_vm0, %v16493_v48  ;;  %v13082_v39 = vld [vmem:[#allocation3 + $0x6c] sm:$0xff]   ;;  %v16554_v18 = vld [vmem:[#allocation3 + $0x1c] sm:$0xf] }
 0x39c   : > { %v11690_v58 = vcombine.low %v16488_v27, %v16506_v13  ;;  %v11691_v47 = vcombine.low %v16500_v12, %v16514_v54  ;;  %v16524_v63 = vsel %vm13455_vm9, %v11675_v36, %v7293_v53  ;;  %v7295_v49 = vrot.slane %v7293_v53, 4  ;;  %v16562_v51 = vld [vmem:[#allocation3 + $0x20] sm:$0x1]  ;;  %v8712_v36 = vld [vmem:[#allocation3 + $0x18] sm:$0xe] }
 0x39d   : > { %v11677_v29 = vrot.slane %v7185_v32, 9  ;;  %v16532_v55 = vsel %vm13455_vm9, %v11676_v28, %v7300_v20  ;;  %v7302_v42 = vrot.slane %v7300_v20, 4  ;;  %v7307_v6 = vrot.slane %v16288_v37, 5 }
 0x39e   : > { %v7310_v22 = vrot.slane %v16324_v24, 5  ;;  %v16539_v52 = vsel %vm13455_vm9, %v7295_v49, %v7296_v41  ;;  %v11678_v5 = vrot.slane %v7186_v2, 9  ;;  %v7314_v44 = vrot.slane %v16300_v61, 5  ;;  %v11862_v2 = vld [vmem:[%s18682_s2 + $0xe] sm:$0x3] }
 0x39f   : > { %12794 = vmatmul.mubr.msk.bf16.gmra.mxu0 %vm1002_vm5, %v13081_v9  ;;  %v7317_v25 = vrot.slane %v16338_v31, 5  ;;  %v11692_v37 = vcombine.low %v16524_v63, %v16539_v52  ;;  %v16548_v24 = vsel %vm13455_vm9, %v7302_v42, %v7303_v1  ;;  %v16552_v59 = vsel %vm13455_vm9, %v11677_v29, %v7307_v6  ;;  %v7188_v1 = vld [vmem:[#allocation3 + $0xb4] sm:$0xe]  ;;  %v16597_v49 = vld [vmem:[#allocation3 + $0x28] sm:$0xf]  ;;  %v13089_v63 = vld [vmem:[#allocation3 + $0xc0] sm:$0xff]  }
 0x3a0   : > { %12797 = vmatprep.mubr.msk.bf16.mxu0 %vm1002_vm5, %v13082_v39  ;;  %v7309_v38 = vrot.slane %v7307_v6, 4  ;;  %v11693_v61 = vcombine.low %v16532_v55, %v16548_v24  ;;  %v16560_v31 = vsel %vm13455_vm9, %v11678_v5, %v7314_v44  ;;  %v7316_v23 = vrot.slane %v7314_v44, 4 }
 0x3a1   : > { %v11780_v62 = vrot.slane %v8711_v60, 9  ;;  %12752 = vmatmul.mubr.msk.bf16.gmra.mxu1 %vm1002_vm5, %v11685_v19  ;;  %v8777_v53 = vrot.slane %v16526_v11, 5  ;;  %v8780_v41 = vrot.slane %v16528_v14, 5  ;;  %v11679_v28 = vrot.slane %v7187_v26, 9 }
 0x3a2   : > { %v16570_v32 = vsel %vm13455_vm9, %v7309_v38, %v7310_v22  ;;  %12755 = vmatprep.mubr.msk.bf16.mxu1 %vm1002_vm5, %v11686_v7  ;;  %v16582_v33 = vsel %vm13455_vm9, %v7316_v23, %v7317_v25  ;;  %v7321_v8 = vrot.slane %v16316_v40, 5  ;;  %v7324_v19 = vrot.slane %v16344_v43, 5  ;;  %v16599_v40 = vld [vmem:[#allocation3 + $0x2c] sm:$0x1]  ;;  %v13083_v43 = vld [vmem:[#allocation3 + $0x78] sm:$0xff]   ;;  %v13084_v22 = vld [vmem:[#allocation3 + $0x84] sm:$0xff]  }
 0x3a3   : > { %v11694_v20 = vcombine.low %v16552_v59, %v16570_v32  ;;  %v11695_v35 = vcombine.low %v16560_v31, %v16582_v33  ;;  %v16593_v34 = vsel %vm13455_vm9, %v11780_v62, %v8777_v53  ;;  %v8779_v7 = vrot.slane %v8777_v53, 4  ;;  %v8713_v25 = vld [vmem:[#allocation3 + $0x24] sm:$0xe]  ;;  %v8000_v59 = vld [vmem:[#allocation3 + $0x48] sm:$0xf] }
 0x3a4   : > { %v8986_v9 = vsel %vm1051_vm0, %v16354_v50, 0  ;;  %v16603_v29 = vsel %vm13455_vm9, %v11679_v28, %v7321_v8  ;;  %v7323_v39 = vrot.slane %v7321_v8, 4  ;;  %v11781_v42 = vrot.slane %v8712_v36, 9  ;;  %v7985_v36 = vld [vmem:[#allocation3 + $0xc] sm:$0xf] }
 0x3a5   : > { %12848 = vmatpush3.bf16.msra.mxu0 %v8986_v9  ;;  %v8784_v6 = vrot.slane %v16554_v18, 5  ;;  %v16608_v60 = vsel %vm13455_vm9, %v8779_v7, %v8780_v41  ;;  %v8787_v50 = vrot.slane %v16562_v51, 5  ;;  %v11680_v5 = vrot.slane %v7188_v1, 9  ;;  %v16638_v7 = vld [vmem:[#allocation3 + $0x34] sm:$0xf] }
 0x3a6   : > { %v7328_v44 = vrot.slane %v16328_v4, 5  ;;  %12999 = vmatprep.subr.msk.bf16.mxu0 %vm1051_vm0, %v11862_v2  ;;  %v11797_v26 = vcombine.low %v16593_v34, %v16608_v60  ;;  %v16618_v38 = vsel %vm13455_vm9, %v7323_v39, %v7324_v19  ;;  %v7331_v28 = vrot.slane %v16364_v46, 5 }
 0x3a7   : > { %12798 = vmatmul.mubr.msk.bf16.gmra.mxu0 %vm1002_vm5, %v13083_v43  ;;  %v16622_v23 = vsel %vm13455_vm9, %v11781_v42, %v8784_v6  ;;  %v8786_v62 = vrot.slane %v8784_v6, 4  ;;  %v11782_v19 = vrot.slane %v8713_v25, 9  ;;  %v8791_v1 = vrot.slane %v16597_v49, 5  ;;  %v8714_v42 = vld [vmem:[#allocation3 + $0x30] sm:$0xe] }
 0x3a8   : > { %12801 = vmatprep.mubr.msk.bf16.mxu0 %vm1002_vm5, %v13084_v22  ;;  %v16629_v53 = vsel %vm13455_vm9, %v11680_v5, %v7328_v44  ;;  %v7330_v41 = vrot.slane %v7328_v44, 4  ;;  %v8794_v2 = vrot.slane %v16599_v40, 5  ;;  %v8034_v43 = vshrl.u32 %v7985_v36, 16  ;;  %v16661_v22 = vld [vmem:[#allocation3 + $0x38] sm:$0x1] }
 0x3a9   : > { %v16634_v8 = vsel %vm13455_vm9, %v8786_v62, %v8787_v50  ;;  %12756 = vmatmul.mubr.msk.bf16.gmra.mxu1 %vm1002_vm5, %v11687_v21  ;;  %v8037_v39 = vshll.u32 %v7985_v36, 16  ;;  %v16658_v0 = vsel %vm13455_vm9, %v11782_v19, %v8791_v1  ;;  %v8793_v21 = vrot.slane %v8791_v1, 4 }
 0x3aa   : > { %v11798_v9 = vcombine.low %v16622_v23, %v16634_v8  ;;  %v16648_v46 = vsel %vm13455_vm9, %v7330_v41, %v7331_v28  ;;  %12759 = vmatprep.mubr.msk.bf16.mxu1 %vm1002_vm5, %v11688_v17  ;;  %v8043_v6 = vshll.u32 %v16526_v11, 16  ;;  %v8036_v50 = vrot.slane %v8034_v43, 4  ;;  %v13085_v17 = vld [vmem:[#allocation3 + $0x90] sm:$0xff]   ;;  %v13086_v28 = vld [vmem:[#allocation3 + $0x9c] sm:$0xff]  }
 0x3ab   : > { %v8039_v5 = vrot.slane %v8037_v39, 5  ;;  %v8047_v44 = vshrl.u32 %v16526_v11, 16  ;;  %v8053_v57 = vshll.u32 %v16528_v14, 16  ;;  %v16667_v25 = vsel %vm13455_vm9, %v8793_v21, %v8794_v2  ;;  %v16822_v23 = vld [vmem:[#allocation3 + $0x70] sm:$0xf] }
 0x3ac   : > { %v8045_v62 = vrot.slane %v8043_v6, 5  ;;  %v11783_v36 = vrot.slane %v8714_v42, 9  ;;  %v8798_v41 = vrot.slane %v16638_v7, 5  ;;  %v11799_v19 = vcombine.low %v16658_v0, %v16667_v25  ;;  %v16678_v42 = vld [vmem:[#allocation3 + $0x40] sm:$0xf] }
 0x3ad   : > { %v8040_v1 = vor.u32 %v8039_v5, %v8036_v50  ;;  %v8049_v43 = vrot.slane %v8047_v44, 4  ;;  %v8055_v39 = vrot.slane %v8053_v57, 5  ;;  %v8801_v2 = vrot.slane %v16661_v22, 5  ;;  %v8715_v6 = vld [vmem:[#allocation3 + $0x3c] sm:$0xe] }
 0x3ae   : > { %v16675_v11 = vsel %vm13455_vm9, %v11783_v36, %v8798_v41  ;;  %v8800_v14 = vrot.slane %v8798_v41, 4  ;;  %v8058_v21 = vshrl.u32 %v7988_v15, 16  ;;  %v8061_v50 = vshll.u32 %v7988_v15, 16  ;;  %v16688_v41 = vld [vmem:[#allocation3 + $0x44] sm:$0x1] }
 0x3af   : > { %12802 = vmatmul.mubr.msk.bf16.gmra.mxu0 %vm1002_vm5, %v13085_v17  ;;  %v8041_v56 = vrot.slane %v8040_v1, 4  ;;  %v8050_v4 = vor.u32 %v8049_v43, %v8045_v62  ;;  %v8067_v5 = vshll.u32 %v16554_v18, 16  ;;  %v8071_v17 = vshrl.u32 %v16554_v18, 16 }
 0x3b0   : > { %12805 = vmatprep.mubr.msk.bf16.mxu0 %vm1002_vm5, %v13086_v28  ;;  %v16684_v44 = vsel %vm13455_vm9, %v8800_v14, %v8801_v2  ;;  %v8060_v57 = vrot.slane %v8058_v21, 4  ;;  %v8077_v36 = vshll.u32 %v16562_v51, 16  ;;  %v8063_v43 = vrot.slane %v8061_v50, 5  ;;  %v7991_v14 = vld [vmem:[#allocation3 + $0x24] sm:$0xf] }
 0x3b1   : > { %12760 = vmatmul.mubr.msk.bf16.gmra.mxu1 %vm1002_vm5, %v11689_v16  ;;  %v8046_v15 = vsel %vm13278_vm6, %v8041_v56, %v8045_v62  ;;  %v8051_v28 = vrot.slane %v8050_v4, 4  ;;  %v11800_v1 = vcombine.low %v16675_v11, %v16684_v44  ;;  %v8069_v18 = vrot.slane %v8067_v5, 5  ;;  %v13087_v62 = vld [vmem:[#allocation3 + $0xa8] sm:$0xff]  }
 0x3b2   : > { %12763 = vmatprep.mubr.msk.bf16.mxu1 %vm1002_vm5, %v11690_v58  ;;  %v8073_v51 = vrot.slane %v8071_v17, 4  ;;  %v8079_v2 = vrot.slane %v8077_v36, 5  ;;  %v11784_v3 = vrot.slane %v8715_v6, 9  ;;  %v8064_v16 = vor.u32 %v8063_v43, %v8060_v57  ;;  %v13088_v58 = vld [vmem:[#allocation3 + $0xb4] sm:$0xff]   ;;  %v16716_v17 = vld [vmem:[#allocation3 + $0x4c] sm:$0xf] }
 0x3b3   : > { %v8056_v45 = vsel %vm13278_vm6, %v8051_v28, %v8055_v39  ;;  %v8805_v4 = vrot.slane %v16678_v42, 5  ;;  %v8808_v56 = vrot.slane %v16688_v41, 5  ;;  %v16710_v27 = vsel %vm1051_vm0, %v16493_v48, 0  ;;  %v16718_v36 = vld [vmem:[#allocation3 + $0x50] sm:$0x1] }
 0x3b4   : > { %v16706_v21 = vcombine.low %v8046_v15, %v8056_v45  ;;  %v8074_v50 = vor.u32 %v8073_v51, %v8069_v18  ;;  %v8082_v13 = vshrl.u32 %v7991_v14, 16  ;;  %v8065_v5 = vrot.slane %v8064_v16, 4  ;;  %v8716_v51 = vld [vmem:[#allocation3 + $0x48] sm:$0xe] }
 0x3b5   : > { %v16714_v6 = vsel %vm13455_vm9, %v11784_v3, %v8805_v4  ;;  %v8807_v39 = vrot.slane %v8805_v4, 4  ;;  %v8085_v57 = vshll.u32 %v7991_v14, 16  ;;  %v8091_v48 = vshll.u32 %v16597_v49, 16  ;;  %v7994_v4 = vld [vmem:[#allocation3 + $0x30] sm:$0xf] }
 0x3b6   : > { %v8075_v15 = vrot.slane %v8074_v50, 4  ;;  %v8084_v28 = vrot.slane %v8082_v13, 4  ;;  %v8095_v43 = vshrl.u32 %v16597_v49, 16  ;;  %v8070_v3 = vsel %vm13278_vm6, %v8065_v5, %v8069_v18 }
 0x3b7   : > { %12806 = vmatmul.mubr.msk.bf16.gmra.mxu0 %vm1002_vm5, %v13087_v62  ;;  %v16728_v14 = vsel %vm13455_vm9, %v8807_v39, %v8808_v56  ;;  %v8087_v45 = vrot.slane %v8085_v57, 5  ;;  %v8101_v16 = vshll.u32 %v16599_v40, 16  ;;  %v8093_v50 = vrot.slane %v8091_v48, 5  ;;  %v16751_v48 = vld [vmem:[#allocation3 + $0x5c] sm:$0x1] }
 0x3b8   : > { %12809 = vmatprep.mubr.msk.bf16.mxu0 %vm1002_vm5, %v13088_v58  ;;  %v8080_v62 = vsel %vm13278_vm6, %v8075_v15, %v8079_v2  ;;  %v11801_v49 = vcombine.low %v16714_v6, %v16728_v14  ;;  %v8097_v13 = vrot.slane %v8095_v43, 4  ;;  %v11785_v5 = vrot.slane %v8716_v51, 9  ;;  %v8717_v43 = vld [vmem:[#allocation3 + $0x54] sm:$0xe] }
 0x3b9   : > { %12764 = vmatmul.mubr.msk.bf16.gmra.mxu1 %vm1002_vm5, %v11691_v47  ;;  %v16739_v18 = vcombine.low %v8070_v3, %v8080_v62  ;;  %v8088_v56 = vor.u32 %v8087_v45, %v8084_v28  ;;  %v8103_v58 = vrot.slane %v8101_v16, 5  ;;  %v8812_v2 = vrot.slane %v16716_v17, 5  ;;  %v16749_v28 = vld [vmem:[#allocation3 + $0x58] sm:$0xf] }
 0x3ba   : > { %12767 = vmatprep.mubr.msk.bf16.mxu1 %vm1002_vm5, %v11692_v37  ;;  %v8098_v40 = vor.u32 %v8097_v13, %v8093_v50  ;;  %v8815_v39 = vrot.slane %v16718_v36, 5  ;;  %v8106_v57 = vshrl.u32 %v7994_v4, 16  ;;  %v8109_v12 = vshll.u32 %v7994_v4, 16 }
 0x3bb   : > { %v8089_v15 = vrot.slane %v8088_v56, 4  ;;  %v8115_v54 = vshll.u32 %v16638_v7, 16  ;;  %v8119_v47 = vshrl.u32 %v16638_v7, 16  ;;  %v16755_v37 = vsel %vm13455_vm9, %v11785_v5, %v8812_v2  ;;  %v7997_v7 = vld [vmem:[#allocation3 + $0x3c] sm:$0xf] }
 0x3bc   : > { %v8099_v52 = vrot.slane %v8098_v40, 4  ;;  %v8814_v51 = vrot.slane %v8812_v2, 4  ;;  %v8108_v3 = vrot.slane %v8106_v57, 4  ;;  %v8111_v16 = vrot.slane %v8109_v12, 5 }
 0x3bd   : > { %v8094_v45 = vsel %vm13278_vm6, %v8089_v15, %v8093_v50  ;;  %v8117_v4 = vrot.slane %v8115_v54, 5  ;;  %v8121_v62 = vrot.slane %v8119_v47, 4  ;;  %v8125_v5 = vshll.u32 %v16661_v22, 16  ;;  %v16777_v22 = vld [vmem:[#allocation3 + $0x64] sm:$0xf] }
 0x3be   : > { %v8104_v13 = vsel %vm13278_vm6, %v8099_v52, %v8103_v58  ;;  %v16764_v56 = vsel %vm13455_vm9, %v8814_v51, %v8815_v39  ;;  %v11786_v40 = vrot.slane %v8717_v43, 9  ;;  %v8112_v57 = vor.u32 %v8111_v16, %v8108_v3  ;;  %v16784_v43 = vld [vmem:[#allocation3 + $0x68] sm:$0x1] }
 0x3bf   : > { %12810 = vmatmul.mubr.msk.bf16.gmra.mxu0 %vm1002_vm5, %v13089_v63  ;;  %v16771_v50 = vcombine.low %v8094_v45, %v8104_v13  ;;  %v11802_v2 = vcombine.low %v16755_v37, %v16764_v56  ;;  %v8122_v15 = vor.u32 %v8121_v62, %v8117_v4  ;;  %v8127_v58 = vrot.slane %v8125_v5, 5 }
 0x3c0   : > { %12849 = vmatprep.mubr.msk.bf16.mxu0 %vm1002_vm5, %v11797_v26  ;;  %v8819_v12 = vrot.slane %v16749_v28, 5  ;;  %v8822_v39 = vrot.slane %v16751_v48, 5  ;;  %v8130_v54 = vshrl.u32 %v7997_v7, 16  ;;  %v8113_v34 = vrot.slane %v8112_v57, 4 }
 0x3c1   : > { %12768 = vmatmul.mubr.msk.bf16.gmra.mxu1 %vm1002_vm5, %v11693_v61  ;;  %v8123_v60 = vrot.slane %v8122_v15, 4  ;;  %v8133_v26 = vshll.u32 %v7997_v7, 16  ;;  %v8139_v47 = vshll.u32 %v16678_v42, 16  ;;  %v8143_v24 = vshrl.u32 %v16678_v42, 16  ;;  %v8718_v61 = vld [vmem:[#allocation3 + $0x60] sm:$0xe] }
 0x3c2   : > { %12771 = vmatprep.mubr.msk.bf16.mxu1 %vm1002_vm5, %v11694_v20  ;;  %v16792_v63 = vsel %vm13455_vm9, %v11786_v40, %v8819_v12  ;;  %v8821_v52 = vrot.slane %v8819_v12, 4  ;;  %v8132_v55 = vrot.slane %v8130_v54, 4  ;;  %v8118_v51 = vsel %vm13278_vm6, %v8113_v34, %v8117_v4 }
 0x3c3   : > { %v8128_v3 = vsel %vm13278_vm6, %v8123_v60, %v8127_v58  ;;  %v8135_v45 = vrot.slane %v8133_v26, 5  ;;  %v8141_v16 = vrot.slane %v8139_v47, 5  ;;  %v8145_v62 = vrot.slane %v8143_v24, 4  ;;  %v8719_v26 = vld [vmem:[#allocation3 + $0x6c] sm:$0xe] }
 0x3c4   : > { %v16799_v32 = vcombine.low %v8118_v51, %v8128_v3  ;;  %v16803_v20 = vsel %vm13455_vm9, %v8821_v52, %v8822_v39  ;;  %v8149_v7 = vshll.u32 %v16688_v41, 16  ;;  %v11787_v4 = vrot.slane %v8718_v61, 9  ;;  %v16837_v52 = vld [vmem:[#allocation3 + $0x74] sm:$0x1] }
 0x3c5   : > { %v11803_v42 = vcombine.low %v16792_v63, %v16803_v20  ;;  %v8136_v13 = vor.u32 %v8135_v45, %v8132_v55  ;;  %v8826_v5 = vrot.slane %v16777_v22, 5  ;;  %v8146_v40 = vor.u32 %v8145_v62, %v8141_v16  ;;  %v8003_v55 = vld [vmem:[#allocation3 + $0x54] sm:$0xf] }
 0x3c6   : > { %v8151_v57 = vrot.slane %v8149_v7, 5  ;;  %v8829_v15 = vrot.slane %v16784_v43, 5  ;;  %v8154_v58 = vshrl.u32 %v8000_v59, 16  ;;  %v8157_v54 = vshll.u32 %v8000_v59, 16 }
 0x3c7   : > { %12850 = vmatmul.mubr.msk.bf16.vlgmr.msra.gmra.mxu0 %vm1002_vm5, %v11798_v9  ;;  %v8137_v41 = vrot.slane %v8136_v13, 4  ;;  %v16820_v12 = vsel %vm13455_vm9, %v11787_v4, %v8826_v5  ;;  %v8828_v39 = vrot.slane %v8826_v5, 4  ;;  %v8147_v8 = vrot.slane %v8146_v40, 4  ;;  %v16853_v4 = vld [vmem:[#allocation3 + $0x7c] sm:$0xf] }
 0x3c8   : > { %12853 = vmatprep.mubr.msk.bf16.mxu0 %vm1002_vm5, %v11799_v19  ;;  %v8156_v9 = vrot.slane %v8154_v58, 4  ;;  %v8163_v34 = vshll.u32 %v16716_v17, 16  ;;  %v8167_v60 = vshrl.u32 %v16716_v17, 16  ;;  %v8159_v19 = vrot.slane %v8157_v54, 5  ;;  %v8720_v5 = vld [vmem:[#allocation3 + $0x78] sm:$0xe] }
 0x3c9   : > { %12772 = vmatmul.mubr.msk.bf16.gmra.mxu1 %vm1002_vm5, %v11695_v35  ;;  %v8142_v0 = vsel %vm13278_vm6, %v8137_v41, %v8141_v16  ;;  %v16834_v25 = vsel %vm13455_vm9, %v8828_v39, %v8829_v15  ;;  %v8173_v47 = vshll.u32 %v16718_v36, 16  ;;  %v18891_v17 = vcombine.low %v16603_v29, %v16618_v38  ;;  %v16863_v41 = vld [vmem:[#allocation3 + $0x80] sm:$0x1] }
 0x3ca   : > { %v8152_v31 = vsel %vm13278_vm6, %v8147_v8, %v8151_v57  ;;  %v11804_v33 = vcombine.low %v16820_v12, %v16834_v25  ;;  %v8165_v35 = vrot.slane %v8163_v34, 5  ;;  %v8169_v24 = vrot.slane %v8167_v60, 4  ;;  %v8006_v39 = vld [vmem:[#allocation3 + $0x60] sm:$0xf]  ;;  %v8723_v25 = vld [vmem:[#allocation3 + $0x9c] sm:$0xe] }
 0x3cb   : > { %12775 = vmatprep.mubr.msk.bf16.mxu1 %vm1002_vm5, %v18891_v17  ;;  %v16847_v61 = vcombine.low %v8142_v0, %v8152_v31  ;;  %v8160_v51 = vor.u32 %v8159_v19, %v8156_v9  ;;  %v8175_v36 = vrot.slane %v8173_v47, 5  ;;  %v11788_v3 = vrot.slane %v8719_v26, 9  ;;  %v16891_v31 = vld [vmem:[#allocation3 + $0x88] sm:$0xf]  ;;  %v16967_v12 = vld [vmem:[#allocation3 + $0xa0] sm:$0xf] }
 0x3cc   : > { %v8170_v45 = vor.u32 %v8169_v24, %v8165_v35  ;;  %v8833_v16 = vrot.slane %v16822_v23, 5  ;;  %v8836_v29 = vrot.slane %v16837_v52, 5  ;;  %v8178_v38 = vshrl.u32 %v8003_v55, 16 }
 0x3cd   : > { %v8161_v59 = vrot.slane %v8160_v51, 4  ;;  %v8181_v62 = vshll.u32 %v8003_v55, 16  ;;  %v8187_v7 = vshll.u32 %v16749_v28, 16  ;;  %v8191_v13 = vshrl.u32 %v16749_v28, 16 }
 0x3ce   : > { %v8171_v40 = vrot.slane %v8170_v45, 4  ;;  %v16861_v57 = vsel %vm13455_vm9, %v11788_v3, %v8833_v16  ;;  %v8835_v15 = vrot.slane %v8833_v16, 4  ;;  %v8180_v58 = vrot.slane %v8178_v38, 4  ;;  %v16902_v38 = vld [vmem:[#allocation3 + $0x8c] sm:$0x1] }
 0x3cf   : > { %12854 = vmatmul.mubr.msk.bf16.gmra.mxu0 %vm1002_vm5, %v11800_v1  ;;  %v8166_v28 = vsel %vm13278_vm6, %v8161_v59, %v8165_v35  ;;  %v8183_v11 = vrot.slane %v8181_v62, 5  ;;  %v8189_v44 = vrot.slane %v8187_v7, 5  ;;  %v8193_v1 = vrot.slane %v8191_v13, 4  ;;  %v8009_v59 = vld [vmem:[#allocation3 + $0x6c] sm:$0xf] }
 0x3d0   : > { %12857 = vmatprep.mubr.msk.bf16.mxu0 %vm1002_vm5, %v11801_v49  ;;  %v8176_v54 = vsel %vm13278_vm6, %v8171_v40, %v8175_v36  ;;  %v16875_v8 = vsel %vm13455_vm9, %v8835_v15, %v8836_v29  ;;  %v8197_v9 = vshll.u32 %v16751_v48, 16  ;;  %v11789_v34 = vrot.slane %v8720_v5, 9  ;;  %v8721_v36 = vld [vmem:[#allocation3 + $0x84] sm:$0xe] }
 0x3d1   : > { %v18892_v6 = vcombine.low %v16629_v53, %v16648_v46  ;;  %v16882_v14 = vcombine.low %v8166_v28, %v8176_v54  ;;  %v11805_v49 = vcombine.low %v16861_v57, %v16875_v8  ;;  %v8184_v60 = vor.u32 %v8183_v11, %v8180_v58 }
 0x3d2   : > { %v8194_v26 = vor.u32 %v8193_v1, %v8189_v44  ;;  %v8199_v0 = vrot.slane %v8197_v9, 5  ;;  %v8840_v19 = vrot.slane %v16853_v4, 5  ;;  %v8843_v48 = vrot.slane %v16863_v41, 5  ;;  %v8722_v9 = vld [vmem:[#allocation3 + $0x90] sm:$0xe] }
 0x3d3   : > { %12776 = vmatmul.mubr.msk.bf16.gmra.mxu1 %vm1002_vm5, %v18892_v6  ;;  %v8202_v47 = vshrl.u32 %v8006_v39, 16  ;;  %v8185_v55 = vrot.slane %v8184_v60, 4  ;;  %v8205_v46 = vshll.u32 %v8006_v39, 16  ;;  %v8211_v17 = vshll.u32 %v16777_v22, 16 }
 0x3d4   : > { %12815 = vmatprep.mubr.msk.bf16.mxu1 %vm1002_vm5, %v16706_v21  ;;  %v8195_v53 = vrot.slane %v8194_v26, 4  ;;  %v16895_v35 = vsel %vm13455_vm9, %v11789_v34, %v8840_v19  ;;  %v8842_v24 = vrot.slane %v8840_v19, 4  ;;  %v8215_v21 = vshrl.u32 %v16777_v22, 16 }
 0x3d5   : > { %v8204_v51 = vrot.slane %v8202_v47, 4  ;;  %v8190_v3 = vsel %vm13278_vm6, %v8185_v55, %v8189_v44  ;;  %v8207_v16 = vrot.slane %v8205_v46, 5  ;;  %v8213_v29 = vrot.slane %v8211_v17, 5  ;;  %v16934_v44 = vld [vmem:[#allocation3 + $0x94] sm:$0xf] }
 0x3d6   : > { %v8200_v45 = vsel %vm13278_vm6, %v8195_v53, %v8199_v0  ;;  %v16912_v22 = vsel %vm13455_vm9, %v8842_v24, %v8843_v48  ;;  %v8217_v7 = vrot.slane %v8215_v21, 4  ;;  %v8221_v13 = vshll.u32 %v16784_v43, 16  ;;  %v16926_v43 = vld [vmem:[%s18682_s2 + $0x10] sm:$0x3] }
 0x3d7   : > { %12858 = vmatmul.mubr.msk.bf16.gmra.mxu0 %vm1002_vm5, %v11802_v2  ;;  %v16908_v62 = vcombine.low %v8190_v3, %v8200_v45  ;;  %v11806_v5 = vcombine.low %v16895_v35, %v16912_v22  ;;  %v8208_v37 = vor.u32 %v8207_v16, %v8204_v51  ;;  %v11790_v56 = vrot.slane %v8721_v36, 9  ;;  %v8012_v0 = vld [vmem:[#allocation3 + $0x78] sm:$0xf]  ;;  %v17006_v22 = vld [vmem:[#allocation3 + $0xb0] sm:$0x1] }
 0x3d8   : > { %12861 = vmatprep.mubr.msk.bf16.mxu0 %vm1002_vm5, %v11803_v42  ;;  %v8847_v2 = vrot.slane %v16891_v31, 5  ;;  %v8218_v40 = vor.u32 %v8217_v7, %v8213_v29  ;;  %v8223_v15 = vrot.slane %v8221_v13, 5  ;;  %v8850_v58 = vrot.slane %v16902_v38, 5  ;;  %v16973_v7 = vld [vmem:[#allocation3 + $0xa4] sm:$0x1] }
 0x3d9   : > { %v8226_v28 = vshrl.u32 %v8009_v59, 16  ;;  %v8209_v63 = vrot.slane %v8208_v37, 4  ;;  %v8229_v11 = vshll.u32 %v8009_v59, 16  ;;  %v8235_v54 = vshll.u32 %v16822_v23, 16  ;;  %v8015_v13 = vld [vmem:[#allocation3 + $0x84] sm:$0xf] }
 0x3da   : > { %v16932_v20 = vsel %vm13455_vm9, %v11790_v56, %v8847_v2  ;;  %v8849_v42 = vrot.slane %v8847_v2, 4  ;;  %v8219_v1 = vrot.slane %v8218_v40, 4  ;;  %v8245_v26 = vshll.u32 %v16837_v52, 16 }
 0x3db   : > { %12816 = vmatmul.mubr.msk.bf16.vlgmr.msra.gmra.mxu1 %vm1002_vm5, %v16739_v18  ;;  %v8228_v39 = vrot.slane %v8226_v28, 4  ;;  %v8239_v18 = vshrl.u32 %v16822_v23, 16  ;;  %v8214_v34 = vsel %vm13278_vm6, %v8209_v63, %v8213_v29  ;;  %v8231_v60 = vrot.slane %v8229_v11, 5 }
 0x3dc   : > { %12882 = vmatpush3.bf16.msra.mxu1 %v16710_v27  ;;  %12819 = vmatprep.mubr.msk.bf16.mxu1 %vm1002_vm5, %v16771_v50  ;;  %v8851_v6 = vsel %vm13455_vm9, %v8849_v42, %v8850_v58  ;;  %v16946_v27 = vld [vmem:[#allocation3 + $0x98] sm:$0x1]  ;;  %v8224_v50 = vsel %vm13278_vm6, %v8219_v1, %v8223_v15  ;;  %v8237_v19 = vrot.slane %v8235_v54, 5  ;;  %v8247_v53 = vrot.slane %v8245_v26, 5 }
 0x3dd   : > { %13000 = vmatprep.subr.msk.bf16.mxu1 %vm1051_vm0, %v16926_v43  ;;  %v11807_v23 = vcombine.low %v16932_v20, %v8851_v6  ;;  %v8241_v48 = vrot.slane %v8239_v18, 4  ;;  %v16953_v47 = vcombine.low %v8214_v34, %v8224_v50  ;;  %v8232_v55 = vor.u32 %v8231_v60, %v8228_v39  ;;  %v16992_v18 = vld [vmem:[#allocation3 + $0xac] sm:$0xf]  ;;  %v8724_v60 = vld [vmem:[#allocation3 + $0xa8] sm:$0xe] }
 0x3de   : > { %v11791_v46 = vrot.slane %v8722_v9, 9  ;;  %v8854_v17 = vrot.slane %v16934_v44, 5  ;;  %v8857_v24 = vrot.slane %v16946_v27, 5  ;;  %v8250_v51 = vshrl.u32 %v8012_v0, 16 }
 0x3df   : > { %12862 = vmatmul.mubr.msk.bf16.gmra.mxu0 %vm1002_vm5, %v11804_v33  ;;  %v8242_v52 = vor.u32 %v8241_v48, %v8237_v19  ;;  %v8233_v21 = vrot.slane %v8232_v55, 4  ;;  %v8253_v36 = vshll.u32 %v8012_v0, 16  ;;  %v8259_v3 = vshll.u32 %v16853_v4, 16 }
 0x3e0   : > { %12865 = vmatprep.mubr.msk.bf16.mxu0 %vm1002_vm5, %v11805_v49  ;;  %v8263_v45 = vshrl.u32 %v16853_v4, 16  ;;  %v16971_v16 = vsel %vm13455_vm9, %v11791_v46, %v8854_v17  ;;  %v8856_v29 = vrot.slane %v8854_v17, 4  ;;  %v8252_v59 = vrot.slane %v8250_v51, 4 }
 0x3e1   : > { %v8243_v33 = vrot.slane %v8242_v52, 4  ;;  %v8238_v57 = vsel %vm13278_vm6, %v8233_v21, %v8237_v19  ;;  %v8255_v8 = vrot.slane %v8253_v36, 5  ;;  %v8261_v4 = vrot.slane %v8259_v3, 5 }
 0x3e2   : > { %v8265_v49 = vrot.slane %v8263_v45, 4  ;;  %v8858_v56 = vsel %vm13455_vm9, %v8856_v29, %v8857_v24  ;;  %v8269_v2 = vshll.u32 %v16863_v41, 16  ;;  %v11792_v40 = vrot.slane %v8723_v25, 9 }
 0x3e3   : > { %12820 = vmatmul.mubr.msk.bf16.gmra.mxu1 %vm1002_vm5, %v16799_v32  ;;  %v8248_v37 = vsel %vm13278_vm6, %v8243_v33, %v8247_v53  ;;  %v11808_v15 = vcombine.low %v16971_v16, %v8858_v56  ;;  %v8256_v58 = vor.u32 %v8255_v8, %v8252_v59  ;;  %v8861_v20 = vrot.slane %v16967_v12, 5 }
 0x3e4   : > { %12823 = vmatprep.mubr.msk.bf16.mxu1 %vm1002_vm5, %v16847_v61  ;;  %v16986_v32 = vcombine.low %v8238_v57, %v8248_v37  ;;  %v8266_v28 = vor.u32 %v8265_v49, %v8261_v4  ;;  %v8271_v63 = vrot.slane %v8269_v2, 5  ;;  %v8864_v61 = vrot.slane %v16973_v7, 5  ;;  %v17030_v49 = vld [vmem:[#allocation3 + $0xbc] sm:$0x1] }
 0x3e5   : > { %v8274_v42 = vshrl.u32 %v8015_v13, 16  ;;  %v8257_v11 = vrot.slane %v8256_v58, 4  ;;  %v8277_v39 = vshll.u32 %v8015_v13, 16  ;;  %v8283_v54 = vshll.u32 %v16891_v31, 16  ;;  %v8021_v13 = vld [vmem:[#allocation3 + $0x9c] sm:$0xf] }
 0x3e6   : > { %v8267_v1 = vrot.slane %v8266_v28, 4  ;;  %v8862_v41 = vsel %vm13455_vm9, %v11792_v40, %v8861_v20  ;;  %v8863_v9 = vrot.slane %v8861_v20, 4  ;;  %v8287_v6 = vshrl.u32 %v16891_v31, 16 }
 0x3e7   : > { %12866 = vmatmul.mubr.msk.bf16.gmra.mxu0 %vm1002_vm5, %v11806_v5  ;;  %v8276_v34 = vrot.slane %v8274_v42, 4  ;;  %v8262_v26 = vsel %vm13278_vm6, %v8257_v11, %v8261_v4  ;;  %v8279_v50 = vrot.slane %v8277_v39, 5  ;;  %v8285_v35 = vrot.slane %v8283_v54, 5  ;;  %v8018_v5 = vld [vmem:[#allocation3 + $0x90] sm:$0xf] }
 0x3e8   : > { %12869 = vmatprep.mubr.msk.bf16.mxu0 %vm1002_vm5, %v11807_v23  ;;  %v8272_v0 = vsel %vm13278_vm6, %v8267_v1, %v8271_v63  ;;  %v8865_v48 = vsel %vm13455_vm9, %v8863_v9, %v8864_v61  ;;  %v8289_v31 = vrot.slane %v8287_v6, 4  ;;  %v8293_v55 = vshll.u32 %v16902_v38, 16  ;;  %v17042_v54 = vld [vmem:[#allocation3 + $0xc4] sm:$0xf] }
 0x3e9   : > { %v17008_v19 = vcombine.low %v8262_v26, %v8272_v0  ;;  %v11809_v23 = vcombine.low %v8862_v41, %v8865_v48  ;;  %v8280_v53 = vor.u32 %v8279_v50, %v8276_v34  ;;  %v11793_v46 = vrot.slane %v8724_v60, 9  ;;  %v8726_v41 = vld [vmem:[#allocation3 + $0xc0] sm:$0xe]  ;;  %v17048_v26 = vld [vmem:[#allocation3 + $0xc8] sm:$0x1] }
 0x3ea   : > { %v8868_v52 = vrot.slane %v16992_v18, 5  ;;  %v8290_v17 = vor.u32 %v8289_v31, %v8285_v35  ;;  %v8295_v24 = vrot.slane %v8293_v55, 5  ;;  %v8871_v51 = vrot.slane %v17006_v22, 5 }
 0x3eb   : > { %12824 = vmatmul.mubr.msk.bf16.gmra.mxu1 %vm1002_vm5, %v16882_v14  ;;  %v8298_v21 = vshrl.u32 %v8018_v5, 16  ;;  %v8281_v36 = vrot.slane %v8280_v53, 4  ;;  %v8301_v45 = vshll.u32 %v8018_v5, 16  ;;  %v17021_v14 = vld [vmem:[#allocation3 + $0xb8] sm:$0xf]  ;;  %v8307_v16 = vshll.u32 %v16934_v44, 16 }
 0x3ec   : > { %12827 = vmatprep.mubr.msk.bf16.mxu1 %vm1002_vm5, %v16908_v62  ;;  %v8869_v38 = vsel %vm13455_vm9, %v11793_v46, %v8868_v52  ;;  %v8870_v3 = vrot.slane %v8868_v52, 4  ;;  %v8291_v25 = vrot.slane %v8290_v17, 4  ;;  %v8311_v29 = vshrl.u32 %v16934_v44, 16  ;;  %v8725_v62 = vld [vmem:[#allocation3 + $0xb4] sm:$0xe] }
 0x3ed   : > { %v8300_v33 = vrot.slane %v8298_v21, 4  ;;  %v8286_v59 = vsel %vm13278_vm6, %v8281_v36, %v8285_v35  ;;  %v8303_v8 = vrot.slane %v8301_v45, 5  ;;  %v8317_v4 = vshll.u32 %v16946_v27, 16  ;;  %v8024_v35 = vld [vmem:[#allocation3 + $0xa8] sm:$0xf] }
 0x3ee   : > { %v8872_v57 = vsel %vm13455_vm9, %v8870_v3, %v8871_v51  ;;  %v8296_v37 = vsel %vm13278_vm6, %v8291_v25, %v8295_v24  ;;  %v8309_v44 = vrot.slane %v8307_v16, 5  ;;  %v8313_v2 = vrot.slane %v8311_v29, 4  ;;  %v9540_v16 = vld [vmem:[#allocation3 + $0x18] sm:$0xf] }
 0x3ef   : > { %12870 = vmatmul.mubr.msk.bf16.gmra.mxu0 %vm1002_vm5, %v11808_v15  ;;  %v11810_v56 = vcombine.low %v8869_v38, %v8872_v57  ;;  %v11758_v40 = vcombine.low %v8286_v59, %v8296_v37  ;;  %v8304_v58 = vor.u32 %v8303_v8, %v8300_v33  ;;  %v8319_v28 = vrot.slane %v8317_v4, 5  ;;  %v9541_v8 = vld [vmem:[#allocation3 + $0x1c] sm:$0xf] }
 0x3f0   : > { %12873 = vmatprep.mubr.msk.bf16.mxu0 %vm1002_vm5, %v11809_v23  ;;  %v11794_v63 = vrot.slane %v8725_v62, 9  ;;  %v8314_v20 = vor.u32 %v8313_v2, %v8309_v44  ;;  %v8875_v27 = vrot.slane %v17021_v14, 5  ;;  %v8878_v61 = vrot.slane %v17030_v49, 5 }
 0x3f1   : > { %v8322_v42 = vshrl.u32 %v8021_v13, 16  ;;  %v8305_v15 = vrot.slane %v8304_v58, 4  ;;  %v8325_v11 = vshll.u32 %v8021_v13, 16  ;;  %v8331_v1 = vshll.u32 %v16967_v12, 16 }
 0x3f2   : > { %v8335_v39 = vshrl.u32 %v16967_v12, 16  ;;  %v8315_v9 = vrot.slane %v8314_v20, 4  ;;  %v8876_v34 = vsel %vm13455_vm9, %v11794_v63, %v8875_v27  ;;  %v8877_v6 = vrot.slane %v8875_v27, 4 }
 0x3f3   : > { %12828 = vmatmul.mubr.msk.bf16.gmra.mxu1 %vm1002_vm5, %v16953_v47  ;;  %v8324_v60 = vrot.slane %v8322_v42, 4  ;;  %v8310_v47 = vsel %vm13278_vm6, %v8305_v15, %v8309_v44  ;;  %v8327_v0 = vrot.slane %v8325_v11, 5  ;;  %v8333_v50 = vrot.slane %v8331_v1, 5 }
 0x3f4   : > { %12831 = vmatprep.mubr.msk.bf16.mxu1 %vm1002_vm5, %v16986_v32  ;;  %v8337_v12 = vrot.slane %v8335_v39, 4  ;;  %v8320_v5 = vsel %vm13278_vm6, %v8315_v9, %v8319_v28  ;;  %v8879_v32 = vsel %vm13455_vm9, %v8877_v6, %v8878_v61  ;;  %v8341_v48 = vshll.u32 %v16973_v7, 16  ;;  %v8027_v28 = vld [vmem:[#allocation3 + $0xb4] sm:$0xf] }
 0x3f5   : > { %v11795_v31 = vrot.slane %v8726_v41, 9  ;;  %v11759_v55 = vcombine.low %v8310_v47, %v8320_v5  ;;  %v11811_v23 = vcombine.low %v8876_v34, %v8879_v32  ;;  %v8328_v53 = vor.u32 %v8327_v0, %v8324_v60 }
 0x3f6   : > { %v8338_v46 = vor.u32 %v8337_v12, %v8333_v50  ;;  %v8343_v52 = vrot.slane %v8341_v48, 5  ;;  %v8882_v17 = vrot.slane %v17042_v54, 5  ;;  %v8885_v24 = vrot.slane %v17048_v26, 5 }
 0x3f7   : > { %12874 = vmatmul.mubr.msk.bf16.gmra.mxu0 %vm1002_vm5, %v11810_v56  ;;  %v8346_v51 = vshrl.u32 %v8024_v35, 16  ;;  %v8329_v21 = vrot.slane %v8328_v53, 4  ;;  %v8349_v38 = vshll.u32 %v8024_v35, 16  ;;  %v8355_v7 = vshll.u32 %v16992_v18, 16  ;;  %v17075_v56 = vld [vmem:[#allocation3 + $0x20] sm:$0x1] }
 0x3f8   : > { %12877 = vmatprep.mubr.msk.bf16.mxu0 %vm1002_vm5, %v11811_v23  ;;  %v8339_v36 = vrot.slane %v8338_v46, 4  ;;  %v8883_v3 = vsel %vm13455_vm9, %v11795_v31, %v8882_v17  ;;  %v8884_v45 = vrot.slane %v8882_v17, 4  ;;  %v8359_v33 = vshrl.u32 %v16992_v18, 16  ;;  %v9543_v35 = vld [vmem:[#allocation3 + $0x24] sm:$0xf] }
 0x3f9   : > { %v8348_v25 = vrot.slane %v8346_v51, 4  ;;  %v8334_v29 = vsel %vm13278_vm6, %v8329_v21, %v8333_v50  ;;  %v8351_v59 = vrot.slane %v8349_v38, 5  ;;  %v8357_v57 = vrot.slane %v8355_v7, 5  ;;  %v17086_v23 = vld [vmem:[#allocation3 + $0x28] sm:$0xf] }
 0x3fa   : > { %v8344_v62 = vsel %vm13278_vm6, %v8339_v36, %v8343_v52  ;;  %v8886_v13 = vsel %vm13455_vm9, %v8884_v45, %v8885_v24  ;;  %v8361_v18 = vrot.slane %v8359_v33, 4  ;;  %v8365_v37 = vshll.u32 %v17006_v22, 16  ;;  %v13112_v17 = vld [vmem:[%s18682_s2 + $0xe] sm:$0x3] }
 0x3fb   : > { %12832 = vmatmul.mubr.msk.bf16.gmra.mxu1 %vm1002_vm5, %v17008_v19  ;;  %v11760_v4 = vcombine.low %v8334_v29, %v8344_v62  ;;  %v11812_v19 = vcombine.low %v8883_v3, %v8886_v13  ;;  %v8352_v44 = vor.u32 %v8351_v59, %v8348_v25  ;;  %v9589_v2 = vshrl.u32 %v9540_v16, 16  ;;  %v8030_v25 = vld [vmem:[#allocation3 + $0xc0] sm:$0xf] }
 0x3fc   : > { %12835 = vmatprep.mubr.msk.bf16.mxu1 %vm1002_vm5, %v11758_v40  ;;  %v9592_v58 = vshll.u32 %v9540_v16, 16  ;;  %v8362_v63 = vor.u32 %v8361_v18, %v8357_v57  ;;  %v8367_v20 = vrot.slane %v8365_v37, 5  ;;  %v9598_v27 = vshll.u32 %v9541_v8, 16 }
 0x3fd   : > { %v9602_v61 = vshrl.u32 %v9541_v8, 16  ;;  %v8353_v42 = vrot.slane %v8352_v44, 4  ;;  %v9591_v40 = vrot.slane %v9589_v2, 4  ;;  %v9608_v11 = vshll.u32 %v17075_v56, 16 }
 0x3fe   : > { %v9594_v15 = vrot.slane %v9592_v58, 5  ;;  %v8363_v1 = vrot.slane %v8362_v63, 4  ;;  %v9600_v22 = vrot.slane %v9598_v27, 5  ;;  %v8370_v41 = vshrl.u32 %v8027_v28, 16 }
 0x3ff   : > { %12878 = vmatmul.mubr.msk.bf16.gmra.mxu0 %vm1002_vm5, %v11812_v19  ;;  %v9604_v39 = vrot.slane %v9602_v61, 4  ;;  %v8358_v9 = vsel %vm13278_vm6, %v8353_v42, %v8357_v57  ;;  %v9610_v6 = vrot.slane %v9608_v11, 5  ;;  %v8373_v60 = vshll.u32 %v8027_v28, 16  ;;  %v17117_v11 = vld [vmem:[#allocation3 + $0x34] sm:$0xf] }
 0x400   : > { %v9595_v34 = vor.u32 %v9594_v15, %v9591_v40  ;;  %v8368_v47 = vsel %vm13278_vm6, %v8363_v1, %v8367_v20  ;;  %v8372_v50 = vrot.slane %v8370_v41, 4  ;;  %v8379_v12 = vshll.u32 %v17021_v14, 16  ;;  %v9546_v20 = vld [vmem:[#allocation3 + $0x30] sm:$0xf] }
 0x401   : > { %v9605_v0 = vor.u32 %v9604_v39, %v9600_v22  ;;  %v11761_v5 = vcombine.low %v8358_v9, %v8368_v47  ;;  %v8375_v48 = vrot.slane %v8373_v60, 5  ;;  %v8383_v31 = vshrl.u32 %v17021_v14, 16  ;;  %v17096_v14 = vld [vmem:[#allocation3 + $0x2c] sm:$0x1] }
 0x402   : > { %v9596_v32 = vrot.slane %v9595_v34, 4  ;;  %v8381_v46 = vrot.slane %v8379_v12, 5  ;;  %v8389_v52 = vshll.u32 %v17030_v49, 16  ;;  %v10071_v24 = vsel %vm1051_vm0, %v13112_v17, 0 }
 0x403   : > { %12836 = vmatmul.mubr.msk.bf16.gmra.mxu1 %vm1002_vm5, %v11759_v55  ;;  %v9606_v53 = vrot.slane %v9605_v0, 4  ;;  %v8376_v51 = vor.u32 %v8375_v48, %v8372_v50  ;;  %v8385_v21 = vrot.slane %v8383_v31, 4  ;;  %12916 = vmatpush3.bf16.msra.mxu0 %v10071_v24  ;;  %v9613_v36 = vshrl.u32 %v9543_v35, 16  ;;  %v17100_v49 = vpop.f32.mrf.mxu0 }
 0x404   : > { %12839 = vmatprep.mubr.msk.bf16.mxu1 %vm1002_vm5, %v11760_v4  ;;  %v9601_v55 = vsel %vm13278_vm6, %v9596_v32, %v9600_v22  ;;  %v8391_v7 = vrot.slane %v8389_v52, 5  ;;  %v9616_v3 = vshll.u32 %v9543_v35, 16  ;;  %v9622_v45 = vshll.u32 %v17086_v23, 16 }
 0x405   : > { %v9611_v38 = vsel %vm13278_vm6, %v9606_v53, %v9610_v6  ;;  %v8377_v16 = vrot.slane %v8376_v51, 4  ;;  %v8386_v29 = vor.u32 %v8385_v21, %v8381_v46  ;;  %v9615_v62 = vrot.slane %v9613_v36, 4  ;;  %v17105_v13 = vpop.f32.mrf.mxu0 }
 0x406   : > { %v11863_v33 = vcombine.low %v9601_v55, %v9611_v38  ;;  %v9618_v59 = vrot.slane %v9616_v3, 5  ;;  %v9624_v57 = vrot.slane %v9622_v45, 5  ;;  %v9626_v8 = vshrl.u32 %v17086_v23, 16  ;;  %v17133_v55 = vld [vmem:[#allocation3 + $0x40] sm:$0xf] }
 0x407   : > { %v9632_v4 = vshll.u32 %v17096_v14, 16  ;;  %v8382_v18 = vsel %vm13278_vm6, %v8377_v16, %v8381_v46  ;;  %v8387_v37 = vrot.slane %v8386_v29, 4  ;;  %v8394_v19 = vshrl.u32 %v8030_v25, 16  ;;  %v17111_v27 = vpop.f32.mrf.mxu0  ;;  %v9549_v46 = vld [vmem:[#allocation3 + $0x3c] sm:$0xf] }
 0x408   : > { %12917 = vmatprep.mubr.msk.bf16.mxu0 %vm1002_vm5, %v11863_v33  ;;  %v8397_v44 = vshll.u32 %v8030_v25, 16  ;;  %v9619_v2 = vor.u32 %v9618_v59, %v9615_v62  ;;  %v9628_v58 = vrot.slane %v9626_v8, 4  ;;  %v8403_v63 = vshll.u32 %v17042_v54, 16  ;;  %v17140_v25 = vld [vmem:[#allocation3 + $0x44] sm:$0x1] }
 0x409   : > { %v9634_v28 = vrot.slane %v9632_v4, 5  ;;  %v8392_v61 = vsel %vm13278_vm6, %v8387_v37, %v8391_v7  ;;  %v8396_v42 = vrot.slane %v8394_v19, 4  ;;  %v8407_v15 = vshrl.u32 %v17042_v54, 16  ;;  %v17119_v9 = vpop.f32.mrf.mxu0  ;;  %v17125_v54 = vld [vmem:[#allocation3 + $0x38] sm:$0x1] }
 0x40a   : > { %v8399_v40 = vrot.slane %v8397_v44, 5  ;;  %v11762_v1 = vcombine.low %v8382_v18, %v8392_v61  ;;  %v9620_v22 = vrot.slane %v9619_v2, 4  ;;  %v9629_v39 = vor.u32 %v9628_v58, %v9624_v57  ;;  %v9552_v4 = vld [vmem:[#allocation3 + $0x48] sm:$0xf]  ;;  %v13090_v44 = vld [vmem:[#allocation3 + $0x18] sm:$0xff]  }
 0x40b   : > { %12840 = vmatmul.mubr.msk.bf16.gmra.mxu1 %vm1002_vm5, %v11761_v5  ;;  %v8405_v41 = vrot.slane %v8403_v63, 5  ;;  %v8409_v6 = vrot.slane %v8407_v15, 4  ;;  %v8413_v60 = vshll.u32 %v17048_v26, 16  ;;  %v9637_v47 = vshrl.u32 %v9546_v20, 16  ;;  %v17128_v5 = vpop.f32.mrf.mxu0 }
 0x40c   : > { %v8400_v34 = vor.u32 %v8399_v40, %v8396_v42  ;;  %12843 = vmatprep.mubr.msk.bf16.mxu1 %vm1002_vm5, %v11762_v1  ;;  %v9625_v0 = vsel %vm13278_vm6, %v9620_v22, %v9624_v57  ;;  %v9630_v50 = vrot.slane %v9629_v39, 4  ;;  %v9640_v12 = vshll.u32 %v9546_v20, 16  ;;  %v17152_v40 = vld [vmem:[#allocation3 + $0x4c] sm:$0xf] }
 0x40d   : > { %v9646_v35 = vshll.u32 %v17117_v11, 16  ;;  %v8410_v48 = vor.u32 %v8409_v6, %v8405_v41  ;;  %v8415_v31 = vrot.slane %v8413_v60, 5  ;;  %v9639_v53 = vrot.slane %v9637_v47, 4  ;;  %v17135_v51 = vpop.f32.mrf.mxu0  ;;  %v17163_v47 = vld [vmem:[#allocation3 + $0x50] sm:$0x1] }
 0x40e   : > { %v8401_v32 = vrot.slane %v8400_v34, 4  ;;  %v9635_v26 = vsel %vm13278_vm6, %v9630_v50, %v9634_v28  ;;  %v9642_v52 = vrot.slane %v9640_v12, 5  ;;  %v9650_v24 = vshrl.u32 %v17117_v11, 16 }
 0x40f   : > { %v9648_v17 = vrot.slane %v9646_v35, 5  ;;  %v11864_v21 = vcombine.low %v9625_v0, %v9635_v26  ;;  %v8411_v38 = vrot.slane %v8410_v48, 4  ;;  %v9656_v7 = vshll.u32 %v17125_v54, 16  ;;  %v17142_v29 = vpop.f32.mrf.mxu0 }
 0x410   : > { %v8406_v36 = vsel %vm13278_vm6, %v8401_v32, %v8405_v41  ;;  %v9643_v3 = vor.u32 %v9642_v52, %v9639_v53  ;;  %v9652_v45 = vrot.slane %v9650_v24, 4  ;;  %v9661_v33 = vshrl.u32 %v9549_v46, 16 }
 0x411   : > { %v9664_v16 = vshll.u32 %v9549_v46, 16  ;;  %12918 = vmatmul.mubr.msk.bf16.vlgmr.msra.gmra.mxu0 %vm1002_vm5, %v11864_v21  ;;  %v8416_v62 = vsel %vm13278_vm6, %v8411_v38, %v8415_v31  ;;  %v9658_v59 = vrot.slane %v9656_v7, 5  ;;  %v9670_v57 = vshll.u32 %v17133_v55, 16  ;;  %v17149_v58 = vpop.f32.mrf.mxu0  ;;  %v9555_v38 = vld [vmem:[#allocation3 + $0x54] sm:$0xf] }
 0x412   : > { %v9674_v8 = vshrl.u32 %v17133_v55, 16  ;;  %v11763_v18 = vcombine.low %v8406_v36, %v8416_v62  ;;  %v9644_v37 = vrot.slane %v9643_v3, 4  ;;  %v9653_v19 = vor.u32 %v9652_v45, %v9648_v17 }
 0x413   : > { %v9663_v2 = vrot.slane %v9661_v33, 4  ;;  %v9666_v28 = vrot.slane %v9664_v16, 5  ;;  %v9672_v63 = vrot.slane %v9670_v57, 5  ;;  %v9680_v61 = vshll.u32 %v17140_v25, 16  ;;  %v17160_v41 = vpop.f32.mrf.mxu0  ;;  %v17186_v57 = vld [vmem:[#allocation3 + $0x5c] sm:$0x1] }
 0x414   : > { %v9676_v20 = vrot.slane %v9674_v8, 4  ;;  %v12681_v42 = vpop.f32.mrf.mxu1  ;;  %12844 = vmatmul.mubr.msk.bf16.gmra.mxu1 %vm1002_vm5, %v11763_v18  ;;  %v9649_v15 = vsel %vm13278_vm6, %v9644_v37, %v9648_v17  ;;  %v9654_v1 = vrot.slane %v9653_v19, 4  ;;  %v9685_v39 = vshrl.u32 %v9552_v4, 16  ;;  %v13091_v8 = vld [vmem:[#allocation3 + $0x24] sm:$0xff]   ;;  %v9558_v19 = vld [vmem:[#allocation3 + $0x60] sm:$0xf] }
 0x415   : > { %v17158_v22 = vadd.f32 %v17100_v49, %v12681_v42  ;;  %12883 = vmatprep.mubr.msk.bf16.mxu1 %vm1002_vm5, %v13090_v44  ;;  %v9667_v34 = vor.u32 %v9666_v28, %v9663_v2  ;;  %v9682_v60 = vrot.slane %v9680_v61, 5  ;;  %v9688_v0 = vshll.u32 %v9552_v4, 16  ;;  %v17169_v48 = vpop.f32.mrf.mxu0  ;;  %v13092_v28 = vld [vmem:[#allocation3 + $0x30] sm:$0xff]  }
 0x416   : > { %v9677_v6 = vor.u32 %v9676_v20, %v9672_v63  ;;  %v6754_v50 = vpop.f32.mrf.mxu1  ;;  %v9659_v12 = vsel %vm13278_vm6, %v9654_v1, %v9658_v59  ;;  %v9687_v35 = vrot.slane %v9685_v39, 4  ;;  %v9694_v32 = vshll.u32 %v17152_v40, 16  ;;  %v17184_v59 = vld [vmem:[#allocation3 + $0x58] sm:$0xf]  ;;  %v17201_v1 = vld [vmem:[#allocation3 + $0x64] sm:$0xf] }
 0x417   : > { %v9698_v49 = vshrl.u32 %v17152_v40, 16  ;;  %v11865_v31 = vcombine.low %v9649_v15, %v9659_v12  ;;  %v9668_v53 = vrot.slane %v9667_v34, 4  ;;  %v9690_v26 = vrot.slane %v9688_v0, 5  ;;  %v17174_v7 = vpop.f32.mrf.mxu0  ;;  %v17208_v0 = vld [vmem:[#allocation3 + $0x68] sm:$0x1] }
 0x418   : > { %v9678_v46 = vrot.slane %v9677_v6, 4  ;;  %v12682_v52 = vpop.f32.mrf.mxu1  ;;  %v9696_v17 = vrot.slane %v9694_v32, 5  ;;  %v9704_v21 = vshll.u32 %v17163_v47, 16  ;;  %v10541_v36 = vsel %vm1051_vm0, %v16926_v43, 0 }
 0x419   : > { %v9700_v24 = vrot.slane %v9698_v49, 4  ;;  %12921 = vmatprep.mubr.msk.bf16.mxu0 %vm1002_vm5, %v11865_v31  ;;  %v9673_v3 = vsel %vm13278_vm6, %v9668_v53, %v9672_v63  ;;  %v9691_v33 = vor.u32 %v9690_v26, %v9687_v35  ;;  %v17182_v16 = vadd.f32 %v17105_v13, %v6754_v50  ;;  %v17191_v44 = vpop.f32.mrf.mxu0  ;;  %v9561_v31 = vld [vmem:[#allocation3 + $0x6c] sm:$0xf] }
 0x41a   : > { %v9683_v45 = vsel %vm13278_vm6, %v9678_v46, %v9682_v60  ;;  %v6757_v62 = vpop.f32.mrf.mxu1  ;;  %v9706_v18 = vrot.slane %v9704_v21, 5  ;;  %v17189_v37 = vadd.f32 %v17111_v27, %v12682_v52  ;;  %v9709_v63 = vshrl.u32 %v9555_v38, 16 }
 0x41b   : > { %v11866_v43 = vcombine.low %v9673_v3, %v9683_v45  ;;  %v9701_v4 = vor.u32 %v9700_v24, %v9696_v17  ;;  %v9692_v2 = vrot.slane %v9691_v33, 4  ;;  %v17194_v13 = vadd.f32 %v17119_v9, %v6757_v62  ;;  %v17203_v39 = vpop.f32.mrf.mxu0  ;;  %v13093_v62 = vld [vmem:[#allocation3 + $0x3c] sm:$0xff]  }
 0x41c   : > { %v9712_v20 = vshll.u32 %v9555_v38, 16  ;;  %12884 = vmatmul.mubr.msk.bf16.vlgmr.msra.gmra.mxu1 %vm1002_vm5, %v13091_v8  ;;  %v9718_v42 = vshll.u32 %v17184_v59, 16  ;;  %v9722_v27 = vshrl.u32 %v17184_v59, 16  ;;  %v9728_v15 = vshll.u32 %v17186_v57, 16 }
 0x41d   : > { %12922 = vmatmul.mubr.msk.bf16.gmra.mxu0 %vm1002_vm5, %v11866_v43  ;;  %v9702_v61 = vrot.slane %v9701_v4, 4  ;;  %v9697_v9 = vsel %vm13278_vm6, %v9692_v2, %v9696_v17  ;;  %12950 = vmatpush3.bf16.msra.mxu1 %v10541_v36  ;;  %v9711_v34 = vrot.slane %v9709_v63, 4  ;;  %v12685_v60 = vpop.f32.mrf.mxu1  ;;  %v9733_v50 = vshrl.u32 %v9558_v19, 16  ;;  %v17212_v53 = vpop.f32.mrf.mxu0  ;;  %v17226_v63 = vld [vmem:[#allocation3 + $0x70] sm:$0xf] }
 0x41e   : > { %12887 = vmatprep.mubr.msk.bf16.mxu1 %vm1002_vm5, %v13092_v28  ;;  %v9714_v6 = vrot.slane %v9712_v20, 5  ;;  %v9720_v35 = vrot.slane %v9718_v42, 5  ;;  %v9724_v32 = vrot.slane %v9722_v27, 4  ;;  %v9730_v49 = vrot.slane %v9728_v15, 5  ;;  %v13094_v27 = vld [vmem:[#allocation3 + $0x48] sm:$0xff]  }
 0x41f   : > { %v9707_v12 = vsel %vm13278_vm6, %v9702_v61, %v9706_v18  ;;  %v17215_v52 = vadd.f32 %v17128_v5, %v12685_v60  ;;  %v9735_v17 = vrot.slane %v9733_v50, 4  ;;  %v6770_v24 = vpop.f32.mrf.mxu1  ;;  %v9736_v36 = vshll.u32 %v9558_v19, 16  ;;  %v17219_v45 = vpop.f32.mrf.mxu0 }
 0x420   : > { %v11867_v46 = vcombine.low %v9697_v9, %v9707_v12  ;;  %v9715_v26 = vor.u32 %v9714_v6, %v9711_v34  ;;  %v9725_v21 = vor.u32 %v9724_v32, %v9720_v35  ;;  %v9742_v38 = vshll.u32 %v17201_v1, 16  ;;  %v17235_v9 = vld [vmem:[#allocation3 + $0x74] sm:$0x1] }
 0x421   : > { %v9746_v3 = vshrl.u32 %v17201_v1, 16  ;;  %v9752_v43 = vshll.u32 %v17208_v0, 16  ;;  %v17224_v8 = vadd.f32 %v17135_v51, %v6770_v24  ;;  %v12686_v5 = vpop.f32.mrf.mxu1  ;;  %v9757_v4 = vshrl.u32 %v9561_v31, 16  ;;  %v17228_v20 = vpop.f32.mrf.mxu0 }
 0x422   : > { %12925 = vmatprep.mubr.msk.bf16.mxu0 %vm1002_vm5, %v11867_v46  ;;  %v9716_v33 = vrot.slane %v9715_v26, 4  ;;  %v9726_v18 = vrot.slane %v9725_v21, 4  ;;  %v9738_v2 = vrot.slane %v9736_v36, 5  ;;  %v9744_v19 = vrot.slane %v9742_v38, 5 }
 0x423   : > { %18893 = vst [vmem:[#allocation26_spill] sm:$0xff] %v17224_v8  ;;  %v9748_v28 = vrot.slane %v9746_v3, 4  ;;  %v9754_v42 = vrot.slane %v9752_v43, 5  ;;  %v17233_v15 = vadd.f32 %v17142_v29, %v12686_v5  ;;  %v6773_v51 = vpop.f32.mrf.mxu1  ;;  %v9759_v34 = vrot.slane %v9757_v4, 4  ;;  %v17257_v43 = vld [vmem:[#allocation3 + $0x80] sm:$0x1] }
 0x424   : > { %v9721_v61 = vsel %vm13278_vm6, %v9716_v33, %v9720_v35  ;;  %v9731_v6 = vsel %vm13278_vm6, %v9726_v18, %v9730_v49  ;;  %12888 = vmatmul.mubr.msk.bf16.gmra.mxu1 %vm1002_vm5, %v13093_v62  ;;  %v9739_v60 = vor.u32 %v9738_v2, %v9735_v17  ;;  %v17241_v12 = vadd.f32 %v17149_v58, %v6773_v51  ;;  %v9564_v35 = vld [vmem:[#allocation3 + $0x78] sm:$0xf]  ;;  %v17243_v32 = vpop.f32.mrf.mxu0  ;;  %v17252_v58 = vld [vmem:[#allocation3 + $0x7c] sm:$0xf] }
 0x425   : > { %18894 = vst [vmem:[#allocation20_spill] sm:$0xff] %v17233_v15  ;;  %v9749_v50 = vor.u32 %v9748_v28, %v9744_v19  ;;  %v11868_v46 = vcombine.low %v9721_v61, %v9731_v6  ;;  %12891 = vmatprep.mubr.msk.bf16.mxu1 %vm1002_vm5, %v13094_v27  ;;  %v9760_v29 = vshll.u32 %v9561_v31, 16  ;;  %v9766_v26 = vshll.u32 %v17226_v63, 16  ;;  %v12689_v21 = vpop.f32.mrf.mxu1 }
 0x426   : > { %18895 = vst [vmem:[#allocation27_spill] sm:$0xff] %v17241_v12  ;;  %v9770_v24 = vshrl.u32 %v17226_v63, 16  ;;  %v9740_v49 = vrot.slane %v9739_v60, 4  ;;  %v9776_v17 = vshll.u32 %v17235_v9, 16  ;;  %v17250_v38 = vadd.f32 %v17160_v41, %v12689_v21  ;;  %v17254_v3 = vpop.f32.mrf.mxu0  ;;  %v13095_v60 = vld [vmem:[#allocation3 + $0x54] sm:$0xff]   ;;  %v13097_v12 = vld [vmem:[#allocation3 + $0x6c] sm:$0xff]  }
 0x427   : > { %v9750_v36 = vrot.slane %v9749_v50, 4  ;;  %12926 = vmatmul.mubr.msk.bf16.gmra.mxu0 %vm1002_vm5, %v11868_v46  ;;  %v9762_v33 = vrot.slane %v9760_v29, 5  ;;  %v9768_v31 = vrot.slane %v9766_v26, 5  ;;  %v9781_v5 = vshrl.u32 %v9564_v35, 16  ;;  %v6786_v4 = vpop.f32.mrf.mxu1  ;;  %v9567_v21 = vld [vmem:[#allocation3 + $0x84] sm:$0xf] }
 0x428   : > { %18896 = vst [vmem:[#allocation11_spill] sm:$0xff] %v17250_v38  ;;  %v9772_v62 = vrot.slane %v9770_v24, 4  ;;  %v9745_v18 = vsel %vm13278_vm6, %v9740_v49, %v9744_v19  ;;  %v9778_v2 = vrot.slane %v9776_v17, 5  ;;  %v9784_v28 = vshll.u32 %v9564_v35, 16  ;;  %v17263_v61 = vpop.f32.mrf.mxu0  ;;  %v17280_v38 = vld [vmem:[#allocation3 + $0x8c] sm:$0x1] }
 0x429   : > { %v9755_v41 = vsel %vm13278_vm6, %v9750_v36, %v9754_v42  ;;  %v9763_v51 = vor.u32 %v9762_v33, %v9759_v34  ;;  %v9783_v50 = vrot.slane %v9781_v5, 4  ;;  %v12690_v46 = vpop.f32.mrf.mxu1  ;;  %v9790_v26 = vshll.u32 %v17252_v58, 16  ;;  %v13096_v36 = vld [vmem:[#allocation3 + $0x60] sm:$0xff]   ;;  %18899 = vst [vmem:[#allocation37_spill] sm:$0xff] %v17280_v38 }
 0x42a   : > { %v11869_v27 = vcombine.low %v9745_v18, %v9755_v41  ;;  %v9773_v6 = vor.u32 %v9772_v62, %v9768_v31  ;;  %v9786_v29 = vrot.slane %v9784_v28, 5  ;;  %v9794_v24 = vshrl.u32 %v17252_v58, 16  ;;  %v17268_v49 = vpop.f32.mrf.mxu0  ;;  %v17277_v62 = vld [vmem:[#allocation3 + $0x88] sm:$0xf] }
 0x42b   : > { %v9800_v19 = vshll.u32 %v17257_v43, 16  ;;  %v9764_v42 = vrot.slane %v9763_v51, 4  ;;  %v17272_v34 = vadd.f32 %v17169_v48, %v6786_v4  ;;  %v17275_v17 = vadd.f32 %v17174_v7, %v12690_v46  ;;  %v6789_v33 = vpop.f32.mrf.mxu1 }
 0x42c   : > { %12929 = vmatprep.mubr.msk.bf16.mxu0 %vm1002_vm5, %v11869_v27  ;;  %v9774_v35 = vrot.slane %v9773_v6, 4  ;;  %12892 = vmatmul.mubr.msk.bf16.gmra.mxu1 %vm1002_vm5, %v13095_v60  ;;  %v9787_v5 = vor.u32 %v9786_v29, %v9783_v50  ;;  %v9792_v18 = vrot.slane %v9790_v26, 5  ;;  %v9796_v41 = vrot.slane %v9794_v24, 4  ;;  %v9570_v29 = vld [vmem:[#allocation3 + $0x90] sm:$0xf] }
 0x42d   : > { %18897 = vst [vmem:[#allocation9_spill] sm:$0xff] %v17272_v34  ;;  %18898 = vst [vmem:[#allocation7_spill] sm:$0xff] %v17275_v17  ;;  %v9802_v28 = vrot.slane %v9800_v19, 5  ;;  %v17282_v27 = vpop.f32.mrf.mxu0  ;;  %v9769_v48 = vsel %vm13278_vm6, %v9764_v42, %v9768_v31  ;;  %12895 = vmatprep.mubr.msk.bf16.mxu1 %vm1002_vm5, %v13096_v36  ;;  %v17290_v4 = vadd.f32 %v17191_v44, %v6789_v33  ;;  %v9805_v51 = vshrl.u32 %v9567_v21, 16 }
 0x42e   : > { %v9779_v7 = vsel %vm13278_vm6, %v9774_v35, %v9778_v2  ;;  %v9788_v60 = vrot.slane %v9787_v5, 4  ;;  %v9797_v50 = vor.u32 %v9796_v41, %v9792_v18  ;;  %v9808_v46 = vshll.u32 %v9567_v21, 16  ;;  %v17297_v35 = vld [vmem:[#allocation3 + $0x94] sm:$0xf] }
 0x42f   : > { %18900 = vst [vmem:[#allocation41_spill] sm:$0xff] %v17290_v4  ;;  %v11870_v6 = vcombine.low %v9769_v48, %v9779_v7  ;;  %v17292_v26 = vpop.f32.mrf.mxu0  ;;  %v9807_v24 = vrot.slane %v9805_v51, 4  ;;  %v9814_v19 = vshll.u32 %v17277_v62, 16  ;;  %v9818_v31 = vshrl.u32 %v17277_v62, 16  ;;  %v12693_v42 = vpop.f32.mrf.mxu1  ;;  %18901 = vst [vmem:[#allocation10_spill] sm:$0xff] %v17297_v35 }
 0x430   : > { %v9824_v2 = vshll.u32 %v17280_v38, 16  ;;  %v9793_v44 = vsel %vm13278_vm6, %v9788_v60, %v9792_v18  ;;  %v9798_v36 = vrot.slane %v9797_v50, 4  ;;  %v9810_v21 = vrot.slane %v9808_v46, 5  ;;  %v17307_v51 = vld [vmem:[#allocation3 + $0x98] sm:$0x1] }
 0x431   : > { %12930 = vmatmul.mubr.msk.bf16.gmra.mxu0 %vm1002_vm5, %v11870_v6  ;;  %v17303_v33 = vadd.f32 %v17203_v39, %v12693_v42  ;;  %v17305_v5 = vpop.f32.mrf.mxu0  ;;  %v9816_v41 = vrot.slane %v9814_v19, 5  ;;  %v9820_v48 = vrot.slane %v9818_v31, 4  ;;  %18903 = vst [vmem:[#allocation6_spill] sm:$0xff] %v17307_v51  ;;  %v9829_v4 = vshrl.u32 %v9570_v29, 16  ;;  %v6802_v17 = vpop.f32.mrf.mxu1  ;;  %v13098_v31 = vld [vmem:[#allocation3 + $0x78] sm:$0xff]  }
 0x432   : > { %v9826_v7 = vrot.slane %v9824_v2, 5  ;;  %v9803_v6 = vsel %vm13278_vm6, %v9798_v36, %v9802_v28  ;;  %v9811_v34 = vor.u32 %v9810_v21, %v9807_v24  ;;  %v9832_v18 = vshll.u32 %v9570_v29, 16  ;;  %v9573_v24 = vld [vmem:[#allocation3 + $0x9c] sm:$0xf]  ;;  %v17325_v21 = vld [vmem:[#allocation3 + $0xa0] sm:$0xf] }
 0x433   : > { %18902 = vst [vmem:[#allocation38_spill] sm:$0xff] %v17303_v33  ;;  %v9838_v60 = vshll.u32 %v17297_v35, 16  ;;  %v17312_v50 = vpop.f32.mrf.mxu0  ;;  %v11871_v39 = vcombine.low %v9793_v44, %v9803_v6  ;;  %v9821_v46 = vor.u32 %v9820_v48, %v9816_v41  ;;  %v9831_v42 = vrot.slane %v9829_v4, 4  ;;  %v12694_v2 = vpop.f32.mrf.mxu1  ;;  %18906 = vst [vmem:[#allocation28_spill] sm:$0xff] %v17325_v21 }
 0x434   : > { %v9842_v19 = vshrl.u32 %v17297_v35, 16  ;;  %v9812_v33 = vrot.slane %v9811_v34, 4  ;;  %12896 = vmatmul.mubr.msk.bf16.gmra.mxu1 %vm1002_vm5, %v13097_v12  ;;  %v9834_v15 = vrot.slane %v9832_v18, 5  ;;  %v9848_v28 = vshll.u32 %v17307_v51, 16 }
 0x435   : > { %v9840_v8 = vrot.slane %v9838_v60, 5  ;;  %12933 = vmatprep.mubr.msk.bf16.mxu0 %vm1002_vm5, %v11871_v39  ;;  %v9822_v29 = vrot.slane %v9821_v46, 4  ;;  %12899 = vmatprep.mubr.msk.bf16.mxu1 %vm1002_vm5, %v13098_v31  ;;  %v17320_v4 = vadd.f32 %v17212_v53, %v6802_v17  ;;  %v17323_v44 = vadd.f32 %v17219_v45, %v12694_v2  ;;  %v6805_v34 = vpop.f32.mrf.mxu1  ;;  %v17332_v60 = vld [vmem:[#allocation3 + $0xa4] sm:$0x1] }
 0x436   : > { %v9844_v36 = vrot.slane %v9842_v19, 4  ;;  %v9817_v12 = vsel %vm13278_vm6, %v9812_v33, %v9816_v41  ;;  %v9835_v48 = vor.u32 %v9834_v15, %v9831_v42  ;;  %v9850_v6 = vrot.slane %v9848_v28, 5  ;;  %18908 = vst [vmem:[#allocation24_spill] sm:$0xff] %v17332_v60  ;;  %v17334_v39 = vpop.f32.mrf.mxu0  ;;  %v9576_v41 = vld [vmem:[#allocation3 + $0xa8] sm:$0xf] }
 0x437   : > { %18904 = vst [vmem:[#allocation43_spill] sm:$0xff] %v17320_v4  ;;  %18905 = vst [vmem:[#allocation31_spill] sm:$0xff] %v17323_v44  ;;  %v17330_v18 = vadd.f32 %v17228_v20, %v6805_v34  ;;  %v9827_v53 = vsel %vm13278_vm6, %v9822_v29, %v9826_v7  ;;  %v9853_v17 = vshrl.u32 %v9573_v24, 16  ;;  %v9856_v46 = vshll.u32 %v9573_v24, 16  ;;  %v12697_v19 = vpop.f32.mrf.mxu1  ;;  %v17343_v44 = vld [vmem:[#allocation3 + $0xac] sm:$0xf] }
 0x438   : > { %v9845_v45 = vor.u32 %v9844_v36, %v9840_v8  ;;  %v11872_v31 = vcombine.low %v9817_v12, %v9827_v53  ;;  %v9836_v2 = vrot.slane %v9835_v48, 4  ;;  %v9862_v33 = vshll.u32 %v17325_v21, 16  ;;  %v17340_v20 = vpop.f32.mrf.mxu0  ;;  %18909 = vst [vmem:[#allocation21_spill] sm:$0xff] %v17343_v44  ;;  %v13099_v48 = vld [vmem:[#allocation3 + $0x84] sm:$0xff]   ;;  %v17351_v53 = vld [vmem:[#allocation3 + $0xb0] sm:$0x1] }
 0x439   : > { %18907 = vst [vmem:[#allocation22_spill] sm:$0xff] %v17330_v18  ;;  %v9866_v15 = vshrl.u32 %v17325_v21, 16  ;;  %v9855_v28 = vrot.slane %v9853_v17, 4  ;;  %v9858_v34 = vrot.slane %v9856_v46, 5  ;;  %v9872_v18 = vshll.u32 %v17332_v60, 16  ;;  %v6818_v7 = vpop.f32.mrf.mxu1  ;;  %18911 = vst [vmem:[#allocation40_spill] sm:$0xff] %v17351_v53 }
 0x43a   : > { %v9846_v42 = vrot.slane %v9845_v45, 4  ;;  %12934 = vmatmul.mubr.msk.bf16.gmra.mxu0 %vm1002_vm5, %v11872_v31  ;;  %v9841_v24 = vsel %vm13278_vm6, %v9836_v2, %v9840_v8  ;;  %v9864_v29 = vrot.slane %v9862_v33, 5  ;;  %v17349_v12 = vadd.f32 %v17243_v32, %v12697_v19  ;;  %v17353_v45 = vpop.f32.mrf.mxu0  ;;  %v13100_v31 = vld [vmem:[#allocation3 + $0x90] sm:$0xff]  }
 0x43b   : > { %v9868_v36 = vrot.slane %v9866_v15, 4  ;;  %v9859_v46 = vor.u32 %v9858_v34, %v9855_v28  ;;  %v9874_v4 = vrot.slane %v9872_v18, 5  ;;  %v9877_v60 = vshrl.u32 %v9576_v41, 16  ;;  %v12698_v21 = vpop.f32.mrf.mxu1 }
 0x43c   : > { %18910 = vst [vmem:[#allocation18_spill] sm:$0xff] %v17349_v12  ;;  %v9851_v17 = vsel %vm13278_vm6, %v9846_v42, %v9850_v6  ;;  %12900 = vmatmul.mubr.msk.bf16.gmra.mxu1 %vm1002_vm5, %v13099_v48  ;;  %v9880_v2 = vshll.u32 %v9576_v41, 16  ;;  %v9886_v32 = vshll.u32 %v17343_v44, 16  ;;  %v17359_v19 = vpop.f32.mrf.mxu0  ;;  %v9890_v12 = vshrl.u32 %v17343_v44, 16  ;;  %v9579_v42 = vld [vmem:[#allocation3 + $0xb4] sm:$0xf] }
 0x43d   : > { %v11873_v51 = vcombine.low %v9841_v24, %v9851_v17  ;;  %v9869_v8 = vor.u32 %v9868_v36, %v9864_v29  ;;  %v9860_v33 = vrot.slane %v9859_v46, 4  ;;  %v9879_v15 = vrot.slane %v9877_v60, 4  ;;  %12903 = vmatprep.mubr.msk.bf16.mxu1 %vm1002_vm5, %v13100_v31  ;;  %v6821_v18 = vpop.f32.mrf.mxu1  ;;  %v17368_v36 = vld [vmem:[#allocation3 + $0xb8] sm:$0xf]  ;;  %v17400_v44 = vld [vmem:[#allocation3 + $0xc8] sm:$0x1] }
 0x43e   : > { %v9896_v6 = vshll.u32 %v17351_v53, 16  ;;  %v9882_v34 = vrot.slane %v9880_v2, 5  ;;  %v9888_v24 = vrot.slane %v9886_v32, 5  ;;  %v17366_v41 = vadd.f32 %v17254_v3, %v6818_v7  ;;  %18913 = vst [vmem:[#allocation12_spill] sm:$0xff] %v17368_v36  ;;  %v17377_v53 = vld [vmem:[#allocation3 + $0xbc] sm:$0x1] }
 0x43f   : > { %12937 = vmatprep.mubr.msk.bf16.mxu0 %vm1002_vm5, %v11873_v51  ;;  %v9870_v28 = vrot.slane %v9869_v8, 4  ;;  %v17370_v48 = vpop.f32.mrf.mxu0  ;;  %v9865_v60 = vsel %vm13278_vm6, %v9860_v33, %v9864_v29  ;;  %v9892_v17 = vrot.slane %v9890_v12, 4  ;;  %v17375_v31 = vadd.f32 %v17263_v61, %v12698_v21  ;;  %18915 = vst [vmem:[#allocation16_spill] sm:$0xff] %v17377_v53  ;;  %v9582_v61 = vld [vmem:[#allocation3 + $0xc0] sm:$0xf]  ;;  %18918 = vst [vmem:[#allocation32_spill] sm:$0xff] %v17400_v44 }
 0x440   : > { %18912 = vst [vmem:[#allocation45_spill] sm:$0xff] %v17366_v41  ;;  %v9898_v46 = vrot.slane %v9896_v6, 5  ;;  %v9883_v8 = vor.u32 %v9882_v34, %v9879_v15  ;;  %v17382_v3 = vadd.f32 %v17268_v49, %v6821_v18  ;;  %v9901_v7 = vshrl.u32 %v9579_v42, 16  ;;  %v17387_v21 = vld [vmem:[#allocation3 + $0xc4] sm:$0xf]  ;;  %v13101_v49 = vld [vmem:[#allocation3 + $0x9c] sm:$0xff]  }
 0x441   : > { %18914 = vst [vmem:[#allocation42_spill] sm:$0xff] %v17375_v31  ;;  %v9875_v51 = vsel %vm13278_vm6, %v9870_v28, %v9874_v4  ;;  %v17384_v2 = vpop.f32.mrf.mxu0  ;;  %v9893_v41 = vor.u32 %v9892_v17, %v9888_v24  ;;  %v9904_v29 = vshll.u32 %v9579_v42, 16  ;;  %v9910_v12 = vshll.u32 %v17368_v36, 16  ;;  %v12701_v33 = vpop.f32.mrf.mxu1  ;;  %v13102_v17 = vld [vmem:[#allocation3 + $0xa8] sm:$0xff]  }
 0x442   : > { %18916 = vst [vmem:[#allocation47_spill] sm:$0xff] %v17382_v3  ;;  %v11874_v32 = vcombine.low %v9865_v60, %v9875_v51  ;;  %v9884_v6 = vrot.slane %v9883_v8, 4  ;;  %v9903_v31 = vrot.slane %v9901_v7, 4  ;;  %v9914_v4 = vshrl.u32 %v17368_v36, 16 }
 0x443   : > { %v9920_v15 = vshll.u32 %v17377_v53, 16  ;;  %v17391_v18 = vpop.f32.mrf.mxu0  ;;  %v9894_v28 = vrot.slane %v9893_v41, 4  ;;  %v9906_v34 = vrot.slane %v9904_v29, 5  ;;  %v9912_v42 = vrot.slane %v9910_v12, 5  ;;  %v6834_v51 = vpop.f32.mrf.mxu1 }
 0x444   : > { %12938 = vmatmul.mubr.msk.bf16.gmra.mxu0 %vm1002_vm5, %v11874_v32  ;;  %v17395_v60 = vadd.f32 %v17282_v27, %v12701_v33  ;;  %v9889_v8 = vsel %vm13278_vm6, %v9884_v6, %v9888_v24  ;;  %v9916_v7 = vrot.slane %v9914_v4, 4  ;;  %12904 = vmatmul.mubr.msk.bf16.gmra.mxu1 %vm1002_vm5, %v13101_v49  ;;  %v9925_v53 = vshrl.u32 %v9582_v61, 16 }
 0x445   : > { %v9922_v3 = vrot.slane %v9920_v15, 5  ;;  %v17402_v36 = vpop.f32.mrf.mxu0  ;;  %v9899_v41 = vsel %vm13278_vm6, %v9894_v28, %v9898_v46  ;;  %v9907_v32 = vor.u32 %v9906_v34, %v9903_v31  ;;  %v9928_v27 = vshll.u32 %v9582_v61, 16  ;;  %12907 = vmatprep.mubr.msk.bf16.mxu1 %vm1002_vm5, %v13102_v17  ;;  %v12702_v12 = vpop.f32.mrf.mxu1  ;;  %v9585_v31 = vld [vmem:[#allocation3 + $0xcc] sm:$0xf]  ;;  %v17419_v17 = vld [vmem:[#allocation3 + $0xd0] sm:$0xf] }
 0x446   : > { %18917 = vst [vmem:[#allocation34_spill] sm:$0xff] %v17395_v60  ;;  %v9934_v29 = vshll.u32 %v17387_v21, 16  ;;  %v11875_v24 = vcombine.low %v9889_v8, %v9899_v41  ;;  %v9917_v33 = vor.u32 %v9916_v7, %v9912_v42  ;;  %v9927_v6 = vrot.slane %v9925_v53, 4 }
 0x447   : > { %v9938_v4 = vshrl.u32 %v17387_v21, 16  ;;  %v17409_v15 = vpop.f32.mrf.mxu0  ;;  %v9908_v49 = vrot.slane %v9907_v32, 4  ;;  %v9930_v60 = vrot.slane %v9928_v27, 5  ;;  %v9944_v38 = vshll.u32 %v17400_v44, 16  ;;  %v6837_v46 = vpop.f32.mrf.mxu1 }
 0x448   : > { %v9936_v35 = vrot.slane %v9934_v29, 5  ;;  %12941 = vmatprep.mubr.msk.bf16.mxu0 %vm1002_vm5, %v11875_v24  ;;  %v9918_v61 = vrot.slane %v9917_v33, 4  ;;  %v17414_v34 = vadd.f32 %v17292_v26, %v6834_v51  ;;  %v17417_v53 = vadd.f32 %v17305_v5, %v12702_v12  ;;  %v17428_v29 = vld [vmem:[#allocation3 + $0xd4] sm:$0x1] }
 0x449   : > { %v9940_v28 = vrot.slane %v9938_v4, 4  ;;  %v17421_v8 = vpop.f32.mrf.mxu0  ;;  %v9913_v7 = vsel %vm13278_vm6, %v9908_v49, %v9912_v42  ;;  %v9931_v41 = vor.u32 %v9930_v60, %v9927_v6  ;;  %v9946_v32 = vrot.slane %v9944_v38, 5  ;;  %v12705_v24 = vpop.f32.mrf.mxu1  ;;  %v13103_v33 = vld [vmem:[#allocation3 + $0xb4] sm:$0xff]  }
 0x44a   : > { %18919 = vst [vmem:[#allocation30_spill] sm:$0xff] %v17414_v34  ;;  %18920 = vst [vmem:[#allocation25_spill] sm:$0xff] %v17417_v53  ;;  %v17426_v27 = vadd.f32 %v17312_v50, %v6837_v46  ;;  %v9923_v26 = vsel %vm13278_vm6, %v9918_v61, %v9922_v3  ;;  %v9949_v51 = vshrl.u32 %v9585_v31, 16  ;;  %v9952_v12 = vshll.u32 %v9585_v31, 16  ;;  %v13104_v50 = vld [vmem:[#allocation3 + $0xc0] sm:$0xff]  }
 0x44b   : > { %v9941_v5 = vor.u32 %v9940_v28, %v9936_v35  ;;  %v17432_v4 = vpop.f32.mrf.mxu0  ;;  %v11876_v53 = vcombine.low %v9913_v7, %v9923_v26  ;;  %v9932_v44 = vrot.slane %v9931_v41, 4  ;;  %v9958_v42 = vshll.u32 %v17419_v17, 16  ;;  %v6850_v60 = vpop.f32.mrf.mxu1  ;;  %v10266_v3 = vld [vmem:[#allocation3 + $0x18] sm:$0xe]  ;;  %v10267_v34 = vld [vmem:[#allocation3 + $0x24] sm:$0xe] }
 0x44c   : > { %18921 = vst [vmem:[#allocation13_spill] sm:$0xff] %v17426_v27  ;;  %v9962_v38 = vshrl.u32 %v17419_v17, 16  ;;  %v9951_v49 = vrot.slane %v9949_v51, 4  ;;  %v9954_v46 = vrot.slane %v9952_v12, 5  ;;  %v9968_v27 = vshll.u32 %v17428_v29, 16  ;;  %12908 = vmatmul.mubr.msk.bf16.gmra.mxu1 %vm1002_vm5, %v13103_v33 }
 0x44d   : > { %v9942_v6 = vrot.slane %v9941_v5, 4  ;;  %v17438_v31 = vpop.f32.mrf.mxu0  ;;  %12942 = vmatmul.mubr.msk.bf16.gmra.mxu0 %vm1002_vm5, %v11876_v53  ;;  %v9937_v61 = vsel %vm13278_vm6, %v9932_v44, %v9936_v35  ;;  %v9960_v28 = vrot.slane %v9958_v42, 5  ;;  %v17444_v41 = vadd.f32 %v17334_v39, %v12705_v24  ;;  %12911 = vmatprep.mubr.msk.bf16.mxu1 %vm1002_vm5, %v13104_v50  ;;  %v12706_v26 = vpop.f32.mrf.mxu1 }
 0x44e   : > { %v9964_v7 = vrot.slane %v9962_v38, 4  ;;  %v9955_v51 = vor.u32 %v9954_v46, %v9951_v49  ;;  %v9970_v12 = vrot.slane %v9968_v27, 5  ;;  %v17450_v33 = vadd.f32 %v17340_v20, %v6850_v60  ;;  %v10268_v60 = vld [vmem:[#allocation3 + $0x30] sm:$0xe] }
 0x44f   : > { %v9947_v5 = vsel %vm13278_vm6, %v9942_v6, %v9946_v32  ;;  %v17452_v53 = vpop.f32.mrf.mxu0  ;;  %v17455_v42 = vadd.f32 %v17353_v45, %v12706_v26  ;;  %v6853_v39 = vpop.f32.mrf.mxu1  ;;  %v11895_v24 = vrot.slane %v10266_v3, 9  ;;  %v13113_v32 = vld [vmem:[#allocation3 + $0x1c] sm:$0xf]  ;;  %v10335_v27 = vrot.slane %v17075_v56, 5  ;;  %v13105_v26 = vld [vmem:[#allocation3 + $0xcc] sm:$0xff]  }
 0x450   : > { %v11877_v35 = vcombine.low %v9937_v61, %v9947_v5  ;;  %v9965_v44 = vor.u32 %v9964_v7, %v9960_v28  ;;  %v9956_v38 = vrot.slane %v9955_v51, 4  ;;  %v17458_v50 = vadd.f32 %v17359_v19, %v6853_v39 }
 0x451   : > { %v10332_v6 = vrot.slane %v13113_v32, 5  ;;  %v17461_v20 = vpop.f32.mrf.mxu0  ;;  %v12709_v46 = vpop.f32.mrf.mxu1  ;;  %v11896_v61 = vrot.slane %v10267_v34, 9  ;;  %v10339_v45 = vrot.slane %v17086_v23, 5  ;;  %v10342_v3 = vrot.slane %v17096_v14, 5 }
 0x452   : > { %12945 = vmatprep.mubr.msk.bf16.mxu0 %vm1002_vm5, %v11877_v35  ;;  %v9966_v49 = vrot.slane %v9965_v44, 4  ;;  %v9961_v19 = vsel %vm13278_vm6, %v9956_v38, %v9960_v28  ;;  %v17469_v7 = vadd.f32 %v17370_v48, %v12709_v46  ;;  %v10269_v35 = vld [vmem:[#allocation3 + $0x3c] sm:$0xe]  ;;  %v11897_v28 = vrot.slane %v10268_v60, 9 }
 0x453   : > { %v10333_v56 = vsel %vm13455_vm9, %v11895_v24, %v10332_v6  ;;  %v10334_v5 = vrot.slane %v10332_v6, 4  ;;  %v17473_v51 = vpop.f32.mrf.mxu0  ;;  %v6866_v23 = vpop.f32.mrf.mxu1  ;;  %v10340_v14 = vsel %vm13455_vm9, %v11896_v61, %v10339_v45  ;;  %v10341_v44 = vrot.slane %v10339_v45, 4  ;;  %v10271_v61 = vld [vmem:[#allocation3 + $0x54] sm:$0xe] }
 0x454   : > { %18922 = vst [vmem:[#allocation17_spill] sm:$0xff] %v17469_v7  ;;  %v9971_v34 = vsel %vm13278_vm6, %v9966_v49, %v9970_v12  ;;  %12912 = vmatmul.mubr.msk.bf16.gmra.mxu1 %vm1002_vm5, %v13105_v26  ;;  %v17483_v24 = vadd.f32 %v17384_v2, %v6866_v23  ;;  %v10346_v38 = vrot.slane %v17117_v11, 5  ;;  %v10349_v60 = vrot.slane %v17125_v54, 5 }
 0x455   : > { %v11878_v39 = vcombine.low %v9961_v19, %v9971_v34  ;;  %v10336_v48 = vsel %vm13455_vm9, %v10334_v5, %v10335_v27  ;;  %v17486_v32 = vpop.f32.mrf.mxu0  ;;  %v12710_v6 = vpop.f32.mrf.mxu1  ;;  %v10343_v49 = vsel %vm13455_vm9, %v10341_v44, %v10342_v3  ;;  %v11898_v46 = vrot.slane %v10269_v35, 9  ;;  %v10272_v44 = vld [vmem:[#allocation3 + $0x60] sm:$0xe] }
 0x456   : > { %18923 = vst [vmem:[#allocation44_spill] sm:$0xff] %v17483_v24  ;;  %v11912_v12 = vcombine.low %v10333_v56, %v10336_v48  ;;  %v17493_v27 = vadd.f32 %v17391_v18, %v12710_v6  ;;  %v11913_v2 = vcombine.low %v10340_v14, %v10343_v49  ;;  %v10347_v11 = vsel %vm13455_vm9, %v11897_v28, %v10346_v38 }
 0x457   : > { %12946 = vmatmul.mubr.msk.bf16.gmra.mxu0 %vm1002_vm5, %v11878_v39  ;;  %v10348_v45 = vrot.slane %v10346_v38, 4  ;;  %v17497_v19 = vpop.f32.mrf.mxu0  ;;  %v6869_v26 = vpop.f32.mrf.mxu1  ;;  %v10353_v3 = vrot.slane %v17133_v55, 5  ;;  %v10356_v54 = vrot.slane %v17140_v25, 5  ;;  %v11899_v56 = vrot.slane %v10270_v10, 9 }
 0x458   : > { %18924 = vst [vmem:[#allocation49_spill] sm:$0xff] %v17493_v27  ;;  %12951 = vmatprep.mubr.msk.bf16.mxu1 %vm1002_vm5, %v11912_v12  ;;  %v10360_v5 = vrot.slane %v17152_v40, 5  ;;  %v17504_v18 = vadd.f32 %v17402_v36, %v6869_v26  ;;  %v10363_v23 = vrot.slane %v17163_v47, 5  ;;  %v11900_v14 = vrot.slane %v10271_v61, 9  ;;  %v10273_v61 = vld [vmem:[#allocation3 + $0x6c] sm:$0xe] }
 0x459   : > { %v10350_v35 = vsel %vm13455_vm9, %v10348_v45, %v10349_v60  ;;  %v17508_v34 = vpop.f32.mrf.mxu0  ;;  %v12749_v28 = vpop.f32.mrf.mxu1  ;;  %v10354_v55 = vsel %vm13455_vm9, %v11898_v46, %v10353_v3  ;;  %v10355_v25 = vrot.slane %v10353_v3, 4  ;;  %v10367_v47 = vrot.slane %v17184_v59, 5  ;;  %v10274_v26 = vld [vmem:[#allocation3 + $0x78] sm:$0xe]  ;;  %v10281_v27 = vld [vmem:[#allocation3 + $0xcc] sm:$0xe] }
 0x45a   : > { %18925 = vst [vmem:[#allocation23_spill] sm:$0xff] %v17504_v18  ;;  %v11914_v39 = vcombine.low %v10347_v11, %v10350_v35  ;;  %v17515_v40 = vsel %vm13455_vm9, %v11899_v56, %v10360_v5  ;;  %v17518_v36 = vadd.f32 %v12749_v28, %v17158_v22  ;;  %v10362_v48 = vrot.slane %v10360_v5, 4 }
 0x45b   : > { %v17520_v38 = vpop.f32.mrf.mxu0  ;;  %v10370_v10 = vrot.slane %v17186_v57, 5  ;;  %v7468_v12 = vpop.f32.mrf.mxu1  ;;  %v10357_v6 = vsel %vm13455_vm9, %v10355_v25, %v10356_v54  ;;  %v11901_v49 = vrot.slane %v10272_v44, 9  ;;  %v10374_v60 = vrot.slane %v17201_v1, 5 }
 0x45c   : > { %v10377_v46 = vrot.slane %v17208_v0, 5  ;;  %12952 = vmatmul.mubr.msk.bf16.vlgmr.msra.gmra.mxu1 %vm1002_vm5, %v11913_v2  ;;  %v17530_v22 = vadd.f32 %v7468_v12, %v17182_v16  ;;  %v11915_v11 = vcombine.low %v10354_v55, %v10357_v6  ;;  %v10364_v59 = vsel %vm13455_vm9, %v10362_v48, %v10363_v23  ;;  %v10275_v55 = vld [vmem:[#allocation3 + $0x84] sm:$0xe] }
 0x45d   : > { %v17534_v57 = vpop.f32.mrf.mxu0  ;;  %v17538_v45 = vsel %vm13455_vm9, %v11900_v14, %v10367_v47  ;;  %12955 = vmatprep.mubr.msk.bf16.mxu1 %vm1002_vm5, %v11914_v39  ;;  %v12750_v1 = vpop.f32.mrf.mxu1  ;;  %v11916_v0 = vcombine.low %v17515_v40, %v10364_v59  ;;  %v10369_v2 = vrot.slane %v10367_v47, 4  ;;  %v17544_v16 = vsel %vm13455_vm9, %v11901_v49, %v10374_v60  ;;  %v10276_v47 = vld [vmem:[#allocation3 + $0x90] sm:$0xe]  ;;  %v18926_v59 = vld [vmem:[#allocation37_spill] sm:$0xff] }
 0x45e   : > { %v10376_v3 = vrot.slane %v10374_v60, 4  ;;  %v17547_v54 = vadd.f32 %v12750_v1, %v17189_v37  ;;  %v11902_v5 = vrot.slane %v10273_v61, 9  ;;  %v10381_v35 = vrot.slane %v17226_v63, 5 }
 0x45f   : > { %v17549_v56 = vpop.f32.mrf.mxu0  ;;  %v10384_v23 = vrot.slane %v17235_v9, 5  ;;  %v7471_v14 = vpop.f32.mrf.mxu1  ;;  %v17555_v44 = vsel %vm13455_vm9, %v10369_v2, %v10370_v10  ;;  %v11903_v39 = vrot.slane %v10274_v26, 9  ;;  %v10388_v37 = vrot.slane %v17252_v58, 5 }
 0x460   : > { %v17559_v28 = vsel %vm13455_vm9, %v10376_v3, %v10377_v46  ;;  %v17563_v25 = vadd.f32 %v7471_v14, %v17194_v13  ;;  %v11917_v63 = vcombine.low %v17538_v45, %v17555_v44  ;;  %v17573_v48 = vsel %vm13455_vm9, %v11902_v5, %v10381_v35  ;;  %v18928_v3 = vld [vmem:[#allocation26_spill] sm:$0xff]  ;;  %v10277_v14 = vld [vmem:[#allocation3 + $0x9c] sm:$0xe] }
 0x461   : > { %v17567_v9 = vpop.f32.mrf.mxu0  ;;  %v11918_v40 = vcombine.low %v17544_v16, %v17559_v28  ;;  %v12753_v10 = vpop.f32.mrf.mxu1  ;;  %v10383_v12 = vrot.slane %v10381_v35, 4  ;;  %v17577_v58 = vsel %vm13455_vm9, %v11903_v39, %v10388_v37  ;;  %v10390_v13 = vrot.slane %v10388_v37, 4  ;;  %v18927_v16 = vld [vmem:[#allocation10_spill] sm:$0xff] }
 0x462   : > { %v10391_v6 = vrot.slane %v17257_v43, 5  ;;  %v17581_v49 = vadd.f32 %v12753_v10, %v17215_v52  ;;  %v11904_v46 = vrot.slane %v10275_v55, 9  ;;  %v10395_v61 = vrot.slane %v17277_v62, 5  ;;  %v18929_v37 = vld [vmem:[#allocation6_spill] sm:$0xff] }
 0x463   : > { %v17583_v60 = vpop.f32.mrf.mxu0  ;;  %v10398_v45 = vrot.slane %v18926_v59, 5  ;;  %v7484_v26 = vpop.f32.mrf.mxu1  ;;  %v17589_v1 = vsel %vm13455_vm9, %v10383_v12, %v10384_v23  ;;  %v11905_v43 = vrot.slane %v10276_v47, 9  ;;  %v10402_v52 = vrot.slane %v18927_v16, 5 }
 0x464   : > { %v17593_v2 = vsel %vm13455_vm9, %v10390_v13, %v10391_v6  ;;  %12956 = vmatmul.mubr.msk.bf16.gmra.mxu1 %vm1002_vm5, %v11915_v11  ;;  %v17598_v5 = vadd.f32 %v7484_v26, %v18928_v3  ;;  %v10397_v28 = vrot.slane %v10395_v61, 4  ;;  %v10405_v55 = vrot.slane %v18929_v37, 5  ;;  %v18930_v11 = vld [vmem:[#allocation20_spill] sm:$0xff] }
 0x465   : > { %v17600_v62 = vpop.f32.mrf.mxu0  ;;  %12959 = vmatprep.mubr.msk.bf16.mxu1 %vm1002_vm5, %v11916_v0  ;;  %v12754_v44 = vpop.f32.mrf.mxu1  ;;  %v10404_v39 = vrot.slane %v10402_v52, 4  ;;  %v17613_v12 = vsel %vm13455_vm9, %v11904_v46, %v10395_v61  ;;  %v17617_v13 = vsel %vm13455_vm9, %v11905_v43, %v10402_v52  ;;  %v18931_v6 = vld [vmem:[#allocation28_spill] sm:$0xff]  ;;  %v11906_v3 = vrot.slane %v10277_v14, 9  ;;  %v10279_v46 = vld [vmem:[#allocation3 + $0xb4] sm:$0xe] }
 0x466   : > { %v7602_v47 = vadd.f32 %v12754_v44, %v18930_v11  ;;  %v10409_v59 = vrot.slane %v18931_v6, 5  ;;  %v17622_v26 = vsel %vm13455_vm9, %v10397_v28, %v10398_v45  ;;  %v18932_v44 = vld [vmem:[#allocation24_spill] sm:$0xff]  ;;  %v18933_v61 = vld [vmem:[#allocation27_spill] sm:$0xff]  ;;  %v11908_v14 = vrot.slane %v10279_v46, 9 }
 0x467   : > { %v17609_v10 = vpop.f32.mrf.mxu0  ;;  %v7487_v0 = vpop.f32.mrf.mxu1  ;;  %v17626_v16 = vsel %vm13455_vm9, %v10404_v39, %v10405_v55  ;;  %v10412_v37 = vrot.slane %v18932_v44, 5  ;;  %v18934_v6 = vld [vmem:[#allocation11_spill] sm:$0xff]  ;;  %v18935_v55 = vld [vmem:[#allocation12_spill] sm:$0xff]  ;;  %v17671_v46 = vadd.f32 %v17409_v15, %v17518_v36  ;;  %v17688_v15 = vadd.f32 %v17432_v4, %v17547_v54 }
 0x468   : > { %v7600_v11 = vadd.f32 %v7487_v0, %v18933_v61  ;;  %v10411_v28 = vrot.slane %v10409_v59, 4  ;;  %v10423_v44 = vrot.slane %v18935_v55, 5  ;;  %v17642_v0 = vsel %vm13455_vm9, %v11906_v3, %v10409_v59  ;;  %v18936_v43 = vld [vmem:[#allocation16_spill] sm:$0xff]  ;;  %v18938_v55 = vld [vmem:[#allocation7_spill] sm:$0xff] }
 0x469   : > { %v17630_v23 = vpop.f32.mrf.mxu0  ;;  %v12757_v45 = vpop.f32.mrf.mxu1  ;;  %v10426_v52 = vrot.slane %v18936_v43, 5  ;;  %v17696_v36 = vadd.f32 %v17452_v53, %v17581_v49 }
 0x46a   : > { %v7605_v35 = vadd.f32 %v12757_v45, %v18934_v6  ;;  %v17646_v61 = vsel %vm13455_vm9, %v10411_v28, %v10412_v37  ;;  %v18937_v45 = vld [vmem:[#allocation9_spill] sm:$0xff]  ;;  %v10425_v3 = vrot.slane %v10423_v44, 4  ;;  %v17661_v43 = vsel %vm13455_vm9, %v11908_v14, %v10423_v44 }
 0x46b   : > { %v17637_v39 = vpop.f32.mrf.mxu0  ;;  %v7500_v18 = vpop.f32.mrf.mxu1  ;;  %v18939_v14 = vld [vmem:[#allocation41_spill] sm:$0xff]  ;;  %v17709_v4 = vadd.f32 %v17486_v32, %v7600_v11  ;;  %v18942_v32 = vld [vmem:[#allocation43_spill] sm:$0xff] }
 0x46c   : > { %12960 = vmatmul.mubr.msk.bf16.gmra.mxu1 %vm1002_vm5, %v11917_v63  ;;  %v7603_v6 = vadd.f32 %v7500_v18, %v18937_v45  ;;  %v11910_v63 = vrot.slane %v10281_v27, 9  ;;  %v10437_v18 = vrot.slane %v17419_v17, 5  ;;  %v17666_v45 = vsel %vm13455_vm9, %v10425_v3, %v10426_v52 }
 0x46d   : > { %v17651_v24 = vpop.f32.mrf.mxu0  ;;  %12963 = vmatprep.mubr.msk.bf16.mxu1 %vm1002_vm5, %v11918_v40  ;;  %v12758_v59 = vpop.f32.mrf.mxu1  ;;  %v10440_v40 = vrot.slane %v17428_v29, 5  ;;  %v11925_v17 = vcombine.low %v17661_v43, %v17666_v45  ;;  %v17716_v53 = vadd.f32 %v17497_v19, %v7605_v35 }
 0x46e   : > { %v7606_v7 = vadd.f32 %v12758_v59, %v18938_v55  ;;  %v17675_v59 = vadd.f32 %v17421_v8, %v17530_v22  ;;  %v17684_v52 = vsel %vm13455_vm9, %v11910_v63, %v10437_v18  ;;  %v10439_v3 = vrot.slane %v10437_v18, 4  ;;  %v18940_v22 = vld [vmem:[#allocation38_spill] sm:$0xff] }
 0x46f   : > { %v17657_v37 = vpop.f32.mrf.mxu0  ;;  %v7503_v28 = vpop.f32.mrf.mxu1  ;;  %v17692_v8 = vadd.f32 %v17438_v31, %v17563_v25  ;;  %v17703_v63 = vadd.f32 %v17461_v20, %v17598_v5  ;;  %v17706_v18 = vadd.f32 %v17473_v51, %v7602_v47  ;;  %v17719_v25 = vadd.f32 %v17508_v34, %v7603_v6 }
 0x470   : > { %v7604_v44 = vadd.f32 %v7503_v28, %v18939_v14  ;;  %v17713_v54 = vsel %vm13455_vm9, %v10439_v3, %v10440_v40  ;;  %v17722_v20 = vadd.f32 %v17520_v38, %v7606_v7  ;;  %v18941_v51 = vcombine.low %v17573_v48, %v17589_v1  ;;  %v18944_v48 = vld [vmem:[#allocation31_spill] sm:$0xff]  ;;  %v18945_v40 = vld [vmem:[#allocation22_spill] sm:$0xff] }
 0x471   : > { %v17678_v27 = vpop.f32.mrf.mxu0  ;;  %v12761_v29 = vpop.f32.mrf.mxu1  ;;  %v11927_v47 = vcombine.low %v17684_v52, %v17713_v54  ;;  %v18943_v7 = vcombine.low %v17577_v58, %v17593_v2  ;;  %v18946_v58 = vld [vmem:[#allocation18_spill] sm:$0xff] }
 0x472   : > { %v7609_v55 = vadd.f32 %v12761_v29, %v18940_v22  ;;  %v17734_v19 = vadd.f32 %v17534_v57, %v7604_v44  ;;  %v18947_v29 = vld [vmem:[#allocation21_spill] sm:$0xff] }
 0x473   : > { %v17699_v28 = vpop.f32.mrf.mxu0  ;;  %v7516_v31 = vpop.f32.mrf.mxu1  ;;  %v10416_v3 = vrot.slane %v18947_v29, 5  ;;  %v18953_v29 = vld [vmem:[#allocation47_spill] sm:$0xff] }
 0x474   : > { %12964 = vmatmul.mubr.msk.bf16.gmra.mxu1 %vm1002_vm5, %v18941_v51  ;;  %v7607_v49 = vadd.f32 %v7516_v31, %v18942_v32  ;;  %v17737_v34 = vadd.f32 %v17549_v56, %v7609_v55  ;;  %v10278_v31 = vld [vmem:[#allocation3 + $0xa8] sm:$0xe]  ;;  %v18948_v51 = vcombine.low %v17613_v12, %v17622_v26  ;;  %v18949_v32 = vld [vmem:[#allocation45_spill] sm:$0xff] }
 0x475   : > { %v17729_v5 = vpop.f32.mrf.mxu0  ;;  %12967 = vmatprep.mubr.msk.bf16.mxu1 %vm1002_vm5, %v18943_v7  ;;  %v12762_v38 = vpop.f32.mrf.mxu1  ;;  %v11907_v12 = vrot.slane %v10278_v31, 9  ;;  %v10418_v26 = vrot.slane %v10416_v3, 4 }
 0x476   : > { %v7610_v1 = vadd.f32 %v12762_v38, %v18944_v48  ;;  %v17747_v11 = vadd.f32 %v17567_v9, %v7607_v49  ;;  %v18950_v49 = vld [vmem:[#allocation40_spill] sm:$0xff] }
 0x477   : > { %v17744_v35 = vpop.f32.mrf.mxu0  ;;  %v7519_v6 = vpop.f32.mrf.mxu1  ;;  %v10419_v7 = vrot.slane %v18950_v49, 5  ;;  %v10417_v31 = vsel %vm13455_vm9, %v11907_v12, %v10416_v3  ;;  %v10430_v49 = vrot.slane %v17387_v21, 5 }
 0x478   : > { %v7608_v57 = vadd.f32 %v7519_v6, %v18945_v40  ;;  %v17753_v56 = vadd.f32 %v17583_v60, %v7610_v1  ;;  %v18952_v6 = vld [vmem:[#allocation42_spill] sm:$0xff] }
 0x479   : > { %v17750_v14 = vpop.f32.mrf.mxu0  ;;  %v12765_v44 = vpop.f32.mrf.mxu1 }
 0x47a   : > { %v7613_v2 = vadd.f32 %v12765_v44, %v18946_v58  ;;  %v17760_v55 = vadd.f32 %v17600_v62, %v7608_v57  ;;  %v18951_v62 = vcombine.low %v17617_v13, %v17626_v16 }
 0x47b   : > { %v17757_v22 = vpop.f32.mrf.mxu0  ;;  %v7532_v9 = vpop.f32.mrf.mxu1 }
 0x47c   : > { %12968 = vmatmul.mubr.msk.bf16.gmra.mxu1 %vm1002_vm5, %v18948_v51  ;;  %v7611_v60 = vadd.f32 %v7532_v9, %v18949_v32  ;;  %v17771_v48 = vadd.f32 %v17609_v10, %v7613_v2  ;;  %v10420_v10 = vsel %vm13455_vm9, %v10418_v26, %v10419_v7  ;;  %v18954_v51 = vld [vmem:[#allocation34_spill] sm:$0xff]  ;;  %v18955_v7 = vcombine.low %v17642_v0, %v17646_v61  ;;  %v18957_v26 = vld [vmem:[#allocation32_spill] sm:$0xff] }
 0x47d   : > { %v17768_v38 = vpop.f32.mrf.mxu0  ;;  %12971 = vmatprep.mubr.msk.bf16.mxu1 %vm1002_vm5, %v18951_v62  ;;  %v12766_v1 = vpop.f32.mrf.mxu1  ;;  %v11924_v62 = vcombine.low %v10417_v31, %v10420_v10  ;;  %v10432_v10 = vrot.slane %v10430_v49, 4 }
 0x47e   : > { %v7614_v40 = vadd.f32 %v12766_v1, %v18952_v6  ;;  %v17779_v44 = vadd.f32 %v17630_v23, %v7611_v60  ;;  %v10280_v6 = vld [vmem:[#allocation3 + $0xc0] sm:$0xe] }
 0x47f   : > { %v12811_v57 = vpop.f32.mrf.mxu0  ;;  %v7535_v58 = vpop.f32.mrf.mxu1 }
 0x480   : > { %v7612_v9 = vadd.f32 %v7535_v58, %v18953_v29  ;;  %v17785_v13 = vadd.f32 %v17637_v39, %v7614_v40  ;;  %v18956_v39 = vld [vmem:[#allocation30_spill] sm:$0xff]  ;;  %v10433_v58 = vrot.slane %v18957_v26, 5 }
 0x481   : > { %v7938_v2 = vpop.f32.mrf.mxu0  ;;  %v12769_v16 = vpop.f32.mrf.mxu1 }
 0x482   : > { %v7617_v32 = vadd.f32 %v12769_v16, %v18954_v51  ;;  %v17792_v60 = vadd.f32 %v17651_v24, %v7612_v9  ;;  %v18958_v24 = vld [vmem:[#allocation25_spill] sm:$0xff]  ;;  %v11909_v9 = vrot.slane %v10280_v6, 9 }
 0x483   : > { %v12812_v23 = vpop.f32.mrf.mxu0  ;;  %v7548_v1 = vpop.f32.mrf.mxu1  ;;  %v18959_v51 = vld [vmem:[#allocation13_spill] sm:$0xff] }
 0x484   : > { %12972 = vmatmul.mubr.msk.bf16.gmra.mxu1 %vm1002_vm5, %v18955_v7  ;;  %v7615_v40 = vadd.f32 %v7548_v1, %v18956_v39  ;;  %v17801_v3 = vadd.f32 %v17657_v37, %v7617_v32  ;;  %v10434_v1 = vsel %vm13455_vm9, %v10432_v10, %v10433_v58  ;;  %v10431_v6 = vsel %vm13455_vm9, %v11909_v9, %v10430_v49 }
 0x485   : > { %v7941_v29 = vpop.f32.mrf.mxu0  ;;  %12975 = vmatprep.mubr.msk.bf16.mxu1 %vm1002_vm5, %v11924_v62  ;;  %v12770_v21 = vpop.f32.mrf.mxu1 }
 0x486   : > { %v7618_v12 = vadd.f32 %v12770_v21, %v18958_v24  ;;  %v17806_v0 = vadd.f32 %v17678_v27, %v7615_v40  ;;  %v11926_v40 = vcombine.low %v10431_v6, %v10434_v1  ;;  %v18963_v6 = vld [vmem:[#allocation23_spill] sm:$0xff] }
 0x487   : > { %v12851_v16 = vpop.f32.mrf.mxu0  ;;  %v7551_v61 = vpop.f32.mrf.mxu1 }
 0x488   : > { %v7616_v31 = vadd.f32 %v7551_v61, %v18959_v51  ;;  %v17812_v37 = vadd.f32 %v17699_v28, %v7618_v12 }
 0x489   : > { %v9022_v7 = vpop.f32.mrf.mxu0  ;;  %v12773_v32 = vpop.f32.mrf.mxu1 }
 0x48a   : > { %v7621_v62 = vadd.f32 %v12773_v32, %v17444_v41  ;;  %v17818_v27 = vadd.f32 %v17729_v5, %v7616_v31  ;;  %v18962_v31 = vld [vmem:[#allocation49_spill] sm:$0xff] }
 0x48b   : > { %v12852_v39 = vpop.f32.mrf.mxu0  ;;  %v7564_v26 = vpop.f32.mrf.mxu1 }
 0x48c   : > { %12976 = vmatmul.mubr.msk.bf16.gmra.mxu1 %vm1002_vm5, %v11925_v17  ;;  %v7619_v28 = vadd.f32 %v7564_v26, %v17450_v33  ;;  %v17828_v41 = vadd.f32 %v17744_v35, %v7621_v62  ;;  %v18960_v35 = vld [vmem:[#allocation17_spill] sm:$0xff] }
 0x48d   : > { %v17825_v58 = vpop.f32.mrf.mxu0  ;;  %12979 = vmatprep.mubr.msk.bf16.mxu1 %vm1002_vm5, %v11926_v40  ;;  %v12774_v30 = vpop.f32.mrf.mxu1 }
 0x48e   : > { %v7622_v5 = vadd.f32 %v12774_v30, %v17455_v42  ;;  %v17833_v21 = vadd.f32 %v17750_v14, %v7619_v28  ;;  %v18961_v14 = vld [vmem:[#allocation44_spill] sm:$0xff] }
 0x48f   : > { %v12855_v49 = vpop.f32.mrf.mxu0  ;;  %v7567_v24 = vpop.f32.mrf.mxu1 }
 0x490   : > { %v7620_v43 = vadd.f32 %v7567_v24, %v17458_v50  ;;  %v17839_v33 = vadd.f32 %v17757_v22, %v7622_v5 }
 0x491   : > { %v17836_v45 = vpop.f32.mrf.mxu0 }
 0x492   : > { %v17843_v10 = vadd.f32 %v17768_v38, %v7620_v43 }
 0x493   : > { %v12777_v17 = vpop.f32.mrf.mxu1  ;;  %v12856_v9 = vpop.f32.mrf.mxu0 }
 0x494   : > { %v7625_v12 = vadd.f32 %v12777_v17, %v18960_v35  ;;  %12980 = vmatmul.mubr.msk.bf16.gmra.mxu1 %vm1002_vm5, %v11927_v47 }
 0x495   : > { %v7580_v42 = vpop.f32.mrf.mxu1  ;;  %v17850_v61 = vpop.f32.mrf.mxu0 }
 0x496   : > { %v7623_v50 = vadd.f32 %v7580_v42, %v18961_v14  ;;  %v17852_v51 = vadd.f32 %v12811_v57, %v7625_v12 }
 0x497   : > { %v12778_v22 = vpop.f32.mrf.mxu1  ;;  %v12859_v32 = vpop.f32.mrf.mxu0 }
 0x498   : > { %v7626_v1 = vadd.f32 %v12778_v22, %v18962_v31  ;;  %v17855_v62 = vadd.f32 %v7938_v2, %v7623_v50 }
 0x499   : > { %v7583_v38 = vpop.f32.mrf.mxu1  ;;  %v17858_v26 = vpop.f32.mrf.mxu0 }
 0x49a   : > { %v7624_v40 = vadd.f32 %v7583_v38, %v18963_v6  ;;  %v17860_v52 = vadd.f32 %v12812_v23, %v7626_v1 }
 0x49b   : > { %v12817_v54 = vpop.f32.mrf.mxu1  ;;  %v12860_v28 = vpop.f32.mrf.mxu0 }
 0x49c   : > { %v8681_v47 = vadd.f32 %v12817_v54, %v17671_v46  ;;  %v17863_v30 = vadd.f32 %v7941_v29, %v7624_v40 }
 0x49d   : > { %v8552_v57 = vpop.f32.mrf.mxu1  ;;  %v17866_v24 = vpop.f32.mrf.mxu0 }
 0x49e   : > { %v8679_v5 = vadd.f32 %v8552_v57, %v17675_v59  ;;  %v17868_v2 = vadd.f32 %v12851_v16, %v8681_v47 }
 0x49f   : > { %v12818_v43 = vpop.f32.mrf.mxu1  ;;  %v12863_v35 = vpop.f32.mrf.mxu0 }
 0x4a0   : > { %v8682_v17 = vadd.f32 %v12818_v43, %v17688_v15  ;;  %v17871_v12 = vadd.f32 %v9022_v7, %v8679_v5 }
 0x4a1   : > { %v8555_v23 = vpop.f32.mrf.mxu1  ;;  %v17876_v46 = vpop.f32.mrf.mxu0 }
 0x4a2   : > { %v17874_v42 = vadd.f32 %v8555_v23, %v17692_v8  ;;  %v17878_v29 = vadd.f32 %v12852_v39, %v8682_v17 }
 0x4a3   : > { %v12821_v14 = vpop.f32.mrf.mxu1  ;;  %v12864_v50 = vpop.f32.mrf.mxu0 }
 0x4a4   : > { %v8685_v59 = vadd.f32 %v12821_v14, %v17696_v36 }
 0x4a5   : > { %v8568_v16 = vpop.f32.mrf.mxu1  ;;  %v17884_v15 = vpop.f32.mrf.mxu0 }
 0x4a6   : > { %v17882_v22 = vadd.f32 %v8568_v16, %v17703_v63  ;;  %v17886_v7 = vadd.f32 %v12855_v49, %v8685_v59 }
 0x4a7   : > { %v12822_v31 = vpop.f32.mrf.mxu1  ;;  %v12867_v1 = vpop.f32.mrf.mxu0 }
 0x4a8   : > { %v8686_v8 = vadd.f32 %v12822_v31, %v17706_v18 }
 0x4a9   : > { %v8571_v38 = vpop.f32.mrf.mxu1  ;;  %v17892_v6 = vpop.f32.mrf.mxu0 }
 0x4aa   : > { %v17890_v39 = vadd.f32 %v8571_v38, %v17709_v4  ;;  %v17894_v36 = vadd.f32 %v12856_v9, %v8686_v8 }
 0x4ab   : > { %v12825_v40 = vpop.f32.mrf.mxu1  ;;  %v12868_v54 = vpop.f32.mrf.mxu0 }
 0x4ac   : > { %v8689_v63 = vadd.f32 %v12825_v40, %v17716_v53 }
 0x4ad   : > { %v8584_v47 = vpop.f32.mrf.mxu1  ;;  %v17900_v57 = vpop.f32.mrf.mxu0 }
 0x4ae   : > { %v17898_v49 = vadd.f32 %v8584_v47, %v17719_v25  ;;  %v17902_v18 = vadd.f32 %v12859_v32, %v8689_v63 }
 0x4af   : > { %v12826_v5 = vpop.f32.mrf.mxu1  ;;  %v12871_v43 = vpop.f32.mrf.mxu0 }
 0x4b0   : > { %v8690_v4 = vadd.f32 %v12826_v5, %v17722_v20 }
 0x4b1   : > { %v8587_v17 = vpop.f32.mrf.mxu1  ;;  %v17908_v23 = vpop.f32.mrf.mxu0 }
 0x4b2   : > { %v17906_v9 = vadd.f32 %v8587_v17, %v17734_v19  ;;  %18964 = vst [vmem:[#allocation46_spill] sm:$0xff] %v17908_v23  ;;  %v17910_v53 = vadd.f32 %v12860_v28, %v8690_v4 }
 0x4b3   : > { %v12829_v14 = vpop.f32.mrf.mxu1  ;;  %v12872_v32 = vpop.f32.mrf.mxu0 }
 0x4b4   : > { %v8693_v25 = vadd.f32 %v12829_v14, %v17737_v34 }
 0x4b5   : > { %v8600_v59 = vpop.f32.mrf.mxu1  ;;  %v17922_v40 = vpop.f32.mrf.mxu0 }
 0x4b6   : > { %v17914_v16 = vadd.f32 %v8600_v59, %v17747_v11  ;;  %v17916_v31 = vadd.f32 %v12863_v35, %v8693_v25  ;;  %18965 = vst [vmem:[#allocation8_spill] sm:$0xff] %v17922_v40 }
 0x4b7   : > { %v12830_v20 = vpop.f32.mrf.mxu1  ;;  %v12875_v35 = vpop.f32.mrf.mxu0 }
 0x4b8   : > { %v8694_v8 = vadd.f32 %v12830_v20, %v17753_v56 }
 0x4b9   : > { %v8603_v38 = vpop.f32.mrf.mxu1  ;;  %v17936_v14 = vpop.f32.mrf.mxu0 }
 0x4ba   : > { %v17920_v19 = vadd.f32 %v8603_v38, %v17760_v55  ;;  %v17924_v28 = vadd.f32 %v12864_v50, %v8694_v8  ;;  %18966 = vst [vmem:[#allocation51_spill] sm:$0xff] %v17936_v14 }
 0x4bb   : > { %v12833_v63 = vpop.f32.mrf.mxu1 }
 0x4bc   : > { %v8697_v34 = vadd.f32 %v12833_v63, %v17771_v48 }
 0x4bd   : > { %v8616_v47 = vpop.f32.mrf.mxu1 }
 0x4be   : > { %v17928_v11 = vadd.f32 %v8616_v47, %v17779_v44  ;;  %v17930_v5 = vadd.f32 %v12867_v1, %v8697_v34  ;;  %v12876_v1 = vpop.f32.mrf.mxu0 }
 0x4bf   : > { %v12834_v4 = vpop.f32.mrf.mxu1 }
 0x4c0   : > { %v8698_v56 = vadd.f32 %v12834_v4, %v17785_v13 }
 0x4c1   : > { %v8619_v17 = vpop.f32.mrf.mxu1 }
 0x4c2   : > { %v17934_v55 = vadd.f32 %v8619_v17, %v17792_v60  ;;  %v17938_v50 = vadd.f32 %v12868_v54, %v8698_v56  ;;  %v17947_v60 = vpop.f32.mrf.mxu0 }
 0x4c3   : > { %v12837_v25 = vpop.f32.mrf.mxu1  ;;  %18968 = vst [vmem:[#allocation35_spill] sm:$0xff] %v17947_v60 }
 0x4c4   : > { %v8701_v48 = vadd.f32 %v12837_v25, %v17801_v3 }
 0x4c5   : > { %v8632_v59 = vpop.f32.mrf.mxu1 }
 0x4c6   : > { %v17942_v44 = vadd.f32 %v8632_v59, %v17806_v0  ;;  %v17944_v20 = vadd.f32 %v12871_v43, %v8701_v48  ;;  %v12879_v0 = vpop.f32.mrf.mxu0 }
 0x4c7   : > { %v12838_v8 = vpop.f32.mrf.mxu1 }
 0x4c8   : > { %18967 = vst [vmem:[#allocation36_spill] sm:$0xff] %v17942_v44  ;;  %v8702_v13 = vadd.f32 %v12838_v8, %v17812_v37  ;;  %v17961_v25 = vpop.f32.mrf.mxu0 }
 0x4c9   : > { %v8635_v38 = vpop.f32.mrf.mxu1  ;;  %18971 = vst [vmem:[#allocation33_spill] sm:$0xff] %v17961_v25 }
 0x4ca   : > { %v17950_v63 = vadd.f32 %v8635_v38, %v17818_v27  ;;  %v17952_v54 = vadd.f32 %v12872_v32, %v8702_v13  ;;  %v12880_v48 = vpop.f32.mrf.mxu0 }
 0x4cb   : > { %v12841_v34 = vpop.f32.mrf.mxu1 }
 0x4cc   : > { %18969 = vst [vmem:[#allocation29_spill] sm:$0xff] %v17950_v63  ;;  %v8705_v3 = vadd.f32 %v12841_v34, %v17828_v41  ;;  %v17974_v13 = vpop.f32.mrf.mxu0 }
 0x4cd   : > { %v8648_v47 = vpop.f32.mrf.mxu1  ;;  %18974 = vst [vmem:[#allocation14_spill] sm:$0xff] %v17974_v13 }
 0x4ce   : > { %v17956_v4 = vadd.f32 %v8648_v47, %v17833_v21  ;;  %v17958_v43 = vadd.f32 %v12875_v35, %v8705_v3 }
 0x4cf   : > { %v12842_v56 = vpop.f32.mrf.mxu1 }
 0x4d0   : > { %18970 = vst [vmem:[#allocation48_spill] sm:$0xff] %v17956_v4  ;;  %v8706_v37 = vadd.f32 %v12842_v56, %v17839_v33 }
 0x4d1   : > { %v8651_v17 = vpop.f32.mrf.mxu1  ;;  %v17982_v3 = vpop.f32.mrf.mxu0 }
 0x4d2   : > { %v17964_v27 = vadd.f32 %v8651_v17, %v17843_v10  ;;  %v17966_v32 = vadd.f32 %v12876_v1, %v8706_v37 }
 0x4d3   : > { %v17990_v56 = vpop.f32.mrf.mxu0 }
 0x4d4   : > { %18972 = vst [vmem:[#allocation50_spill] sm:$0xff] %v17964_v27  ;;  %v12845_v41 = vpop.f32.mrf.mxu1 }
 0x4d5   : > { %v8709_v59 = vadd.f32 %v12845_v41, %v17852_v51  ;;  %v17995_v17 = vpop.f32.mrf.mxu0 }
 0x4d6   : > { %v8664_v8 = vpop.f32.mrf.mxu1 }
 0x4d7   : > { %v17970_v21 = vadd.f32 %v8664_v8, %v17855_v62  ;;  %v17972_v35 = vadd.f32 %v12879_v0, %v8709_v59 }
 0x4d8   : > { %v12846_v33 = vpop.f32.mrf.mxu1 }
 0x4d9   : > { %18973 = vst [vmem:[#allocation52_spill] sm:$0xff] %v17970_v21  ;;  %v8710_v38 = vadd.f32 %v12846_v33, %v17860_v52 }
 0x4da   : > { %v8667_v34 = vpop.f32.mrf.mxu1 }
 0x4db   : > { %v17978_v10 = vadd.f32 %v8667_v34, %v17863_v30  ;;  %v17980_v1 = vadd.f32 %v12880_v48, %v8710_v38 }
 0x4dc   : > { %v12885_v51 = vpop.f32.mrf.mxu1 }
 0x4dd   : > { %18975 = vst [vmem:[#allocation39_spill] sm:$0xff] %v17978_v10  ;;  %v17985_v47 = vadd.f32 %v12885_v51, %v17868_v2  ;;  %v18000_v2 = vpop.f32.mrf.mxu0 }
 0x4de   : > { %v9381_v62 = vpop.f32.mrf.mxu1 }
 0x4df   : > { %v17988_v0 = vadd.f32 %v9381_v62, %v17871_v12  ;;  %v18007_v38 = vpop.f32.mrf.mxu0 }
 0x4e0   : > { %v12886_v37 = vpop.f32.mrf.mxu1 }
 0x4e1   : > { %v17993_v52 = vadd.f32 %v12886_v37, %v17878_v29  ;;  %v18014_v62 = vpop.f32.mrf.mxu0 }
 0x4e2   : > { %v9384_v30 = vpop.f32.mrf.mxu1 }
 0x4e4   : > { %v12889_v48 = vpop.f32.mrf.mxu1 }
 0x4e5   : > { %v17998_v41 = vadd.f32 %v12889_v48, %v17886_v7 }
 0x4e6   : > { %v9397_v59 = vpop.f32.mrf.mxu1 }
 0x4e8   : > { %v12890_v8 = vpop.f32.mrf.mxu1 }
 0x4e9   : > { %v18003_v12 = vadd.f32 %v12890_v8, %v17894_v36  ;;  %v18021_v36 = vpop.f32.mrf.mxu0 }
 0x4ea   : > { %v18005_v33 = vpop.f32.mrf.mxu1 }
 0x4ec   : > { %v12893_v29 = vpop.f32.mrf.mxu1 }
 0x4ed   : > { %v18010_v34 = vadd.f32 %v12893_v29, %v17902_v18  ;;  %v18028_v18 = vpop.f32.mrf.mxu0 }
 0x4ee   : > { %v18012_v51 = vpop.f32.mrf.mxu1 }
 0x4f0   : > { %v12894_v7 = vpop.f32.mrf.mxu1 }
 0x4f1   : > { %v18017_v37 = vadd.f32 %v12894_v7, %v17910_v53  ;;  %v18035_v53 = vpop.f32.mrf.mxu0 }
 0x4f2   : > { %v18019_v48 = vpop.f32.mrf.mxu1 }
 0x4f4   : > { %v12897_v8 = vpop.f32.mrf.mxu1 }
 0x4f5   : > { %v18024_v13 = vadd.f32 %v12897_v8, %v17916_v31  ;;  %v18042_v31 = vpop.f32.mrf.mxu0 }
 0x4f6   : > { %v18026_v10 = vpop.f32.mrf.mxu1 }
 0x4f8   : > { %v12898_v29 = vpop.f32.mrf.mxu1 }
 0x4f9   : > { %v18031_v25 = vadd.f32 %v12898_v29, %v17924_v28  ;;  %v18049_v28 = vpop.f32.mrf.mxu0 }
 0x4fa   : > { %v18033_v21 = vpop.f32.mrf.mxu1 }
 0x4fc   : > { %v12901_v7 = vpop.f32.mrf.mxu1 }
 0x4fd   : > { %v18038_v60 = vadd.f32 %v12901_v7, %v17930_v5  ;;  %v18056_v5 = vpop.f32.mrf.mxu0 }
 0x4fe   : > { %v18040_v27 = vpop.f32.mrf.mxu1 }
 0x4ff   : > { %18976 = vst [vmem:[#allocation15_spill] sm:$0xff] %v18038_v60 }
 0x500   : > { %v12902_v8 = vpop.f32.mrf.mxu1 }
 0x501   : > { %v18045_v14 = vadd.f32 %v12902_v8, %v17938_v50  ;;  %v18063_v50 = vpop.f32.mrf.mxu0 }
 0x502   : > { %v18047_v4 = vpop.f32.mrf.mxu1 }
 0x503   : > { %18977 = vst [vmem:[#allocation4_spill] sm:$0xff] %v18045_v14  ;;  %18978 = vst [vmem:[#allocation19_spill] sm:$0xff] %v18047_v4 }
 0x504   : > { %v12905_v29 = vpop.f32.mrf.mxu1 }
 0x505   : > { %v18052_v40 = vadd.f32 %v12905_v29, %v17944_v20  ;;  %v18070_v20 = vpop.f32.mrf.mxu0 }
 0x506   : > { %v18054_v63 = vpop.f32.mrf.mxu1 }
 0x507   : > { %18979 = vst [vmem:[#allocation5_spill] sm:$0xff] %v18052_v40  ;;  %18980 = vst [vmem:[#allocation37_spill] sm:$0xff] %v18054_v63 }
 0x508   : > { %v12906_v7 = vpop.f32.mrf.mxu1 }
 0x509   : > { %v18059_v60 = vadd.f32 %v12906_v7, %v17952_v54  ;;  %v18077_v54 = vpop.f32.mrf.mxu0 }
 0x50a   : > { %v18061_v23 = vpop.f32.mrf.mxu1 }
 0x50b   : > { %18981 = vst [vmem:[#allocation10_spill] sm:$0xff] %v18059_v60  ;;  %18982 = vst [vmem:[#allocation26_spill] sm:$0xff] %v18061_v23 }
 0x50c   : > { %v12909_v8 = vpop.f32.mrf.mxu1 }
 0x50d   : > { %v18066_v14 = vadd.f32 %v12909_v8, %v17958_v43  ;;  %v18084_v43 = vpop.f32.mrf.mxu0 }
 0x50e   : > { %v18068_v44 = vpop.f32.mrf.mxu1 }
 0x50f   : > { %18983 = vst [vmem:[#allocation6_spill] sm:$0xff] %v18066_v14  ;;  %18984 = vst [vmem:[#allocation20_spill] sm:$0xff] %v18068_v44 }
 0x510   : > { %v12910_v29 = vpop.f32.mrf.mxu1 }
 0x511   : > { %v18073_v40 = vadd.f32 %v12910_v29, %v17966_v32  ;;  %v9150_v32 = vadd.f32 %v17825_v58, %v17874_v42  ;;  %v18093_v29 = vpop.f32.mrf.mxu0 }
 0x512   : > { %v18075_v63 = vpop.f32.mrf.mxu1 }
 0x513   : > { %18985 = vst [vmem:[#allocation28_spill] sm:$0xff] %v18073_v40  ;;  %18986 = vst [vmem:[#allocation24_spill] sm:$0xff] %v18075_v63  ;;  %v9509_v63 = vadd.f32 %v9384_v30, %v9150_v32  ;;  %v18099_v4 = vpop.f32.mrf.mxu0  ;;  %v9154_v30 = vadd.f32 %v17850_v61, %v17890_v39 }
 0x514   : > { %v12913_v7 = vpop.f32.mrf.mxu1 }
 0x515   : > { %v18080_v60 = vadd.f32 %v12913_v7, %v17972_v35  ;;  %v9153_v35 = vadd.f32 %v17836_v45, %v17882_v22  ;;  %v10235_v58 = vadd.f32 %v18000_v2, %v9509_v63  ;;  %v10237_v22 = vadd.f32 %v17995_v17, %v17993_v52 }
 0x516   : > { %v18082_v23 = vpop.f32.mrf.mxu1  ;;  %v9157_v52 = vadd.f32 %v17858_v26, %v17898_v49  ;;  %v9158_v26 = vadd.f32 %v17866_v24, %v17906_v9 }
 0x517   : > { %18987 = vst [vmem:[#allocation27_spill] sm:$0xff] %v18080_v60  ;;  %18988 = vst [vmem:[#allocation11_spill] sm:$0xff] %v18082_v23  ;;  %v10234_v60 = vadd.f32 %v17990_v56, %v17988_v0  ;;  %v9512_v23 = vadd.f32 %v9397_v59, %v9153_v35  ;;  %v18114_v56 = vpop.f32.mrf.mxu0 }
 0x518   : > { %v12914_v8 = vpop.f32.mrf.mxu1  ;;  %v9516_v32 = vadd.f32 %v18012_v51, %v9157_v52  ;;  %v10241_v51 = vadd.f32 %v18021_v36, %v18003_v12  ;;  %v9161_v12 = vadd.f32 %v17876_v46, %v17914_v16  ;;  %v9162_v46 = vadd.f32 %v17884_v15, %v17920_v19 }
 0x519   : > { %v18087_v14 = vadd.f32 %v12914_v8, %v17980_v1  ;;  %v10236_v8 = vadd.f32 %v17982_v3, %v17985_v47  ;;  %v10238_v3 = vadd.f32 %v18014_v62, %v9512_v23  ;;  %v18130_v23 = vpop.f32.mrf.mxu0 }
 0x51a   : > { %v18089_v44 = vpop.f32.mrf.mxu1  ;;  %v10242_v9 = vadd.f32 %v18042_v31, %v9516_v32  ;;  %v10244_v31 = vadd.f32 %v18035_v53, %v18010_v34 }
 0x51b   : > { %18989 = vst [vmem:[#allocation12_spill] sm:$0xff] %v18087_v14 }
 0x51c   : > { %v12953_v40 = vpop.f32.mrf.mxu1 }
 0x51d   : > { %v18108_v45 = vadd.f32 %v12953_v40, %v10236_v8 }
 0x51e   : > { %v10577_v7 = vpop.f32.mrf.mxu1 }
 0x51f   : > { %v18103_v14 = vadd.f32 %v10577_v7, %v10234_v60  ;;  %v9513_v60 = vadd.f32 %v18005_v33, %v9154_v30  ;;  %v10739_v17 = vsel %vm1002_vm5, %v18108_v45, 0.0  ;;  %v10240_v7 = vadd.f32 %v18007_v38, %v17998_v41 }
 0x520   : > { %v12954_v1 = vpop.f32.mrf.mxu1 }
 0x521   : > { %v10736_v63 = vsel %vm1002_vm5, %v18103_v14, 0.0  ;;  %v18120_v47 = vadd.f32 %v12954_v1, %v10237_v22  ;;  %v10239_v1 = vadd.f32 %v18028_v18, %v9513_v60  ;;  %v18148_v22 = vpop.f32.mrf.mxu0  ;;  %v9517_v18 = vadd.f32 %v18019_v48, %v9158_v26 }
 0x522   : > { %v10580_v42 = vpop.f32.mrf.mxu1 }
 0x523   : > { %v18112_v0 = vadd.f32 %v10580_v42, %v10235_v58  ;;  %v10741_v35 = vsel %vm1002_vm5, %v18120_v47, 0.0 }
 0x524   : > { %v12957_v59 = vpop.f32.mrf.mxu1 }
 0x525   : > { %v10737_v61 = vsel %vm1002_vm5, %v18112_v0, 0.0  ;;  %v18140_v58 = vadd.f32 %v12957_v59, %v10240_v7 }
 0x526   : > { %v10738_v39 = vadd.f32 %v10737_v61, %v10736_v63  ;;  %v10593_v40 = vpop.f32.mrf.mxu1  ;;  %v18162_v61 = vpop.f32.mrf.mxu0 }
 0x527   : > { %v18128_v2 = vadd.f32 %v10593_v40, %v10238_v3  ;;  %v10747_v36 = vsel %vm1002_vm5, %v18140_v58, 0.0  ;;  %v9520_v40 = vadd.f32 %v18026_v10, %v9161_v12  ;;  %v10245_v10 = vadd.f32 %v18049_v28, %v18017_v37 }
 0x528   : > { %v10740_v33 = vadd.f32 %v10739_v17, %v10738_v39  ;;  %v12958_v62 = vpop.f32.mrf.mxu1  ;;  %v10243_v17 = vadd.f32 %v18056_v5, %v9517_v18  ;;  %v18180_v7 = vpop.f32.mrf.mxu0  ;;  %v9521_v5 = vadd.f32 %v18033_v21, %v9162_v46  ;;  %v9165_v37 = vadd.f32 %v17892_v6, %v17928_v11 }
 0x529   : > { %v10743_v42 = vsel %vm1002_vm5, %v18128_v2, 0.0  ;;  %v18151_v3 = vadd.f32 %v12958_v62, %v10241_v51  ;;  %v10246_v19 = vadd.f32 %v18070_v20, %v9520_v40  ;;  %v10248_v20 = vadd.f32 %v18063_v50, %v18024_v13 }
 0x52a   : > { %v10742_v49 = vadd.f32 %v10741_v35, %v10740_v33  ;;  %v10596_v8 = vpop.f32.mrf.mxu1  ;;  %v10247_v18 = vadd.f32 %v18084_v43, %v9521_v5  ;;  %v9166_v6 = vadd.f32 %v17900_v57, %v17934_v55  ;;  %v18990_v43 = vld [vmem:[#allocation19_spill] sm:$0xff] }
 0x52b   : > { %v18146_v30 = vadd.f32 %v10596_v8, %v10239_v1  ;;  %v10749_v52 = vsel %vm1002_vm5, %v18151_v3, 0.0 }
 0x52c   : > { %v10744_v41 = vadd.f32 %v10743_v42, %v10742_v49  ;;  %v12961_v38 = vpop.f32.mrf.mxu1  ;;  %v10190_v42 = vpop.f32.mrf.mxu0 }
 0x52d   : > { %v10745_v24 = vsel %vm1002_vm5, %v18146_v30, 0.0  ;;  %v18172_v62 = vadd.f32 %v12961_v38, %v10244_v31  ;;  %v18992_v31 = vld [vmem:[#allocation46_spill] sm:$0xff] }
 0x52e   : > { %v10746_v59 = vadd.f32 %v10745_v24, %v10744_v41  ;;  %v10609_v60 = vpop.f32.mrf.mxu1  ;;  %v9524_v41 = vadd.f32 %v18040_v27, %v9165_v37  ;;  %v10249_v27 = vadd.f32 %v18077_v54, %v18031_v25  ;;  %v18210_v12 = vpop.f32.mrf.mxu0 }
 0x52f   : > { %v18160_v63 = vadd.f32 %v10609_v60, %v10242_v9  ;;  %v10755_v28 = vsel %vm1002_vm5, %v18172_v62, 0.0 }
 0x530   : > { %v10748_v48 = vadd.f32 %v10747_v36, %v10746_v59  ;;  %v12962_v39 = vpop.f32.mrf.mxu1  ;;  %v9525_v36 = vadd.f32 %v18990_v43, %v9166_v6  ;;  %v10250_v55 = vadd.f32 %v18099_v4, %v9524_v41  ;;  %v10203_v46 = vpop.f32.mrf.mxu0  ;;  %v18998_v6 = vld [vmem:[#allocation26_spill] sm:$0xff]  ;;  %v19000_v43 = vld [vmem:[#allocation51_spill] sm:$0xff] }
 0x531   : > { %v10751_v32 = vsel %vm1002_vm5, %v18160_v63, 0.0  ;;  %v18183_v1 = vadd.f32 %v12962_v39, %v10245_v10 }
 0x532   : > { %v10750_v16 = vadd.f32 %v10749_v52, %v10748_v48  ;;  %v10612_v33 = vpop.f32.mrf.mxu1  ;;  %v18991_v52 = vld [vmem:[#allocation36_spill] sm:$0xff]  ;;  %v10251_v5 = vadd.f32 %v18130_v23, %v9525_v36 }
 0x533   : > { %v18178_v35 = vadd.f32 %v10612_v33, %v10243_v17  ;;  %v10757_v38 = vsel %vm1002_vm5, %v18183_v1, 0.0  ;;  %v9169_v25 = vadd.f32 %v18992_v31, %v18991_v52  ;;  %v19001_v52 = vld [vmem:[#allocation20_spill] sm:$0xff] }
 0x534   : > { %v10752_v34 = vadd.f32 %v10751_v32, %v10750_v16  ;;  %v12965_v53 = vpop.f32.mrf.mxu1  ;;  %v18993_v32 = vld [vmem:[#allocation37_spill] sm:$0xff] }
 0x535   : > { %v10753_v15 = vsel %vm1002_vm5, %v18178_v35, 0.0  ;;  %v18202_v9 = vadd.f32 %v12965_v53, %v10248_v20  ;;  %v9528_v10 = vadd.f32 %v18993_v32, %v9169_v25  ;;  %v18994_v53 = vld [vmem:[#allocation15_spill] sm:$0xff]  ;;  %v12944_v20 = vpop.f32.mrf.mxu0 }
 0x536   : > { %v10754_v26 = vadd.f32 %v10753_v15, %v10752_v34  ;;  %v10625_v49 = vpop.f32.mrf.mxu1  ;;  %v10252_v4 = vadd.f32 %v18093_v29, %v18994_v53  ;;  %v18995_v15 = vld [vmem:[#allocation29_spill] sm:$0xff]  ;;  %v19004_v32 = vld [vmem:[#allocation35_spill] sm:$0xff] }
 0x537   : > { %v18192_v8 = vadd.f32 %v10625_v49, %v10246_v19  ;;  %v10763_v54 = vsel %vm1002_vm5, %v18202_v9, 0.0  ;;  %v18996_v19 = vld [vmem:[#allocation8_spill] sm:$0xff] }
 0x538   : > { %v10756_v51 = vadd.f32 %v10755_v28, %v10754_v26  ;;  %v12966_v21 = vpop.f32.mrf.mxu1  ;;  %v9170_v26 = vadd.f32 %v18996_v19, %v18995_v15  ;;  %v19005_v15 = vld [vmem:[#allocation10_spill] sm:$0xff] }
 0x539   : > { %v10759_v59 = vsel %vm1002_vm5, %v18192_v8, 0.0  ;;  %v18213_v48 = vadd.f32 %v12966_v21, %v10249_v27  ;;  %v18997_v21 = vld [vmem:[#allocation4_spill] sm:$0xff]  ;;  %v10257_v19 = vadd.f32 %v18180_v7, %v19005_v15 }
 0x53a   : > { %v10758_v11 = vadd.f32 %v10757_v38, %v10756_v51  ;;  %v10628_v24 = vpop.f32.mrf.mxu1  ;;  %v10253_v41 = vadd.f32 %v18114_v56, %v18997_v21  ;;  %v9529_v23 = vadd.f32 %v18998_v6, %v9170_v26 }
 0x53b   : > { %v18208_v60 = vadd.f32 %v10628_v24, %v10247_v18  ;;  %v10765_v34 = vsel %vm1002_vm5, %v18213_v48, 0.0 }
 0x53c   : > { %v10760_v13 = vadd.f32 %v10759_v59, %v10758_v11  ;;  %v12969_v50 = vpop.f32.mrf.mxu1  ;;  %v10254_v59 = vadd.f32 %v18162_v61, %v9528_v10 }
 0x53d   : > { %v10761_v57 = vsel %vm1002_vm5, %v18208_v60, 0.0  ;;  %v18232_v28 = vadd.f32 %v12969_v50, %v10252_v4  ;;  %v18999_v50 = vld [vmem:[#allocation48_spill] sm:$0xff] }
 0x53e   : > { %v10762_v39 = vadd.f32 %v10761_v57, %v10760_v13  ;;  %v10641_v40 = vpop.f32.mrf.mxu1  ;;  %v9173_v36 = vadd.f32 %v19000_v43, %v18999_v50 }
 0x53f   : > { %v18222_v17 = vadd.f32 %v10641_v40, %v10250_v55  ;;  %v10771_v56 = vsel %vm1002_vm5, %v18232_v28, 0.0  ;;  %v10206_v55 = vpop.f32.mrf.mxu0 }
 0x540   : > { %v10764_v16 = vadd.f32 %v10763_v54, %v10762_v39  ;;  %v12970_v33 = vpop.f32.mrf.mxu1  ;;  %v9532_v31 = vadd.f32 %v19001_v52, %v9173_v36  ;;  %v19002_v54 = vld [vmem:[#allocation5_spill] sm:$0xff]  ;;  %v19009_v36 = vld [vmem:[#allocation11_spill] sm:$0xff] }
 0x541   : > { %v10767_v51 = vsel %vm1002_vm5, %v18222_v17, 0.0  ;;  %v18241_v11 = vadd.f32 %v12970_v33, %v10253_v41  ;;  %v10256_v61 = vadd.f32 %v18148_v22, %v19002_v54  ;;  %v19003_v33 = vld [vmem:[#allocation50_spill] sm:$0xff]  ;;  %v19006_v22 = vld [vmem:[#allocation24_spill] sm:$0xff] }
 0x542   : > { %v10766_v49 = vadd.f32 %v10765_v34, %v10764_v16  ;;  %v10644_v37 = vpop.f32.mrf.mxu1  ;;  %v10255_v16 = vadd.f32 %v10190_v42, %v9529_v23  ;;  %v9174_v10 = vadd.f32 %v19004_v32, %v19003_v33  ;;  %v19007_v23 = vld [vmem:[#allocation52_spill] sm:$0xff] }
 0x543   : > { %v18238_v38 = vadd.f32 %v10644_v37, %v10251_v5  ;;  %v10773_v25 = vsel %vm1002_vm5, %v18241_v11, 0.0 }
 0x544   : > { %v10768_v18 = vadd.f32 %v10767_v51, %v10766_v49  ;;  %v12973_v29 = vpop.f32.mrf.mxu1  ;;  %v12947_v49 = vpop.f32.mrf.mxu0  ;;  %v9533_v42 = vadd.f32 %v19006_v22, %v9174_v10  ;;  %v19013_v10 = vld [vmem:[#allocation28_spill] sm:$0xff] }
 0x545   : > { %v10769_v24 = vsel %vm1002_vm5, %v18238_v38, 0.0  ;;  %v18259_v4 = vadd.f32 %v12973_v29, %v10256_v61 }
 0x546   : > { %v10770_v27 = vadd.f32 %v10769_v24, %v10768_v18  ;;  %v10657_v13 = vpop.f32.mrf.mxu1  ;;  %v10258_v18 = vadd.f32 %v10203_v46, %v9532_v31  ;;  %v19008_v24 = vld [vmem:[#allocation33_spill] sm:$0xff]  ;;  %v10259_v52 = vadd.f32 %v10206_v55, %v9533_v42  ;;  %v19011_v31 = vld [vmem:[#allocation39_spill] sm:$0xff] }
 0x547   : > { %v18250_v57 = vadd.f32 %v10657_v13, %v10254_v59  ;;  %v9177_v59 = vadd.f32 %v19008_v24, %v19007_v23  ;;  %v10779_v7 = vsel %vm1002_vm5, %v18259_v4, 0.0  ;;  %v10219_v13 = vpop.f32.mrf.mxu0  ;;  %v19014_v24 = vld [vmem:[#allocation27_spill] sm:$0xff] }
 0x548   : > { %v10772_v39 = vadd.f32 %v10771_v56, %v10770_v27  ;;  %v12974_v40 = vpop.f32.mrf.mxu1 }
 0x549   : > { %v10775_v5 = vsel %vm1002_vm5, %v18250_v57, 0.0  ;;  %v18268_v21 = vadd.f32 %v12974_v40, %v10257_v19  ;;  %v9536_v56 = vadd.f32 %v19009_v36, %v9177_v59  ;;  %v19010_v40 = vld [vmem:[#allocation6_spill] sm:$0xff]  ;;  %v10264_v59 = vadd.f32 %v12947_v49, %v19014_v24 }
 0x54a   : > { %v10774_v34 = vadd.f32 %v10773_v25, %v10772_v39  ;;  %v10660_v53 = vpop.f32.mrf.mxu1  ;;  %v10260_v46 = vadd.f32 %v18210_v12, %v19010_v40  ;;  %v19012_v25 = vld [vmem:[#allocation14_spill] sm:$0xff] }
 0x54b   : > { %v18265_v26 = vadd.f32 %v10660_v53, %v10255_v16  ;;  %v10781_v39 = vsel %vm1002_vm5, %v18268_v21, 0.0  ;;  %v9178_v54 = vadd.f32 %v19012_v25, %v19011_v31  ;;  %v10262_v55 = vadd.f32 %v10219_v13, %v9536_v56 }
 0x54c   : > { %v10776_v37 = vadd.f32 %v10775_v5, %v10774_v34  ;;  %v12977_v51 = vpop.f32.mrf.mxu1  ;;  %v10261_v34 = vadd.f32 %v12944_v20, %v19013_v10  ;;  %v12948_v5 = vpop.f32.mrf.mxu0 }
 0x54d   : > { %v10777_v41 = vsel %vm1002_vm5, %v18265_v26, 0.0  ;;  %v10730_v33 = vadd.f32 %v12977_v51, %v10260_v46 }
 0x54e   : > { %v10778_v29 = vadd.f32 %v10777_v41, %v10776_v37  ;;  %v10673_v6 = vpop.f32.mrf.mxu1  ;;  %v9537_v37 = vadd.f32 %v18089_v44, %v9178_v54 }
 0x54f   : > { %v18276_v27 = vadd.f32 %v10673_v6, %v10258_v18  ;;  %v10787_v18 = vsel %vm1002_vm5, %v10730_v33, 0.0 }
 0x550   : > { %v10780_v50 = vadd.f32 %v10779_v7, %v10778_v29  ;;  %v12978_v43 = vpop.f32.mrf.mxu1  ;;  %v10222_v29 = vpop.f32.mrf.mxu0 }
 0x551   : > { %v10783_v32 = vsel %vm1002_vm5, %v18276_v27, 0.0  ;;  %v10731_v22 = vadd.f32 %v12978_v43, %v10261_v34  ;;  %v10263_v7 = vadd.f32 %v10222_v29, %v9537_v37 }
 0x552   : > { %v10782_v61 = vadd.f32 %v10781_v39, %v10780_v50  ;;  %v10676_v16 = vpop.f32.mrf.mxu1  ;;  %v19015_v39 = vld [vmem:[#allocation12_spill] sm:$0xff] }
 0x553   : > { %v10729_v53 = vadd.f32 %v10676_v16, %v10259_v52  ;;  %v10789_v20 = vsel %vm1002_vm5, %v10731_v22, 0.0  ;;  %v10265_v13 = vadd.f32 %v12948_v5, %v19015_v39 }
 0x554   : > { %v10784_v15 = vadd.f32 %v10783_v32, %v10782_v61  ;;  %v12981_v19 = vpop.f32.mrf.mxu1 }
 0x555   : > { %v10785_v12 = vsel %vm1002_vm5, %v10729_v53, 0.0  ;;  %v10734_v44 = vadd.f32 %v12981_v19, %v10264_v59 }
 0x556   : > { %v10786_v42 = vadd.f32 %v10785_v12, %v10784_v15  ;;  %v10689_v41 = vpop.f32.mrf.mxu1 }
 0x557   : > { %v10732_v51 = vadd.f32 %v10689_v41, %v10262_v55  ;;  %v10795_v25 = vsel %vm1002_vm5, %v10734_v44, 0.0 }
 0x558   : > { %v10788_v6 = vadd.f32 %v10787_v18, %v10786_v42  ;;  %v12982_v23 = vpop.f32.mrf.mxu1 }
 0x559   : > { %v10791_v43 = vsel %vm1002_vm5, %v10732_v51, 0.0  ;;  %v10735_v46 = vadd.f32 %v12982_v23, %v10265_v13 }
 0x55a   : > { %v10790_v50 = vadd.f32 %v10789_v20, %v10788_v6  ;;  %v10692_v36 = vpop.f32.mrf.mxu1 }
 0x55b   : > { %v10733_v56 = vadd.f32 %v10692_v36, %v10263_v7  ;;  %v10797_v61 = vsel %vm1002_vm5, %v10735_v46, 0.0 }
 0x55c   : > { %v10792_v40 = vadd.f32 %v10791_v43, %v10790_v50 }
 0x55d   : > { %v10793_v52 = vsel %vm1002_vm5, %v10733_v56, 0.0 }
 0x55e   : > { %v10794_v31 = vadd.f32 %v10793_v52, %v10792_v40 }
 0x560   : > { %v10796_v54 = vadd.f32 %v10795_v25, %v10794_v31 }
 0x562   : > { %v10798_v49 = vadd.f32 %v10797_v61, %v10796_v54 }
 0x564   : > { %v10799_v16 = vrot.slane %v10798_v49, 4 }
 0x566   : > { %v10800_v32 = vadd.f32 %v10799_v16, %v10798_v49 }
 0x568   : > { %v10801_v10 = vrot.slane %v10800_v32, 2 }
 0x56a   : > { %v10802_v34 = vadd.f32 %v10801_v10, %v10800_v32 }
 0x56c   : > { %v10803_v15 = vrot.slane %v10802_v34, 1 }
 0x56e   : > { %v10804_v19 = vadd.f32 %v10803_v15, %v10802_v34 }
 0x570   : > { %v10805_v37 = vmul.f32 0.00390625, %v10804_v19 }
 0x572   : > { %v18299_v5 = vsub.f32 %v18178_v35, %v10805_v37  ;;  %v18302_v12 = vsub.f32 %v18192_v8, %v10805_v37  ;;  %v18305_v55 = vsub.f32 %v18208_v60, %v10805_v37  ;;  %v18308_v42 = vsub.f32 %v18202_v9, %v10805_v37 }
 0x573   : > { %v18311_v41 = vsub.f32 %v18213_v48, %v10805_v37  ;;  %v18314_v18 = vsub.f32 %v18222_v17, %v10805_v37  ;;  %v18317_v29 = vsub.f32 %v18238_v38, %v10805_v37  ;;  %v18320_v35 = vsub.f32 %v18232_v28, %v10805_v37 }
 0x574   : > { %v18323_v8 = vsub.f32 %v18241_v11, %v10805_v37  ;;  %v18326_v60 = vsub.f32 %v18250_v57, %v10805_v37  ;;  %v18329_v9 = vsub.f32 %v18265_v26, %v10805_v37  ;;  %v18332_v48 = vsub.f32 %v18259_v4, %v10805_v37 }
 0x575   : > { %v18335_v17 = vsub.f32 %v18268_v21, %v10805_v37  ;;  %v18338_v38 = vsub.f32 %v18276_v27, %v10805_v37  ;;  %v18340_v28 = vsub.f32 %v10729_v53, %v10805_v37  ;;  %v18342_v6 = vsub.f32 %v10730_v33, %v10805_v37 }
 0x576   : > { %v18344_v11 = vsub.f32 %v10731_v22, %v10805_v37  ;;  %v18346_v57 = vsub.f32 %v10732_v51, %v10805_v37  ;;  %v18348_v23 = vsub.f32 %v10733_v56, %v10805_v37  ;;  %v18350_v26 = vsub.f32 %v10734_v44, %v10805_v37 }
 0x577   : > { %v18352_v4 = vsub.f32 %v10735_v46, %v10805_v37  ;;  %v18355_v21 = vsub.f32 %v18103_v14, %v10805_v37  ;;  %v18358_v27 = vsub.f32 %v18112_v0, %v10805_v37  ;;  %v18361_v53 = vsub.f32 %v18108_v45, %v10805_v37 }
 0x578   : > { %v18364_v33 = vsub.f32 %v18120_v47, %v10805_v37  ;;  %v18371_v20 = vsub.f32 %v18128_v2, %v10805_v37  ;;  %v18376_v0 = vsub.f32 %v18146_v30, %v10805_v37  ;;  %v18383_v7 = vsub.f32 %v18140_v58, %v10805_v37 }
 0x579   : > { %v10838_v22 = vmul.f32 %v18355_v21, %v18355_v21  ;;  %v10839_v51 = vmul.f32 %v18358_v27, %v18358_v27  ;;  %v10840_v14 = vmul.f32 %v18361_v53, %v18361_v53  ;;  %v18389_v30 = vsub.f32 %v18151_v3, %v10805_v37 }
 0x57a   : > { %v10841_v45 = vmul.f32 %v18364_v33, %v18364_v33  ;;  %v10842_v2 = vmul.f32 %v18371_v20, %v18371_v20  ;;  %v10843_v44 = vmul.f32 %v18376_v0, %v18376_v0  ;;  %v18395_v13 = vsub.f32 %v18160_v63, %v10805_v37 }
 0x57b   : > { %v10870_v47 = vsel %vm1002_vm5, %v10838_v22, 0.0  ;;  %v10871_v24 = vsel %vm1002_vm5, %v10839_v51, 0.0  ;;  %v10873_v50 = vsel %vm1002_vm5, %v10840_v14, 0.0  ;;  %v10844_v58 = vmul.f32 %v18383_v7, %v18383_v7 }
 0x57c   : > { %v10872_v59 = vadd.f32 %v10871_v24, %v10870_v47  ;;  %v10875_v43 = vsel %vm1002_vm5, %v10841_v45, 0.0  ;;  %v10877_v56 = vsel %vm1002_vm5, %v10842_v2, 0.0  ;;  %v10845_v46 = vmul.f32 %v18389_v30, %v18389_v30 }
 0x57d   : > { %v10879_v3 = vsel %vm1002_vm5, %v10843_v44, 0.0  ;;  %v18404_v31 = vsub.f32 %v18172_v62, %v10805_v37  ;;  %v10846_v25 = vmul.f32 %v18395_v13, %v18395_v13  ;;  %v10881_v63 = vsel %vm1002_vm5, %v10844_v58, 0.0 }
 0x57e   : > { %v10874_v36 = vadd.f32 %v10873_v50, %v10872_v59  ;;  %v18410_v61 = vsub.f32 %v18183_v1, %v10805_v37  ;;  %v10847_v49 = vmul.f32 %v18299_v5, %v18299_v5  ;;  %v10883_v16 = vsel %vm1002_vm5, %v10845_v46, 0.0 }
 0x57f   : > { %v10848_v10 = vmul.f32 %v18404_v31, %v18404_v31  ;;  %v10885_v62 = vsel %vm1002_vm5, %v10846_v25, 0.0  ;;  %v10850_v1 = vmul.f32 %v18302_v12, %v18302_v12  ;;  %v10851_v14 = vmul.f32 %v18305_v55, %v18305_v55 }
 0x580   : > { %v10876_v39 = vadd.f32 %v10875_v43, %v10874_v36  ;;  %v10849_v15 = vmul.f32 %v18410_v61, %v18410_v61  ;;  %v10887_v19 = vsel %vm1002_vm5, %v10847_v49, 0.0  ;;  %v10852_v24 = vmul.f32 %v18308_v42, %v18308_v42 }
 0x581   : > { %v10889_v37 = vsel %vm1002_vm5, %v10848_v10, 0.0  ;;  %v10893_v59 = vsel %vm1002_vm5, %v10850_v1, 0.0  ;;  %v10853_v50 = vmul.f32 %v18311_v41, %v18311_v41  ;;  %v10895_v36 = vsel %vm1002_vm5, %v10851_v14, 0.0 }
 0x582   : > { %v10878_v40 = vadd.f32 %v10877_v56, %v10876_v39  ;;  %v10891_v45 = vsel %vm1002_vm5, %v10849_v15, 0.0  ;;  %v10854_v43 = vmul.f32 %v18314_v18, %v18314_v18  ;;  %v10897_v39 = vsel %vm1002_vm5, %v10852_v24, 0.0 }
 0x583   : > { %v10855_v56 = vmul.f32 %v18317_v29, %v18317_v29 }
 0x584   : > { %v10880_v52 = vadd.f32 %v10879_v3, %v10878_v40  ;;  %v10899_v40 = vsel %vm1002_vm5, %v10853_v50, 0.0  ;;  %v10856_v3 = vmul.f32 %v18320_v35, %v18320_v35 }
 0x586   : > { %v10882_v54 = vadd.f32 %v10881_v63, %v10880_v52  ;;  %v10901_v52 = vsel %vm1002_vm5, %v10854_v43, 0.0  ;;  %v10857_v63 = vmul.f32 %v18323_v8, %v18323_v8 }
 0x588   : > { %v10884_v32 = vadd.f32 %v10883_v16, %v10882_v54  ;;  %v10903_v54 = vsel %vm1002_vm5, %v10855_v56, 0.0  ;;  %v10858_v16 = vmul.f32 %v18326_v60, %v18326_v60 }
 0x58a   : > { %v10886_v34 = vadd.f32 %v10885_v62, %v10884_v32  ;;  %v10905_v32 = vsel %vm1002_vm5, %v10856_v3, 0.0  ;;  %v10859_v62 = vmul.f32 %v18329_v9, %v18329_v9 }
 0x58c   : > { %v10888_v22 = vadd.f32 %v10887_v19, %v10886_v34  ;;  %v10907_v34 = vsel %vm1002_vm5, %v10857_v63, 0.0  ;;  %v10860_v19 = vmul.f32 %v18332_v48, %v18332_v48 }
 0x58e   : > { %v10890_v51 = vadd.f32 %v10889_v37, %v10888_v22  ;;  %v10909_v22 = vsel %vm1002_vm5, %v10858_v16, 0.0  ;;  %v10861_v37 = vmul.f32 %v18335_v17, %v18335_v17 }
 0x590   : > { %v10892_v47 = vadd.f32 %v10891_v45, %v10890_v51  ;;  %v10911_v51 = vsel %vm1002_vm5, %v10859_v62, 0.0  ;;  %v10862_v45 = vmul.f32 %v18338_v38, %v18338_v38 }
 0x592   : > { %v10894_v2 = vadd.f32 %v10893_v59, %v10892_v47  ;;  %v10913_v47 = vsel %vm1002_vm5, %v10860_v19, 0.0  ;;  %v10863_v59 = vmul.f32 %v18340_v28, %v18340_v28 }
 0x594   : > { %v10896_v44 = vadd.f32 %v10895_v36, %v10894_v2  ;;  %v10915_v2 = vsel %vm1002_vm5, %v10861_v37, 0.0  ;;  %v10864_v36 = vmul.f32 %v18342_v6, %v18342_v6 }
 0x596   : > { %v10898_v58 = vadd.f32 %v10897_v39, %v10896_v44  ;;  %v10917_v44 = vsel %vm1002_vm5, %v10862_v45, 0.0  ;;  %v10865_v39 = vmul.f32 %v18344_v11, %v18344_v11 }
 0x598   : > { %v10900_v46 = vadd.f32 %v10899_v40, %v10898_v58  ;;  %v10919_v58 = vsel %vm1002_vm5, %v10863_v59, 0.0  ;;  %v10866_v40 = vmul.f32 %v18346_v57, %v18346_v57 }
 0x59a   : > { %v10902_v25 = vadd.f32 %v10901_v52, %v10900_v46  ;;  %v10921_v46 = vsel %vm1002_vm5, %v10864_v36, 0.0  ;;  %v10867_v52 = vmul.f32 %v18348_v23, %v18348_v23 }
 0x59c   : > { %v10904_v49 = vadd.f32 %v10903_v54, %v10902_v25  ;;  %v10923_v25 = vsel %vm1002_vm5, %v10865_v39, 0.0  ;;  %v10868_v54 = vmul.f32 %v18350_v26, %v18350_v26 }
 0x59e   : > { %v10906_v10 = vadd.f32 %v10905_v32, %v10904_v49  ;;  %v10925_v49 = vsel %vm1002_vm5, %v10866_v40, 0.0  ;;  %v10869_v32 = vmul.f32 %v18352_v4, %v18352_v4 }
 0x5a0   : > { %v10908_v15 = vadd.f32 %v10907_v34, %v10906_v10  ;;  %v10927_v10 = vsel %vm1002_vm5, %v10867_v52, 0.0  ;;  %v10929_v34 = vsel %vm1002_vm5, %v10868_v54, 0.0  ;;  %v10931_v19 = vsel %vm1002_vm5, %v10869_v32, 0.0  ;;  %v11950_v52 = vld [vmem:[%s13180_s25 + $0x61] sm:$0xff]  ;;  %v11956_v32 = vld [vmem:[%s13180_s25 + $0xa9] sm:$0xff] }
 0x5a1   : > { %v11953_v54 = vld [vmem:[%s13180_s25 + $0x81] sm:$0xff] }
 0x5a2   : > { %v10910_v1 = vadd.f32 %v10909_v22, %v10908_v15 }
 0x5a4   : > { %v10912_v14 = vadd.f32 %v10911_v51, %v10910_v1 }
 0x5a6   : > { %v10914_v24 = vadd.f32 %v10913_v47, %v10912_v14 }
 0x5a8   : > { %v10916_v50 = vadd.f32 %v10915_v2, %v10914_v24 }
 0x5aa   : > { %v10918_v43 = vadd.f32 %v10917_v44, %v10916_v50 }
 0x5ac   : > { %v10920_v56 = vadd.f32 %v10919_v58, %v10918_v43 }
 0x5ae   : > { %v10922_v3 = vadd.f32 %v10921_v46, %v10920_v56  ;;  %v11948_v46 = vld [vmem:[%s13180_s25 + $0x49] sm:$0xff] }
 0x5b0   : > { %v10924_v63 = vadd.f32 %v10923_v25, %v10922_v3  ;;  %v11949_v3 = vld [vmem:[%s13180_s25 + $0x51] sm:$0xff]  ;;  %v11951_v25 = vld [vmem:[%s13180_s25 + $0x69] sm:$0xff] }
 0x5b2   : > { %v10926_v16 = vadd.f32 %v10925_v49, %v10924_v63  ;;  %v11954_v49 = vld [vmem:[%s13180_s25 + $0x91] sm:$0xff] }
 0x5b4   : > { %v10928_v62 = vadd.f32 %v10927_v10, %v10926_v16  ;;  %v11957_v10 = vld [vmem:[%s13180_s25 + $0xb1] sm:$0xff] }
 0x5b6   : > { %v10930_v15 = vadd.f32 %v10929_v34, %v10928_v62  ;;  %v11958_v62 = vld [vmem:[%s13180_s25 + $0xc1] sm:$0xff]  ;;  %v11959_v34 = vld [vmem:[%s13180_s25 + $0xc9] sm:$0xff] }
 0x5b8   : > { %v10932_v22 = vadd.f32 %v10931_v19, %v10930_v15  ;;  %v11960_v15 = vld [vmem:[%s13180_s25 + $0xd9] sm:$0xff]  ;;  %v11961_v19 = vld [vmem:[%s13180_s25 + $0xe1] sm:$0xff] }
 0x5ba   : > { %v10933_v1 = vrot.slane %v10932_v22, 4 }
 0x5bc   : > { %v10934_v37 = vadd.f32 %v10933_v1, %v10932_v22  ;;  %v11962_v22 = vld [vmem:[%s13180_s25 + $0xf1] sm:$0xff] }
 0x5be   : > { %v10935_v51 = vrot.slane %v10934_v37, 2 }
 0x5c0   : > { %v10936_v14 = vadd.f32 %v10935_v51, %v10934_v37 }
 0x5c2   : > { %v10937_v45 = vrot.slane %v10936_v14, 1 }
 0x5c4   : > { %v10938_v47 = vadd.f32 %v10937_v45, %v10936_v14  ;;  %v11965_v14 = vld [vmem:[%s13180_s25 + $0x111] sm:$0xff] }
 0x5c6   : > { %v10939_v24 = vmul.f32 0.00390625, %v10938_v47 }
 0x5c8   : > { %v10940_v59 = vadd.f32 1e-05, %v10939_v24 }
 0x5ca   : > { %13108 = vrsqrt.f32 %v10940_v59 }
 0x5d7   : > { %v13109_v2 = vpop.eup %13108 }
 0x5d8   : > { %v10942_v50 = vmul.f32 %v13109_v2, %v18355_v21  ;;  %v10943_v36 = vmul.f32 %v13109_v2, %v18358_v27  ;;  %v10944_v44 = vmul.f32 %v13109_v2, %v18361_v53  ;;  %v10945_v43 = vmul.f32 %v13109_v2, %v18364_v33 }
 0x5d9   : > { %v10946_v39 = vmul.f32 %v13109_v2, %v18371_v20  ;;  %v10947_v58 = vmul.f32 %v13109_v2, %v18376_v0  ;;  %v10948_v56 = vmul.f32 %v13109_v2, %v18383_v7  ;;  %v10949_v40 = vmul.f32 %v13109_v2, %v18389_v30 }
 0x5da   : > { %v10950_v21 = vmul.f32 %v13109_v2, %v18395_v13  ;;  %v10951_v27 = vmul.f32 %v13109_v2, %v18299_v5  ;;  %v10952_v53 = vmul.f32 %v13109_v2, %v18404_v31  ;;  %v10953_v33 = vmul.f32 %v13109_v2, %v18410_v61  ;;  %v11944_v5 = vld [vmem:[%s13180_s25 + $0x19] sm:$0xff]  ;;  %v11945_v13 = vld [vmem:[%s13180_s25 + $0x21] sm:$0xff]  ;;  %v11946_v31 = vld [vmem:[%s13180_s25 + $0x31] sm:$0xff] }
 0x5db   : > { %v18496_v20 = vmul.f32 %v13109_v2, %v18302_v12  ;;  %v18499_v0 = vmul.f32 %v13109_v2, %v18305_v55  ;;  %v18502_v7 = vmul.f32 %v13109_v2, %v18308_v42  ;;  %v18505_v30 = vmul.f32 %v13109_v2, %v18311_v41  ;;  %v11947_v61 = vld [vmem:[%s13180_s25 + $0x39] sm:$0xff] }
 0x5dc   : > { %v18513_v12 = vmul.f32 %v13109_v2, %v18314_v18  ;;  %v18516_v55 = vmul.f32 %v13109_v2, %v18317_v29  ;;  %v18519_v42 = vmul.f32 %v13109_v2, %v18320_v35  ;;  %v18522_v41 = vmul.f32 %v13109_v2, %v18323_v8  ;;  %v11952_v8 = vld [vmem:[%s13180_s25 + $0x79] sm:$0xff] }
 0x5dd   : > { %v18529_v63 = vmul.f32 %v13109_v2, %v18326_v60  ;;  %v18532_v18 = vmul.f32 %v13109_v2, %v18329_v9  ;;  %v18535_v29 = vmul.f32 %v13109_v2, %v18332_v48  ;;  %v18538_v35 = vmul.f32 %v13109_v2, %v18335_v17  ;;  %v11955_v17 = vld [vmem:[%s13180_s25 + $0x99] sm:$0xff] }
 0x5de   : > { %v18544_v16 = vmul.f32 %v13109_v2, %v18338_v38  ;;  %v18547_v60 = vmul.f32 %v13109_v2, %v18340_v28  ;;  %v18550_v9 = vmul.f32 %v13109_v2, %v18342_v6  ;;  %v18553_v48 = vmul.f32 %v13109_v2, %v18344_v11 }
 0x5df   : > { %v18564_v38 = vmul.f32 %v13109_v2, %v18346_v57  ;;  %v18567_v28 = vmul.f32 %v13109_v2, %v18348_v23  ;;  %v18570_v6 = vmul.f32 %v13109_v2, %v18350_v26  ;;  %v18573_v11 = vmul.f32 %v13109_v2, %v18352_v4  ;;  %v11963_v57 = vld [vmem:[%s13180_s25 + $0xf9] sm:$0xff]  ;;  %v11964_v26 = vld [vmem:[%s13180_s25 + $0x109] sm:$0xff]  ;;  %v11966_v4 = vld [vmem:[%s13180_s25 + $0x121] sm:$0xff] }
 0x5e0   : > { %v11007_v1 = vadd.f32 %v11944_v5, %v10942_v50  ;;  %v11008_v37 = vadd.f32 %v11945_v13, %v10943_v36  ;;  %v11009_v51 = vadd.f32 %v11946_v31, %v10944_v44  ;;  %v11010_v23 = vadd.f32 %v11947_v61, %v10945_v43  ;;  %v11967_v2 = vld [vmem:[%s13180_s25 + $0x129] sm:$0xff]  ;;  %v11969_v50 = vld [vmem:[%s13180_s25 + $0x141] sm:$0xff] }
 0x5e1   : > { %19016 = vst [vmem:[#allocation16_spill] sm:$0xff] %v18573_v11  ;;  %v11011_v45 = vadd.f32 %v11948_v46, %v10946_v39  ;;  %v11012_v47 = vadd.f32 %v11949_v3, %v10947_v58  ;;  %v11013_v24 = vadd.f32 %v11950_v52, %v10948_v56  ;;  %v11014_v59 = vadd.f32 %v11951_v25, %v10949_v40  ;;  %v11968_v11 = vld [vmem:[%s13180_s25 + $0x139] sm:$0xff]  ;;  %v11970_v39 = vld [vmem:[%s13180_s25 + $0x151] sm:$0xff]  ;;  %v11972_v56 = vld [vmem:[%s13180_s25 + $0x169] sm:$0xff] }
 0x5e2   : > { %v11015_v36 = vadd.f32 %v11952_v8, %v10950_v21  ;;  %v11016_v44 = vadd.f32 %v11953_v54, %v10951_v27  ;;  %v11017_v43 = vadd.f32 %v11954_v49, %v10952_v53  ;;  %v11018_v5 = vadd.f32 %v11955_v17, %v10953_v33  ;;  %11039 = vst.msk [vmem:[%s18561_s11] sm:$0xff] %vm1002_vm5, %v11007_v1  ;;  %v11971_v58 = vld [vmem:[%s13180_s25 + $0x159] sm:$0xff]  ;;  %v11973_v33 = vld [vmem:[%s13180_s25 + $0x171] sm:$0xff] }
 0x5e3   : > { %11040 = vst.msk [vmem:[%s18561_s11 + $0x8] sm:$0xff] %vm1002_vm5, %v11008_v37  ;;  %11041 = vst.msk [vmem:[%s18561_s11 + $0x10] sm:$0xff] %vm1002_vm5, %v11009_v51  ;;  %v11019_v40 = vadd.f32 %v11956_v32, %v18496_v20  ;;  %v11020_v21 = vadd.f32 %v11957_v10, %v18499_v0  ;;  %v11021_v27 = vadd.f32 %v11958_v62, %v18502_v7  ;;  %v11974_v20 = vld [vmem:[%s13180_s25 + $0x181] sm:$0xff]  ;;  %v11975_v0 = vld [vmem:[%s13180_s25 + $0x189] sm:$0xff] }
 0x5e4   : > { %11042 = vst.msk [vmem:[%s18561_s11 + $0x18] sm:$0xff] %vm1002_vm5, %v11010_v23  ;;  %v11022_v53 = vadd.f32 %v11959_v34, %v18505_v30  ;;  %11043 = vst.msk [vmem:[%s18561_s11 + $0x20] sm:$0xff] %vm1002_vm5, %v11011_v45  ;;  %v11023_v7 = vadd.f32 %v11960_v15, %v18513_v12  ;;  %v11024_v13 = vadd.f32 %v11961_v19, %v18516_v55 }
 0x5e5   : > { %11044 = vst.msk [vmem:[%s18561_s11 + $0x28] sm:$0xff] %vm1002_vm5, %v11012_v47  ;;  %11045 = vst.msk [vmem:[%s18561_s11 + $0x30] sm:$0xff] %vm1002_vm5, %v11013_v24  ;;  %v11025_v30 = vadd.f32 %v11962_v22, %v18519_v42  ;;  %v11026_v31 = vadd.f32 %v11963_v57, %v18522_v41  ;;  %v11027_v61 = vadd.f32 %v11964_v26, %v18529_v63 }
 0x5e6   : > { %11046 = vst.msk [vmem:[%s18561_s11 + $0x38] sm:$0xff] %vm1002_vm5, %v11014_v59  ;;  %11047 = vst.msk [vmem:[%s18561_s11 + $0x40] sm:$0xff] %vm1002_vm5, %v11015_v36  ;;  %v11028_v12 = vadd.f32 %v11965_v14, %v18532_v18  ;;  %v11029_v55 = vadd.f32 %v11966_v4, %v18535_v29  ;;  %v11030_v42 = vadd.f32 %v11967_v2, %v18538_v35 }
 0x5e7   : > { %11048 = vst.msk [vmem:[%s18561_s11 + $0x48] sm:$0xff] %vm1002_vm5, %v11016_v44  ;;  %11049 = vst.msk [vmem:[%s18561_s11 + $0x50] sm:$0xff] %vm1002_vm5, %v11017_v43  ;;  %v11031_v41 = vadd.f32 %v11968_v11, %v18544_v16  ;;  %v11032_v46 = vadd.f32 %v11969_v50, %v18547_v60  ;;  %v11033_v3 = vadd.f32 %v11970_v39, %v18550_v9 }
 0x5e8   : > { %11050 = vst.msk [vmem:[%s18561_s11 + $0x58] sm:$0xff] %vm1002_vm5, %v11018_v5  ;;  %11051 = vst.msk [vmem:[%s18561_s11 + $0x60] sm:$0xff] %vm1002_vm5, %v11019_v40  ;;  %v11034_v52 = vadd.f32 %v11971_v58, %v18553_v48  ;;  %v11035_v25 = vadd.f32 %v11972_v56, %v18564_v38  ;;  %v11036_v63 = vadd.f32 %v11973_v33, %v18567_v28  ;;  %v19017_v29 = vld [vmem:[#allocation16_spill] sm:$0xff] }
 0x5e9   : > { %11052 = vst.msk [vmem:[%s18561_s11 + $0x68] sm:$0xff] %vm1002_vm5, %v11020_v21  ;;  %11053 = vst.msk [vmem:[%s18561_s11 + $0x70] sm:$0xff] %vm1002_vm5, %v11021_v27  ;;  %v11037_v18 = vadd.f32 %v11974_v20, %v18570_v6  ;;  %v11038_v35 = vadd.f32 %v11975_v0, %v19017_v29 }
 0x5ea   : > { %11054 = vst.msk [vmem:[%s18561_s11 + $0x78] sm:$0xff] %vm1002_vm5, %v11022_v53  ;;  %11055 = vst.msk [vmem:[%s18561_s11 + $0x80] sm:$0xff] %vm1002_vm5, %v11023_v7 }
 0x5eb   : > { %11056 = vst.msk [vmem:[%s18561_s11 + $0x88] sm:$0xff] %vm1002_vm5, %v11024_v13  ;;  %11057 = vst.msk [vmem:[%s18561_s11 + $0x90] sm:$0xff] %vm1002_vm5, %v11025_v30 }
 0x5ec   : > { %11058 = vst.msk [vmem:[%s18561_s11 + $0x98] sm:$0xff] %vm1002_vm5, %v11026_v31  ;;  %11059 = vst.msk [vmem:[%s18561_s11 + $0xa0] sm:$0xff] %vm1002_vm5, %v11027_v61 }
 0x5ed   : > { %11060 = vst.msk [vmem:[%s18561_s11 + $0xa8] sm:$0xff] %vm1002_vm5, %v11028_v12  ;;  %11061 = vst.msk [vmem:[%s18561_s11 + $0xb0] sm:$0xff] %vm1002_vm5, %v11029_v55 }
 0x5ee   : > { %11062 = vst.msk [vmem:[%s18561_s11 + $0xb8] sm:$0xff] %vm1002_vm5, %v11030_v42  ;;  %11063 = vst.msk [vmem:[%s18561_s11 + $0xc0] sm:$0xff] %vm1002_vm5, %v11031_v41 }
 0x5ef   : > { %11064 = vst.msk [vmem:[%s18561_s11 + $0xc8] sm:$0xff] %vm1002_vm5, %v11032_v46  ;;  %11065 = vst.msk [vmem:[%s18561_s11 + $0xd0] sm:$0xff] %vm1002_vm5, %v11033_v3 }
 0x5f0   : > { %11066 = vst.msk [vmem:[%s18561_s11 + $0xd8] sm:$0xff] %vm1002_vm5, %v11034_v52  ;;  %11067 = vst.msk [vmem:[%s18561_s11 + $0xe0] sm:$0xff] %vm1002_vm5, %v11035_v25 }
 0x5f1   : > { %11068 = vst.msk [vmem:[%s18561_s11 + $0xe8] sm:$0xff] %vm1002_vm5, %v11036_v63  ;;  %11069 = vst.msk [vmem:[%s18561_s11 + $0xf0] sm:$0xff] %vm1002_vm5, %v11037_v18 }
 0x5f2   : > { %11070 = vst.msk [vmem:[%s18561_s11 + $0xf8] sm:$0xff] %vm1002_vm5, %v11038_v35 }
 0x5f3 PF: > { %s13_s12 = sadd.s32 1, %s13120_s12  }
 0x5f4   : > { %p10_p4 = scmp.ge.s32.totalorder %s13_s12, 4  }
 0x5f6   :  { %12 = sbr.rel (!%p10_p4) target bundleno = 1 (0x1), region = 84 }

</bundles_post_ra>
